<compile_context>
chip_gen: v7x
topology: tpu7x:2x2x1
jax: 0.10.0
libtpu: 0.0.40
codegen_flags: <defaults>
</compile_context>

<pallas_src>
import numpy as np
import jax
import jax.numpy as jnp
from jax.experimental import pallas as pl
from jax.experimental.pallas import tpu as pltpu

NEG_SLOPE = 0.01  # F.leaky_relu default negative slope


def _leaky(v):
    return jnp.where(v > 0, v, NEG_SLOPE * v)


# ----------------------------- fused Pallas kernel ---------------------------

def _disc_fused_kernel(p1_ref, w1_ref, b1_ref, w2_ref, b2_ref, pm_ref,
                       wf1_ref, bf1_ref, wf2_ref, bf2_ref, o_ref, h1p_ref):
    """Per-sample fused forward: conv1 -> conv2 (shifted taps) -> avgpool(3)->avgpool(2)
    -> fc1 -> fc2 -> sigmoid.  Everything stays in VMEM; only the (1,128) result is stored."""
    # ---- nconv1: (576,50) @ (50,64) + bias, LeakyReLU -------------------------------
    h1 = jnp.dot(p1_ref[0], w1_ref[...], preferred_element_type=jnp.float32)   # (576,64)
    h1 = _leaky(h1 + b1_ref[...])

    # keep h1 resident in VMEM, zero-padded in the row dimension so conv2 taps can be
    # expressed as plain row-shifted slices (rows >= 576 only feed garbage output rows
    # that the pool matrix zeroes out).
    h1p_ref[0:576, :] = h1
    h1p_ref[576:680, :] = jnp.zeros((104, 64), jnp.float32)

    # ---- nconv2: 25 shifted-tap matmuls in the padded 24x24 row space ----------------
    # h2[i*24+j, o] = sum_{kh,kw,c} h1[(i+kh)*24+(j+kw), c] * w2[kh,kw,c,o]
    acc = jnp.zeros((576, 128), jnp.float32)
    for kw in range(5):
        sh = h1p_ref[kw:kw + 672, :]                      # one unaligned sublane shift per kw
        for kh in range(5):
            tap = sh[kh * 24:kh * 24 + 576, :].astype(jnp.bfloat16)   # aligned sub-slice
            acc = acc + jnp.dot(tap, w2_ref[kh * 5 + kw],
                                preferred_element_type=jnp.float32)
    h2 = _leaky(acc + b2_ref[...])                        # (576,128) f32, rows i*24+j

    # ---- AvgPool2d(3) -> AvgPool2d(2): 0/1 pool matrix (bf16-exact) + 1/36 scale -----
    pooled = jnp.dot(pm_ref[...], h2.astype(jnp.bfloat16),
                     preferred_element_type=jnp.float32) * (1.0 / 36.0)        # (9,128)

    # ---- nfc1: contract (hw, ch) against the (9,128,164) repacked weight -------------
    f1 = bf1_ref[...]                                     # (1,164) f32 bias
    for hw in range(9):
        row = pooled[hw:hw + 1, :].astype(jnp.bfloat16)   # (1,128)
        f1 = f1 + jnp.dot(row, wf1_ref[hw], preferred_element_type=jnp.float32)
    f1 = _leaky(f1)
    # F.dropout(training=False) -> identity at inference.

    # ---- nfc2 + sigmoid; weight padded to 128 lanes (lane 0 is the real output) ------
    z = jnp.dot(f1.astype(jnp.bfloat16), wf2_ref[...],
                preferred_element_type=jnp.float32) + bf2_ref[...]             # (1,128)
    o_ref[0] = 1.0 / (1.0 + jnp.exp(-z))


def fused_discriminator_call(p1, w1, b1, w2, b2, pm, wf1, bf1, wf2, bf2):
    B = p1.shape[0]
    return pl.pallas_call(
        _disc_fused_kernel,
        grid=(B,),
        in_specs=[
            pl.BlockSpec((1, 576, 50), lambda b: (b, 0, 0)),    # conv1 patches (bf16)
            pl.BlockSpec((50, 64), lambda b: (0, 0)),           # w1
            pl.BlockSpec((1, 64), lambda b: (0, 0)),            # b1 (f32)
            pl.BlockSpec((25, 64, 128), lambda b: (0, 0, 0)),   # w2 taps
            pl.BlockSpec((1, 128), lambda b: (0, 0)),           # b2 (f32)
            pl.BlockSpec((9, 576), lambda b: (0, 0)),           # pool matrix (0/1)
            pl.BlockSpec((9, 128, 164), lambda b: (0, 0, 0)),   # fc1 weight (hw,ch,n)
            pl.BlockSpec((1, 164), lambda b: (0, 0)),           # fc1 bias (f32)
            pl.BlockSpec((164, 128), lambda b: (0, 0)),         # fc2 weight (lane padded)
            pl.BlockSpec((1, 128), lambda b: (0, 0)),           # fc2 bias  (lane padded)
        ],
        out_specs=pl.BlockSpec((1, 1, 128), lambda b: (b, 0, 0)),   # lane-dense output slab
        out_shape=jax.ShapeDtypeStruct((B, 1, 128), jnp.float32),
        scratch_shapes=[pltpu.VMEM((680, 64), jnp.float32)],        # padded h1 buffer
        compiler_params=pltpu.CompilerParams(
            dimension_semantics=("parallel",),
            vmem_limit_bytes=32 * 1024 * 1024),
    )(p1, w1, b1, w2, b2, pm, wf1, bf1, wf2, bf2)


# ------------------------------ one-time prep --------------------------------

def make_pool_matrix_padded():
    """(9,576) 0/1 matrix: AvgPool2d(3)->AvgPool2d(2) == mean over 6x6 blocks of the
    top-left 18x18, expressed over the padded 24-wide conv2 row space (scale 1/36 in-kernel)."""
    P = np.zeros((9, 576), np.float32)
    for pi in range(3):
        for pj in range(3):
            for i in range(6 * pi, 6 * pi + 6):
                for j in range(6 * pj, 6 * pj + 6):
                    P[pi * 3 + pj, i * 24 + j] = 1.0
    return jnp.asarray(P)


def prepare_params(params):
    """Hoisted, one-time weight repacking (kept out of the jitted per-call forward)."""
    bf16 = jnp.bfloat16
    wf2_pad = jnp.zeros((164, 128), jnp.float32).at[:, 0].set(params["nfc2_w"][0])
    bf2_pad = jnp.zeros((1, 128), jnp.float32).at[0, 0].set(params["nfc2_b"][0])
    return {
        "emb": params["emb"],
        "emb_fc_wT": params["emb_fc_w"].T,                                   # (50,784)
        "emb_fc_b": params["emb_fc_b"],
        # conv1 weight (O,I,5,5) -> (kh,kw,cin,O) -> (50,64): matches im2col (kh,kw,c) order
        "w1": params["nconv1_w"].transpose(2, 3, 1, 0).reshape(50, 64).astype(bf16),
        "b1": params["nconv1_b"][None, :].astype(jnp.float32),
        # conv2 weight as 25 taps (kh*5+kw, cin, cout)
        "w2": params["nconv2_w"].transpose(2, 3, 1, 0).reshape(25, 64, 128).astype(bf16),
        "b2": params["nconv2_b"][None, :].astype(jnp.float32),
        "pm": make_pool_matrix_padded().astype(bf16),                        # 0/1, exact
        # fc1 weight (n, ch*9+hw) -> (hw, ch, n)
        "wf1": params["nfc1_w"].reshape(164, 128, 9).transpose(2, 1, 0).astype(bf16),
        "bf1": params["nfc1_b"][None, :].astype(jnp.float32),
        "wf2": wf2_pad.astype(bf16),
        "bf2": bf2_pad,
    }


# ------------------------------ JAX glue --------------------------------------

def im2col(x, k):
    """x: (B,H,W,C) -> (B, Ho*Wo, k*k*C), feature order (kh, kw, c)."""
    B, H, W, C = x.shape
    Ho, Wo = H - k + 1, W - k + 1
    cols = []
    for kh in range(k):
        for kw in range(k):
            cols.append(x[:, kh:kh + Ho, kw:kw + Wo, :])
    return jnp.concatenate(cols, axis=-1).reshape(B, Ho * Wo, k * k * C)


def discriminator_forward(prep, x_nchw, c):
    B = x_nchw.shape[0]
    # Embedding lookup + emb_fc stay as tiny XLA ops (no extra pallas launch).
    e = prep["emb"][c]                                                       # (B,50)
    cond = e @ prep["emb_fc_wT"] + prep["emb_fc_b"]                          # (B,784)
    cond = cond.reshape(B, 28, 28, 1)
    x = jnp.transpose(x_nchw, (0, 2, 3, 1))                                  # NCHW -> NHWC
    h = jnp.concatenate([cond, x], axis=-1)                                  # (B,28,28,2) = [cond,x]
    p1 = im2col(h, 5).astype(jnp.bfloat16)                                   # (B,576,50)
    out = fused_discriminator_call(
        p1, prep["w1"], prep["b1"], prep["w2"], prep["b2"], prep["pm"],
        prep["wf1"], prep["bf1"], prep["wf2"], prep["bf2"])                  # (B,1,128)
    return out[:, 0, :1]                                                     # (B,1)


# --------------------------- pure-JAX reference -------------------------------

def reference_forward(params, x_nchw, c):
    hp = jax.lax.Precision.HIGHEST
    lrelu = lambda v: jnp.where(v > 0, v, NEG_SLOPE * v)
    e = params["emb"][c]
    cond = e @ params["emb_fc_w"].T + params["emb_fc_b"]
    cond = cond.reshape(-1, 1, 28, 28)
    x = jnp.concatenate([cond, x_nchw], axis=1)

    def conv(v, w, b):
        y = jax.lax.conv_general_dilated(
            v, w, (1, 1), "VALID",
            dimension_numbers=("NCHW", "OIHW", "NCHW"), precision=hp)
        return y + b[None, :, None, None]

    def avgpool(v, k):
        B, C, H, W = v.shape
        Ho, Wo = H // k, W // k
        v = v[:, :, :Ho * k, :Wo * k].reshape(B, C, Ho, k, Wo, k)
        return v.mean(axis=(3, 5))

    h = lrelu(conv(x, params["nconv1_w"], params["nconv1_b"]))
    h = lrelu(conv(h, params["nconv2_w"], params["nconv2_b"]))
    h = avgpool(h, 3)
    h = avgpool(h, 2)
    h = h.reshape(h.shape[0], -1)
    h = lrelu(h @ params["nfc1_w"].T + params["nfc1_b"])
    h = h @ params["nfc2_w"].T + params["nfc2_b"]
    return jax.nn.sigmoid(h)


# --------------------------------- main ---------------------------------------

if __name__ == "__main__":
    key = jax.random.PRNGKey(0)
    ks = jax.random.split(key, 16)

    def init(k, shape, scale=0.05):
        return (scale * jax.random.normal(k, shape)).astype(jnp.float32)

    params = {
        "emb":       init(ks[0], (10, 50), 0.3),
        "emb_fc_w":  init(ks[1], (784, 50)),
        "emb_fc_b":  init(ks[2], (784,)),
        "nconv1_w":  init(ks[3], (64, 2, 5, 5)),
        "nconv1_b":  init(ks[4], (64,)),
        "nconv2_w":  init(ks[5], (128, 64, 5, 5)),
        "nconv2_b":  init(ks[6], (128,)),
        "nfc1_w":    init(ks[7], (164, 1152)),
        "nfc1_b":    init(ks[8], (164,)),
        "nfc2_w":    init(ks[9], (1, 164)),
        "nfc2_b":    init(ks[10], (1,)),
    }

    x = jax.random.normal(ks[11], (2, 1, 28, 28), jnp.float32)   # NCHW like PyTorch
    c = jnp.array([3, 7], dtype=jnp.int32)                       # class labels in [0, 10)

    prep = prepare_params(params)                                # one-time weight repack
    fwd = jax.jit(discriminator_forward)
    out = jax.block_until_ready(fwd(prep, x, c))
    assert out.shape == (2, 1), out.shape

    ref = reference_forward(params, x, c)
    assert jnp.allclose(out, ref, atol=2e-3, rtol=2e-3), (out, ref)

    print("KERNEL_OK")
</pallas_src>

<mosaic_0001>
module attributes {stable_mosaic.version = 11 : i64} {
  func.func @_disc_fused_kernel(%arg0: i32, %arg1: memref<1x576x50xbf16, #tpu.memory_space<vmem>>, %arg2: memref<50x64xbf16, #tpu.memory_space<vmem>>, %arg3: memref<1x64xf32, #tpu.memory_space<vmem>>, %arg4: memref<25x64x128xbf16, #tpu.memory_space<vmem>>, %arg5: memref<1x128xf32, #tpu.memory_space<vmem>>, %arg6: memref<9x576xbf16, #tpu.memory_space<vmem>>, %arg7: memref<9x128x164xbf16, #tpu.memory_space<vmem>>, %arg8: memref<1x164xf32, #tpu.memory_space<vmem>>, %arg9: memref<164x128xbf16, #tpu.memory_space<vmem>>, %arg10: memref<1x128xf32, #tpu.memory_space<vmem>>, %arg11: memref<1x1x128xf32, #tpu.memory_space<vmem>>, %arg12: memref<680x64xf32, #tpu.memory_space<vmem>>) attributes {dimension_semantics = [#tpu.dimension_semantics<parallel>], iteration_bounds = array<i64: 2>, scalar_prefetch = 0 : i64, scratch_operands = 1 : i64, tpu.core_type = #tpu.core_type<tc>, window_params = [{transform_indices = @transform_0, window_bounds = array<i64: 1, 576, 50>}, {pipeline_mode = #tpu.pipeline_mode<synchronous>, transform_indices = @transform_1, window_bounds = array<i64: 50, 64>}, {pipeline_mode = #tpu.pipeline_mode<synchronous>, transform_indices = @transform_2, window_bounds = array<i64: 1, 64>}, {pipeline_mode = #tpu.pipeline_mode<synchronous>, transform_indices = @transform_3, window_bounds = array<i64: 25, 64, 128>}, {pipeline_mode = #tpu.pipeline_mode<synchronous>, transform_indices = @transform_4, window_bounds = array<i64: 1, 128>}, {pipeline_mode = #tpu.pipeline_mode<synchronous>, transform_indices = @transform_5, window_bounds = array<i64: 9, 576>}, {pipeline_mode = #tpu.pipeline_mode<synchronous>, transform_indices = @transform_6, window_bounds = array<i64: 9, 128, 164>}, {pipeline_mode = #tpu.pipeline_mode<synchronous>, transform_indices = @transform_7, window_bounds = array<i64: 1, 164>}, {pipeline_mode = #tpu.pipeline_mode<synchronous>, transform_indices = @transform_8, window_bounds = array<i64: 164, 128>}, {pipeline_mode = #tpu.pipeline_mode<synchronous>, transform_indices = @transform_9, window_bounds = array<i64: 1, 128>}, {transform_indices = @transform_10, window_bounds = array<i64: 1, 1, 128>}]} {
    %c0 = arith.constant 0 : index
    %c0_0 = arith.constant 0 : index
    %c0_1 = arith.constant 0 : index
    %0 = vector.load %arg1[%c0, %c0_0, %c0_1] : memref<1x576x50xbf16, #tpu.memory_space<vmem>>, vector<1x576x50xbf16>
    %1 = vector.shape_cast %0 : vector<1x576x50xbf16> to vector<576x50xbf16>
    %c0_2 = arith.constant 0 : index
    %c0_3 = arith.constant 0 : index
    %2 = vector.load %arg2[%c0_2, %c0_3] : memref<50x64xbf16, #tpu.memory_space<vmem>>, vector<50x64xbf16>
    %cst = arith.constant dense<0.000000e+00> : vector<576x64xf32>
    %3 = tpu.matmul %1, %2, %cst {dimension_numbers = #tpu.dot_dimension_numbers<[1], [0], [0], [1], [0, 0, 1, 1], [], []>} : vector<576x50xbf16>, vector<50x64xbf16>, vector<576x64xf32> -> vector<576x64xf32>
    %c0_4 = arith.constant 0 : index
    %c0_5 = arith.constant 0 : index
    %4 = vector.load %arg3[%c0_4, %c0_5] : memref<1x64xf32, #tpu.memory_space<vmem>>, vector<1x64xf32>
    %5 = vector.broadcast %4 : vector<1x64xf32> to vector<576x64xf32>
    %6 = arith.addf %3, %5 : vector<576x64xf32>
    %cst_6 = arith.constant 0.000000e+00 : f32
    %7 = vector.broadcast %cst_6 : f32 to vector<576x64xf32>
    %8 = arith.cmpf ogt, %6, %7 : vector<576x64xf32>
    %cst_7 = arith.constant 0.00999999977 : f32
    %9 = vector.broadcast %cst_7 : f32 to vector<576x64xf32>
    %10 = arith.mulf %9, %6 : vector<576x64xf32>
    %11 = arith.select %8, %6, %10 : vector<576x64xi1>, vector<576x64xf32>
    %c0_8 = arith.constant 0 : index
    %c0_9 = arith.constant 0 : index
    %12 = vector.load %arg12[%c0_8, %c0_9] : memref<680x64xf32, #tpu.memory_space<vmem>>, vector<576x64xf32>
    tpu.vector_store %arg12[%c0_8, %c0_9], %11 {strides = array<i32>} : memref<680x64xf32, #tpu.memory_space<vmem>>, vector<576x64xf32>,
    %cst_10 = arith.constant 0.000000e+00 : f32
    %13 = vector.broadcast %cst_10 : f32 to vector<104x64xf32>
    %c576 = arith.constant 576 : index
    %c0_11 = arith.constant 0 : index
    %14 = vector.load %arg12[%c576, %c0_11] : memref<680x64xf32, #tpu.memory_space<vmem>>, vector<104x64xf32>
    tpu.vector_store %arg12[%c576, %c0_11], %13 {strides = array<i32>} : memref<680x64xf32, #tpu.memory_space<vmem>>, vector<104x64xf32>,
    %cst_12 = arith.constant 0.000000e+00 : f32
    %15 = vector.broadcast %cst_12 : f32 to vector<576x128xf32>
    %c0_13 = arith.constant 0 : index
    %c0_14 = arith.constant 0 : index
    %16 = vector.load %arg12[%c0_13, %c0_14] : memref<680x64xf32, #tpu.memory_space<vmem>>, vector<672x64xf32>
    %17 = vector.extract_strided_slice %16 {offsets = [0, 0], sizes = [576, 64], strides = [1, 1]} : vector<672x64xf32> to vector<576x64xf32>
    %18 = arith.truncf %17 : vector<576x64xf32> to vector<576x64xbf16>
    %c0_15 = arith.constant 0 : index
    %c0_16 = arith.constant 0 : index
    %c0_17 = arith.constant 0 : index
    %19 = vector.load %arg4[%c0_15, %c0_16, %c0_17] : memref<25x64x128xbf16, #tpu.memory_space<vmem>>, vector<1x64x128xbf16>
    %20 = vector.shape_cast %19 : vector<1x64x128xbf16> to vector<64x128xbf16>
    %cst_18 = arith.constant dense<0.000000e+00> : vector<576x128xf32>
    %21 = tpu.matmul %18, %20, %cst_18 {dimension_numbers = #tpu.dot_dimension_numbers<[1], [0], [0], [1], [0, 0, 1, 1], [], []>} : vector<576x64xbf16>, vector<64x128xbf16>, vector<576x128xf32> -> vector<576x128xf32>
    %22 = arith.addf %15, %21 : vector<576x128xf32>
    %23 = vector.extract_strided_slice %16 {offsets = [24, 0], sizes = [576, 64], strides = [1, 1]} : vector<672x64xf32> to vector<576x64xf32>
    %24 = arith.truncf %23 : vector<576x64xf32> to vector<576x64xbf16>
    %c5 = arith.constant 5 : index
    %c0_19 = arith.constant 0 : index
    %c0_20 = arith.constant 0 : index
    %25 = vector.load %arg4[%c5, %c0_19, %c0_20] : memref<25x64x128xbf16, #tpu.memory_space<vmem>>, vector<1x64x128xbf16>
    %26 = vector.shape_cast %25 : vector<1x64x128xbf16> to vector<64x128xbf16>
    %cst_21 = arith.constant dense<0.000000e+00> : vector<576x128xf32>
    %27 = tpu.matmul %24, %26, %cst_21 {dimension_numbers = #tpu.dot_dimension_numbers<[1], [0], [0], [1], [0, 0, 1, 1], [], []>} : vector<576x64xbf16>, vector<64x128xbf16>, vector<576x128xf32> -> vector<576x128xf32>
    %28 = arith.addf %22, %27 : vector<576x128xf32>
    %29 = vector.extract_strided_slice %16 {offsets = [48, 0], sizes = [576, 64], strides = [1, 1]} : vector<672x64xf32> to vector<576x64xf32>
    %30 = arith.truncf %29 : vector<576x64xf32> to vector<576x64xbf16>
    %c10 = arith.constant 10 : index
    %c0_22 = arith.constant 0 : index
    %c0_23 = arith.constant 0 : index
    %31 = vector.load %arg4[%c10, %c0_22, %c0_23] : memref<25x64x128xbf16, #tpu.memory_space<vmem>>, vector<1x64x128xbf16>
    %32 = vector.shape_cast %31 : vector<1x64x128xbf16> to vector<64x128xbf16>
    %cst_24 = arith.constant dense<0.000000e+00> : vector<576x128xf32>
    %33 = tpu.matmul %30, %32, %cst_24 {dimension_numbers = #tpu.dot_dimension_numbers<[1], [0], [0], [1], [0, 0, 1, 1], [], []>} : vector<576x64xbf16>, vector<64x128xbf16>, vector<576x128xf32> -> vector<576x128xf32>
    %34 = arith.addf %28, %33 : vector<576x128xf32>
    %35 = vector.extract_strided_slice %16 {offsets = [72, 0], sizes = [576, 64], strides = [1, 1]} : vector<672x64xf32> to vector<576x64xf32>
    %36 = arith.truncf %35 : vector<576x64xf32> to vector<576x64xbf16>
    %c15 = arith.constant 15 : index
    %c0_25 = arith.constant 0 : index
    %c0_26 = arith.constant 0 : index
    %37 = vector.load %arg4[%c15, %c0_25, %c0_26] : memref<25x64x128xbf16, #tpu.memory_space<vmem>>, vector<1x64x128xbf16>
    %38 = vector.shape_cast %37 : vector<1x64x128xbf16> to vector<64x128xbf16>
    %cst_27 = arith.constant dense<0.000000e+00> : vector<576x128xf32>
    %39 = tpu.matmul %36, %38, %cst_27 {dimension_numbers = #tpu.dot_dimension_numbers<[1], [0], [0], [1], [0, 0, 1, 1], [], []>} : vector<576x64xbf16>, vector<64x128xbf16>, vector<576x128xf32> -> vector<576x128xf32>
    %40 = arith.addf %34, %39 : vector<576x128xf32>
    %41 = vector.extract_strided_slice %16 {offsets = [96, 0], sizes = [576, 64], strides = [1, 1]} : vector<672x64xf32> to vector<576x64xf32>
    %42 = arith.truncf %41 : vector<576x64xf32> to vector<576x64xbf16>
    %c20 = arith.constant 20 : index
    %c0_28 = arith.constant 0 : index
    %c0_29 = arith.constant 0 : index
    %43 = vector.load %arg4[%c20, %c0_28, %c0_29] : memref<25x64x128xbf16, #tpu.memory_space<vmem>>, vector<1x64x128xbf16>
    %44 = vector.shape_cast %43 : vector<1x64x128xbf16> to vector<64x128xbf16>
    %cst_30 = arith.constant dense<0.000000e+00> : vector<576x128xf32>
    %45 = tpu.matmul %42, %44, %cst_30 {dimension_numbers = #tpu.dot_dimension_numbers<[1], [0], [0], [1], [0, 0, 1, 1], [], []>} : vector<576x64xbf16>, vector<64x128xbf16>, vector<576x128xf32> -> vector<576x128xf32>
    %46 = arith.addf %40, %45 : vector<576x128xf32>
    %c1 = arith.constant 1 : index
    %c0_31 = arith.constant 0 : index
    %47 = vector.load %arg12[%c1, %c0_31] : memref<680x64xf32, #tpu.memory_space<vmem>>, vector<672x64xf32>
    %48 = vector.extract_strided_slice %47 {offsets = [0, 0], sizes = [576, 64], strides = [1, 1]} : vector<672x64xf32> to vector<576x64xf32>
    %49 = arith.truncf %48 : vector<576x64xf32> to vector<576x64xbf16>
    %c1_32 = arith.constant 1 : index
    %c0_33 = arith.constant 0 : index
    %c0_34 = arith.constant 0 : index
    %50 = vector.load %arg4[%c1_32, %c0_33, %c0_34] : memref<25x64x128xbf16, #tpu.memory_space<vmem>>, vector<1x64x128xbf16>
    %51 = vector.shape_cast %50 : vector<1x64x128xbf16> to vector<64x128xbf16>
    %cst_35 = arith.constant dense<0.000000e+00> : vector<576x128xf32>
    %52 = tpu.matmul %49, %51, %cst_35 {dimension_numbers = #tpu.dot_dimension_numbers<[1], [0], [0], [1], [0, 0, 1, 1], [], []>} : vector<576x64xbf16>, vector<64x128xbf16>, vector<576x128xf32> -> vector<576x128xf32>
    %53 = arith.addf %46, %52 : vector<576x128xf32>
    %54 = vector.extract_strided_slice %47 {offsets = [24, 0], sizes = [576, 64], strides = [1, 1]} : vector<672x64xf32> to vector<576x64xf32>
    %55 = arith.truncf %54 : vector<576x64xf32> to vector<576x64xbf16>
    %c6 = arith.constant 6 : index
    %c0_36 = arith.constant 0 : index
    %c0_37 = arith.constant 0 : index
    %56 = vector.load %arg4[%c6, %c0_36, %c0_37] : memref<25x64x128xbf16, #tpu.memory_space<vmem>>, vector<1x64x128xbf16>
    %57 = vector.shape_cast %56 : vector<1x64x128xbf16> to vector<64x128xbf16>
    %cst_38 = arith.constant dense<0.000000e+00> : vector<576x128xf32>
    %58 = tpu.matmul %55, %57, %cst_38 {dimension_numbers = #tpu.dot_dimension_numbers<[1], [0], [0], [1], [0, 0, 1, 1], [], []>} : vector<576x64xbf16>, vector<64x128xbf16>, vector<576x128xf32> -> vector<576x128xf32>
    %59 = arith.addf %53, %58 : vector<576x128xf32>
    %60 = vector.extract_strided_slice %47 {offsets = [48, 0], sizes = [576, 64], strides = [1, 1]} : vector<672x64xf32> to vector<576x64xf32>
    %61 = arith.truncf %60 : vector<576x64xf32> to vector<576x64xbf16>
    %c11 = arith.constant 11 : index
    %c0_39 = arith.constant 0 : index
    %c0_40 = arith.constant 0 : index
    %62 = vector.load %arg4[%c11, %c0_39, %c0_40] : memref<25x64x128xbf16, #tpu.memory_space<vmem>>, vector<1x64x128xbf16>
    %63 = vector.shape_cast %62 : vector<1x64x128xbf16> to vector<64x128xbf16>
    %cst_41 = arith.constant dense<0.000000e+00> : vector<576x128xf32>
    %64 = tpu.matmul %61, %63, %cst_41 {dimension_numbers = #tpu.dot_dimension_numbers<[1], [0], [0], [1], [0, 0, 1, 1], [], []>} : vector<576x64xbf16>, vector<64x128xbf16>, vector<576x128xf32> -> vector<576x128xf32>
    %65 = arith.addf %59, %64 : vector<576x128xf32>
    %66 = vector.extract_strided_slice %47 {offsets = [72, 0], sizes = [576, 64], strides = [1, 1]} : vector<672x64xf32> to vector<576x64xf32>
    %67 = arith.truncf %66 : vector<576x64xf32> to vector<576x64xbf16>
    %c16 = arith.constant 16 : index
    %c0_42 = arith.constant 0 : index
    %c0_43 = arith.constant 0 : index
    %68 = vector.load %arg4[%c16, %c0_42, %c0_43] : memref<25x64x128xbf16, #tpu.memory_space<vmem>>, vector<1x64x128xbf16>
    %69 = vector.shape_cast %68 : vector<1x64x128xbf16> to vector<64x128xbf16>
    %cst_44 = arith.constant dense<0.000000e+00> : vector<576x128xf32>
    %70 = tpu.matmul %67, %69, %cst_44 {dimension_numbers = #tpu.dot_dimension_numbers<[1], [0], [0], [1], [0, 0, 1, 1], [], []>} : vector<576x64xbf16>, vector<64x128xbf16>, vector<576x128xf32> -> vector<576x128xf32>
    %71 = arith.addf %65, %70 : vector<576x128xf32>
    %72 = vector.extract_strided_slice %47 {offsets = [96, 0], sizes = [576, 64], strides = [1, 1]} : vector<672x64xf32> to vector<576x64xf32>
    %73 = arith.truncf %72 : vector<576x64xf32> to vector<576x64xbf16>
    %c21 = arith.constant 21 : index
    %c0_45 = arith.constant 0 : index
    %c0_46 = arith.constant 0 : index
    %74 = vector.load %arg4[%c21, %c0_45, %c0_46] : memref<25x64x128xbf16, #tpu.memory_space<vmem>>, vector<1x64x128xbf16>
    %75 = vector.shape_cast %74 : vector<1x64x128xbf16> to vector<64x128xbf16>
    %cst_47 = arith.constant dense<0.000000e+00> : vector<576x128xf32>
    %76 = tpu.matmul %73, %75, %cst_47 {dimension_numbers = #tpu.dot_dimension_numbers<[1], [0], [0], [1], [0, 0, 1, 1], [], []>} : vector<576x64xbf16>, vector<64x128xbf16>, vector<576x128xf32> -> vector<576x128xf32>
    %77 = arith.addf %71, %76 : vector<576x128xf32>
    %c2 = arith.constant 2 : index
    %c0_48 = arith.constant 0 : index
    %78 = vector.load %arg12[%c2, %c0_48] : memref<680x64xf32, #tpu.memory_space<vmem>>, vector<672x64xf32>
    %79 = vector.extract_strided_slice %78 {offsets = [0, 0], sizes = [576, 64], strides = [1, 1]} : vector<672x64xf32> to vector<576x64xf32>
    %80 = arith.truncf %79 : vector<576x64xf32> to vector<576x64xbf16>
    %c2_49 = arith.constant 2 : index
    %c0_50 = arith.constant 0 : index
    %c0_51 = arith.constant 0 : index
    %81 = vector.load %arg4[%c2_49, %c0_50, %c0_51] : memref<25x64x128xbf16, #tpu.memory_space<vmem>>, vector<1x64x128xbf16>
    %82 = vector.shape_cast %81 : vector<1x64x128xbf16> to vector<64x128xbf16>
    %cst_52 = arith.constant dense<0.000000e+00> : vector<576x128xf32>
    %83 = tpu.matmul %80, %82, %cst_52 {dimension_numbers = #tpu.dot_dimension_numbers<[1], [0], [0], [1], [0, 0, 1, 1], [], []>} : vector<576x64xbf16>, vector<64x128xbf16>, vector<576x128xf32> -> vector<576x128xf32>
    %84 = arith.addf %77, %83 : vector<576x128xf32>
    %85 = vector.extract_strided_slice %78 {offsets = [24, 0], sizes = [576, 64], strides = [1, 1]} : vector<672x64xf32> to vector<576x64xf32>
    %86 = arith.truncf %85 : vector<576x64xf32> to vector<576x64xbf16>
    %c7 = arith.constant 7 : index
    %c0_53 = arith.constant 0 : index
    %c0_54 = arith.constant 0 : index
    %87 = vector.load %arg4[%c7, %c0_53, %c0_54] : memref<25x64x128xbf16, #tpu.memory_space<vmem>>, vector<1x64x128xbf16>
    %88 = vector.shape_cast %87 : vector<1x64x128xbf16> to vector<64x128xbf16>
    %cst_55 = arith.constant dense<0.000000e+00> : vector<576x128xf32>
    %89 = tpu.matmul %86, %88, %cst_55 {dimension_numbers = #tpu.dot_dimension_numbers<[1], [0], [0], [1], [0, 0, 1, 1], [], []>} : vector<576x64xbf16>, vector<64x128xbf16>, vector<576x128xf32> -> vector<576x128xf32>
    %90 = arith.addf %84, %89 : vector<576x128xf32>
    %91 = vector.extract_strided_slice %78 {offsets = [48, 0], sizes = [576, 64], strides = [1, 1]} : vector<672x64xf32> to vector<576x64xf32>
    %92 = arith.truncf %91 : vector<576x64xf32> to vector<576x64xbf16>
    %c12 = arith.constant 12 : index
    %c0_56 = arith.constant 0 : index
    %c0_57 = arith.constant 0 : index
    %93 = vector.load %arg4[%c12, %c0_56, %c0_57] : memref<25x64x128xbf16, #tpu.memory_space<vmem>>, vector<1x64x128xbf16>
    %94 = vector.shape_cast %93 : vector<1x64x128xbf16> to vector<64x128xbf16>
    %cst_58 = arith.constant dense<0.000000e+00> : vector<576x128xf32>
    %95 = tpu.matmul %92, %94, %cst_58 {dimension_numbers = #tpu.dot_dimension_numbers<[1], [0], [0], [1], [0, 0, 1, 1], [], []>} : vector<576x64xbf16>, vector<64x128xbf16>, vector<576x128xf32> -> vector<576x128xf32>
    %96 = arith.addf %90, %95 : vector<576x128xf32>
    %97 = vector.extract_strided_slice %78 {offsets = [72, 0], sizes = [576, 64], strides = [1, 1]} : vector<672x64xf32> to vector<576x64xf32>
    %98 = arith.truncf %97 : vector<576x64xf32> to vector<576x64xbf16>
    %c17 = arith.constant 17 : index
    %c0_59 = arith.constant 0 : index
    %c0_60 = arith.constant 0 : index
    %99 = vector.load %arg4[%c17, %c0_59, %c0_60] : memref<25x64x128xbf16, #tpu.memory_space<vmem>>, vector<1x64x128xbf16>
    %100 = vector.shape_cast %99 : vector<1x64x128xbf16> to vector<64x128xbf16>
    %cst_61 = arith.constant dense<0.000000e+00> : vector<576x128xf32>
    %101 = tpu.matmul %98, %100, %cst_61 {dimension_numbers = #tpu.dot_dimension_numbers<[1], [0], [0], [1], [0, 0, 1, 1], [], []>} : vector<576x64xbf16>, vector<64x128xbf16>, vector<576x128xf32> -> vector<576x128xf32>
    %102 = arith.addf %96, %101 : vector<576x128xf32>
    %103 = vector.extract_strided_slice %78 {offsets = [96, 0], sizes = [576, 64], strides = [1, 1]} : vector<672x64xf32> to vector<576x64xf32>
    %104 = arith.truncf %103 : vector<576x64xf32> to vector<576x64xbf16>
    %c22 = arith.constant 22 : index
    %c0_62 = arith.constant 0 : index
    %c0_63 = arith.constant 0 : index
    %105 = vector.load %arg4[%c22, %c0_62, %c0_63] : memref<25x64x128xbf16, #tpu.memory_space<vmem>>, vector<1x64x128xbf16>
    %106 = vector.shape_cast %105 : vector<1x64x128xbf16> to vector<64x128xbf16>
    %cst_64 = arith.constant dense<0.000000e+00> : vector<576x128xf32>
    %107 = tpu.matmul %104, %106, %cst_64 {dimension_numbers = #tpu.dot_dimension_numbers<[1], [0], [0], [1], [0, 0, 1, 1], [], []>} : vector<576x64xbf16>, vector<64x128xbf16>, vector<576x128xf32> -> vector<576x128xf32>
    %108 = arith.addf %102, %107 : vector<576x128xf32>
    %c3 = arith.constant 3 : index
    %c0_65 = arith.constant 0 : index
    %109 = vector.load %arg12[%c3, %c0_65] : memref<680x64xf32, #tpu.memory_space<vmem>>, vector<672x64xf32>
    %110 = vector.extract_strided_slice %109 {offsets = [0, 0], sizes = [576, 64], strides = [1, 1]} : vector<672x64xf32> to vector<576x64xf32>
    %111 = arith.truncf %110 : vector<576x64xf32> to vector<576x64xbf16>
    %c3_66 = arith.constant 3 : index
    %c0_67 = arith.constant 0 : index
    %c0_68 = arith.constant 0 : index
    %112 = vector.load %arg4[%c3_66, %c0_67, %c0_68] : memref<25x64x128xbf16, #tpu.memory_space<vmem>>, vector<1x64x128xbf16>
    %113 = vector.shape_cast %112 : vector<1x64x128xbf16> to vector<64x128xbf16>
    %cst_69 = arith.constant dense<0.000000e+00> : vector<576x128xf32>
    %114 = tpu.matmul %111, %113, %cst_69 {dimension_numbers = #tpu.dot_dimension_numbers<[1], [0], [0], [1], [0, 0, 1, 1], [], []>} : vector<576x64xbf16>, vector<64x128xbf16>, vector<576x128xf32> -> vector<576x128xf32>
    %115 = arith.addf %108, %114 : vector<576x128xf32>
    %116 = vector.extract_strided_slice %109 {offsets = [24, 0], sizes = [576, 64], strides = [1, 1]} : vector<672x64xf32> to vector<576x64xf32>
    %117 = arith.truncf %116 : vector<576x64xf32> to vector<576x64xbf16>
    %c8 = arith.constant 8 : index
    %c0_70 = arith.constant 0 : index
    %c0_71 = arith.constant 0 : index
    %118 = vector.load %arg4[%c8, %c0_70, %c0_71] : memref<25x64x128xbf16, #tpu.memory_space<vmem>>, vector<1x64x128xbf16>
    %119 = vector.shape_cast %118 : vector<1x64x128xbf16> to vector<64x128xbf16>
    %cst_72 = arith.constant dense<0.000000e+00> : vector<576x128xf32>
    %120 = tpu.matmul %117, %119, %cst_72 {dimension_numbers = #tpu.dot_dimension_numbers<[1], [0], [0], [1], [0, 0, 1, 1], [], []>} : vector<576x64xbf16>, vector<64x128xbf16>, vector<576x128xf32> -> vector<576x128xf32>
    %121 = arith.addf %115, %120 : vector<576x128xf32>
    %122 = vector.extract_strided_slice %109 {offsets = [48, 0], sizes = [576, 64], strides = [1, 1]} : vector<672x64xf32> to vector<576x64xf32>
    %123 = arith.truncf %122 : vector<576x64xf32> to vector<576x64xbf16>
    %c13 = arith.constant 13 : index
    %c0_73 = arith.constant 0 : index
    %c0_74 = arith.constant 0 : index
    %124 = vector.load %arg4[%c13, %c0_73, %c0_74] : memref<25x64x128xbf16, #tpu.memory_space<vmem>>, vector<1x64x128xbf16>
    %125 = vector.shape_cast %124 : vector<1x64x128xbf16> to vector<64x128xbf16>
    %cst_75 = arith.constant dense<0.000000e+00> : vector<576x128xf32>
    %126 = tpu.matmul %123, %125, %cst_75 {dimension_numbers = #tpu.dot_dimension_numbers<[1], [0], [0], [1], [0, 0, 1, 1], [], []>} : vector<576x64xbf16>, vector<64x128xbf16>, vector<576x128xf32> -> vector<576x128xf32>
    %127 = arith.addf %121, %126 : vector<576x128xf32>
    %128 = vector.extract_strided_slice %109 {offsets = [72, 0], sizes = [576, 64], strides = [1, 1]} : vector<672x64xf32> to vector<576x64xf32>
    %129 = arith.truncf %128 : vector<576x64xf32> to vector<576x64xbf16>
    %c18 = arith.constant 18 : index
    %c0_76 = arith.constant 0 : index
    %c0_77 = arith.constant 0 : index
    %130 = vector.load %arg4[%c18, %c0_76, %c0_77] : memref<25x64x128xbf16, #tpu.memory_space<vmem>>, vector<1x64x128xbf16>
    %131 = vector.shape_cast %130 : vector<1x64x128xbf16> to vector<64x128xbf16>
    %cst_78 = arith.constant dense<0.000000e+00> : vector<576x128xf32>
    %132 = tpu.matmul %129, %131, %cst_78 {dimension_numbers = #tpu.dot_dimension_numbers<[1], [0], [0], [1], [0, 0, 1, 1], [], []>} : vector<576x64xbf16>, vector<64x128xbf16>, vector<576x128xf32> -> vector<576x128xf32>
    %133 = arith.addf %127, %132 : vector<576x128xf32>
    %134 = vector.extract_strided_slice %109 {offsets = [96, 0], sizes = [576, 64], strides = [1, 1]} : vector<672x64xf32> to vector<576x64xf32>
    %135 = arith.truncf %134 : vector<576x64xf32> to vector<576x64xbf16>
    %c23 = arith.constant 23 : index
    %c0_79 = arith.constant 0 : index
    %c0_80 = arith.constant 0 : index
    %136 = vector.load %arg4[%c23, %c0_79, %c0_80] : memref<25x64x128xbf16, #tpu.memory_space<vmem>>, vector<1x64x128xbf16>
    %137 = vector.shape_cast %136 : vector<1x64x128xbf16> to vector<64x128xbf16>
    %cst_81 = arith.constant dense<0.000000e+00> : vector<576x128xf32>
    %138 = tpu.matmul %135, %137, %cst_81 {dimension_numbers = #tpu.dot_dimension_numbers<[1], [0], [0], [1], [0, 0, 1, 1], [], []>} : vector<576x64xbf16>, vector<64x128xbf16>, vector<576x128xf32> -> vector<576x128xf32>
    %139 = arith.addf %133, %138 : vector<576x128xf32>
    %c4 = arith.constant 4 : index
    %c0_82 = arith.constant 0 : index
    %140 = vector.load %arg12[%c4, %c0_82] : memref<680x64xf32, #tpu.memory_space<vmem>>, vector<672x64xf32>
    %141 = vector.extract_strided_slice %140 {offsets = [0, 0], sizes = [576, 64], strides = [1, 1]} : vector<672x64xf32> to vector<576x64xf32>
    %142 = arith.truncf %141 : vector<576x64xf32> to vector<576x64xbf16>
    %c4_83 = arith.constant 4 : index
    %c0_84 = arith.constant 0 : index
    %c0_85 = arith.constant 0 : index
    %143 = vector.load %arg4[%c4_83, %c0_84, %c0_85] : memref<25x64x128xbf16, #tpu.memory_space<vmem>>, vector<1x64x128xbf16>
    %144 = vector.shape_cast %143 : vector<1x64x128xbf16> to vector<64x128xbf16>
    %cst_86 = arith.constant dense<0.000000e+00> : vector<576x128xf32>
    %145 = tpu.matmul %142, %144, %cst_86 {dimension_numbers = #tpu.dot_dimension_numbers<[1], [0], [0], [1], [0, 0, 1, 1], [], []>} : vector<576x64xbf16>, vector<64x128xbf16>, vector<576x128xf32> -> vector<576x128xf32>
    %146 = arith.addf %139, %145 : vector<576x128xf32>
    %147 = vector.extract_strided_slice %140 {offsets = [24, 0], sizes = [576, 64], strides = [1, 1]} : vector<672x64xf32> to vector<576x64xf32>
    %148 = arith.truncf %147 : vector<576x64xf32> to vector<576x64xbf16>
    %c9 = arith.constant 9 : index
    %c0_87 = arith.constant 0 : index
    %c0_88 = arith.constant 0 : index
    %149 = vector.load %arg4[%c9, %c0_87, %c0_88] : memref<25x64x128xbf16, #tpu.memory_space<vmem>>, vector<1x64x128xbf16>
    %150 = vector.shape_cast %149 : vector<1x64x128xbf16> to vector<64x128xbf16>
    %cst_89 = arith.constant dense<0.000000e+00> : vector<576x128xf32>
    %151 = tpu.matmul %148, %150, %cst_89 {dimension_numbers = #tpu.dot_dimension_numbers<[1], [0], [0], [1], [0, 0, 1, 1], [], []>} : vector<576x64xbf16>, vector<64x128xbf16>, vector<576x128xf32> -> vector<576x128xf32>
    %152 = arith.addf %146, %151 : vector<576x128xf32>
    %153 = vector.extract_strided_slice %140 {offsets = [48, 0], sizes = [576, 64], strides = [1, 1]} : vector<672x64xf32> to vector<576x64xf32>
    %154 = arith.truncf %153 : vector<576x64xf32> to vector<576x64xbf16>
    %c14 = arith.constant 14 : index
    %c0_90 = arith.constant 0 : index
    %c0_91 = arith.constant 0 : index
    %155 = vector.load %arg4[%c14, %c0_90, %c0_91] : memref<25x64x128xbf16, #tpu.memory_space<vmem>>, vector<1x64x128xbf16>
    %156 = vector.shape_cast %155 : vector<1x64x128xbf16> to vector<64x128xbf16>
    %cst_92 = arith.constant dense<0.000000e+00> : vector<576x128xf32>
    %157 = tpu.matmul %154, %156, %cst_92 {dimension_numbers = #tpu.dot_dimension_numbers<[1], [0], [0], [1], [0, 0, 1, 1], [], []>} : vector<576x64xbf16>, vector<64x128xbf16>, vector<576x128xf32> -> vector<576x128xf32>
    %158 = arith.addf %152, %157 : vector<576x128xf32>
    %159 = vector.extract_strided_slice %140 {offsets = [72, 0], sizes = [576, 64], strides = [1, 1]} : vector<672x64xf32> to vector<576x64xf32>
    %160 = arith.truncf %159 : vector<576x64xf32> to vector<576x64xbf16>
    %c19 = arith.constant 19 : index
    %c0_93 = arith.constant 0 : index
    %c0_94 = arith.constant 0 : index
    %161 = vector.load %arg4[%c19, %c0_93, %c0_94] : memref<25x64x128xbf16, #tpu.memory_space<vmem>>, vector<1x64x128xbf16>
    %162 = vector.shape_cast %161 : vector<1x64x128xbf16> to vector<64x128xbf16>
    %cst_95 = arith.constant dense<0.000000e+00> : vector<576x128xf32>
    %163 = tpu.matmul %160, %162, %cst_95 {dimension_numbers = #tpu.dot_dimension_numbers<[1], [0], [0], [1], [0, 0, 1, 1], [], []>} : vector<576x64xbf16>, vector<64x128xbf16>, vector<576x128xf32> -> vector<576x128xf32>
    %164 = arith.addf %158, %163 : vector<576x128xf32>
    %165 = vector.extract_strided_slice %140 {offsets = [96, 0], sizes = [576, 64], strides = [1, 1]} : vector<672x64xf32> to vector<576x64xf32>
    %166 = arith.truncf %165 : vector<576x64xf32> to vector<576x64xbf16>
    %c24 = arith.constant 24 : index
    %c0_96 = arith.constant 0 : index
    %c0_97 = arith.constant 0 : index
    %167 = vector.load %arg4[%c24, %c0_96, %c0_97] : memref<25x64x128xbf16, #tpu.memory_space<vmem>>, vector<1x64x128xbf16>
    %168 = vector.shape_cast %167 : vector<1x64x128xbf16> to vector<64x128xbf16>
    %cst_98 = arith.constant dense<0.000000e+00> : vector<576x128xf32>
    %169 = tpu.matmul %166, %168, %cst_98 {dimension_numbers = #tpu.dot_dimension_numbers<[1], [0], [0], [1], [0, 0, 1, 1], [], []>} : vector<576x64xbf16>, vector<64x128xbf16>, vector<576x128xf32> -> vector<576x128xf32>
    %170 = arith.addf %164, %169 : vector<576x128xf32>
    %c0_99 = arith.constant 0 : index
    %c0_100 = arith.constant 0 : index
    %171 = vector.load %arg5[%c0_99, %c0_100] : memref<1x128xf32, #tpu.memory_space<vmem>>, vector<1x128xf32>
    %172 = vector.broadcast %171 : vector<1x128xf32> to vector<576x128xf32>
    %173 = arith.addf %170, %172 : vector<576x128xf32>
    %cst_101 = arith.constant 0.000000e+00 : f32
    %174 = vector.broadcast %cst_101 : f32 to vector<576x128xf32>
    %175 = arith.cmpf ogt, %173, %174 : vector<576x128xf32>
    %cst_102 = arith.constant 0.00999999977 : f32
    %176 = vector.broadcast %cst_102 : f32 to vector<576x128xf32>
    %177 = arith.mulf %176, %173 : vector<576x128xf32>
    %178 = arith.select %175, %173, %177 : vector<576x128xi1>, vector<576x128xf32>
    %c0_103 = arith.constant 0 : index
    %c0_104 = arith.constant 0 : index
    %179 = vector.load %arg6[%c0_103, %c0_104] : memref<9x576xbf16, #tpu.memory_space<vmem>>, vector<9x576xbf16>
    %180 = arith.truncf %178 : vector<576x128xf32> to vector<576x128xbf16>
    %cst_105 = arith.constant dense<0.000000e+00> : vector<9x128xf32>
    %181 = tpu.matmul %179, %180, %cst_105 {dimension_numbers = #tpu.dot_dimension_numbers<[1], [0], [0], [1], [0, 0, 1, 1], [], []>} : vector<9x576xbf16>, vector<576x128xbf16>, vector<9x128xf32> -> vector<9x128xf32>
    %cst_106 = arith.constant 0.027777778 : f32
    %182 = vector.broadcast %cst_106 : f32 to vector<9x128xf32>
    %183 = arith.mulf %181, %182 : vector<9x128xf32>
    %c0_107 = arith.constant 0 : index
    %c0_108 = arith.constant 0 : index
    %184 = vector.load %arg8[%c0_107, %c0_108] : memref<1x164xf32, #tpu.memory_space<vmem>>, vector<1x164xf32>
    %185 = vector.extract_strided_slice %183 {offsets = [0, 0], sizes = [1, 128], strides = [1, 1]} : vector<9x128xf32> to vector<1x128xf32>
    %186 = arith.truncf %185 : vector<1x128xf32> to vector<1x128xbf16>
    %c0_109 = arith.constant 0 : index
    %c0_110 = arith.constant 0 : index
    %c0_111 = arith.constant 0 : index
    %187 = vector.load %arg7[%c0_109, %c0_110, %c0_111] : memref<9x128x164xbf16, #tpu.memory_space<vmem>>, vector<1x128x164xbf16>
    %188 = vector.shape_cast %187 : vector<1x128x164xbf16> to vector<128x164xbf16>
    %cst_112 = arith.constant dense<0.000000e+00> : vector<1x164xf32>
    %189 = tpu.matmul %186, %188, %cst_112 {dimension_numbers = #tpu.dot_dimension_numbers<[1], [0], [0], [1], [0, 0, 1, 1], [], []>} : vector<1x128xbf16>, vector<128x164xbf16>, vector<1x164xf32> -> vector<1x164xf32>
    %190 = arith.addf %184, %189 : vector<1x164xf32>
    %191 = vector.extract_strided_slice %183 {offsets = [1, 0], sizes = [1, 128], strides = [1, 1]} : vector<9x128xf32> to vector<1x128xf32>
    %192 = arith.truncf %191 : vector<1x128xf32> to vector<1x128xbf16>
    %c1_113 = arith.constant 1 : index
    %c0_114 = arith.constant 0 : index
    %c0_115 = arith.constant 0 : index
    %193 = vector.load %arg7[%c1_113, %c0_114, %c0_115] : memref<9x128x164xbf16, #tpu.memory_space<vmem>>, vector<1x128x164xbf16>
    %194 = vector.shape_cast %193 : vector<1x128x164xbf16> to vector<128x164xbf16>
    %cst_116 = arith.constant dense<0.000000e+00> : vector<1x164xf32>
    %195 = tpu.matmul %192, %194, %cst_116 {dimension_numbers = #tpu.dot_dimension_numbers<[1], [0], [0], [1], [0, 0, 1, 1], [], []>} : vector<1x128xbf16>, vector<128x164xbf16>, vector<1x164xf32> -> vector<1x164xf32>
    %196 = arith.addf %190, %195 : vector<1x164xf32>
    %197 = vector.extract_strided_slice %183 {offsets = [2, 0], sizes = [1, 128], strides = [1, 1]} : vector<9x128xf32> to vector<1x128xf32>
    %198 = arith.truncf %197 : vector<1x128xf32> to vector<1x128xbf16>
    %c2_117 = arith.constant 2 : index
    %c0_118 = arith.constant 0 : index
    %c0_119 = arith.constant 0 : index
    %199 = vector.load %arg7[%c2_117, %c0_118, %c0_119] : memref<9x128x164xbf16, #tpu.memory_space<vmem>>, vector<1x128x164xbf16>
    %200 = vector.shape_cast %199 : vector<1x128x164xbf16> to vector<128x164xbf16>
    %cst_120 = arith.constant dense<0.000000e+00> : vector<1x164xf32>
    %201 = tpu.matmul %198, %200, %cst_120 {dimension_numbers = #tpu.dot_dimension_numbers<[1], [0], [0], [1], [0, 0, 1, 1], [], []>} : vector<1x128xbf16>, vector<128x164xbf16>, vector<1x164xf32> -> vector<1x164xf32>
    %202 = arith.addf %196, %201 : vector<1x164xf32>
    %203 = vector.extract_strided_slice %183 {offsets = [3, 0], sizes = [1, 128], strides = [1, 1]} : vector<9x128xf32> to vector<1x128xf32>
    %204 = arith.truncf %203 : vector<1x128xf32> to vector<1x128xbf16>
    %c3_121 = arith.constant 3 : index
    %c0_122 = arith.constant 0 : index
    %c0_123 = arith.constant 0 : index
    %205 = vector.load %arg7[%c3_121, %c0_122, %c0_123] : memref<9x128x164xbf16, #tpu.memory_space<vmem>>, vector<1x128x164xbf16>
    %206 = vector.shape_cast %205 : vector<1x128x164xbf16> to vector<128x164xbf16>
    %cst_124 = arith.constant dense<0.000000e+00> : vector<1x164xf32>
    %207 = tpu.matmul %204, %206, %cst_124 {dimension_numbers = #tpu.dot_dimension_numbers<[1], [0], [0], [1], [0, 0, 1, 1], [], []>} : vector<1x128xbf16>, vector<128x164xbf16>, vector<1x164xf32> -> vector<1x164xf32>
    %208 = arith.addf %202, %207 : vector<1x164xf32>
    %209 = vector.extract_strided_slice %183 {offsets = [4, 0], sizes = [1, 128], strides = [1, 1]} : vector<9x128xf32> to vector<1x128xf32>
    %210 = arith.truncf %209 : vector<1x128xf32> to vector<1x128xbf16>
    %c4_125 = arith.constant 4 : index
    %c0_126 = arith.constant 0 : index
    %c0_127 = arith.constant 0 : index
    %211 = vector.load %arg7[%c4_125, %c0_126, %c0_127] : memref<9x128x164xbf16, #tpu.memory_space<vmem>>, vector<1x128x164xbf16>
    %212 = vector.shape_cast %211 : vector<1x128x164xbf16> to vector<128x164xbf16>
    %cst_128 = arith.constant dense<0.000000e+00> : vector<1x164xf32>
    %213 = tpu.matmul %210, %212, %cst_128 {dimension_numbers = #tpu.dot_dimension_numbers<[1], [0], [0], [1], [0, 0, 1, 1], [], []>} : vector<1x128xbf16>, vector<128x164xbf16>, vector<1x164xf32> -> vector<1x164xf32>
    %214 = arith.addf %208, %213 : vector<1x164xf32>
    %215 = vector.extract_strided_slice %183 {offsets = [5, 0], sizes = [1, 128], strides = [1, 1]} : vector<9x128xf32> to vector<1x128xf32>
    %216 = arith.truncf %215 : vector<1x128xf32> to vector<1x128xbf16>
    %c5_129 = arith.constant 5 : index
    %c0_130 = arith.constant 0 : index
    %c0_131 = arith.constant 0 : index
    %217 = vector.load %arg7[%c5_129, %c0_130, %c0_131] : memref<9x128x164xbf16, #tpu.memory_space<vmem>>, vector<1x128x164xbf16>
    %218 = vector.shape_cast %217 : vector<1x128x164xbf16> to vector<128x164xbf16>
    %cst_132 = arith.constant dense<0.000000e+00> : vector<1x164xf32>
    %219 = tpu.matmul %216, %218, %cst_132 {dimension_numbers = #tpu.dot_dimension_numbers<[1], [0], [0], [1], [0, 0, 1, 1], [], []>} : vector<1x128xbf16>, vector<128x164xbf16>, vector<1x164xf32> -> vector<1x164xf32>
    %220 = arith.addf %214, %219 : vector<1x164xf32>
    %221 = vector.extract_strided_slice %183 {offsets = [6, 0], sizes = [1, 128], strides = [1, 1]} : vector<9x128xf32> to vector<1x128xf32>
    %222 = arith.truncf %221 : vector<1x128xf32> to vector<1x128xbf16>
    %c6_133 = arith.constant 6 : index
    %c0_134 = arith.constant 0 : index
    %c0_135 = arith.constant 0 : index
    %223 = vector.load %arg7[%c6_133, %c0_134, %c0_135] : memref<9x128x164xbf16, #tpu.memory_space<vmem>>, vector<1x128x164xbf16>
    %224 = vector.shape_cast %223 : vector<1x128x164xbf16> to vector<128x164xbf16>
    %cst_136 = arith.constant dense<0.000000e+00> : vector<1x164xf32>
    %225 = tpu.matmul %222, %224, %cst_136 {dimension_numbers = #tpu.dot_dimension_numbers<[1], [0], [0], [1], [0, 0, 1, 1], [], []>} : vector<1x128xbf16>, vector<128x164xbf16>, vector<1x164xf32> -> vector<1x164xf32>
    %226 = arith.addf %220, %225 : vector<1x164xf32>
    %227 = vector.extract_strided_slice %183 {offsets = [7, 0], sizes = [1, 128], strides = [1, 1]} : vector<9x128xf32> to vector<1x128xf32>
    %228 = arith.truncf %227 : vector<1x128xf32> to vector<1x128xbf16>
    %c7_137 = arith.constant 7 : index
    %c0_138 = arith.constant 0 : index
    %c0_139 = arith.constant 0 : index
    %229 = vector.load %arg7[%c7_137, %c0_138, %c0_139] : memref<9x128x164xbf16, #tpu.memory_space<vmem>>, vector<1x128x164xbf16>
    %230 = vector.shape_cast %229 : vector<1x128x164xbf16> to vector<128x164xbf16>
    %cst_140 = arith.constant dense<0.000000e+00> : vector<1x164xf32>
    %231 = tpu.matmul %228, %230, %cst_140 {dimension_numbers = #tpu.dot_dimension_numbers<[1], [0], [0], [1], [0, 0, 1, 1], [], []>} : vector<1x128xbf16>, vector<128x164xbf16>, vector<1x164xf32> -> vector<1x164xf32>
    %232 = arith.addf %226, %231 : vector<1x164xf32>
    %233 = vector.extract_strided_slice %183 {offsets = [8, 0], sizes = [1, 128], strides = [1, 1]} : vector<9x128xf32> to vector<1x128xf32>
    %234 = arith.truncf %233 : vector<1x128xf32> to vector<1x128xbf16>
    %c8_141 = arith.constant 8 : index
    %c0_142 = arith.constant 0 : index
    %c0_143 = arith.constant 0 : index
    %235 = vector.load %arg7[%c8_141, %c0_142, %c0_143] : memref<9x128x164xbf16, #tpu.memory_space<vmem>>, vector<1x128x164xbf16>
    %236 = vector.shape_cast %235 : vector<1x128x164xbf16> to vector<128x164xbf16>
    %cst_144 = arith.constant dense<0.000000e+00> : vector<1x164xf32>
    %237 = tpu.matmul %234, %236, %cst_144 {dimension_numbers = #tpu.dot_dimension_numbers<[1], [0], [0], [1], [0, 0, 1, 1], [], []>} : vector<1x128xbf16>, vector<128x164xbf16>, vector<1x164xf32> -> vector<1x164xf32>
    %238 = arith.addf %232, %237 : vector<1x164xf32>
    %cst_145 = arith.constant 0.000000e+00 : f32
    %239 = vector.broadcast %cst_145 : f32 to vector<1x164xf32>
    %240 = arith.cmpf ogt, %238, %239 : vector<1x164xf32>
    %cst_146 = arith.constant 0.00999999977 : f32
    %241 = vector.broadcast %cst_146 : f32 to vector<1x164xf32>
    %242 = arith.mulf %241, %238 : vector<1x164xf32>
    %243 = arith.select %240, %238, %242 : vector<1x164xi1>, vector<1x164xf32>
    %244 = arith.truncf %243 : vector<1x164xf32> to vector<1x164xbf16>
    %c0_147 = arith.constant 0 : index
    %c0_148 = arith.constant 0 : index
    %245 = vector.load %arg9[%c0_147, %c0_148] : memref<164x128xbf16, #tpu.memory_space<vmem>>, vector<164x128xbf16>
    %cst_149 = arith.constant dense<0.000000e+00> : vector<1x128xf32>
    %246 = tpu.matmul %244, %245, %cst_149 {dimension_numbers = #tpu.dot_dimension_numbers<[1], [0], [0], [1], [0, 0, 1, 1], [], []>} : vector<1x164xbf16>, vector<164x128xbf16>, vector<1x128xf32> -> vector<1x128xf32>
    %c0_150 = arith.constant 0 : index
    %c0_151 = arith.constant 0 : index
    %247 = vector.load %arg10[%c0_150, %c0_151] : memref<1x128xf32, #tpu.memory_space<vmem>>, vector<1x128xf32>
    %248 = arith.addf %246, %247 : vector<1x128xf32>
    %cst_152 = arith.constant 0.000000e+00 : f32
    %249 = vector.broadcast %cst_152 : f32 to vector<1x128xf32>
    %250 = arith.subf %249, %248 : vector<1x128xf32>
    %251 = math.exp %250 : vector<1x128xf32>
    %cst_153 = arith.constant 1.000000e+00 : f32
    %252 = vector.broadcast %cst_153 : f32 to vector<1x128xf32>
    %253 = arith.addf %252, %251 : vector<1x128xf32>
    %cst_154 = arith.constant 1.000000e+00 : f32
    %254 = vector.broadcast %cst_154 : f32 to vector<1x128xf32>
    %255 = arith.divf %254, %253 : vector<1x128xf32>
    %c0_155 = arith.constant 0 : index
    %c0_156 = arith.constant 0 : index
    %c0_157 = arith.constant 0 : index
    %256 = vector.load %arg11[%c0_155, %c0_156, %c0_157] : memref<1x1x128xf32, #tpu.memory_space<vmem>>, vector<1x1x128xf32>
    %257 = vector.shape_cast %256 : vector<1x1x128xf32> to vector<1x128xf32>
    %258 = vector.shape_cast %255 : vector<1x128xf32> to vector<1x1x128xf32>
    tpu.vector_store %arg11[%c0_155, %c0_156, %c0_157], %258 {strides = array<i32>} : memref<1x1x128xf32, #tpu.memory_space<vmem>>, vector<1x1x128xf32>,
    return
  }
  func.func @transform_0(%arg0: i32) -> (i32, i32, i32) {
    %c0_i32 = arith.constant 0 : i32
    %c0_i32_0 = arith.constant 0 : i32
    %c0_i32_1 = arith.constant 0 : i32
    return %arg0, %c0_i32, %c0_i32_0 : i32, i32, i32
  }
  func.func @transform_1(%arg0: i32) -> (i32, i32) {
    %c0_i32 = arith.constant 0 : i32
    %c0_i32_0 = arith.constant 0 : i32
    %c0_i32_1 = arith.constant 0 : i32
    return %c0_i32, %c0_i32_0 : i32, i32
  }
  func.func @transform_2(%arg0: i32) -> (i32, i32) {
    %c0_i32 = arith.constant 0 : i32
    %c0_i32_0 = arith.constant 0 : i32
    %c0_i32_1 = arith.constant 0 : i32
    return %c0_i32, %c0_i32_0 : i32, i32
  }
  func.func @transform_3(%arg0: i32) -> (i32, i32, i32) {
    %c0_i32 = arith.constant 0 : i32
    %c0_i32_0 = arith.constant 0 : i32
    %c0_i32_1 = arith.constant 0 : i32
    %c0_i32_2 = arith.constant 0 : i32
    return %c0_i32, %c0_i32_0, %c0_i32_1 : i32, i32, i32
  }
  func.func @transform_4(%arg0: i32) -> (i32, i32) {
    %c0_i32 = arith.constant 0 : i32
    %c0_i32_0 = arith.constant 0 : i32
    %c0_i32_1 = arith.constant 0 : i32
    return %c0_i32, %c0_i32_0 : i32, i32
  }
  func.func @transform_5(%arg0: i32) -> (i32, i32) {
    %c0_i32 = arith.constant 0 : i32
    %c0_i32_0 = arith.constant 0 : i32
    %c0_i32_1 = arith.constant 0 : i32
    return %c0_i32, %c0_i32_0 : i32, i32
  }
  func.func @transform_6(%arg0: i32) -> (i32, i32, i32) {
    %c0_i32 = arith.constant 0 : i32
    %c0_i32_0 = arith.constant 0 : i32
    %c0_i32_1 = arith.constant 0 : i32
    %c0_i32_2 = arith.constant 0 : i32
    return %c0_i32, %c0_i32_0, %c0_i32_1 : i32, i32, i32
  }
  func.func @transform_7(%arg0: i32) -> (i32, i32) {
    %c0_i32 = arith.constant 0 : i32
    %c0_i32_0 = arith.constant 0 : i32
    %c0_i32_1 = arith.constant 0 : i32
    return %c0_i32, %c0_i32_0 : i32, i32
  }
  func.func @transform_8(%arg0: i32) -> (i32, i32) {
    %c0_i32 = arith.constant 0 : i32
    %c0_i32_0 = arith.constant 0 : i32
    %c0_i32_1 = arith.constant 0 : i32
    return %c0_i32, %c0_i32_0 : i32, i32
  }
  func.func @transform_9(%arg0: i32) -> (i32, i32) {
    %c0_i32 = arith.constant 0 : i32
    %c0_i32_0 = arith.constant 0 : i32
    %c0_i32_1 = arith.constant 0 : i32
    return %c0_i32, %c0_i32_0 : i32, i32
  }
  func.func @transform_10(%arg0: i32) -> (i32, i32, i32) {
    %c0_i32 = arith.constant 0 : i32
    %c0_i32_0 = arith.constant 0 : i32
    %c0_i32_1 = arith.constant 0 : i32
    return %arg0, %c0_i32, %c0_i32_0 : i32, i32, i32
  }
}

</mosaic_0001>

<bundles_post_ra>
// kernel: discriminator_forward.1
= control target key start
LH: loop header
LB: loop body
LE: loop exit
PB: predicated region body
PF: predicated region fallthrough
CT: control target
= control target key end

     0   :  { %s23247_s13 = smov 0   ;;  %s27606_s0 = inlined_call_operand.vmem [shape: bf16[2,576,50], index: 0, kind: input, shape index: {}]   ;;  %s27607_s1 = inlined_call_operand.vmem [shape: bf16[50,64], index: 1, kind: input, shape index: {}]   ;;  %s27608_s2 = inlined_call_operand.vmem [shape: f32[1,64], index: 2, kind: input, shape index: {}]   ;;  %s27609_s3 = inlined_call_operand.vmem [shape: bf16[25,64,128], index: 3, kind: input, shape index: {}]   ;;  %s27610_s4 = inlined_call_operand.vmem [shape: f32[1,128], index: 4, kind: input, shape index: {}]   ;;  %s27611_s5 = inlined_call_operand.vmem [shape: bf16[9,576], index: 5, kind: input, shape index: {}]   ;;  %s27612_s6 = inlined_call_operand.vmem [shape: bf16[9,128,164], index: 6, kind: input, shape index: {}]   ;;  %s27613_s7 = inlined_call_operand.vmem [shape: f32[1,164], index: 7, kind: input, shape index: {}]   ;;  %s27614_s8 = inlined_call_operand.vmem [shape: bf16[164,128], index: 8, kind: input, shape index: {}]   ;;  %s27615_s9 = inlined_call_operand.vmem [shape: f32[1,128], index: 9, kind: input, shape index: {}]   ;;  %s27616_s10 = inlined_call_operand.vmem [shape: f32[2,1,128], index: 10, kind: output, shape index: {}]  }
   0x1 LB: > { %s16050_s14 = sadd.s32 4294967295, %s23186_s13   ;;  %p16054_p0 = scmp.ge.s32.totalorder %s23186_s13, 1  ;;  %s23186_s13 = sphi %s23247_s13, %s20_s13  }
   0x2   : > { %p312_p1 = scmp.lt.s32.totalorder %s23186_s13, 3 }
   0x4   : > { %p313_p2 = pnand %p16054_p0, %p312_p1 }
   0x6   : > { %316 = sbr.rel (%p313_p2) target bundleno = 3623 (0xe27), region = 60 }
   0xd   : > { %v22549_v0 = vld [vmem:[%s27607_s1] sm:$0xff]   ;;  %v22550_v1 = vld [vmem:[%s27607_s1 + $0x8] sm:$0xff]   ;;  %p348_p3 = scmp.lt.s32.totalorder %s16050_s14, 1  ;;  %v22551_v2 = vld [vmem:[%s27607_s1 + $0x10] sm:$0xff]   ;;  %vm644_vm0 = vcmask 408576   ;;  %vm753_vm1 = vcmask 1040384  }
   0xe   : > { %18707 = vmatprep.subr.bf16.mxu0 %v22549_v0  ;;  %v22552_v3 = vld [vmem:[%s27607_s1 + $0x18] ss:$0 sps:$4 sm:$0x11]   ;;  %v22589_v32 = vld [vmem:[%s27609_s3 + $0xa0] sm:$0xff]   ;;  %v22590_v33 = vld [vmem:[%s27609_s3 + $0xa8] sm:$0xff]   ;;  %vm1294_vm3 = vcmask 523264  }
   0xf   : > { %18708 = vmatpush3.bf16.msra.mxu0 %v22549_v0  ;;  %s28740_s14 = smov (!%p348_p3, %s16050_s14), 1  ;;  %v755_v5 = vsel %vm753_vm1, %v22552_v3, 0  ;;  %v22591_v36 = vld [vmem:[%s27609_s3 + $0xb0] sm:$0xff]   ;;  %v22592_v37 = vld [vmem:[%s27609_s3 + $0xb8] sm:$0xff]   ;;  %v22593_v45 = vld [vmem:[%s27609_s3 + $0x40] sm:$0xff]  }
  0x10   : > { %18709 = vmatprep.subr.bf16.mxu0 %v22550_v1  ;;  %s22536_s21 = smul.u32 288, %s28740_s14  ;;  %20799 = vmatprep.subr.bf16.mxu1 %v22593_v45  ;;  %v22594_v46 = vld [vmem:[%s27609_s3 + $0x48] sm:$0xff]   ;;  %v22595_v47 = vld [vmem:[%s27609_s3 + $0x50] sm:$0xff]   ;;  %v22596_v48 = vld [vmem:[%s27609_s3 + $0x58] sm:$0xff]   ;;  %s355_s29 = scalar_lea.vmem %s27616_s10, %s28740_s14 }
  0x11   : > { %20803 = vmatpush3.bf16.msra.mxu1 %v22593_v45  ;;  %v23374_v49 = vld [vmem:[%s27608_s2] ss:$0 sm:$0xff] }
  0x12   : > { %s23273_s26 = scalar_lea.vmem %s27606_s0, %s22536_s21  ;;  %20800 = vmatprep.subr.bf16.mxu1 %v22594_v46 }
  0x13   : > { %18710 = vmatpush3.bf16.msra.mxu0 %v22550_v1  ;;  %v22553_v4 = vld [vmem:[%s23273_s26] sm:$0xff]   ;;  %v22554_v6 = vld [vmem:[%s23273_s26 + $0x8] sm:$0xff]   ;;  %v22555_v7 = vld [vmem:[%s23273_s26 + $0x10] sm:$0xff]  }
  0x14   : > { %18711 = vmatprep.subr.bf16.mxu0 %v22551_v2  ;;  %18715 = vmatprep.mubr.msk.bf16.mxu0 %vm644_vm0, %v22553_v4  ;;  %v22556_v8 = vld [vmem:[%s23273_s26 + $0x18] sm:$0xff]   ;;  %v22557_v9 = vld [vmem:[%s23273_s26 + $0x20] sm:$0xff]   ;;  %v22558_v10 = vld [vmem:[%s23273_s26 + $0x28] sm:$0xff]  }
  0x15   : > { %v22559_v11 = vld [vmem:[%s23273_s26 + $0x30] sm:$0xff]   ;;  %v22560_v12 = vld [vmem:[%s23273_s26 + $0x38] sm:$0xff]   ;;  %v22561_v13 = vld [vmem:[%s23273_s26 + $0x40] sm:$0xff]   ;;  %20804 = vmatpush3.bf16.msra.mxu1 %v22594_v46 }
  0x16   : > { %v22562_v14 = vld [vmem:[%s23273_s26 + $0x48] sm:$0xff]   ;;  %v22563_v15 = vld [vmem:[%s23273_s26 + $0x50] sm:$0xff]   ;;  %v22564_v16 = vld [vmem:[%s23273_s26 + $0x58] sm:$0xff]   ;;  %20801 = vmatprep.subr.bf16.mxu1 %v22595_v47 }
  0x17   : > { %18712 = vmatpush3.bf16.msra.mxu0 %v22551_v2  ;;  %v22565_v17 = vld [vmem:[%s23273_s26 + $0x60] sm:$0xff]   ;;  %v22566_v18 = vld [vmem:[%s23273_s26 + $0x68] sm:$0xff]   ;;  %v22567_v19 = vld [vmem:[%s23273_s26 + $0x70] sm:$0xff]  }
  0x18   : > { %22535 = vmatprep.subr.msk.bf16.mxu0 %vm753_vm1, %v22552_v3  ;;  %v22568_v20 = vld [vmem:[%s23273_s26 + $0x78] sm:$0xff]   ;;  %v22569_v21 = vld [vmem:[%s23273_s26 + $0x80] sm:$0xff]   ;;  %v22570_v22 = vld [vmem:[%s23273_s26 + $0x88] sm:$0xff]  }
  0x19   : > { %v22571_v23 = vld [vmem:[%s23273_s26 + $0x90] sm:$0xff]   ;;  %v22572_v24 = vld [vmem:[%s23273_s26 + $0x98] sm:$0xff]   ;;  %v22573_v25 = vld [vmem:[%s23273_s26 + $0xa0] sm:$0xff]   ;;  %20805 = vmatpush3.bf16.msra.mxu1 %v22595_v47 }
  0x1a   : > { %v22574_v26 = vld [vmem:[%s23273_s26 + $0xa8] sm:$0xff]   ;;  %v22575_v27 = vld [vmem:[%s23273_s26 + $0xb0] sm:$0xff]   ;;  %v22576_v28 = vld [vmem:[%s23273_s26 + $0xb8] sm:$0xff]   ;;  %20802 = vmatprep.subr.bf16.mxu1 %v22596_v48 }
  0x1b   : > { %18714 = vmatpush3.bf16.msra.mxu0 %v755_v5  ;;  %v22577_v29 = vld [vmem:[%s23273_s26 + $0xc0] sm:$0xff]   ;;  %v22578_v30 = vld [vmem:[%s23273_s26 + $0xc8] sm:$0xff]   ;;  %v22579_v31 = vld [vmem:[%s23273_s26 + $0xd0] sm:$0xff]  }
  0x1c   : > { %18787 = vmatprep.subr.bf16.mxu0 %v22589_v32  ;;  %v22580_v34 = vld [vmem:[%s23273_s26 + $0xd8] sm:$0xff]   ;;  %v22581_v35 = vld [vmem:[%s23273_s26 + $0xe0] sm:$0xff]   ;;  %v22582_v38 = vld [vmem:[%s23273_s26 + $0xe8] sm:$0xff]  }
  0x1d   : > { %v22583_v39 = vld [vmem:[%s23273_s26 + $0xf0] sm:$0xff]   ;;  %v22584_v40 = vld [vmem:[%s23273_s26 + $0xf8] sm:$0xff]   ;;  %v22585_v41 = vld [vmem:[%s23273_s26 + $0x100] sm:$0xff]   ;;  %20806 = vmatpush3.bf16.msra.mxu1 %v22596_v48 }
  0x1e   : > { %18716 = vmatmul.mubr.msk.bf16.vlgmr.msra.gmra.mrb[0].mxu0 %vm644_vm0, %v22554_v6  ;;  %v22586_v42 = vld [vmem:[%s23273_s26 + $0x108] sm:$0xff]   ;;  %v22587_v43 = vld [vmem:[%s23273_s26 + $0x110] sm:$0xff]   ;;  %v22588_v44 = vld [vmem:[%s23273_s26 + $0x118] sm:$0xff]  }
  0x1f   : > { %18719 = vmatprep.mubr.msk.bf16.mxu0 %vm644_vm0, %v22555_v7  ;;  %18788 = vmatpush3.bf16.msra.mxu0 %v22589_v32 }
  0x20   : > { %18789 = vmatprep.subr.bf16.mxu0 %v22590_v33 }
  0x23   : > { %18790 = vmatpush3.bf16.msra.mxu0 %v22590_v33 }
  0x24   : > { %18791 = vmatprep.subr.bf16.mxu0 %v22591_v36 }
  0x26   : > { %18720 = vmatmul.mubr.msk.bf16.gmra.mrb[4].mxu0 %vm644_vm0, %v22556_v8 }
  0x27   : > { %18723 = vmatprep.mubr.msk.bf16.mxu0 %vm644_vm0, %v22557_v9  ;;  %18792 = vmatpush3.bf16.msra.mxu0 %v22591_v36 }
  0x28   : > { %18793 = vmatprep.subr.bf16.mxu0 %v22592_v37 }
  0x2b   : > { %18794 = vmatpush3.bf16.msra.mxu0 %v22592_v37 }
  0x2e   : > { %18724 = vmatmul.mubr.msk.bf16.gmra.mrb[8].mxu0 %vm644_vm0, %v22558_v10 }
  0x2f   : > { %18727 = vmatprep.mubr.msk.bf16.mxu0 %vm644_vm0, %v22559_v11 }
  0x36   : > { %18728 = vmatmul.mubr.msk.bf16.gmra.mrb[12].mxu0 %vm644_vm0, %v22560_v12 }
  0x37   : > { %18731 = vmatprep.mubr.msk.bf16.mxu0 %vm644_vm0, %v22561_v13 }
  0x3e   : > { %18732 = vmatmul.mubr.msk.bf16.gmra.mrb[16].mxu0 %vm644_vm0, %v22562_v14 }
  0x3f   : > { %18735 = vmatprep.mubr.msk.bf16.mxu0 %vm644_vm0, %v22563_v15 }
  0x46   : > { %18736 = vmatmul.mubr.msk.bf16.gmra.mrb[20].mxu0 %vm644_vm0, %v22564_v16  ;;  %v22597_v16 = vld [vmem:[%s27609_s3 + $0xe0] sm:$0xff]  }
  0x47   : > { %18739 = vmatprep.mubr.msk.bf16.mxu0 %vm644_vm0, %v22565_v17  ;;  %19667 = vmatprep.subr.bf16.mxu1 %v22597_v16 }
  0x4e   : > { %18740 = vmatmul.mubr.msk.bf16.gmra.mrb[24].mxu0 %vm644_vm0, %v22566_v18 }
  0x4f   : > { %18743 = vmatprep.mubr.msk.bf16.mxu0 %vm644_vm0, %v22567_v19 }
  0x56   : > { %18744 = vmatmul.mubr.msk.bf16.gmra.mrb[28].mxu0 %vm644_vm0, %v22568_v20 }
  0x57   : > { %18747 = vmatprep.mubr.msk.bf16.mxu0 %vm644_vm0, %v22569_v21 }
  0x5e   : > { %18748 = vmatmul.mubr.msk.bf16.gmra.mrb[32].mxu0 %vm644_vm0, %v22570_v22  ;;  %v27617_v22 = vmov 0.0  }
  0x5f   : > { %18751 = vmatprep.mubr.msk.bf16.mxu0 %vm644_vm0, %v22571_v23  ;;  %1367 = vst.msk [vmem:[#allocation2 + $0x240] sm:$0xff] %vm1294_vm3, %v27617_v22  ;;  %1368 = vst.msk [vmem:[#allocation2 + $0x248] sm:$0xff] %vm1294_vm3, %v27617_v22 }
  0x60   : > { %1369 = vst.msk [vmem:[#allocation2 + $0x250] sm:$0xff] %vm1294_vm3, %v27617_v22  ;;  %1370 = vst.msk [vmem:[#allocation2 + $0x258] sm:$0xff] %vm1294_vm3, %v27617_v22 }
  0x61   : > { %1371 = vst.msk [vmem:[#allocation2 + $0x260] sm:$0xff] %vm1294_vm3, %v27617_v22  ;;  %1372 = vst.msk [vmem:[#allocation2 + $0x268] sm:$0xff] %vm1294_vm3, %v27617_v22 }
  0x62   : > { %1373 = vst.msk [vmem:[#allocation2 + $0x270] sm:$0xff] %vm1294_vm3, %v27617_v22  ;;  %1374 = vst.msk [vmem:[#allocation2 + $0x278] sm:$0xff] %vm1294_vm3, %v27617_v22 }
  0x63   : > { %1375 = vst.msk [vmem:[#allocation2 + $0x280] sm:$0xff] %vm1294_vm3, %v27617_v22  ;;  %1376 = vst.msk [vmem:[#allocation2 + $0x288] sm:$0xff] %vm1294_vm3, %v27617_v22 }
  0x64   : > { %1377 = vst.msk [vmem:[#allocation2 + $0x290] sm:$0xff] %vm1294_vm3, %v27617_v22  ;;  %1378 = vst.msk [vmem:[#allocation2 + $0x298] sm:$0xff] %vm1294_vm3, %v27617_v22 }
  0x65   : > { %1379 = vst.msk [vmem:[#allocation2 + $0x2a0] sm:$0xff] %vm1294_vm3, %v27617_v22 }
  0x66   : > { %18752 = vmatmul.mubr.msk.bf16.gmra.mrb[36].mxu0 %vm644_vm0, %v22572_v24 }
  0x67   : > { %18755 = vmatprep.mubr.msk.bf16.mxu0 %vm644_vm0, %v22573_v25 }
  0x6e   : > { %18756 = vmatmul.mubr.msk.bf16.gmra.mrb[40].mxu0 %vm644_vm0, %v22574_v26 }
  0x6f   : > { %18759 = vmatprep.mubr.msk.bf16.mxu0 %vm644_vm0, %v22575_v27 }
  0x76   : > { %18760 = vmatmul.mubr.msk.bf16.gmra.mrb[44].mxu0 %vm644_vm0, %v22576_v28 }
  0x77   : > { %18763 = vmatprep.mubr.msk.bf16.mxu0 %vm644_vm0, %v22577_v29 }
  0x7e   : > { %18764 = vmatmul.mubr.msk.bf16.gmra.mrb[48].mxu0 %vm644_vm0, %v22578_v30 }
  0x7f   : > { %18767 = vmatprep.mubr.msk.bf16.mxu0 %vm644_vm0, %v22579_v31 }
  0x86   : > { %18768 = vmatmul.mubr.msk.bf16.gmra.mrb[52].mxu0 %vm644_vm0, %v22580_v34 }
  0x87   : > { %18771 = vmatprep.mubr.msk.bf16.mxu0 %vm644_vm0, %v22581_v35 }
  0x8e   : > { %18772 = vmatmul.mubr.msk.bf16.gmra.mrb[56].mxu0 %vm644_vm0, %v22582_v38 }
  0x8f   : > { %18775 = vmatprep.mubr.msk.bf16.mxu0 %vm644_vm0, %v22583_v39 }
  0x96   : > { %18776 = vmatmul.mubr.msk.bf16.gmra.mrb[60].mxu0 %vm644_vm0, %v22584_v40 }
  0x97   : > { %18779 = vmatprep.mubr.msk.bf16.mxu0 %vm644_vm0, %v22585_v41 }
  0x9e   : > { %18780 = vmatmul.mubr.msk.bf16.gmra.mrb[64].mxu0 %vm644_vm0, %v22586_v42 }
  0x9f   : > { %18783 = vmatprep.mubr.msk.bf16.mxu0 %vm644_vm0, %v22587_v43 }
  0xa6   : > { %18784 = vmatmul.mubr.msk.bf16.gmra.mrb[68].mxu0 %vm644_vm0, %v22588_v44 }
  0xf1   : > { %v18717_v50 = vpop.f32.mrb[0].mxu0 }
  0xf2   : > { %v800_v51 = vadd.f32 %v18717_v50, %v23374_v49  ;;  %v791_v52 = vpop.f32.mrb[1].mxu0 }
  0xf3   : > { %v792_v53 = vadd.f32 %v23374_v49, %v791_v52  ;;  %v18718_v54 = vpop.f32.mrb[2].mxu0 }
  0xf4   : > { %vm1080_vm2 = vcmp.gt.f32.partialorder %v800_v51, 0.0  ;;  %v1152_v55 = vmul.f32 0.01, %v800_v51  ;;  %v803_v56 = vadd.f32 %v18718_v54, %v23374_v49  ;;  %v794_v57 = vpop.f32.mrb[3].mxu0 }
  0xf5   : > { %vm1078_vm4 = vcmp.gt.f32.partialorder %v792_v53, 0.0  ;;  %v1150_v58 = vmul.f32 0.01, %v792_v53  ;;  %v795_v59 = vadd.f32 %v23374_v49, %v794_v57 }
  0xf6   : > { %v1224_v60 = vsel %vm1080_vm2, %v800_v51, %v1152_v55  ;;  %vm1081_vm5 = vcmp.gt.f32.partialorder %v803_v56, 0.0  ;;  %v1153_v61 = vmul.f32 0.01, %v803_v56  ;;  %v22599_v55 = vld [vmem:[%s27609_s3] sm:$0xff]  }
  0xf7   : > { %1297 = vst.msk [vmem:[#allocation2 + $0x10] sm:$0xff] %vm1294_vm3, %v1224_v60  ;;  %v1222_v62 = vsel %vm1078_vm4, %v792_v53, %v1150_v58  ;;  %vm1079_vm6 = vcmp.gt.f32.partialorder %v795_v59, 0.0  ;;  %v1151_v63 = vmul.f32 0.01, %v795_v59  ;;  %18867 = vmatprep.subr.bf16.mxu0 %v22599_v55 }
  0xf8   : > { %1295 = vst.msk [vmem:[#allocation2] sm:$0xff] %vm1294_vm3, %v1222_v62  ;;  %v1225_v0 = vsel %vm1081_vm5, %v803_v56, %v1153_v61 }
  0xf9   : > { %1298 = vst.msk [vmem:[#allocation2 + $0x18] sm:$0xff] %vm1294_vm3, %v1225_v0  ;;  %v1223_v1 = vsel %vm1079_vm6, %v795_v59, %v1151_v63  ;;  %v18721_v2 = vpop.f32.mrb[4].mxu0 }
  0xfa   : > { %1296 = vst.msk [vmem:[#allocation2 + $0x8] sm:$0xff] %vm1294_vm3, %v1223_v1  ;;  %v816_v3 = vadd.f32 %v18721_v2, %v23374_v49  ;;  %v807_v4 = vpop.f32.mrb[5].mxu0  ;;  %v22600_v2 = vld [vmem:[%s27609_s3 + $0x8] sm:$0xff]  }
  0xfb   : > { %v808_v5 = vadd.f32 %v23374_v49, %v807_v4  ;;  %v18722_v6 = vpop.f32.mrb[6].mxu0 }
  0xfc   : > { %vm1084_vm7 = vcmp.gt.f32.partialorder %v816_v3, 0.0  ;;  %v1156_v7 = vmul.f32 0.01, %v816_v3  ;;  %v819_v8 = vadd.f32 %v18722_v6, %v23374_v49  ;;  %v810_v9 = vpop.f32.mrb[7].mxu0 }
  0xfd   : > { %vm1082_vm8 = vcmp.gt.f32.partialorder %v808_v5, 0.0  ;;  %v1154_v10 = vmul.f32 0.01, %v808_v5  ;;  %v811_v11 = vadd.f32 %v23374_v49, %v810_v9 }
  0xfe   : > { %v1228_v12 = vsel %vm1084_vm7, %v816_v3, %v1156_v7  ;;  %vm1085_vm9 = vcmp.gt.f32.partialorder %v819_v8, 0.0  ;;  %v1157_v13 = vmul.f32 0.01, %v819_v8 }
  0xff   : > { %1301 = vst.msk [vmem:[#allocation2 + $0x30] sm:$0xff] %vm1294_vm3, %v1228_v12  ;;  %v1226_v14 = vsel %vm1082_vm8, %v808_v5, %v1154_v10  ;;  %vm1083_vm10 = vcmp.gt.f32.partialorder %v811_v11, 0.0  ;;  %v1155_v15 = vmul.f32 0.01, %v811_v11 }
 0x100   : > { %1299 = vst.msk [vmem:[#allocation2 + $0x20] sm:$0xff] %vm1294_vm3, %v1226_v14  ;;  %v1229_v17 = vsel %vm1085_vm9, %v819_v8, %v1157_v13  ;;  %v1383_v34 = vld [vmem:[#allocation2 + $0x18] sm:$0xff] }
 0x101   : > { %1302 = vst.msk [vmem:[#allocation2 + $0x38] sm:$0xff] %vm1294_vm3, %v1229_v17  ;;  %v1227_v18 = vsel %vm1083_vm10, %v811_v11, %v1155_v15  ;;  %v18725_v19 = vpop.f32.mrb[8].mxu0 }
 0x102   : > { %1300 = vst.msk [vmem:[#allocation2 + $0x28] sm:$0xff] %vm1294_vm3, %v1227_v18  ;;  %v832_v20 = vadd.f32 %v18725_v19, %v23374_v49  ;;  %v823_v21 = vpop.f32.mrb[9].mxu0 }
 0x103   : > { %v824_v23 = vadd.f32 %v23374_v49, %v823_v21  ;;  %v18726_v24 = vpop.f32.mrb[10].mxu0 }
 0x104   : > { %vm1088_vm11 = vcmp.gt.f32.partialorder %v832_v20, 0.0  ;;  %v1160_v25 = vmul.f32 0.01, %v832_v20  ;;  %v835_v26 = vadd.f32 %v18726_v24, %v23374_v49  ;;  %v826_v27 = vpop.f32.mrb[11].mxu0 }
 0x105   : > { %vm1086_vm12 = vcmp.gt.f32.partialorder %v824_v23, 0.0  ;;  %v1158_v28 = vmul.f32 0.01, %v824_v23  ;;  %v827_v29 = vadd.f32 %v23374_v49, %v826_v27 }
 0x106   : > { %v1232_v30 = vsel %vm1088_vm11, %v832_v20, %v1160_v25  ;;  %vm1089_vm13 = vcmp.gt.f32.partialorder %v835_v26, 0.0  ;;  %v1161_v31 = vmul.f32 0.01, %v835_v26  ;;  %v1386_v38 = vld [vmem:[#allocation2 + $0x30] sm:$0xff] }
 0x107   : > { %1305 = vst.msk [vmem:[#allocation2 + $0x50] sm:$0xff] %vm1294_vm3, %v1232_v30  ;;  %v1230_v32 = vsel %vm1086_vm12, %v824_v23, %v1158_v28  ;;  %vm1087_vm14 = vcmp.gt.f32.partialorder %v827_v29, 0.0  ;;  %v1159_v33 = vmul.f32 0.01, %v827_v29  ;;  %v23426_v35 = vld [vmem:[#allocation2 + $0x20] sm:$0xff] }
 0x108   : > { %1303 = vst.msk [vmem:[#allocation2 + $0x40] sm:$0xff] %vm1294_vm3, %v1230_v32  ;;  %v1233_v36 = vsel %vm1089_vm13, %v835_v26, %v1161_v31  ;;  %v1508_v37 = vpack.c.bf16 %v23426_v35, %v1383_v34  ;;  %v23430_v39 = vld [vmem:[#allocation2 + $0x38] sm:$0xff] }
 0x109   : > { %1306 = vst.msk [vmem:[#allocation2 + $0x58] sm:$0xff] %vm1294_vm3, %v1233_v36  ;;  %v1231_v40 = vsel %vm1087_vm14, %v827_v29, %v1159_v33  ;;  %v18729_v41 = vpop.f32.mrb[12].mxu0  ;;  %v23433_v42 = vld [vmem:[#allocation2 + $0x28] sm:$0xff]  ;;  %v23438_v44 = vpack.c.bf16 %v23430_v39, %v1386_v38  ;;  %v23448_v51 = vld [vmem:[#allocation2 + $0x1b] sm:$0xff]  ;;  %v23466_v63 = vld [vmem:[#allocation2 + $0x33] sm:$0xff] }
 0x10a   : > { %v23435_v43 = vld [vmem:[#allocation2 + $0x22] sm:$0xff]  ;;  %1304 = vst.msk [vmem:[#allocation2 + $0x48] sm:$0xff] %vm1294_vm3, %v1231_v40  ;;  %v848_v45 = vadd.f32 %v18729_v41, %v23374_v49  ;;  %v839_v46 = vpop.f32.mrb[13].mxu0  ;;  %18795 = vmatprep.mubr.msk.bf16.mxu0 %vm1294_vm3, %v1508_v37  ;;  %v1509_v47 = vpack.c.bf16 %v1386_v38, %v23433_v42  ;;  %v23444_v48 = vld [vmem:[#allocation2 + $0x2a] sm:$0xff]  ;;  %27933 = vst [vmem:[#allocation5_spill] sm:$0xff] %v23448_v51 }
 0x10b   : > { %27931 = vst [vmem:[#allocation3_spill] sm:$0xff] %v23435_v43  ;;  %27932 = vst [vmem:[#allocation4_spill] sm:$0xff] %v23444_v48  ;;  %v23450_v52 = vld [vmem:[#allocation2 + $0x23] sm:$0xff]  ;;  %v840_v53 = vadd.f32 %v23374_v49, %v839_v46  ;;  %v18730_v54 = vpop.f32.mrb[14].mxu0  ;;  %v23456_v56 = vld [vmem:[#allocation2 + $0x2b] sm:$0xff] }
 0x10c   : > { %27934 = vst [vmem:[#allocation6_spill] sm:$0xff] %v23450_v52  ;;  %27935 = vst [vmem:[#allocation7_spill] sm:$0xff] %v23456_v56  ;;  %vm1092_vm15 = vcmp.gt.f32.partialorder %v848_v45, 0.0  ;;  %v1164_v59 = vmul.f32 0.01, %v848_v45  ;;  %v851_v60 = vadd.f32 %v18730_v54, %v23374_v49  ;;  %v842_v61 = vpop.f32.mrb[15].mxu0  ;;  %18796 = vmatmul.mubr.msk.bf16.vlgmr.msra.gmra.mrb[72].mxu0 %vm1294_vm3, %v1509_v47 }
 0x10d   : > { %v23464_v62 = vld [vmem:[#allocation2 + $0x29] sm:$0xff]  ;;  %27937 = vst [vmem:[#allocation9_spill] sm:$0xff] %v23466_v63  ;;  %vm1090_vm0 = vcmp.gt.f32.partialorder %v840_v53, 0.0  ;;  %v1162_v0 = vmul.f32 0.01, %v840_v53  ;;  %v843_v1 = vadd.f32 %v23374_v49, %v842_v61  ;;  %v23472_v3 = vld [vmem:[#allocation2 + $0x31] sm:$0xff]  ;;  %18868 = vmatpush3.bf16.msra.mxu0 %v22599_v55 }
 0x10e   : > { %27936 = vst [vmem:[#allocation8_spill] sm:$0xff] %v23464_v62  ;;  %27938 = vst [vmem:[#allocation10_spill] sm:$0xff] %v23472_v3  ;;  %v1236_v4 = vsel %vm1092_vm15, %v848_v45, %v1164_v59  ;;  %vm1093_vm1 = vcmp.gt.f32.partialorder %v851_v60, 0.0  ;;  %v1165_v5 = vmul.f32 0.01, %v851_v60  ;;  %v23474_v6 = vld [vmem:[#allocation2 + $0x21] sm:$0xff]  ;;  %18869 = vmatprep.subr.bf16.mxu0 %v22600_v2 }
 0x10f   : > { %27939 = vst [vmem:[#allocation11_spill] sm:$0xff] %v23474_v6  ;;  %1309 = vst.msk [vmem:[#allocation2 + $0x70] sm:$0xff] %vm1294_vm3, %v1236_v4  ;;  %v1234_v8 = vsel %vm1090_vm0, %v840_v53, %v1162_v0  ;;  %vm1091_vm2 = vcmp.gt.f32.partialorder %v843_v1, 0.0  ;;  %v1163_v9 = vmul.f32 0.01, %v843_v1  ;;  %v1388_v10 = vld [vmem:[#allocation2 + $0x40] sm:$0xff] }
 0x110   : > { %v6317_v11 = vld [vmem:[#allocation2 + $0x32] sm:$0xff]  ;;  %v6318_v12 = vld [vmem:[#allocation2 + $0x3a] sm:$0xff]  ;;  %1307 = vst.msk [vmem:[#allocation2 + $0x60] sm:$0xff] %vm1294_vm3, %v1234_v8  ;;  %v1237_v14 = vsel %vm1093_vm1, %v851_v60, %v1165_v5  ;;  %v1510_v15 = vpack.c.bf16 %v1388_v10, %v23430_v39 }
 0x111   : > { %v1390_v16 = vld [vmem:[#allocation2 + $0x50] sm:$0xff]  ;;  %v1391_v17 = vld [vmem:[#allocation2 + $0x58] sm:$0xff]  ;;  %v23483_v18 = vpack.c.bf16 %v6318_v12, %v6317_v11  ;;  %1310 = vst.msk [vmem:[#allocation2 + $0x78] sm:$0xff] %vm1294_vm3, %v1237_v14  ;;  %v1235_v20 = vsel %vm1091_vm2, %v843_v1, %v1163_v9  ;;  %v18733_v21 = vpop.f32.mrb[16].mxu0  ;;  %v1389_v23 = vld [vmem:[#allocation2 + $0x48] sm:$0xff]  ;;  %18870 = vmatpush3.bf16.msra.mxu0 %v22600_v2 }
 0x112   : > { %v23485_v19 = vld [vmem:[#allocation2 + $0x19] sm:$0xff]  ;;  %v6319_v24 = vld [vmem:[#allocation2 + $0x42] sm:$0xff]  ;;  %v23488_v25 = vpack.c.bf16 %v1391_v17, %v1390_v16  ;;  %1308 = vst.msk [vmem:[#allocation2 + $0x68] sm:$0xff] %vm1294_vm3, %v1235_v20  ;;  %v864_v27 = vadd.f32 %v18733_v21, %v23374_v49  ;;  %v855_v28 = vpop.f32.mrb[17].mxu0  ;;  %18799 = vmatprep.mubr.msk.bf16.mxu0 %vm1294_vm3, %v1510_v15  ;;  %v23495_v29 = vpack.c.bf16 %v1390_v16, %v1389_v23  ;;  %v6320_v30 = vld [vmem:[#allocation2 + $0x4a] sm:$0xff] }
 0x113   : > { %27940 = vst [vmem:[#allocation12_spill] sm:$0xff] %v23483_v18  ;;  %27941 = vst [vmem:[#allocation13_spill] sm:$0xff] %v23485_v19  ;;  %v856_v31 = vadd.f32 %v23374_v49, %v855_v28  ;;  %v18734_v32 = vpop.f32.mrb[18].mxu0  ;;  %v22602_v33 = vld [vmem:[%s27609_s3 + $0x10] sm:$0xff]   ;;  %v23501_v34 = vpack.c.bf16 %v6320_v30, %v6319_v24  ;;  %v23506_v39 = vpack.c.bf16 %v1389_v23, %v1388_v10  ;;  %v23508_v40 = vld [vmem:[#allocation2 + $0x43] sm:$0xff] }
 0x114   : > { %27942 = vst [vmem:[#allocation14_spill] sm:$0xff] %v23488_v25  ;;  %27943 = vst [vmem:[#allocation15_spill] sm:$0xff] %v23495_v29  ;;  %vm1096_vm4 = vcmp.gt.f32.partialorder %v864_v27, 0.0  ;;  %v1168_v36 = vmul.f32 0.01, %v864_v27  ;;  %v867_v37 = vadd.f32 %v18734_v32, %v23374_v49  ;;  %v858_v38 = vpop.f32.mrb[19].mxu0  ;;  %18800 = vmatmul.mubr.msk.bf16.gmra.mrb[76].mxu0 %vm1294_vm3, %v23495_v29  ;;  %18871 = vmatprep.subr.bf16.mxu0 %v22602_v33 }
 0x115   : > { %27944 = vst [vmem:[#allocation16_spill] sm:$0xff] %v23501_v34  ;;  %27945 = vst [vmem:[#allocation17_spill] sm:$0xff] %v23508_v40  ;;  %vm1094_vm5 = vcmp.gt.f32.partialorder %v856_v31, 0.0  ;;  %v1166_v41 = vmul.f32 0.01, %v856_v31  ;;  %v859_v45 = vadd.f32 %v23374_v49, %v858_v38  ;;  %v22604_v46 = vld [vmem:[%s27609_s3 + $0x18] sm:$0xff]   ;;  %18872 = vmatpush3.bf16.msra.mxu0 %v22602_v33 }
 0x116   : > { %v1240_v47 = vsel %vm1096_vm4, %v864_v27, %v1168_v36  ;;  %vm1097_vm6 = vcmp.gt.f32.partialorder %v867_v37, 0.0  ;;  %v1169_v53 = vmul.f32 0.01, %v867_v37  ;;  %v23514_v54 = vld [vmem:[#allocation2 + $0x3b] sm:$0xff]  ;;  %18873 = vmatprep.subr.bf16.mxu0 %v22604_v46  ;;  %v6321_v0 = vld [vmem:[#allocation2 + $0x52] sm:$0xff] }
 0x117   : > { %27946 = vst [vmem:[#allocation18_spill] sm:$0xff] %v23514_v54  ;;  %v23516_v55 = vld [vmem:[#allocation2 + $0x41] sm:$0xff]  ;;  %1313 = vst.msk [vmem:[#allocation2 + $0x90] sm:$0xff] %vm1294_vm3, %v1240_v47  ;;  %v1238_v59 = vsel %vm1094_vm5, %v856_v31, %v1166_v41  ;;  %vm1095_vm7 = vcmp.gt.f32.partialorder %v859_v45, 0.0  ;;  %v1167_v60 = vmul.f32 0.01, %v859_v45 }
 0x118   : > { %27947 = vst [vmem:[#allocation19_spill] sm:$0xff] %v23516_v55  ;;  %v1392_v61 = vld [vmem:[#allocation2 + $0x60] sm:$0xff]  ;;  %1311 = vst.msk [vmem:[#allocation2 + $0x80] sm:$0xff] %vm1294_vm3, %v1238_v59  ;;  %v1241_v4 = vsel %vm1097_vm6, %v867_v37, %v1169_v53  ;;  %v1394_v8 = vld [vmem:[#allocation2 + $0x70] sm:$0xff] }
 0x119   : > { %v6322_v1 = vld [vmem:[#allocation2 + $0x5a] sm:$0xff]  ;;  %v23522_v5 = vpack.c.bf16 %v1392_v61, %v1391_v17  ;;  %1314 = vst.msk [vmem:[#allocation2 + $0x98] sm:$0xff] %vm1294_vm3, %v1241_v4  ;;  %v1239_v12 = vsel %vm1095_vm7, %v859_v45, %v1167_v60  ;;  %v18737_v14 = vpop.f32.mrb[20].mxu0  ;;  %v1393_v15 = vld [vmem:[#allocation2 + $0x68] sm:$0xff]  ;;  %18874 = vmatpush3.bf16.msra.mxu0 %v22604_v46  ;;  %v3787_v23 = vld [vmem:[#allocation2 + $0x71] sm:$0xff] }
 0x11a   : > { %v1395_v9 = vld [vmem:[#allocation2 + $0x78] sm:$0xff]  ;;  %v23524_v10 = vpack.c.bf16 %v6322_v1, %v6321_v0  ;;  %v6323_v16 = vld [vmem:[#allocation2 + $0x62] sm:$0xff]  ;;  %v6324_v20 = vld [vmem:[#allocation2 + $0x6a] sm:$0xff]  ;;  %1312 = vst.msk [vmem:[#allocation2 + $0x88] sm:$0xff] %vm1294_vm3, %v1239_v12  ;;  %v880_v17 = vadd.f32 %v18737_v14, %v23374_v49  ;;  %v871_v24 = vpop.f32.mrb[21].mxu0  ;;  %v23537_v27 = vpack.c.bf16 %v1394_v8, %v1393_v15  ;;  %v23540_v31 = vpack.c.bf16 %v1393_v15, %v1392_v61 }
 0x11b   : > { %27948 = vst [vmem:[#allocation20_spill] sm:$0xff] %v23522_v5  ;;  %v23526_v11 = vld [vmem:[#allocation2 + $0x39] sm:$0xff]  ;;  %v23529_v21 = vpack.c.bf16 %v1395_v9, %v1394_v8  ;;  %18803 = vmatprep.mubr.msk.bf16.mxu0 %vm1294_vm3, %v23522_v5  ;;  %v872_v28 = vadd.f32 %v23374_v49, %v871_v24  ;;  %v18738_v30 = vpop.f32.mrb[22].mxu0  ;;  %v23542_v32 = vpack.c.bf16 %v6324_v20, %v6323_v16  ;;  %v8858_v33 = vld [vmem:[#allocation2 + $0x4b] sm:$0xff]  ;;  %v8861_v45 = vld [vmem:[#allocation2 + $0x63] sm:$0xff] }
 0x11c   : > { %27949 = vst [vmem:[#allocation21_spill] sm:$0xff] %v23524_v10  ;;  %27950 = vst [vmem:[#allocation22_spill] sm:$0xff] %v23526_v11  ;;  %v8859_v36 = vld [vmem:[#allocation2 + $0x53] sm:$0xff]  ;;  %vm1100_vm8 = vcmp.gt.f32.partialorder %v880_v17, 0.0  ;;  %v1172_v37 = vmul.f32 0.01, %v880_v17  ;;  %v883_v38 = vadd.f32 %v18738_v30, %v23374_v49  ;;  %18804 = vmatmul.mubr.msk.bf16.gmra.mrb[80].mxu0 %vm1294_vm3, %v23537_v27 }
 0x11d   : > { %27951 = vst [vmem:[#allocation23_spill] sm:$0xff] %v23529_v21  ;;  %27952 = vst [vmem:[#allocation24_spill] sm:$0xff] %v23537_v27  ;;  %v874_v41 = vpop.f32.mrb[23].mxu0  ;;  %vm1098_vm9 = vcmp.gt.f32.partialorder %v872_v28, 0.0  ;;  %v1170_v46 = vmul.f32 0.01, %v872_v28  ;;  %v23548_v1 = vpack.c.bf16 %v8859_v36, %v8858_v33 }
 0x11e   : > { %27953 = vst [vmem:[#allocation25_spill] sm:$0xff] %v23540_v31  ;;  %27954 = vst [vmem:[#allocation26_spill] sm:$0xff] %v23542_v32  ;;  %v875_v47 = vadd.f32 %v23374_v49, %v874_v41  ;;  %v1244_v53 = vsel %vm1100_vm8, %v880_v17, %v1172_v37  ;;  %vm1101_vm10 = vcmp.gt.f32.partialorder %v883_v38, 0.0  ;;  %v1173_v59 = vmul.f32 0.01, %v883_v38  ;;  %v3782_v60 = vld [vmem:[#allocation2 + $0x49] sm:$0xff] }
 0x11f   : > { %v8860_v61 = vld [vmem:[#allocation2 + $0x5b] sm:$0xff]  ;;  %v3783_v0 = vld [vmem:[#allocation2 + $0x51] sm:$0xff]  ;;  %27955 = vst [vmem:[#allocation27_spill] sm:$0xff] %v23548_v1  ;;  %1317 = vst.msk [vmem:[#allocation2 + $0xb0] sm:$0xff] %vm1294_vm3, %v1244_v53  ;;  %v1242_v4 = vsel %vm1098_vm9, %v872_v28, %v1170_v46 }
 0x120   : > { %vm1099_vm11 = vcmp.gt.f32.partialorder %v875_v47, 0.0  ;;  %v1171_v8 = vmul.f32 0.01, %v875_v47  ;;  %v1396_v12 = vld [vmem:[#allocation2 + $0x80] sm:$0xff]  ;;  %v6325_v14 = vld [vmem:[#allocation2 + $0x72] sm:$0xff]  ;;  %v23551_v16 = vpack.c.bf16 %v8861_v45, %v8860_v61  ;;  %1315 = vst.msk [vmem:[#allocation2 + $0xa0] sm:$0xff] %vm1294_vm3, %v1242_v4  ;;  %v1245_v20 = vsel %vm1101_vm10, %v883_v38, %v1173_v59 }
 0x121   : > { %v6326_v15 = vld [vmem:[#allocation2 + $0x7a] sm:$0xff]  ;;  %v23554_v17 = vpack.c.bf16 %v1396_v12, %v1395_v9  ;;  %v1398_v24 = vld [vmem:[#allocation2 + $0x90] sm:$0xff]  ;;  %1318 = vst.msk [vmem:[#allocation2 + $0xb8] sm:$0xff] %vm1294_vm3, %v1245_v20  ;;  %v18741_v28 = vpop.f32.mrb[24].mxu0  ;;  %v1397_v36 = vld [vmem:[#allocation2 + $0x88] sm:$0xff]  ;;  %v23561_v45 = vpack.c.bf16 %v3783_v0, %v3782_v60 }
 0x122   : > { %27956 = vst [vmem:[#allocation28_spill] sm:$0xff] %v23551_v16  ;;  %v1399_v30 = vld [vmem:[#allocation2 + $0x98] sm:$0xff]  ;;  %v23556_v37 = vpack.c.bf16 %v6326_v15, %v6325_v14  ;;  %v1243_v33 = vsel %vm1099_vm11, %v875_v47, %v1171_v8  ;;  %v6327_v41 = vld [vmem:[#allocation2 + $0x82] sm:$0xff]  ;;  %v6328_v46 = vld [vmem:[#allocation2 + $0x8a] sm:$0xff]  ;;  %v896_v9 = vadd.f32 %v18741_v28, %v23374_v49  ;;  %v887_v38 = vpop.f32.mrb[25].mxu0  ;;  %v23567_v59 = vpack.c.bf16 %v1398_v24, %v1397_v36 }
 0x123   : > { %27957 = vst [vmem:[#allocation29_spill] sm:$0xff] %v23554_v17  ;;  %v23559_v53 = vpack.c.bf16 %v1399_v30, %v1398_v24  ;;  %27960 = vst [vmem:[#allocation32_spill] sm:$0xff] %v23561_v45  ;;  %18807 = vmatprep.mubr.msk.bf16.mxu0 %vm1294_vm3, %v23554_v17  ;;  %v3785_v61 = vld [vmem:[#allocation2 + $0x61] sm:$0xff]  ;;  %v888_v47 = vadd.f32 %v23374_v49, %v887_v38  ;;  %v18742_v4 = vpop.f32.mrb[26].mxu0  ;;  %v23570_v8 = vpack.c.bf16 %v1397_v36, %v1396_v12  ;;  %v8862_v60 = vld [vmem:[#allocation2 + $0x6b] sm:$0xff] }
 0x124   : > { %27958 = vst [vmem:[#allocation30_spill] sm:$0xff] %v23556_v37  ;;  %1316 = vst.msk [vmem:[#allocation2 + $0xa8] sm:$0xff] %vm1294_vm3, %v1243_v33  ;;  %v23572_v14 = vpack.c.bf16 %v6328_v46, %v6327_v41  ;;  %v8863_v0 = vld [vmem:[#allocation2 + $0x73] sm:$0xff]  ;;  %vm1104_vm12 = vcmp.gt.f32.partialorder %v896_v9, 0.0  ;;  %v1176_v15 = vmul.f32 0.01, %v896_v9  ;;  %v899_v20 = vadd.f32 %v18742_v4, %v23374_v49  ;;  %18808 = vmatmul.mubr.msk.bf16.gmra.mrb[84].mxu0 %vm1294_vm3, %v23567_v59 }
 0x125   : > { %27959 = vst [vmem:[#allocation31_spill] sm:$0xff] %v23559_v53  ;;  %27961 = vst [vmem:[#allocation33_spill] sm:$0xff] %v23567_v59  ;;  %v890_v33 = vpop.f32.mrb[27].mxu0  ;;  %v3784_v24 = vld [vmem:[#allocation2 + $0x59] sm:$0xff]  ;;  %v8865_v28 = vld [vmem:[#allocation2 + $0x83] sm:$0xff]  ;;  %vm1102_vm13 = vcmp.gt.f32.partialorder %v888_v47, 0.0  ;;  %v23580_v13 = vpack.c.bf16 %v8863_v0, %v8862_v60 }
 0x126   : > { %27962 = vst [vmem:[#allocation34_spill] sm:$0xff] %v23570_v8  ;;  %27963 = vst [vmem:[#allocation35_spill] sm:$0xff] %v23572_v14  ;;  %v1174_v22 = vmul.f32 0.01, %v888_v47  ;;  %v891_v38 = vadd.f32 %v23374_v49, %v890_v33  ;;  %v23578_v12 = vpack.c.bf16 %v3785_v61, %v3784_v24  ;;  %v1248_v36 = vsel %vm1104_vm12, %v896_v9, %v1176_v15  ;;  %v3786_v46 = vld [vmem:[#allocation2 + $0x69] sm:$0xff]  ;;  %v8864_v58 = vld [vmem:[#allocation2 + $0x7b] sm:$0xff] }
 0x127   : > { %vm1105_vm14 = vcmp.gt.f32.partialorder %v899_v20, 0.0  ;;  %v1177_v41 = vmul.f32 0.01, %v899_v20  ;;  %27965 = vst [vmem:[#allocation37_spill] sm:$0xff] %v23580_v13  ;;  %1321 = vst.msk [vmem:[#allocation2 + $0xd0] sm:$0xff] %vm1294_vm3, %v1248_v36  ;;  %v1400_v7 = vld [vmem:[#allocation2 + $0xa0] sm:$0xff]  ;;  %v23583_v50 = vpack.c.bf16 %v8865_v28, %v8864_v58  ;;  %v23593_v58 = vpack.c.bf16 %v3787_v23, %v3786_v46 }
 0x128   : > { %27964 = vst [vmem:[#allocation36_spill] sm:$0xff] %v23578_v12  ;;  %v1246_v4 = vsel %vm1102_vm13, %v888_v47, %v1174_v22  ;;  %vm1103_vm15 = vcmp.gt.f32.partialorder %v891_v38, 0.0  ;;  %v1175_v2 = vmul.f32 0.01, %v891_v38  ;;  %v6329_v26 = vld [vmem:[#allocation2 + $0x92] sm:$0xff]  ;;  %v6330_v57 = vld [vmem:[#allocation2 + $0x9a] sm:$0xff]  ;;  %v23586_v61 = vpack.c.bf16 %v1400_v7, %v1399_v30 }
 0x129   : > { %27966 = vst [vmem:[#allocation38_spill] sm:$0xff] %v23583_v50  ;;  %1319 = vst.msk [vmem:[#allocation2 + $0xc0] sm:$0xff] %vm1294_vm3, %v1246_v4  ;;  %v1249_v9 = vsel %vm1105_vm14, %v899_v20, %v1177_v41  ;;  %v1402_v15 = vld [vmem:[#allocation2 + $0xb0] sm:$0xff]  ;;  %v1403_v33 = vld [vmem:[#allocation2 + $0xb8] sm:$0xff]  ;;  %v23588_v24 = vpack.c.bf16 %v6330_v57, %v6329_v26  ;;  %v18745_v22 = vpop.f32.mrb[28].mxu0 }
 0x12a   : > { %27967 = vst [vmem:[#allocation39_spill] sm:$0xff] %v23586_v61  ;;  %1322 = vst.msk [vmem:[#allocation2 + $0xd8] sm:$0xff] %vm1294_vm3, %v1249_v9  ;;  %v1247_v60 = vsel %vm1103_vm15, %v891_v38, %v1175_v2  ;;  %v23591_v43 = vpack.c.bf16 %v1403_v33, %v1402_v15  ;;  %v912_v30 = vadd.f32 %v18745_v22, %v23374_v49  ;;  %v903_v20 = vpop.f32.mrb[29].mxu0  ;;  %18811 = vmatprep.mubr.msk.bf16.mxu0 %vm1294_vm3, %v23586_v61  ;;  %v3789_v26 = vld [vmem:[#allocation2 + $0x81] sm:$0xff]  ;;  %v8866_v23 = vld [vmem:[#allocation2 + $0x8b] sm:$0xff] }
 0x12b   : > { %27968 = vst [vmem:[#allocation40_spill] sm:$0xff] %v23588_v24  ;;  %v1401_v47 = vld [vmem:[#allocation2 + $0xa8] sm:$0xff]  ;;  %27970 = vst [vmem:[#allocation42_spill] sm:$0xff] %v23593_v58  ;;  %v904_v2 = vadd.f32 %v23374_v49, %v903_v20  ;;  %v18746_v28 = vpop.f32.mrb[30].mxu0  ;;  %v8867_v46 = vld [vmem:[#allocation2 + $0x93] sm:$0xff] }
 0x12c   : > { %v6331_v0 = vld [vmem:[#allocation2 + $0xa2] sm:$0xff]  ;;  %v6332_v36 = vld [vmem:[#allocation2 + $0xaa] sm:$0xff]  ;;  %27969 = vst [vmem:[#allocation41_spill] sm:$0xff] %v23591_v43  ;;  %1320 = vst.msk [vmem:[#allocation2 + $0xc8] sm:$0xff] %vm1294_vm3, %v1247_v60  ;;  %v23599_v57 = vpack.c.bf16 %v1402_v15, %v1401_v47  ;;  %v23602_v38 = vpack.c.bf16 %v1401_v47, %v1400_v7  ;;  %vm1108_vm0 = vcmp.gt.f32.partialorder %v912_v30, 0.0  ;;  %v915_v9 = vadd.f32 %v18746_v28, %v23374_v49  ;;  %v906_v60 = vpop.f32.mrb[31].mxu0 }
 0x12d   : > { %v23604_v41 = vpack.c.bf16 %v6332_v36, %v6331_v0  ;;  %v1180_v4 = vmul.f32 0.01, %v912_v30  ;;  %v3788_v15 = vld [vmem:[#allocation2 + $0x79] sm:$0xff]  ;;  %v8869_v22 = vld [vmem:[#allocation2 + $0xa3] sm:$0xff]  ;;  %vm1106_vm1 = vcmp.gt.f32.partialorder %v904_v2, 0.0  ;;  %v907_v20 = vadd.f32 %v23374_v49, %v906_v60  ;;  %v3791_v50 = vld [vmem:[#allocation2 + $0x91] sm:$0xff] }
 0x12e   : > { %27971 = vst [vmem:[#allocation43_spill] sm:$0xff] %v23599_v57  ;;  %27972 = vst [vmem:[#allocation44_spill] sm:$0xff] %v23602_v38  ;;  %18812 = vmatmul.mubr.msk.bf16.gmra.mrb[88].mxu0 %vm1294_vm3, %v23599_v57  ;;  %v1178_v48 = vmul.f32 0.01, %v904_v2  ;;  %v23610_v7 = vpack.c.bf16 %v3789_v26, %v3788_v15  ;;  %vm1109_vm2 = vcmp.gt.f32.partialorder %v915_v9, 0.0  ;;  %v3790_v36 = vld [vmem:[#allocation2 + $0x89] sm:$0xff]  ;;  %v23612_v13 = vpack.c.bf16 %v8867_v46, %v8866_v23 }
 0x12f   : > { %27973 = vst [vmem:[#allocation45_spill] sm:$0xff] %v23604_v41  ;;  %v1252_v47 = vsel %vm1108_vm0, %v912_v30, %v1180_v4  ;;  %v1181_v0 = vmul.f32 0.01, %v915_v9  ;;  %v8868_v58 = vld [vmem:[#allocation2 + $0x9b] sm:$0xff]  ;;  %vm1107_vm4 = vcmp.gt.f32.partialorder %v907_v20, 0.0  ;;  %v6333_v16 = vld [vmem:[#allocation2 + $0xb2] sm:$0xff] }
 0x130   : > { %27974 = vst [vmem:[#allocation46_spill] sm:$0xff] %v23610_v7  ;;  %27975 = vst [vmem:[#allocation47_spill] sm:$0xff] %v23612_v13  ;;  %v1250_v28 = vsel %vm1106_vm1, %v904_v2, %v1178_v48  ;;  %v1179_v12 = vmul.f32 0.01, %v907_v20  ;;  %v1404_v45 = vld [vmem:[#allocation2 + $0xc0] sm:$0xff]  ;;  %v23615_v11 = vpack.c.bf16 %v8869_v22, %v8868_v58  ;;  %v1406_v4 = vld [vmem:[#allocation2 + $0xd0] sm:$0xff]  ;;  %v23625_v58 = vpack.c.bf16 %v3791_v50, %v3790_v36 }
 0x131   : > { %1325 = vst.msk [vmem:[#allocation2 + $0xf0] sm:$0xff] %vm1294_vm3, %v1252_v47  ;;  %v6334_v1 = vld [vmem:[#allocation2 + $0xba] sm:$0xff]  ;;  %1323 = vst.msk [vmem:[#allocation2 + $0xe0] sm:$0xff] %vm1294_vm3, %v1250_v28  ;;  %v1253_v30 = vsel %vm1109_vm2, %v915_v9, %v1181_v0  ;;  %v23618_v26 = vpack.c.bf16 %v1404_v45, %v1403_v33  ;;  %v18749_v48 = vpop.f32.mrb[32].mxu0  ;;  %v8870_v50 = vld [vmem:[#allocation2 + $0xab] sm:$0xff] }
 0x132   : > { %27976 = vst [vmem:[#allocation48_spill] sm:$0xff] %v23615_v11  ;;  %v1407_v60 = vld [vmem:[#allocation2 + $0xd8] sm:$0xff]  ;;  %v23620_v15 = vpack.c.bf16 %v6334_v1, %v6333_v16  ;;  %1326 = vst.msk [vmem:[#allocation2 + $0xf8] sm:$0xff] %vm1294_vm3, %v1253_v30  ;;  %v1251_v23 = vsel %vm1107_vm4, %v907_v20, %v1179_v12  ;;  %v928_v33 = vadd.f32 %v18749_v48, %v23374_v49  ;;  %v919_v9 = vpop.f32.mrb[33].mxu0  ;;  %v3793_v16 = vld [vmem:[#allocation2 + $0xa1] sm:$0xff] }
 0x133   : > { %27977 = vst [vmem:[#allocation49_spill] sm:$0xff] %v23618_v26  ;;  %v1405_v2 = vld [vmem:[#allocation2 + $0xc8] sm:$0xff]  ;;  %v23623_v13 = vpack.c.bf16 %v1407_v60, %v1406_v4  ;;  %27980 = vst [vmem:[#allocation52_spill] sm:$0xff] %v23625_v58  ;;  %18815 = vmatprep.mubr.msk.bf16.mxu0 %vm1294_vm3, %v23618_v26  ;;  %v920_v12 = vadd.f32 %v23374_v49, %v919_v9  ;;  %v18750_v22 = vpop.f32.mrb[34].mxu0  ;;  %v8871_v36 = vld [vmem:[#allocation2 + $0xb3] sm:$0xff] }
 0x134   : > { %27978 = vst [vmem:[#allocation50_spill] sm:$0xff] %v23620_v15  ;;  %v6335_v46 = vld [vmem:[#allocation2 + $0xc2] sm:$0xff]  ;;  %v6336_v47 = vld [vmem:[#allocation2 + $0xca] sm:$0xff]  ;;  %1324 = vst.msk [vmem:[#allocation2 + $0xe8] sm:$0xff] %vm1294_vm3, %v1251_v23  ;;  %v23631_v1 = vpack.c.bf16 %v1406_v4, %v1405_v2  ;;  %v23634_v20 = vpack.c.bf16 %v1405_v2, %v1404_v45  ;;  %vm1112_vm5 = vcmp.gt.f32.partialorder %v928_v33, 0.0  ;;  %v931_v30 = vadd.f32 %v18750_v22, %v23374_v49  ;;  %v922_v23 = vpop.f32.mrb[35].mxu0 }
 0x135   : > { %27979 = vst [vmem:[#allocation51_spill] sm:$0xff] %v23623_v13  ;;  %v23636_v0 = vpack.c.bf16 %v6336_v47, %v6335_v46  ;;  %v1184_v28 = vmul.f32 0.01, %v928_v33  ;;  %v3792_v4 = vld [vmem:[#allocation2 + $0x99] sm:$0xff]  ;;  %v8873_v48 = vld [vmem:[#allocation2 + $0xc3] sm:$0xff]  ;;  %vm1110_vm6 = vcmp.gt.f32.partialorder %v920_v12, 0.0  ;;  %v923_v9 = vadd.f32 %v23374_v49, %v922_v23 }
 0x136   : > { %27981 = vst [vmem:[#allocation53_spill] sm:$0xff] %v23631_v1  ;;  %27982 = vst [vmem:[#allocation54_spill] sm:$0xff] %v23634_v20  ;;  %18816 = vmatmul.mubr.msk.bf16.gmra.mrb[92].mxu0 %vm1294_vm3, %v23631_v1  ;;  %v1182_v58 = vmul.f32 0.01, %v920_v12  ;;  %v23642_v45 = vpack.c.bf16 %v3793_v16, %v3792_v4  ;;  %vm1113_vm7 = vcmp.gt.f32.partialorder %v931_v30, 0.0  ;;  %v3794_v47 = vld [vmem:[#allocation2 + $0xa9] sm:$0xff]  ;;  %v23644_v55 = vpack.c.bf16 %v8871_v36, %v8870_v50 }
 0x137   : > { %27983 = vst [vmem:[#allocation55_spill] sm:$0xff] %v23636_v0  ;;  %v1256_v2 = vsel %vm1112_vm5, %v928_v33, %v1184_v28  ;;  %v1185_v46 = vmul.f32 0.01, %v931_v30  ;;  %v8872_v11 = vld [vmem:[#allocation2 + $0xbb] sm:$0xff]  ;;  %v3795_v7 = vld [vmem:[#allocation2 + $0xb1] sm:$0xff]  ;;  %vm1111_vm8 = vcmp.gt.f32.partialorder %v923_v9, 0.0 }
 0x138   : > { %27984 = vst [vmem:[#allocation56_spill] sm:$0xff] %v23642_v45  ;;  %27985 = vst [vmem:[#allocation57_spill] sm:$0xff] %v23644_v55  ;;  %v1254_v22 = vsel %vm1110_vm6, %v920_v12, %v1182_v58  ;;  %v1183_v62 = vmul.f32 0.01, %v923_v9  ;;  %v1408_v3 = vld [vmem:[#allocation2 + $0xe0] sm:$0xff]  ;;  %v6337_v54 = vld [vmem:[#allocation2 + $0xd2] sm:$0xff]  ;;  %v23647_v56 = vpack.c.bf16 %v8873_v48, %v8872_v11  ;;  %v23657_v11 = vpack.c.bf16 %v3795_v7, %v3794_v47 }
 0x139   : > { %1329 = vst.msk [vmem:[#allocation2 + $0x110] sm:$0xff] %vm1294_vm3, %v1256_v2  ;;  %v6338_v40 = vld [vmem:[#allocation2 + $0xda] sm:$0xff]  ;;  %1327 = vst.msk [vmem:[#allocation2 + $0x100] sm:$0xff] %vm1294_vm3, %v1254_v22  ;;  %v1257_v33 = vsel %vm1113_vm7, %v931_v30, %v1185_v46  ;;  %v23650_v16 = vpack.c.bf16 %v1408_v3, %v1407_v60  ;;  %v1410_v28 = vld [vmem:[#allocation2 + $0xf0] sm:$0xff]  ;;  %v18753_v58 = vpop.f32.mrb[36].mxu0 }
 0x13a   : > { %27986 = vst [vmem:[#allocation58_spill] sm:$0xff] %v23647_v56  ;;  %v1411_v23 = vld [vmem:[#allocation2 + $0xf8] sm:$0xff]  ;;  %v23652_v4 = vpack.c.bf16 %v6338_v40, %v6337_v54  ;;  %1330 = vst.msk [vmem:[#allocation2 + $0x118] sm:$0xff] %vm1294_vm3, %v1257_v33  ;;  %v1255_v50 = vsel %vm1111_vm8, %v923_v9, %v1183_v62  ;;  %v944_v60 = vadd.f32 %v18753_v58, %v23374_v49  ;;  %v935_v30 = vpop.f32.mrb[37].mxu0  ;;  %v3797_v54 = vld [vmem:[#allocation2 + $0xc1] sm:$0xff] }
 0x13b   : > { %27987 = vst [vmem:[#allocation59_spill] sm:$0xff] %v23650_v16  ;;  %v1409_v12 = vld [vmem:[#allocation2 + $0xe8] sm:$0xff]  ;;  %v23655_v55 = vpack.c.bf16 %v1411_v23, %v1410_v28  ;;  %27990 = vst [vmem:[#allocation62_spill] sm:$0xff] %v23657_v11  ;;  %18819 = vmatprep.mubr.msk.bf16.mxu0 %vm1294_vm3, %v23650_v16  ;;  %v936_v62 = vadd.f32 %v23374_v49, %v935_v30  ;;  %v18754_v48 = vpop.f32.mrb[38].mxu0  ;;  %v8875_v47 = vld [vmem:[#allocation2 + $0xd3] sm:$0xff] }
 0x13c   : > { %27988 = vst [vmem:[#allocation60_spill] sm:$0xff] %v23652_v4  ;;  %v6339_v36 = vld [vmem:[#allocation2 + $0xe2] sm:$0xff]  ;;  %v6340_v2 = vld [vmem:[#allocation2 + $0xea] sm:$0xff]  ;;  %1328 = vst.msk [vmem:[#allocation2 + $0x108] sm:$0xff] %vm1294_vm3, %v1255_v50  ;;  %v23663_v40 = vpack.c.bf16 %v1410_v28, %v1409_v12  ;;  %v23666_v9 = vpack.c.bf16 %v1409_v12, %v1408_v3  ;;  %vm1116_vm9 = vcmp.gt.f32.partialorder %v944_v60, 0.0  ;;  %v947_v33 = vadd.f32 %v18754_v48, %v23374_v49  ;;  %v938_v50 = vpop.f32.mrb[39].mxu0 }
 0x13d   : > { %27989 = vst [vmem:[#allocation61_spill] sm:$0xff] %v23655_v55  ;;  %v23668_v46 = vpack.c.bf16 %v6340_v2, %v6339_v36  ;;  %v8874_v7 = vld [vmem:[#allocation2 + $0xcb] sm:$0xff]  ;;  %v1188_v22 = vmul.f32 0.01, %v944_v60  ;;  %v3796_v28 = vld [vmem:[#allocation2 + $0xb9] sm:$0xff]  ;;  %v8877_v58 = vld [vmem:[#allocation2 + $0xe3] sm:$0xff]  ;;  %v939_v30 = vadd.f32 %v23374_v49, %v938_v50 }
 0x13e   : > { %27991 = vst [vmem:[#allocation63_spill] sm:$0xff] %v23663_v40  ;;  %27992 = vst [vmem:[#allocation64_spill] sm:$0xff] %v23666_v9  ;;  %18820 = vmatmul.mubr.msk.bf16.gmra.mrb[96].mxu0 %vm1294_vm3, %v23663_v40  ;;  %vm1114_vm10 = vcmp.gt.f32.partialorder %v936_v62, 0.0  ;;  %v1186_v11 = vmul.f32 0.01, %v936_v62  ;;  %v23674_v3 = vpack.c.bf16 %v3797_v54, %v3796_v28  ;;  %vm1117_vm11 = vcmp.gt.f32.partialorder %v947_v33, 0.0 }
 0x13f   : > { %27993 = vst [vmem:[#allocation65_spill] sm:$0xff] %v23668_v46  ;;  %v1260_v12 = vsel %vm1116_vm9, %v944_v60, %v1188_v22  ;;  %v1189_v36 = vmul.f32 0.01, %v947_v33  ;;  %v3798_v2 = vld [vmem:[#allocation2 + $0xc9] sm:$0xff]  ;;  %v8876_v56 = vld [vmem:[#allocation2 + $0xdb] sm:$0xff]  ;;  %v3799_v45 = vld [vmem:[#allocation2 + $0xd1] sm:$0xff]  ;;  %v23676_v63 = vpack.c.bf16 %v8875_v47, %v8874_v7 }
 0x140   : > { %27994 = vst [vmem:[#allocation66_spill] sm:$0xff] %v23674_v3  ;;  %1333 = vst.msk [vmem:[#allocation2 + $0x130] sm:$0xff] %vm1294_vm3, %v1260_v12  ;;  %v1258_v48 = vsel %vm1114_vm10, %v936_v62, %v1186_v11  ;;  %vm1115_vm12 = vcmp.gt.f32.partialorder %v939_v30, 0.0  ;;  %v1187_v19 = vmul.f32 0.01, %v939_v30  ;;  %v1412_v6 = vld [vmem:[#allocation2 + $0x100] sm:$0xff]  ;;  %v23679_v40 = vpack.c.bf16 %v8877_v58, %v8876_v56 }
 0x141   : > { %27995 = vst [vmem:[#allocation67_spill] sm:$0xff] %v23676_v63  ;;  %v6341_v51 = vld [vmem:[#allocation2 + $0xf2] sm:$0xff]  ;;  %v6342_v52 = vld [vmem:[#allocation2 + $0xfa] sm:$0xff]  ;;  %1331 = vst.msk [vmem:[#allocation2 + $0x120] sm:$0xff] %vm1294_vm3, %v1258_v48  ;;  %v1261_v60 = vsel %vm1117_vm11, %v947_v33, %v1189_v36  ;;  %v23682_v54 = vpack.c.bf16 %v1412_v6, %v1411_v23  ;;  %v18757_v11 = vpop.f32.mrb[40].mxu0  ;;  %v23689_v56 = vpack.c.bf16 %v3799_v45, %v3798_v2 }
 0x142   : > { %27996 = vst [vmem:[#allocation68_spill] sm:$0xff] %v23679_v40  ;;  %v1414_v22 = vld [vmem:[#allocation2 + $0x110] sm:$0xff]  ;;  %v1415_v50 = vld [vmem:[#allocation2 + $0x118] sm:$0xff]  ;;  %v23684_v28 = vpack.c.bf16 %v6342_v52, %v6341_v51  ;;  %1334 = vst.msk [vmem:[#allocation2 + $0x138] sm:$0xff] %vm1294_vm3, %v1261_v60  ;;  %v1259_v7 = vsel %vm1115_vm12, %v939_v30, %v1187_v19  ;;  %v960_v23 = vadd.f32 %v18757_v11, %v23374_v49  ;;  %v951_v33 = vpop.f32.mrb[41].mxu0 }
 0x143   : > { %27997 = vst [vmem:[#allocation69_spill] sm:$0xff] %v23682_v54  ;;  %v1413_v62 = vld [vmem:[#allocation2 + $0x108] sm:$0xff]  ;;  %v23687_v63 = vpack.c.bf16 %v1415_v50, %v1414_v22  ;;  %28000 = vst [vmem:[#allocation72_spill] sm:$0xff] %v23689_v56  ;;  %18823 = vmatprep.mubr.msk.bf16.mxu0 %vm1294_vm3, %v23682_v54  ;;  %v952_v19 = vadd.f32 %v23374_v49, %v951_v33  ;;  %v18758_v58 = vpop.f32.mrb[42].mxu0  ;;  %v8879_v2 = vld [vmem:[#allocation2 + $0xf3] sm:$0xff] }
 0x144   : > { %27998 = vst [vmem:[#allocation70_spill] sm:$0xff] %v23684_v28  ;;  %v6343_v47 = vld [vmem:[#allocation2 + $0x102] sm:$0xff]  ;;  %v6344_v12 = vld [vmem:[#allocation2 + $0x10a] sm:$0xff]  ;;  %1332 = vst.msk [vmem:[#allocation2 + $0x128] sm:$0xff] %vm1294_vm3, %v1259_v7  ;;  %v23695_v51 = vpack.c.bf16 %v1414_v22, %v1413_v62  ;;  %v23698_v30 = vpack.c.bf16 %v1413_v62, %v1412_v6  ;;  %vm1120_vm13 = vcmp.gt.f32.partialorder %v960_v23, 0.0  ;;  %v963_v60 = vadd.f32 %v18758_v58, %v23374_v49  ;;  %v954_v7 = vpop.f32.mrb[43].mxu0 }
 0x145   : > { %27999 = vst [vmem:[#allocation71_spill] sm:$0xff] %v23687_v63  ;;  %v3801_v52 = vld [vmem:[#allocation2 + $0xe1] sm:$0xff]  ;;  %v23700_v36 = vpack.c.bf16 %v6344_v12, %v6343_v47  ;;  %v8878_v45 = vld [vmem:[#allocation2 + $0xeb] sm:$0xff]  ;;  %v1192_v48 = vmul.f32 0.01, %v960_v23  ;;  %v3800_v22 = vld [vmem:[#allocation2 + $0xd9] sm:$0xff]  ;;  %v955_v33 = vadd.f32 %v23374_v49, %v954_v7 }
 0x146   : > { %28001 = vst [vmem:[#allocation73_spill] sm:$0xff] %v23695_v51  ;;  %28002 = vst [vmem:[#allocation74_spill] sm:$0xff] %v23698_v30  ;;  %18824 = vmatmul.mubr.msk.bf16.gmra.mrb[100].mxu0 %vm1294_vm3, %v23695_v51  ;;  %v8881_v11 = vld [vmem:[#allocation2 + $0x103] sm:$0xff]  ;;  %vm1118_vm14 = vcmp.gt.f32.partialorder %v952_v19, 0.0  ;;  %v1190_v56 = vmul.f32 0.01, %v952_v19  ;;  %v23706_v6 = vpack.c.bf16 %v3801_v52, %v3800_v22  ;;  %v23708_v54 = vpack.c.bf16 %v8879_v2, %v8878_v45 }
 0x147   : > { %28003 = vst [vmem:[#allocation75_spill] sm:$0xff] %v23700_v36  ;;  %v1264_v62 = vsel %vm1120_vm13, %v960_v23, %v1192_v48  ;;  %vm1121_vm15 = vcmp.gt.f32.partialorder %v963_v60, 0.0  ;;  %v1193_v47 = vmul.f32 0.01, %v963_v60  ;;  %v3802_v12 = vld [vmem:[#allocation2 + $0xe9] sm:$0xff]  ;;  %v8880_v40 = vld [vmem:[#allocation2 + $0xfb] sm:$0xff] }
 0x148   : > { %28004 = vst [vmem:[#allocation76_spill] sm:$0xff] %v23706_v6  ;;  %v3803_v3 = vld [vmem:[#allocation2 + $0xf1] sm:$0xff]  ;;  %28005 = vst [vmem:[#allocation77_spill] sm:$0xff] %v23708_v54  ;;  %v1262_v58 = vsel %vm1118_vm14, %v952_v19, %v1190_v56  ;;  %vm1119_vm0 = vcmp.gt.f32.partialorder %v955_v33, 0.0  ;;  %v1191_v51 = vmul.f32 0.01, %v955_v33  ;;  %v23711_v57 = vpack.c.bf16 %v8881_v11, %v8880_v40 }
 0x149   : > { %1337 = vst.msk [vmem:[#allocation2 + $0x150] sm:$0xff] %vm1294_vm3, %v1264_v62  ;;  %v1416_v16 = vld [vmem:[#allocation2 + $0x120] sm:$0xff]  ;;  %v6345_v1 = vld [vmem:[#allocation2 + $0x112] sm:$0xff]  ;;  %1335 = vst.msk [vmem:[#allocation2 + $0x140] sm:$0xff] %vm1294_vm3, %v1262_v58  ;;  %v1265_v49 = vsel %vm1121_vm15, %v963_v60, %v1193_v47  ;;  %v18761_v56 = vpop.f32.mrb[44].mxu0  ;;  %v23721_v40 = vpack.c.bf16 %v3803_v3, %v3802_v12 }
 0x14a   : > { %v6346_v26 = vld [vmem:[#allocation2 + $0x11a] sm:$0xff]  ;;  %28006 = vst [vmem:[#allocation78_spill] sm:$0xff] %v23711_v57  ;;  %v23714_v23 = vpack.c.bf16 %v1416_v16, %v1415_v50  ;;  %v1418_v52 = vld [vmem:[#allocation2 + $0x130] sm:$0xff]  ;;  %1338 = vst.msk [vmem:[#allocation2 + $0x158] sm:$0xff] %vm1294_vm3, %v1265_v49  ;;  %v1263_v45 = vsel %vm1119_vm0, %v955_v33, %v1191_v51 }
 0x14b   : > { %v1419_v48 = vld [vmem:[#allocation2 + $0x138] sm:$0xff]  ;;  %v23716_v7 = vpack.c.bf16 %v6346_v26, %v6345_v1  ;;  %v1417_v19 = vld [vmem:[#allocation2 + $0x128] sm:$0xff]  ;;  %28010 = vst [vmem:[#allocation82_spill] sm:$0xff] %v23721_v40  ;;  %1336 = vst.msk [vmem:[#allocation2 + $0x148] sm:$0xff] %vm1294_vm3, %v1263_v45  ;;  %v967_v1 = vpop.f32.mrb[45].mxu0 }
 0x14c   : > { %28007 = vst [vmem:[#allocation79_spill] sm:$0xff] %v23714_v23  ;;  %v6347_v2 = vld [vmem:[#allocation2 + $0x122] sm:$0xff]  ;;  %v6348_v22 = vld [vmem:[#allocation2 + $0x12a] sm:$0xff]  ;;  %v23719_v62 = vpack.c.bf16 %v1419_v48, %v1418_v52  ;;  %v23727_v50 = vld [vmem:[%s27608_s2] ss:$0 sm:$0xff]  ;;  %18827 = vmatprep.mubr.msk.bf16.mxu0 %vm1294_vm3, %v23714_v23  ;;  %v23732_v51 = vpack.c.bf16 %v1418_v52, %v1417_v19  ;;  %v18762_v3 = vpop.f32.mrb[46].mxu0  ;;  %v23735_v33 = vpack.c.bf16 %v1417_v19, %v1416_v16 }
 0x14d   : > { %28008 = vst [vmem:[#allocation80_spill] sm:$0xff] %v23716_v7  ;;  %v976_v26 = vadd.f32 %v23727_v50, %v18761_v56  ;;  %v3805_v60 = vld [vmem:[#allocation2 + $0x101] sm:$0xff]  ;;  %v968_v11 = vadd.f32 %v23727_v50, %v967_v1  ;;  %v23737_v47 = vpack.c.bf16 %v6348_v22, %v6347_v2  ;;  %v8882_v12 = vld [vmem:[#allocation2 + $0x10b] sm:$0xff]  ;;  %v8883_v58 = vld [vmem:[#allocation2 + $0x113] sm:$0xff]  ;;  %v979_v45 = vadd.f32 %v23727_v50, %v18762_v3  ;;  %v970_v56 = vpop.f32.mrb[47].mxu0 }
 0x14e   : > { %28009 = vst [vmem:[#allocation81_spill] sm:$0xff] %v23719_v62  ;;  %28011 = vst [vmem:[#allocation83_spill] sm:$0xff] %v23732_v51  ;;  %18828 = vmatmul.mubr.msk.bf16.gmra.mrb[104].mxu0 %vm1294_vm3, %v23732_v51  ;;  %v3804_v52 = vld [vmem:[#allocation2 + $0xf9] sm:$0xff]  ;;  %v8885_v40 = vld [vmem:[#allocation2 + $0x123] sm:$0xff]  ;;  %v971_v1 = vadd.f32 %v23727_v50, %v970_v56  ;;  %v23745_v23 = vpack.c.bf16 %v8883_v58, %v8882_v12 }
 0x14f   : > { %28012 = vst [vmem:[#allocation84_spill] sm:$0xff] %v23735_v33  ;;  %28013 = vst [vmem:[#allocation85_spill] sm:$0xff] %v23737_v47  ;;  %vm1124_vm1 = vcmp.gt.f32.partialorder %v976_v26, 0.0  ;;  %v1196_v49 = vmul.f32 0.01, %v976_v26  ;;  %vm1122_vm2 = vcmp.gt.f32.partialorder %v968_v11, 0.0  ;;  %v23743_v16 = vpack.c.bf16 %v3805_v60, %v3804_v52 }
 0x150   : > { %v1194_v57 = vmul.f32 0.01, %v968_v11  ;;  %vm1125_vm4 = vcmp.gt.f32.partialorder %v979_v45, 0.0  ;;  %v1197_v2 = vmul.f32 0.01, %v979_v45  ;;  %v3806_v22 = vld [vmem:[#allocation2 + $0x109] sm:$0xff] }
 0x151   : > { %28014 = vst [vmem:[#allocation86_spill] sm:$0xff] %v23743_v16  ;;  %v1268_v19 = vsel %vm1124_vm1, %v976_v26, %v1196_v49  ;;  %v8884_v54 = vld [vmem:[#allocation2 + $0x11b] sm:$0xff]  ;;  %v3807_v6 = vld [vmem:[#allocation2 + $0x111] sm:$0xff]  ;;  %28015 = vst [vmem:[#allocation87_spill] sm:$0xff] %v23745_v23  ;;  %vm1123_vm5 = vcmp.gt.f32.partialorder %v971_v1, 0.0 }
 0x152   : > { %1341 = vst.msk [vmem:[#allocation2 + $0x170] sm:$0xff] %vm1294_vm3, %v1268_v19  ;;  %v1266_v3 = vsel %vm1122_vm2, %v968_v11, %v1194_v57  ;;  %v1195_v51 = vmul.f32 0.01, %v971_v1  ;;  %v1420_v61 = vld [vmem:[#allocation2 + $0x140] sm:$0xff]  ;;  %v6349_v59 = vld [vmem:[#allocation2 + $0x132] sm:$0xff]  ;;  %v23748_v27 = vpack.c.bf16 %v8885_v40, %v8884_v54  ;;  %v1269_v26 = vsel %vm1125_vm4, %v979_v45, %v1197_v2  ;;  %v18765_v57 = vpop.f32.mrb[48].mxu0 }
 0x153   : > { %v6350_v17 = vld [vmem:[#allocation2 + $0x13a] sm:$0xff]  ;;  %1339 = vst.msk [vmem:[#allocation2 + $0x160] sm:$0xff] %vm1294_vm3, %v1266_v3  ;;  %v23751_v60 = vpack.c.bf16 %v1420_v61, %v1419_v48  ;;  %v1422_v49 = vld [vmem:[#allocation2 + $0x150] sm:$0xff]  ;;  %1342 = vst.msk [vmem:[#allocation2 + $0x178] sm:$0xff] %vm1294_vm3, %v1269_v26  ;;  %v23758_v54 = vpack.c.bf16 %v3807_v6, %v3806_v22  ;;  %v992_v48 = vadd.f32 %v23727_v50, %v18765_v57  ;;  %v983_v40 = vpop.f32.mrb[49].mxu0 }
 0x154   : > { %28016 = vst [vmem:[#allocation88_spill] sm:$0xff] %v23748_v27  ;;  %v1423_v56 = vld [vmem:[#allocation2 + $0x158] sm:$0xff]  ;;  %v23753_v52 = vpack.c.bf16 %v6350_v17, %v6349_v59  ;;  %v1267_v12 = vsel %vm1123_vm5, %v971_v1, %v1195_v51  ;;  %v1421_v11 = vld [vmem:[#allocation2 + $0x148] sm:$0xff]  ;;  %v984_v51 = vadd.f32 %v23727_v50, %v983_v40  ;;  %v18766_v45 = vpop.f32.mrb[50].mxu0 }
 0x155   : > { %28017 = vst [vmem:[#allocation89_spill] sm:$0xff] %v23751_v60  ;;  %v6351_v58 = vld [vmem:[#allocation2 + $0x142] sm:$0xff]  ;;  %v6352_v19 = vld [vmem:[#allocation2 + $0x14a] sm:$0xff]  ;;  %v23756_v23 = vpack.c.bf16 %v1423_v56, %v1422_v49  ;;  %28020 = vst [vmem:[#allocation92_spill] sm:$0xff] %v23758_v54  ;;  %18831 = vmatprep.mubr.msk.bf16.mxu0 %vm1294_vm3, %v23751_v60  ;;  %v23764_v17 = vpack.c.bf16 %v1422_v49, %v1421_v11  ;;  %v23767_v1 = vpack.c.bf16 %v1421_v11, %v1420_v61 }
 0x156   : > { %28018 = vst [vmem:[#allocation90_spill] sm:$0xff] %v23753_v52  ;;  %1340 = vst.msk [vmem:[#allocation2 + $0x168] sm:$0xff] %vm1294_vm3, %v1267_v12  ;;  %v3809_v59 = vld [vmem:[#allocation2 + $0x121] sm:$0xff]  ;;  %v23769_v2 = vpack.c.bf16 %v6352_v19, %v6351_v58  ;;  %v8886_v6 = vld [vmem:[#allocation2 + $0x12b] sm:$0xff]  ;;  %vm1128_vm6 = vcmp.gt.f32.partialorder %v992_v48, 0.0  ;;  %v995_v26 = vadd.f32 %v23727_v50, %v18766_v45  ;;  %v986_v12 = vpop.f32.mrb[51].mxu0 }
 0x157   : > { %28019 = vst [vmem:[#allocation91_spill] sm:$0xff] %v23756_v23  ;;  %28021 = vst [vmem:[#allocation93_spill] sm:$0xff] %v23764_v17  ;;  %v8887_v22 = vld [vmem:[#allocation2 + $0x133] sm:$0xff]  ;;  %v1200_v3 = vmul.f32 0.01, %v992_v48  ;;  %18832 = vmatmul.mubr.msk.bf16.gmra.mrb[108].mxu0 %vm1294_vm3, %v23764_v17  ;;  %v8889_v57 = vld [vmem:[#allocation2 + $0x143] sm:$0xff]  ;;  %v987_v40 = vadd.f32 %v23727_v50, %v986_v12 }
 0x158   : > { %28022 = vst [vmem:[#allocation94_spill] sm:$0xff] %v23767_v1  ;;  %28023 = vst [vmem:[#allocation95_spill] sm:$0xff] %v23769_v2  ;;  %v3808_v49 = vld [vmem:[#allocation2 + $0x119] sm:$0xff]  ;;  %vm1126_vm7 = vcmp.gt.f32.partialorder %v984_v51, 0.0  ;;  %v1198_v54 = vmul.f32 0.01, %v984_v51  ;;  %v23777_v60 = vpack.c.bf16 %v8887_v22, %v8886_v6 }
 0x159   : > { %v23775_v61 = vpack.c.bf16 %v3809_v59, %v3808_v49  ;;  %v1272_v11 = vsel %vm1128_vm6, %v992_v48, %v1200_v3  ;;  %vm1129_vm8 = vcmp.gt.f32.partialorder %v995_v26, 0.0  ;;  %v1201_v58 = vmul.f32 0.01, %v995_v26  ;;  %v3810_v19 = vld [vmem:[#allocation2 + $0x129] sm:$0xff]  ;;  %v8888_v27 = vld [vmem:[#allocation2 + $0x13b] sm:$0xff]  ;;  %v3811_v16 = vld [vmem:[#allocation2 + $0x131] sm:$0xff] }
 0x15a   : > { %28025 = vst [vmem:[#allocation97_spill] sm:$0xff] %v23777_v60  ;;  %1345 = vst.msk [vmem:[#allocation2 + $0x190] sm:$0xff] %vm1294_vm3, %v1272_v11  ;;  %v1270_v45 = vsel %vm1126_vm7, %v984_v51, %v1198_v54  ;;  %vm1127_vm9 = vcmp.gt.f32.partialorder %v987_v40, 0.0  ;;  %v1199_v17 = vmul.f32 0.01, %v987_v40  ;;  %v1424_v5 = vld [vmem:[#allocation2 + $0x160] sm:$0xff]  ;;  %v23780_v52 = vpack.c.bf16 %v8889_v57, %v8888_v27 }
 0x15b   : > { %28024 = vst [vmem:[#allocation96_spill] sm:$0xff] %v23775_v61  ;;  %v6354_v29 = vld [vmem:[#allocation2 + $0x15a] sm:$0xff]  ;;  %v6353_v2 = vld [vmem:[#allocation2 + $0x152] sm:$0xff]  ;;  %1343 = vst.msk [vmem:[#allocation2 + $0x180] sm:$0xff] %vm1294_vm3, %v1270_v45  ;;  %v1273_v48 = vsel %vm1129_vm8, %v995_v26, %v1201_v58  ;;  %v23783_v59 = vpack.c.bf16 %v1424_v5, %v1423_v56  ;;  %v18769_v51 = vpop.f32.mrb[52].mxu0  ;;  %v23790_v27 = vpack.c.bf16 %v3811_v16, %v3810_v19 }
 0x15c   : > { %28026 = vst [vmem:[#allocation98_spill] sm:$0xff] %v23780_v52  ;;  %v1426_v3 = vld [vmem:[#allocation2 + $0x170] sm:$0xff]  ;;  %v1427_v49 = vld [vmem:[#allocation2 + $0x178] sm:$0xff]  ;;  %v23785_v6 = vpack.c.bf16 %v6354_v29, %v6353_v2  ;;  %1346 = vst.msk [vmem:[#allocation2 + $0x198] sm:$0xff] %vm1294_vm3, %v1273_v48  ;;  %v1271_v54 = vsel %vm1127_vm9, %v987_v40, %v1199_v17  ;;  %v1008_v56 = vadd.f32 %v23727_v50, %v18769_v51  ;;  %v999_v26 = vpop.f32.mrb[53].mxu0 }
 0x15d   : > { %28027 = vst [vmem:[#allocation99_spill] sm:$0xff] %v23783_v59  ;;  %v6357_v12 = vld [vmem:[#allocation2 + $0x172] sm:$0xff]  ;;  %v1425_v22 = vld [vmem:[#allocation2 + $0x168] sm:$0xff]  ;;  %v23788_v61 = vpack.c.bf16 %v1427_v49, %v1426_v3  ;;  %28030 = vst [vmem:[#allocation102_spill] sm:$0xff] %v23790_v27  ;;  %18835 = vmatprep.mubr.msk.bf16.mxu0 %vm1294_vm3, %v23783_v59  ;;  %v1000_v57 = vadd.f32 %v23727_v50, %v999_v26  ;;  %v18770_v40 = vpop.f32.mrb[54].mxu0 }
 0x15e   : > { %28028 = vst [vmem:[#allocation100_spill] sm:$0xff] %v23785_v6  ;;  %v6355_v11 = vld [vmem:[#allocation2 + $0x162] sm:$0xff]  ;;  %v6356_v60 = vld [vmem:[#allocation2 + $0x16a] sm:$0xff]  ;;  %1344 = vst.msk [vmem:[#allocation2 + $0x188] sm:$0xff] %vm1294_vm3, %v1271_v54  ;;  %v23796_v29 = vpack.c.bf16 %v1426_v3, %v1425_v22  ;;  %v23803_v16 = vpack.c.bf16 %v1425_v22, %v1424_v5  ;;  %vm1132_vm10 = vcmp.gt.f32.partialorder %v1008_v56, 0.0  ;;  %v1011_v54 = vadd.f32 %v23727_v50, %v18770_v40  ;;  %v1002_v51 = vpop.f32.mrb[55].mxu0 }
 0x15f   : > { %28029 = vst [vmem:[#allocation101_spill] sm:$0xff] %v23788_v61  ;;  %v23798_v2 = vpack.c.bf16 %v6356_v60, %v6355_v11  ;;  %v3813_v17 = vld [vmem:[#allocation2 + $0x141] sm:$0xff]  ;;  %v23801_v58 = vpack.c.bf16 %v6357_v12, %v6356_v60  ;;  %v8890_v19 = vld [vmem:[#allocation2 + $0x14b] sm:$0xff]  ;;  %v8891_v45 = vld [vmem:[#allocation2 + $0x153] sm:$0xff]  ;;  %v1204_v48 = vmul.f32 0.01, %v1008_v56  ;;  %v1003_v5 = vadd.f32 %v23727_v50, %v1002_v51 }
 0x160   : > { %28031 = vst [vmem:[#allocation103_spill] sm:$0xff] %v23796_v29  ;;  %28034 = vst [vmem:[#allocation106_spill] sm:$0xff] %v23803_v16  ;;  %18836 = vmatmul.mubr.msk.bf16.gmra.mrb[112].mxu0 %vm1294_vm3, %v23796_v29  ;;  %v3812_v3 = vld [vmem:[#allocation2 + $0x139] sm:$0xff]  ;;  %v8893_v11 = vld [vmem:[#allocation2 + $0x163] sm:$0xff]  ;;  %vm1130_vm11 = vcmp.gt.f32.partialorder %v1000_v57, 0.0  ;;  %vm1133_vm12 = vcmp.gt.f32.partialorder %v1011_v54, 0.0  ;;  %v23813_v6 = vpack.c.bf16 %v8891_v45, %v8890_v19 }
 0x161   : > { %28032 = vst [vmem:[#allocation104_spill] sm:$0xff] %v23798_v2  ;;  %28033 = vst [vmem:[#allocation105_spill] sm:$0xff] %v23801_v58  ;;  %19639 = vmatprep.mubr.msk.bf16.mxu1 %vm1294_vm3, %v23798_v2  ;;  %v1202_v60 = vmul.f32 0.01, %v1000_v57  ;;  %v23811_v22 = vpack.c.bf16 %v3813_v17, %v3812_v3  ;;  %v1276_v26 = vsel %vm1132_vm10, %v1008_v56, %v1204_v48  ;;  %v1205_v27 = vmul.f32 0.01, %v1011_v54 }
 0x162   : > { %v3814_v52 = vld [vmem:[#allocation2 + $0x149] sm:$0xff]  ;;  %v8892_v40 = vld [vmem:[#allocation2 + $0x15b] sm:$0xff]  ;;  %v3815_v59 = vld [vmem:[#allocation2 + $0x151] sm:$0xff]  ;;  %28036 = vst [vmem:[#allocation108_spill] sm:$0xff] %v23813_v6  ;;  %vm1131_vm13 = vcmp.gt.f32.partialorder %v1003_v5, 0.0 }
 0x163   : > { %28035 = vst [vmem:[#allocation107_spill] sm:$0xff] %v23811_v22  ;;  %1349 = vst.msk [vmem:[#allocation2 + $0x1b0] sm:$0xff] %vm1294_vm3, %v1276_v26  ;;  %v1274_v29 = vsel %vm1130_vm11, %v1000_v57, %v1202_v60  ;;  %v1203_v2 = vmul.f32 0.01, %v1003_v5  ;;  %v1428_v47 = vld [vmem:[#allocation2 + $0x180] sm:$0xff]  ;;  %v22598_v17 = vld [vmem:[%s27609_s3 + $0xe8] sm:$0xff]   ;;  %v23819_v51 = vpack.c.bf16 %v8893_v11, %v8892_v40  ;;  %v1277_v56 = vsel %vm1133_vm12, %v1011_v54, %v1205_v27 }
 0x164   : > { %v6358_v7 = vld [vmem:[#allocation2 + $0x17a] sm:$0xff]  ;;  %1347 = vst.msk [vmem:[#allocation2 + $0x1a0] sm:$0xff] %vm1294_vm3, %v1274_v29  ;;  %v23822_v48 = vpack.c.bf16 %v1428_v47, %v1427_v49  ;;  %v1430_v45 = vld [vmem:[#allocation2 + $0x190] sm:$0xff]  ;;  %1350 = vst.msk [vmem:[#allocation2 + $0x1b8] sm:$0xff] %vm1294_vm3, %v1277_v56  ;;  %v18773_v26 = vpop.f32.mrb[56].mxu0  ;;  %v23829_v11 = vpack.c.bf16 %v3815_v59, %v3814_v52 }
 0x165   : > { %28037 = vst [vmem:[#allocation109_spill] sm:$0xff] %v23819_v51  ;;  %v23824_v19 = vpack.c.bf16 %v6358_v7, %v6357_v12  ;;  %v1431_v3 = vld [vmem:[#allocation2 + $0x198] sm:$0xff]  ;;  %v1275_v60 = vsel %vm1131_vm13, %v1003_v5, %v1203_v2  ;;  %v1429_v6 = vld [vmem:[#allocation2 + $0x188] sm:$0xff]  ;;  %v1024_v49 = vadd.f32 %v23727_v50, %v18773_v26  ;;  %v1015_v12 = vpop.f32.mrb[57].mxu0  ;;  %v22928_v52 = vld [vmem:[%s27609_s3 + $0xe0] sm:$0xff]  }
 0x166   : > { %28038 = vst [vmem:[#allocation110_spill] sm:$0xff] %v23822_v48  ;;  %v6361_v57 = vld [vmem:[#allocation2 + $0x192] sm:$0xff]  ;;  %v6359_v22 = vld [vmem:[#allocation2 + $0x182] sm:$0xff]  ;;  %v6360_v36 = vld [vmem:[#allocation2 + $0x18a] sm:$0xff]  ;;  %v23827_v28 = vpack.c.bf16 %v1431_v3, %v1430_v45  ;;  %18839 = vmatprep.mubr.msk.bf16.mxu0 %vm1294_vm3, %v23822_v48  ;;  %v23837_v27 = vpack.c.bf16 %v1430_v45, %v1429_v6  ;;  %v1016_v2 = vadd.f32 %v23727_v50, %v1015_v12  ;;  %v18774_v54 = vpop.f32.mrb[58].mxu0 }
 0x167   : > { %28039 = vst [vmem:[#allocation111_spill] sm:$0xff] %v23824_v19  ;;  %28041 = vst [vmem:[#allocation113_spill] sm:$0xff] %v23829_v11  ;;  %19640 = vmatmul.mubr.msk.bf16.vlgmr.msra.gmra.mrb[0].mxu1 %vm1294_vm3, %v23824_v19  ;;  %v23839_v29 = vpack.c.bf16 %v6360_v36, %v6359_v22  ;;  %v22601_v59 = vld [vmem:[%s27609_s3 + $0xf0] sm:$0xff]   ;;  %v23848_v5 = vpack.c.bf16 %v6359_v22, %v6358_v7  ;;  %v23850_v40 = vpack.c.bf16 %v6361_v57, %v6360_v36  ;;  %v3817_v45 = vld [vmem:[#allocation2 + $0x161] sm:$0xff]  ;;  %v1018_v12 = vpop.f32.mrb[59].mxu0 }
 0x168   : > { %28040 = vst [vmem:[#allocation112_spill] sm:$0xff] %v23827_v28  ;;  %1348 = vst.msk [vmem:[#allocation2 + $0x1a8] sm:$0xff] %vm1294_vm3, %v1275_v60  ;;  %19668 = vmatpush3.bf16.msra.mxu1 %v22928_v52  ;;  %v23852_v56 = vpack.c.bf16 %v1429_v6, %v1428_v47  ;;  %vm1136_vm14 = vcmp.gt.f32.partialorder %v1024_v49, 0.0  ;;  %v1208_v60 = vmul.f32 0.01, %v1024_v49  ;;  %v1027_v26 = vadd.f32 %v23727_v50, %v18774_v54  ;;  %v8894_v52 = vld [vmem:[#allocation2 + $0x16b] sm:$0xff] }
 0x169   : > { %28042 = vst [vmem:[#allocation114_spill] sm:$0xff] %v23837_v27  ;;  %28043 = vst [vmem:[#allocation115_spill] sm:$0xff] %v23839_v29  ;;  %18840 = vmatmul.mubr.msk.bf16.gmra.mrb[116].mxu0 %vm1294_vm3, %v23837_v27  ;;  %19643 = vmatprep.mubr.msk.bf16.mxu1 %vm1294_vm3, %v23839_v29  ;;  %v8895_v11 = vld [vmem:[#allocation2 + $0x173] sm:$0xff]  ;;  %vm1134_vm15 = vcmp.gt.f32.partialorder %v1016_v2, 0.0  ;;  %v1206_v7 = vmul.f32 0.01, %v1016_v2  ;;  %v1019_v36 = vadd.f32 %v23727_v50, %v1018_v12 }
 0x16a   : > { %28044 = vst [vmem:[#allocation116_spill] sm:$0xff] %v23848_v5  ;;  %28045 = vst [vmem:[#allocation117_spill] sm:$0xff] %v23850_v40  ;;  %19669 = vmatprep.subr.bf16.mxu1 %v22598_v17  ;;  %v3816_v47 = vld [vmem:[#allocation2 + $0x159] sm:$0xff]  ;;  %v1280_v6 = vsel %vm1136_vm14, %v1024_v49, %v1208_v60  ;;  %vm1137_vm0 = vcmp.gt.f32.partialorder %v1027_v26, 0.0  ;;  %v1209_v22 = vmul.f32 0.01, %v1027_v26  ;;  %v23866_v4 = vpack.c.bf16 %v8895_v11, %v8894_v52 }
 0x16b   : > { %28046 = vst [vmem:[#allocation118_spill] sm:$0xff] %v23852_v56  ;;  %v8897_v51 = vld [vmem:[#allocation2 + $0x183] sm:$0xff]  ;;  %v23860_v54 = vpack.c.bf16 %v3817_v45, %v3816_v47  ;;  %1353 = vst.msk [vmem:[#allocation2 + $0x1d0] sm:$0xff] %vm1294_vm3, %v1280_v6  ;;  %v1278_v27 = vsel %vm1134_vm15, %v1016_v2, %v1206_v7  ;;  %vm1135_vm1 = vcmp.gt.f32.partialorder %v1019_v36, 0.0  ;;  %v1207_v48 = vmul.f32 0.01, %v1019_v36 }
 0x16c   : > { %v1432_v29 = vld [vmem:[#allocation2 + $0x1a0] sm:$0xff]  ;;  %19670 = vmatpush3.bf16.msra.mxu1 %v22598_v17  ;;  %v22603_v12 = vld [vmem:[%s27609_s3 + $0xf8] sm:$0xff]   ;;  %28048 = vst [vmem:[#allocation120_spill] sm:$0xff] %v23866_v4  ;;  %1351 = vst.msk [vmem:[#allocation2 + $0x1c0] sm:$0xff] %vm1294_vm3, %v1278_v27  ;;  %v1281_v49 = vsel %vm1137_vm0, %v1027_v26, %v1209_v22  ;;  %v18777_v6 = vpop.f32.mrb[60].mxu0 }
 0x16d   : > { %28047 = vst [vmem:[#allocation119_spill] sm:$0xff] %v23860_v54  ;;  %v6362_v19 = vld [vmem:[#allocation2 + $0x19a] sm:$0xff]  ;;  %v23869_v45 = vpack.c.bf16 %v1432_v29, %v1431_v3  ;;  %v1434_v2 = vld [vmem:[#allocation2 + $0x1b0] sm:$0xff]  ;;  %19671 = vmatprep.subr.bf16.mxu1 %v22601_v59  ;;  %1354 = vst.msk [vmem:[#allocation2 + $0x1d8] sm:$0xff] %vm1294_vm3, %v1281_v49  ;;  %v1279_v17 = vsel %vm1135_vm1, %v1019_v36, %v1207_v48  ;;  %v1040_v3 = vadd.f32 %v23727_v50, %v18777_v6 }
 0x16e   : > { %v8896_v46 = vld [vmem:[#allocation2 + $0x17b] sm:$0xff]  ;;  %v23871_v60 = vpack.c.bf16 %v6362_v19, %v6361_v57  ;;  %v6365_v47 = vld [vmem:[#allocation2 + $0x1b2] sm:$0xff]  ;;  %1352 = vst.msk [vmem:[#allocation2 + $0x1c8] sm:$0xff] %vm1294_vm3, %v1279_v17  ;;  %v1031_v57 = vpop.f32.mrb[61].mxu0  ;;  %v3818_v17 = vld [vmem:[#allocation2 + $0x169] sm:$0xff] }
 0x16f   : > { %28049 = vst [vmem:[#allocation121_spill] sm:$0xff] %v23869_v45  ;;  %v1435_v7 = vld [vmem:[#allocation2 + $0x1b8] sm:$0xff]  ;;  %v1433_v54 = vld [vmem:[#allocation2 + $0x1a8] sm:$0xff]  ;;  %v23877_v27 = vpack.c.bf16 %v8897_v51, %v8896_v46  ;;  %18843 = vmatprep.mubr.msk.bf16.mxu0 %vm1294_vm3, %v23869_v45  ;;  %v1032_v36 = vadd.f32 %v23727_v50, %v1031_v57  ;;  %v18778_v22 = vpop.f32.mrb[62].mxu0  ;;  %vm1140_vm2 = vcmp.gt.f32.partialorder %v1040_v3, 0.0 }
 0x170   : > { %28050 = vst [vmem:[#allocation122_spill] sm:$0xff] %v23871_v60  ;;  %v6363_v0 = vld [vmem:[#allocation2 + $0x1a2] sm:$0xff]  ;;  %v6364_v11 = vld [vmem:[#allocation2 + $0x1aa] sm:$0xff]  ;;  %v23875_v52 = vpack.c.bf16 %v1435_v7, %v1434_v2  ;;  %19644 = vmatmul.mubr.msk.bf16.gmra.mrb[4].mxu1 %vm1294_vm3, %v23871_v60  ;;  %v23885_v48 = vpack.c.bf16 %v1434_v2, %v1433_v54  ;;  %v23894_v49 = vpack.c.bf16 %v1433_v54, %v1432_v29  ;;  %v1034_v2 = vpop.f32.mrb[63].mxu0  ;;  %v3824_v37 = vld [vmem:[#allocation2 + $0x199] sm:$0xff] }
 0x171   : > { %28052 = vst [vmem:[#allocation124_spill] sm:$0xff] %v23877_v27  ;;  %v23887_v26 = vpack.c.bf16 %v6364_v11, %v6363_v0  ;;  %19672 = vmatpush3.bf16.msra.mxu1 %v22601_v59  ;;  %v23890_v46 = vpack.c.bf16 %v6363_v0, %v6362_v19  ;;  %v23892_v51 = vpack.c.bf16 %v6365_v47, %v6364_v11  ;;  %v3819_v6 = vld [vmem:[#allocation2 + $0x171] sm:$0xff]  ;;  %v1212_v27 = vmul.f32 0.01, %v1040_v3  ;;  %v23904_v0 = vld [vmem:[%s27609_s3 + $0x180] sm:$0xff]  }
 0x172   : > { %28051 = vst [vmem:[#allocation123_spill] sm:$0xff] %v23875_v52  ;;  %28053 = vst [vmem:[#allocation125_spill] sm:$0xff] %v23885_v48  ;;  %v1043_v4 = vadd.f32 %v23727_v50, %v18778_v22  ;;  %18844 = vmatmul.mubr.msk.bf16.gmra.mrb[120].mxu0 %vm1294_vm3, %v23885_v48  ;;  %v3821_v19 = vld [vmem:[#allocation2 + $0x181] sm:$0xff]  ;;  %vm1138_vm4 = vcmp.gt.f32.partialorder %v1032_v36, 0.0  ;;  %v1210_v29 = vmul.f32 0.01, %v1032_v36  ;;  %v1035_v59 = vadd.f32 %v23727_v50, %v1034_v2 }
 0x173   : > { %28054 = vst [vmem:[#allocation126_spill] sm:$0xff] %v23887_v26  ;;  %28055 = vst [vmem:[#allocation127_spill] sm:$0xff] %v23890_v46  ;;  %19647 = vmatprep.mubr.msk.bf16.mxu1 %vm1294_vm3, %v23887_v26  ;;  %19673 = vmatprep.subr.bf16.mxu1 %v22603_v12  ;;  %v1284_v54 = vsel %vm1140_vm2, %v1040_v3, %v1212_v27  ;;  %v8898_v57 = vld [vmem:[#allocation2 + $0x18b] sm:$0xff]  ;;  %v3820_v22 = vld [vmem:[#allocation2 + $0x179] sm:$0xff]  ;;  %v23907_v45 = vpack.c.bf16 %v3819_v6, %v3818_v17 }
 0x174   : > { %28056 = vst [vmem:[#allocation128_spill] sm:$0xff] %v23892_v51  ;;  %28057 = vst [vmem:[#allocation129_spill] sm:$0xff] %v23894_v49  ;;  %vm1141_vm5 = vcmp.gt.f32.partialorder %v1043_v4, 0.0  ;;  %v1213_v11 = vmul.f32 0.01, %v1043_v4  ;;  %v8899_v48 = vld [vmem:[#allocation2 + $0x193] sm:$0xff]  ;;  %v1282_v26 = vsel %vm1138_vm4, %v1032_v36, %v1210_v29  ;;  %v23910_v24 = vpack.c.bf16 %v3821_v19, %v3820_v22 }
 0x175   : > { %28058 = vst [vmem:[#allocation130_spill] sm:$0xff] %v23907_v45  ;;  %1357 = vst.msk [vmem:[#allocation2 + $0x1f0] sm:$0xff] %vm1294_vm3, %v1284_v54  ;;  %vm1139_vm6 = vcmp.gt.f32.partialorder %v1035_v59, 0.0  ;;  %v1211_v60 = vmul.f32 0.01, %v1035_v59  ;;  %v1436_v15 = vld [vmem:[#allocation2 + $0x1c0] sm:$0xff]  ;;  %19674 = vmatpush3.bf16.msra.mxu1 %v22603_v12 }
 0x176   : > { %v6366_v41 = vld [vmem:[#allocation2 + $0x1ba] sm:$0xff]  ;;  %28059 = vst [vmem:[#allocation131_spill] sm:$0xff] %v23910_v24  ;;  %1355 = vst.msk [vmem:[#allocation2 + $0x1e0] sm:$0xff] %vm1294_vm3, %v1282_v26  ;;  %v1285_v27 = vsel %vm1141_vm5, %v1043_v4, %v1213_v11  ;;  %v23913_v3 = vpack.c.bf16 %v1436_v15, %v1435_v7  ;;  %v1438_v14 = vld [vmem:[#allocation2 + $0x1d0] sm:$0xff]  ;;  %19747 = vmatprep.subr.bf16.mxu1 %v23904_v0  ;;  %v18781_v29 = vpop.f32.mrb[64].mxu0  ;;  %v23921_v26 = vpack.c.bf16 %v8899_v48, %v8898_v57 }
 0x177   : > { %v23915_v2 = vpack.c.bf16 %v6366_v41, %v6365_v47  ;;  %v1439_v17 = vld [vmem:[#allocation2 + $0x1d8] sm:$0xff]  ;;  %1358 = vst.msk [vmem:[#allocation2 + $0x1f8] sm:$0xff] %vm1294_vm3, %v1285_v27  ;;  %v1283_v36 = vsel %vm1139_vm6, %v1035_v59, %v1211_v60  ;;  %v1437_v54 = vld [vmem:[#allocation2 + $0x1c8] sm:$0xff]  ;;  %v1056_v4 = vadd.f32 %v23727_v50, %v18781_v29  ;;  %v1047_v7 = vpop.f32.mrb[65].mxu0 }
 0x178   : > { %28060 = vst [vmem:[#allocation132_spill] sm:$0xff] %v23913_v3  ;;  %v6369_v6 = vld [vmem:[#allocation2 + $0x1d2] sm:$0xff]  ;;  %v6367_v12 = vld [vmem:[#allocation2 + $0x1c2] sm:$0xff]  ;;  %v6368_v19 = vld [vmem:[#allocation2 + $0x1ca] sm:$0xff]  ;;  %v23919_v22 = vpack.c.bf16 %v1439_v17, %v1438_v14  ;;  %18847 = vmatprep.mubr.msk.bf16.mxu0 %vm1294_vm3, %v23913_v3  ;;  %v23929_v60 = vpack.c.bf16 %v1438_v14, %v1437_v54  ;;  %v1048_v59 = vadd.f32 %v23727_v50, %v1047_v7  ;;  %v18782_v11 = vpop.f32.mrb[66].mxu0 }
 0x179   : > { %28061 = vst [vmem:[#allocation133_spill] sm:$0xff] %v23915_v2  ;;  %28063 = vst [vmem:[#allocation135_spill] sm:$0xff] %v23921_v26  ;;  %19648 = vmatmul.mubr.msk.bf16.gmra.mrb[8].mxu1 %vm1294_vm3, %v23915_v2  ;;  %v23931_v47 = vpack.c.bf16 %v6368_v19, %v6367_v12  ;;  %v23934_v48 = vpack.c.bf16 %v6367_v12, %v6366_v41  ;;  %v23936_v57 = vpack.c.bf16 %v6369_v6, %v6368_v19  ;;  %v1050_v24 = vpop.f32.mrb[67].mxu0  ;;  %v3822_v14 = vld [vmem:[#allocation2 + $0x189] sm:$0xff]  ;;  %v3823_v7 = vld [vmem:[#allocation2 + $0x191] sm:$0xff] }
 0x17a   : > { %28062 = vst [vmem:[#allocation134_spill] sm:$0xff] %v23919_v22  ;;  %1356 = vst.msk [vmem:[#allocation2 + $0x1e8] sm:$0xff] %vm1294_vm3, %v1283_v36  ;;  %v23938_v27 = vpack.c.bf16 %v1437_v54, %v1436_v15  ;;  %v8901_v36 = vld [vmem:[#allocation2 + $0x1a3] sm:$0xff]  ;;  %vm1144_vm7 = vcmp.gt.f32.partialorder %v1056_v4, 0.0  ;;  %v1216_v29 = vmul.f32 0.01, %v1056_v4  ;;  %v1059_v26 = vadd.f32 %v23727_v50, %v18782_v11  ;;  %18848 = vmatmul.mubr.msk.bf16.gmra.mrb[124].mxu0 %vm1294_vm3, %v23929_v60 }
 0x17b   : > { %28064 = vst [vmem:[#allocation136_spill] sm:$0xff] %v23929_v60  ;;  %28065 = vst [vmem:[#allocation137_spill] sm:$0xff] %v23931_v47  ;;  %19651 = vmatprep.mubr.msk.bf16.mxu1 %vm1294_vm3, %v23931_v47  ;;  %vm1142_vm8 = vcmp.gt.f32.partialorder %v1048_v59, 0.0  ;;  %v1214_v41 = vmul.f32 0.01, %v1048_v59  ;;  %v1051_v12 = vadd.f32 %v23727_v50, %v1050_v24  ;;  %v8900_v15 = vld [vmem:[#allocation2 + $0x19b] sm:$0xff]  ;;  %v23949_v32 = vpack.c.bf16 %v3823_v7, %v3822_v14 }
 0x17c   : > { %28066 = vst [vmem:[#allocation138_spill] sm:$0xff] %v23934_v48  ;;  %28067 = vst [vmem:[#allocation139_spill] sm:$0xff] %v23936_v57  ;;  %v1288_v54 = vsel %vm1144_vm7, %v1056_v4, %v1216_v29  ;;  %vm1145_vm9 = vcmp.gt.f32.partialorder %v1059_v26, 0.0  ;;  %v1217_v19 = vmul.f32 0.01, %v1059_v26  ;;  %v3825_v45 = vld [vmem:[#allocation2 + $0x1a1] sm:$0xff]  ;;  %v23946_v3 = vpack.c.bf16 %v8901_v36, %v8900_v15 }
 0x17d   : > { %28068 = vst [vmem:[#allocation140_spill] sm:$0xff] %v23938_v27  ;;  %1361 = vst.msk [vmem:[#allocation2 + $0x210] sm:$0xff] %vm1294_vm3, %v1288_v54  ;;  %v1286_v11 = vsel %vm1142_vm8, %v1048_v59, %v1214_v41  ;;  %vm1143_vm10 = vcmp.gt.f32.partialorder %v1051_v12, 0.0  ;;  %v1215_v60 = vmul.f32 0.01, %v1051_v12  ;;  %v1440_v2 = vld [vmem:[#allocation2 + $0x1e0] sm:$0xff]  ;;  %v23959_v14 = vpack.c.bf16 %v3825_v45, %v3824_v37 }
 0x17e   : > { %28069 = vst [vmem:[#allocation141_spill] sm:$0xff] %v23946_v3  ;;  %v6370_v47 = vld [vmem:[#allocation2 + $0x1da] sm:$0xff]  ;;  %28070 = vst [vmem:[#allocation142_spill] sm:$0xff] %v23949_v32  ;;  %v1289_v24 = vsel %vm1145_vm9, %v1059_v26, %v1217_v19  ;;  %v23952_v10 = vpack.c.bf16 %v1440_v2, %v1439_v17  ;;  %v1442_v29 = vld [vmem:[#allocation2 + $0x1f0] sm:$0xff]  ;;  %v18785_v41 = vpop.f32.mrb[68].mxu0 }
 0x17f   : > { %1359 = vst.msk [vmem:[#allocation2 + $0x200] sm:$0xff] %vm1294_vm3, %v1286_v11  ;;  %v23954_v4 = vpack.c.bf16 %v6370_v47, %v6369_v6  ;;  %v1443_v36 = vld [vmem:[#allocation2 + $0x1f8] sm:$0xff]  ;;  %1362 = vst.msk [vmem:[#allocation2 + $0x218] sm:$0xff] %vm1294_vm3, %v1289_v24  ;;  %v1287_v59 = vsel %vm1143_vm10, %v1051_v12, %v1215_v60  ;;  %v1072_v17 = vadd.f32 %v23727_v50, %v18785_v41  ;;  %v1063_v6 = vpop.f32.mrb[69].mxu0  ;;  %v8902_v11 = vld [vmem:[#allocation2 + $0x1ab] sm:$0xff] }
 0x180   : > { %28071 = vst [vmem:[#allocation143_spill] sm:$0xff] %v23952_v10  ;;  %v6373_v15 = vld [vmem:[#allocation2 + $0x1f2] sm:$0xff]  ;;  %v23957_v18 = vpack.c.bf16 %v1443_v36, %v1442_v29  ;;  %28074 = vst [vmem:[#allocation146_spill] sm:$0xff] %v23959_v14  ;;  %18851 = vmatprep.mubr.msk.bf16.mxu0 %vm1294_vm3, %v23952_v10  ;;  %v1064_v7 = vadd.f32 %v23727_v50, %v1063_v6  ;;  %v18786_v12 = vpop.f32.mrb[70].mxu0  ;;  %v8904_v6 = vld [vmem:[#allocation2 + $0x1bb] sm:$0xff] }
 0x181   : > { %28072 = vst [vmem:[#allocation144_spill] sm:$0xff] %v23954_v4  ;;  %v1441_v54 = vld [vmem:[#allocation2 + $0x1e8] sm:$0xff]  ;;  %1360 = vst.msk [vmem:[#allocation2 + $0x208] sm:$0xff] %vm1294_vm3, %v1287_v59  ;;  %19652 = vmatmul.mubr.msk.bf16.gmra.mrb[12].mxu1 %vm1294_vm3, %v23954_v4  ;;  %v8903_v24 = vld [vmem:[#allocation2 + $0x1b3] sm:$0xff]  ;;  %vm1148_vm11 = vcmp.gt.f32.partialorder %v1072_v17, 0.0  ;;  %v1075_v41 = vadd.f32 %v23727_v50, %v18786_v12  ;;  %v1066_v14 = vpop.f32.mrb[71].mxu0 }
 0x182   : > { %v6371_v3 = vld [vmem:[#allocation2 + $0x1e2] sm:$0xff]  ;;  %v6372_v34 = vld [vmem:[#allocation2 + $0x1ea] sm:$0xff]  ;;  %28073 = vst [vmem:[#allocation145_spill] sm:$0xff] %v23957_v18  ;;  %v23967_v26 = vpack.c.bf16 %v1442_v29, %v1441_v54  ;;  %v23976_v19 = vpack.c.bf16 %v1441_v54, %v1440_v2  ;;  %v1220_v59 = vmul.f32 0.01, %v1072_v17  ;;  %vm1146_vm12 = vcmp.gt.f32.partialorder %v1064_v7, 0.0 }
 0x183   : > { %v23969_v60 = vpack.c.bf16 %v6372_v34, %v6371_v3  ;;  %v23972_v37 = vpack.c.bf16 %v6371_v3, %v6370_v47  ;;  %v23974_v45 = vpack.c.bf16 %v6373_v15, %v6372_v34  ;;  %v8905_v29 = vld [vmem:[#allocation2 + $0x1c3] sm:$0xff]  ;;  %v1218_v3 = vmul.f32 0.01, %v1064_v7  ;;  %v3827_v32 = vld [vmem:[#allocation2 + $0x1b1] sm:$0xff]  ;;  %v22933_v5 = vld [vmem:[#allocation2 + $0x3a] sm:$0xff] }
 0x184   : > { %28075 = vst [vmem:[#allocation147_spill] sm:$0xff] %v23967_v26  ;;  %28079 = vst [vmem:[#allocation151_spill] sm:$0xff] %v23976_v19  ;;  %18852 = vmatmul.mubr.msk.bf16.gmra.mrb[128].mxu0 %vm1294_vm3, %v23967_v26  ;;  %v1067_v34 = vadd.f32 %v23727_v50, %v1066_v14  ;;  %v3826_v2 = vld [vmem:[#allocation2 + $0x1a9] sm:$0xff]  ;;  %v1292_v47 = vsel %vm1148_vm11, %v1072_v17, %v1220_v59  ;;  %vm1149_vm13 = vcmp.gt.f32.partialorder %v1075_v41, 0.0  ;;  %v1221_v54 = vmul.f32 0.01, %v1075_v41 }
 0x185   : > { %28076 = vst [vmem:[#allocation148_spill] sm:$0xff] %v23969_v60  ;;  %28077 = vst [vmem:[#allocation149_spill] sm:$0xff] %v23972_v37  ;;  %19655 = vmatprep.mubr.msk.bf16.mxu1 %vm1294_vm3, %v23969_v60  ;;  %v3829_v10 = vld [vmem:[#allocation2 + $0x1c1] sm:$0xff]  ;;  %v23984_v12 = vpack.c.bf16 %v8903_v24, %v8902_v11  ;;  %v1290_v26 = vsel %vm1146_vm12, %v1064_v7, %v1218_v3  ;;  %v8906_v19 = vld [vmem:[#allocation2 + $0x1cb] sm:$0xff]  ;;  %v23987_v50 = vpack.c.bf16 %v8905_v29, %v8904_v6 }
 0x186   : > { %28078 = vst [vmem:[#allocation150_spill] sm:$0xff] %v23974_v45  ;;  %1365 = vst.msk [vmem:[#allocation2 + $0x230] sm:$0xff] %vm1294_vm3, %v1292_v47  ;;  %vm1147_vm14 = vcmp.gt.f32.partialorder %v1067_v34, 0.0  ;;  %v1219_v4 = vmul.f32 0.01, %v1067_v34  ;;  %v1444_v60 = vld [vmem:[#allocation2 + $0x200] sm:$0xff]  ;;  %v1293_v14 = vsel %vm1149_vm13, %v1075_v41, %v1221_v54  ;;  %v23999_v57 = vpack.c.bf16 %v3827_v32, %v3826_v2 }
 0x187   : > { %28080 = vst [vmem:[#allocation152_spill] sm:$0xff] %v23984_v12  ;;  %v6374_v18 = vld [vmem:[#allocation2 + $0x1fa] sm:$0xff]  ;;  %v8909_v45 = vld [vmem:[#allocation2 + $0x1e3] sm:$0xff]  ;;  %28081 = vst [vmem:[#allocation153_spill] sm:$0xff] %v23987_v50  ;;  %v23991_v17 = vpack.c.bf16 %v1444_v60, %v1443_v36 }
 0x188   : > { %v8907_v22 = vld [vmem:[#allocation2 + $0x1d3] sm:$0xff]  ;;  %1363 = vst.msk [vmem:[#allocation2 + $0x220] sm:$0xff] %vm1294_vm3, %v1290_v26  ;;  %v23993_v11 = vpack.c.bf16 %v6374_v18, %v6373_v15  ;;  %v3830_v47 = vld [vmem:[#allocation2 + $0x1c9] sm:$0xff]  ;;  %v3833_v52 = vld [vmem:[#allocation2 + $0x1e1] sm:$0xff]  ;;  %v1291_v29 = vsel %vm1147_vm14, %v1067_v34, %v1219_v4 }
 0x189   : > { %28082 = vst [vmem:[#allocation154_spill] sm:$0xff] %v23991_v17  ;;  %v1446_v24 = vld [vmem:[#allocation2 + $0x210] sm:$0xff]  ;;  %v1447_v59 = vld [vmem:[#allocation2 + $0x218] sm:$0xff]  ;;  %1366 = vst.msk [vmem:[#allocation2 + $0x238] sm:$0xff] %vm1294_vm3, %v1293_v14  ;;  %18855 = vmatprep.mubr.msk.bf16.mxu0 %vm1294_vm3, %v23991_v17 }
 0x18a   : > { %28083 = vst [vmem:[#allocation155_spill] sm:$0xff] %v23993_v11  ;;  %v6377_v7 = vld [vmem:[#allocation2 + $0x212] sm:$0xff]  ;;  %v1445_v26 = vld [vmem:[#allocation2 + $0x208] sm:$0xff]  ;;  %v23997_v36 = vpack.c.bf16 %v1447_v59, %v1446_v24  ;;  %v8908_v15 = vld [vmem:[#allocation2 + $0x1db] sm:$0xff]  ;;  %19656 = vmatmul.mubr.msk.bf16.gmra.mrb[16].mxu1 %vm1294_vm3, %v23993_v11 }
 0x18b   : > { %v3828_v3 = vld [vmem:[#allocation2 + $0x1b9] sm:$0xff]  ;;  %v8910_v12 = vld [vmem:[#allocation2 + $0x1eb] sm:$0xff]  ;;  %v6375_v6 = vld [vmem:[#allocation2 + $0x202] sm:$0xff]  ;;  %28085 = vst [vmem:[#allocation157_spill] sm:$0xff] %v23999_v57  ;;  %v24006_v14 = vpack.c.bf16 %v1446_v24, %v1445_v26  ;;  %v24016_v2 = vpack.c.bf16 %v1445_v26, %v1444_v60  ;;  %v24026_v11 = vpack.c.bf16 %v8909_v45, %v8908_v15 }
 0x18c   : > { %v3831_v27 = vld [vmem:[#allocation2 + $0x1d1] sm:$0xff]  ;;  %28084 = vst [vmem:[#allocation156_spill] sm:$0xff] %v23997_v36  ;;  %v3834_v54 = vld [vmem:[#allocation2 + $0x1e9] sm:$0xff]  ;;  %1364 = vst.msk [vmem:[#allocation2 + $0x228] sm:$0xff] %vm1294_vm3, %v1291_v29  ;;  %v24010_v34 = vpack.c.bf16 %v6375_v6, %v6374_v18  ;;  %v24018_v51 = vpack.c.bf16 %v3829_v10, %v3828_v3 }
 0x18d   : > { %v8911_v37 = vld [vmem:[#allocation2 + $0x1f3] sm:$0xff]  ;;  %v6376_v41 = vld [vmem:[#allocation2 + $0x20a] sm:$0xff]  ;;  %28086 = vst [vmem:[#allocation158_spill] sm:$0xff] %v24006_v14  ;;  %v3837_v28 = vld [vmem:[#allocation2 + $0x201] sm:$0xff]  ;;  %18856 = vmatmul.mubr.msk.bf16.gmra.mrb[132].mxu0 %vm1294_vm3, %v24006_v14  ;;  %v24030_v26 = vpack.c.bf16 %v3831_v27, %v3830_v47 }
 0x18e   : > { %v3835_v50 = vld [vmem:[#allocation2 + $0x1f1] sm:$0xff]  ;;  %v24008_v4 = vpack.c.bf16 %v6376_v41, %v6375_v6  ;;  %28088 = vst [vmem:[#allocation160_spill] sm:$0xff] %v24010_v34  ;;  %v8913_v36 = vld [vmem:[#allocation2 + $0x203] sm:$0xff]  ;;  %v24014_v32 = vpack.c.bf16 %v6377_v7, %v6376_v41  ;;  %28091 = vst [vmem:[#allocation163_spill] sm:$0xff] %v24016_v2  ;;  %v24024_v6 = vpack.c.bf16 %v8907_v22, %v8906_v19 }
 0x18f   : > { %v8914_v49 = vld [vmem:[#allocation2 + $0x20b] sm:$0xff]  ;;  %v8915_v57 = vld [vmem:[#allocation2 + $0x213] sm:$0xff]  ;;  %28092 = vst [vmem:[#allocation164_spill] sm:$0xff] %v24018_v51  ;;  %v8912_v24 = vld [vmem:[#allocation2 + $0x1fb] sm:$0xff]  ;;  %v24034_v10 = vpack.c.bf16 %v8911_v37, %v8910_v12  ;;  %v24038_v51 = vpack.c.bf16 %v3835_v50, %v3834_v54 }
 0x190   : > { %28087 = vst [vmem:[#allocation159_spill] sm:$0xff] %v24008_v4  ;;  %v24012_v48 = vld [vmem:[#allocation2 + $0x2c] sm:$0xff]  ;;  %28090 = vst [vmem:[#allocation162_spill] sm:$0xff] %v24014_v32  ;;  %19659 = vmatprep.mubr.msk.bf16.mxu1 %vm1294_vm3, %v24008_v4  ;;  %v3832_v18 = vld [vmem:[#allocation2 + $0x1d9] sm:$0xff]  ;;  %v24036_v3 = vpack.c.bf16 %v8913_v36, %v8912_v24  ;;  %v24042_v4 = vpack.c.bf16 %v8915_v57, %v8914_v49 }
 0x191   : > { %28089 = vst [vmem:[#allocation161_spill] sm:$0xff] %v24012_v48  ;;  %v3838_v29 = vld [vmem:[#allocation2 + $0x209] sm:$0xff]  ;;  %v3839_v17 = vld [vmem:[#allocation2 + $0x211] sm:$0xff]  ;;  %28093 = vst [vmem:[#allocation165_spill] sm:$0xff] %v24024_v6  ;;  %v24032_v2 = vpack.c.bf16 %v3833_v52, %v3832_v18 }
 0x192   : > { %28094 = vst [vmem:[#allocation166_spill] sm:$0xff] %v24026_v11  ;;  %v24028_v41 = vld [vmem:[#allocation2 + $0x34] sm:$0xff]  ;;  %28096 = vst [vmem:[#allocation168_spill] sm:$0xff] %v24030_v26  ;;  %v24044_v22 = vpack.c.bf16 %v3839_v17, %v3838_v29  ;;  %v1448_v45 = vld [vmem:[#allocation2 + $0x220] sm:$0xff] }
 0x193   : > { %28095 = vst [vmem:[#allocation167_spill] sm:$0xff] %v24028_v41  ;;  %v3836_v60 = vld [vmem:[#allocation2 + $0x1f9] sm:$0xff]  ;;  %28097 = vst [vmem:[#allocation169_spill] sm:$0xff] %v24032_v2  ;;  %v24050_v27 = vpack.c.bf16 %v1448_v45, %v1447_v59  ;;  %v1450_v12 = vld [vmem:[#allocation2 + $0x230] sm:$0xff] }
 0x194   : > { %28098 = vst [vmem:[#allocation170_spill] sm:$0xff] %v24034_v10  ;;  %28099 = vst [vmem:[#allocation171_spill] sm:$0xff] %v24036_v3  ;;  %v24040_v14 = vpack.c.bf16 %v3837_v28, %v3836_v60  ;;  %v6378_v19 = vld [vmem:[#allocation2 + $0x21a] sm:$0xff]  ;;  %v6381_v47 = vld [vmem:[#allocation2 + $0x232] sm:$0xff] }
 0x195   : > { %28100 = vst [vmem:[#allocation172_spill] sm:$0xff] %v24038_v51  ;;  %28102 = vst [vmem:[#allocation174_spill] sm:$0xff] %v24042_v4  ;;  %v24046_v15 = vld [vmem:[#allocation2 + $0x240] sm:$0xff]  ;;  %v24052_v37 = vpack.c.bf16 %v6378_v19, %v6377_v7  ;;  %v1451_v50 = vld [vmem:[#allocation2 + $0x238] sm:$0xff]  ;;  %18859 = vmatprep.mubr.msk.bf16.mxu0 %vm1294_vm3, %v24050_v27 }
 0x196   : > { %28101 = vst [vmem:[#allocation173_spill] sm:$0xff] %v24040_v14  ;;  %28103 = vst [vmem:[#allocation175_spill] sm:$0xff] %v24044_v22  ;;  %v1449_v28 = vld [vmem:[#allocation2 + $0x228] sm:$0xff]  ;;  %v24054_v57 = vpack.c.bf16 %v1451_v50, %v1450_v12  ;;  %v8916_v17 = vld [vmem:[#allocation2 + $0x21b] sm:$0xff]  ;;  %v24067_v60 = vpack.c.bf16 %v24046_v15, %v1451_v50 }
 0x197   : > { %28104 = vst [vmem:[#allocation176_spill] sm:$0xff] %v24046_v15  ;;  %28105 = vst [vmem:[#allocation177_spill] sm:$0xff] %v24050_v27  ;;  %v6379_v36 = vld [vmem:[#allocation2 + $0x222] sm:$0xff]  ;;  %v6380_v49 = vld [vmem:[#allocation2 + $0x22a] sm:$0xff]  ;;  %19660 = vmatmul.mubr.msk.bf16.gmra.mrb[20].mxu1 %vm1294_vm3, %v24052_v37  ;;  %v24060_v54 = vpack.c.bf16 %v1450_v12, %v1449_v28  ;;  %v24071_v48 = vpack.c.bf16 %v1449_v28, %v1448_v45 }
 0x198   : > { %28106 = vst [vmem:[#allocation178_spill] sm:$0xff] %v24052_v37  ;;  %28107 = vst [vmem:[#allocation179_spill] sm:$0xff] %v24054_v57  ;;  %v24062_v59 = vpack.c.bf16 %v6380_v49, %v6379_v36  ;;  %v24064_v7 = vpack.c.bf16 %v6379_v36, %v6378_v19  ;;  %v8917_v29 = vld [vmem:[#allocation2 + $0x223] sm:$0xff]  ;;  %v8918_v18 = vld [vmem:[#allocation2 + $0x22b] sm:$0xff]  ;;  %v24069_v52 = vpack.c.bf16 %v6381_v47, %v6380_v49 }
 0x199   : > { %28108 = vst [vmem:[#allocation180_spill] sm:$0xff] %v24060_v54  ;;  %v3840_v24 = vld [vmem:[#allocation2 + $0x219] sm:$0xff]  ;;  %28111 = vst [vmem:[#allocation183_spill] sm:$0xff] %v24067_v60  ;;  %v3841_v41 = vld [vmem:[#allocation2 + $0x221] sm:$0xff]  ;;  %18860 = vmatmul.mubr.msk.bf16.gmra.mrb[136].mxu0 %vm1294_vm3, %v24060_v54  ;;  %v24077_v12 = vpack.c.bf16 %v8917_v29, %v8916_v17 }
 0x19a   : > { %28109 = vst [vmem:[#allocation181_spill] sm:$0xff] %v24062_v59  ;;  %28110 = vst [vmem:[#allocation182_spill] sm:$0xff] %v24064_v7  ;;  %v3842_v22 = vld [vmem:[#allocation2 + $0x229] sm:$0xff]  ;;  %v8919_v4 = vld [vmem:[#allocation2 + $0x233] sm:$0xff]  ;;  %19663 = vmatprep.mubr.msk.bf16.mxu1 %vm1294_vm3, %v24062_v59  ;;  %v24079_v36 = vpack.c.bf16 %v3841_v41, %v3840_v24  ;;  %18863 = vmatprep.mubr.msk.bf16.mxu0 %vm1294_vm3, %v24067_v60 }
 0x19b   : > { %28112 = vst [vmem:[#allocation184_spill] sm:$0xff] %v24069_v52  ;;  %28113 = vst [vmem:[#allocation185_spill] sm:$0xff] %v24071_v48  ;;  %v3843_v19 = vld [vmem:[#allocation2 + $0x231] sm:$0xff]  ;;  %v24083_v50 = vld [vmem:[#allocation2 + $0x23a] sm:$0xff]  ;;  %v24089_v49 = vpack.c.bf16 %v8919_v4, %v8918_v18 }
 0x19c   : > { %28114 = vst [vmem:[#allocation186_spill] sm:$0xff] %v24077_v12  ;;  %28115 = vst [vmem:[#allocation187_spill] sm:$0xff] %v24079_v36  ;;  %v24085_v45 = vld [vmem:[#allocation2 + $0x248] sm:$0xff]  ;;  %v24087_v28 = vld [vmem:[#allocation2 + $0x250] sm:$0xff]  ;;  %v24091_v14 = vpack.c.bf16 %v3843_v19, %v3842_v22  ;;  %v24094_v51 = vpack.c.bf16 %v24083_v50, %v6381_v47 }
 0x19d   : > { %28116 = vst [vmem:[#allocation188_spill] sm:$0xff] %v24083_v50  ;;  %28117 = vst [vmem:[#allocation189_spill] sm:$0xff] %v24085_v45  ;;  %v6314_v17 = vld [vmem:[#allocation2 + $0x1a] sm:$0xff]  ;;  %v24098_v41 = vpack.c.bf16 %v24087_v28, %v24085_v45  ;;  %v1381_v24 = vld [vmem:[#allocation2 + $0x8] sm:$0xff] }
 0x19e   : > { %28118 = vst [vmem:[#allocation190_spill] sm:$0xff] %v24087_v28  ;;  %28119 = vst [vmem:[#allocation191_spill] sm:$0xff] %v24089_v49  ;;  %v1380_v29 = vld [vmem:[#allocation2] sm:$0xff]  ;;  %v11396_v4 = vld [vmem:[#allocation2 + $0x4c] sm:$0xff] }
 0x19f   : > { %28120 = vst [vmem:[#allocation192_spill] sm:$0xff] %v24091_v14  ;;  %28121 = vst [vmem:[#allocation193_spill] sm:$0xff] %v24094_v51  ;;  %v22929_v36 = vld [vmem:[#allocation2 + $0x22] sm:$0xff]  ;;  %v11397_v18 = vld [vmem:[#allocation2 + $0x54] sm:$0xff]  ;;  %19664 = vmatmul.mubr.msk.bf16.gmra.mrb[24].mxu1 %vm1294_vm3, %v24094_v51 }
 0x1a0   : > { %28122 = vst [vmem:[#allocation194_spill] sm:$0xff] %v24098_v41  ;;  %v6965_v12 = vpack.c.bf16 %v22929_v36, %v6314_v17  ;;  %v24100_v3 = vld [vmem:[#allocation2 + $0x24] sm:$0xff]  ;;  %v24104_v22 = vld [vmem:[#allocation2 + $0x10] sm:$0xff]  ;;  %v1464_v36 = vpack.c.bf16 %v1381_v24, %v1380_v29  ;;  %v24109_v17 = vld [vmem:[#allocation2 + $0x1c] sm:$0xff]  ;;  %v24129_v9 = vpack.c.bf16 %v11397_v18, %v11396_v4 }
 0x1a1   : > { %28123 = vst [vmem:[#allocation195_spill] sm:$0xff] %v24100_v3  ;;  %v24102_v10 = vld [vmem:[#allocation2 + $0x44] sm:$0xff]  ;;  %v11400_v19 = vld [vmem:[#allocation2 + $0x6c] sm:$0xff]  ;;  %v11401_v14 = vld [vmem:[#allocation2 + $0x74] sm:$0xff]  ;;  %18864 = vmatmul.mubr.msk.bf16.gmra.mrb[140].mxu0 %vm1294_vm3, %v24098_v41 }
 0x1a2   : > { %28124 = vst [vmem:[#allocation196_spill] sm:$0xff] %v24102_v10  ;;  %v11399_v47 = vld [vmem:[#allocation2 + $0x64] sm:$0xff]  ;;  %v11404_v2 = vld [vmem:[#allocation2 + $0x8c] sm:$0xff]  ;;  %v11405_v26 = vld [vmem:[#allocation2 + $0x94] sm:$0xff]  ;;  %19675 = vmatprep.mubr.msk.bf16.mxu1 %vm1294_vm3, %v6965_v12  ;;  %18875 = vmatprep.mubr.msk.bf16.mxu0 %vm1294_vm3, %v1464_v36  ;;  %v24133_v21 = vpack.c.bf16 %v11401_v14, %v11400_v19 }
 0x1a3   : > { %v11403_v49 = vld [vmem:[#allocation2 + $0x84] sm:$0xff]  ;;  %28125 = vst [vmem:[#allocation197_spill] sm:$0xff] %v24109_v17  ;;  %v24111_v11 = vld [vmem:[#allocation2 + $0x3c] sm:$0xff]  ;;  %v11408_v60 = vld [vmem:[#allocation2 + $0xac] sm:$0xff]  ;;  %v24137_v25 = vpack.c.bf16 %v11405_v26, %v11404_v2 }
 0x1a4   : > { %28126 = vst [vmem:[#allocation198_spill] sm:$0xff] %v24111_v11  ;;  %v11407_v6 = vld [vmem:[#allocation2 + $0xa4] sm:$0xff]  ;;  %v11409_v54 = vld [vmem:[#allocation2 + $0xb4] sm:$0xff]  ;;  %v11412_v28 = vld [vmem:[#allocation2 + $0xcc] sm:$0xff] }
 0x1a5   : > { %v11411_v27 = vld [vmem:[#allocation2 + $0xc4] sm:$0xff]  ;;  %v11413_v45 = vld [vmem:[#allocation2 + $0xd4] sm:$0xff]  ;;  %v11398_v15 = vld [vmem:[#allocation2 + $0x5c] sm:$0xff]  ;;  %28127 = vst [vmem:[#allocation199_spill] sm:$0xff] %v24129_v9  ;;  %v24141_v11 = vpack.c.bf16 %v11409_v54, %v11408_v60 }
 0x1a6   : > { %v11402_v51 = vld [vmem:[#allocation2 + $0x7c] sm:$0xff]  ;;  %v11415_v59 = vld [vmem:[#allocation2 + $0xe4] sm:$0xff]  ;;  %v11416_v37 = vld [vmem:[#allocation2 + $0xec] sm:$0xff]  ;;  %v24131_v8 = vpack.c.bf16 %v11399_v47, %v11398_v15  ;;  %28129 = vst [vmem:[#allocation201_spill] sm:$0xff] %v24133_v21  ;;  %v24145_v3 = vpack.c.bf16 %v11413_v45, %v11412_v28 }
 0x1a7   : > { %v11417_v57 = vld [vmem:[#allocation2 + $0xf4] sm:$0xff]  ;;  %v11419_v12 = vld [vmem:[#allocation2 + $0x104] sm:$0xff]  ;;  %v11420_v29 = vld [vmem:[#allocation2 + $0x10c] sm:$0xff]  ;;  %v24135_v31 = vpack.c.bf16 %v11403_v49, %v11402_v51  ;;  %28131 = vst [vmem:[#allocation203_spill] sm:$0xff] %v24137_v25 }
 0x1a8   : > { %v11421_v24 = vld [vmem:[#allocation2 + $0x114] sm:$0xff]  ;;  %v22931_v50 = vld [vmem:[#allocation2 + $0x2a] sm:$0xff]  ;;  %v11406_v34 = vld [vmem:[#allocation2 + $0x9c] sm:$0xff]  ;;  %28128 = vst [vmem:[#allocation200_spill] sm:$0xff] %v24131_v8  ;;  %v24149_v2 = vpack.c.bf16 %v11417_v57, %v11416_v37 }
 0x1a9   : > { %v24115_v48 = vld [vmem:[#allocation2 + $0x18] sm:$0xff]  ;;  %v11423_v56 = vld [vmem:[#allocation2 + $0x124] sm:$0xff]  ;;  %v11424_v61 = vld [vmem:[#allocation2 + $0x12c] sm:$0xff]  ;;  %28130 = vst [vmem:[#allocation202_spill] sm:$0xff] %v24135_v31  ;;  %v24139_v9 = vpack.c.bf16 %v11407_v6, %v11406_v34  ;;  %v24153_v19 = vpack.c.bf16 %v11421_v24, %v11420_v29 }
 0x1aa   : > { %v22932_v7 = vld [vmem:[#allocation2 + $0x32] sm:$0xff]  ;;  %v11410_v41 = vld [vmem:[#allocation2 + $0xbc] sm:$0xff]  ;;  %v11427_v40 = vld [vmem:[#allocation2 + $0x144] sm:$0xff]  ;;  %28133 = vst [vmem:[#allocation205_spill] sm:$0xff] %v24141_v11 }
 0x1ab   : > { %v6966_v32 = vpack.c.bf16 %v22932_v7, %v22931_v50  ;;  %v11425_v46 = vld [vmem:[#allocation2 + $0x134] sm:$0xff]  ;;  %v11428_v16 = vld [vmem:[#allocation2 + $0x14c] sm:$0xff]  ;;  %v22934_v58 = vld [vmem:[#allocation2 + $0x42] sm:$0xff]  ;;  %28132 = vst [vmem:[#allocation204_spill] sm:$0xff] %v24139_v9  ;;  %v24143_v10 = vpack.c.bf16 %v11411_v27, %v11410_v41 }
 0x1ac   : > { %v11429_v23 = vld [vmem:[#allocation2 + $0x154] sm:$0xff]  ;;  %v6967_v1 = vpack.c.bf16 %v22934_v58, %v22933_v5  ;;  %v24123_v52 = vld [vmem:[%s27609_s3 + $0x188] sm:$0xff]   ;;  %v11414_v36 = vld [vmem:[#allocation2 + $0xdc] sm:$0xff]  ;;  %28135 = vst [vmem:[#allocation207_spill] sm:$0xff] %v24145_v3  ;;  %v24158_v45 = vpack.c.bf16 %v11425_v46, %v11424_v61  ;;  %v28147_v61 = vpack.c.bf16 %v24115_v48, %v24104_v22 }
 0x1ad   : > { %v11418_v62 = vld [vmem:[#allocation2 + $0xfc] sm:$0xff]  ;;  %v11431_v33 = vld [vmem:[#allocation2 + $0x164] sm:$0xff]  ;;  %v11432_v7 = vld [vmem:[#allocation2 + $0x16c] sm:$0xff]  ;;  %28134 = vst [vmem:[#allocation206_spill] sm:$0xff] %v24143_v10  ;;  %v24147_v49 = vpack.c.bf16 %v11415_v59, %v11414_v36  ;;  %19676 = vmatmul.mubr.msk.bf16.vlgmr.msra.gmra.mrb[28].mxu1 %vm1294_vm3, %v6966_v32  ;;  %v24162_v59 = vpack.c.bf16 %v11429_v23, %v11428_v16 }
 0x1ae   : > { %v11433_v50 = vld [vmem:[#allocation2 + $0x174] sm:$0xff]  ;;  %v11435_v63 = vld [vmem:[#allocation2 + $0x184] sm:$0xff]  ;;  %v11422_v58 = vld [vmem:[#allocation2 + $0x11c] sm:$0xff]  ;;  %28137 = vst [vmem:[#allocation209_spill] sm:$0xff] %v24149_v2  ;;  %v24151_v26 = vpack.c.bf16 %v11419_v12, %v11418_v62  ;;  %19679 = vmatprep.mubr.msk.bf16.mxu1 %vm1294_vm3, %v6967_v1  ;;  %19748 = vmatpush3.bf16.msra.mxu1 %v23904_v0 }
 0x1af   : > { %v11426_v5 = vld [vmem:[#allocation2 + $0x13c] sm:$0xff]  ;;  %v11436_v13 = vld [vmem:[#allocation2 + $0x18c] sm:$0xff]  ;;  %v11437_v20 = vld [vmem:[#allocation2 + $0x194] sm:$0xff]  ;;  %28136 = vst [vmem:[#allocation208_spill] sm:$0xff] %v24147_v49  ;;  %v24156_v60 = vpack.c.bf16 %v11423_v56, %v11422_v58  ;;  %v24168_v41 = vpack.c.bf16 %v11433_v50, %v11432_v7  ;;  %18876 = vmatmul.mubr.msk.bf16.vlgmr.msra.gmra.mrb[72].mxu0 %vm1294_vm3, %v28147_v61  ;;  %19749 = vmatprep.subr.bf16.mxu1 %v24123_v52 }
 0x1b0   : > { %v11439_v43 = vld [vmem:[#allocation2 + $0x1a4] sm:$0xff]  ;;  %v11440_v38 = vld [vmem:[#allocation2 + $0x1ac] sm:$0xff]  ;;  %v11441_v53 = vld [vmem:[#allocation2 + $0x1b4] sm:$0xff]  ;;  %28138 = vst [vmem:[#allocation210_spill] sm:$0xff] %v24151_v26  ;;  %v24160_v28 = vpack.c.bf16 %v11427_v40, %v11426_v5  ;;  %v24183_v1 = vpack.c.bf16 %v11437_v20, %v11436_v13  ;;  %v28151_v40 = vpack.c.bf16 %v23433_v42, %v23426_v35 }
 0x1b1   : > { %v11430_v30 = vld [vmem:[#allocation2 + $0x15c] sm:$0xff]  ;;  %v11443_v55 = vld [vmem:[#allocation2 + $0x1c4] sm:$0xff]  ;;  %v11444_v4 = vld [vmem:[#allocation2 + $0x1cc] sm:$0xff]  ;;  %28139 = vst [vmem:[#allocation211_spill] sm:$0xff] %v24153_v19  ;;  %v24187_v16 = vpack.c.bf16 %v11441_v53, %v11440_v38 }
 0x1b2   : > { %v11434_v17 = vld [vmem:[#allocation2 + $0x17c] sm:$0xff]  ;;  %v11445_v18 = vld [vmem:[#allocation2 + $0x1d4] sm:$0xff]  ;;  %v11447_v14 = vld [vmem:[#allocation2 + $0x1e4] sm:$0xff]  ;;  %28140 = vst [vmem:[#allocation212_spill] sm:$0xff] %v24156_v60  ;;  %v24166_v32 = vpack.c.bf16 %v11431_v33, %v11430_v30  ;;  %18879 = vmatprep.mubr.msk.bf16.mxu0 %vm1294_vm3, %v28151_v40  ;;  %19750 = vmatpush3.bf16.msra.mxu1 %v24123_v52 }
 0x1b3   : > { %v11438_v15 = vld [vmem:[#allocation2 + $0x19c] sm:$0xff]  ;;  %v11448_v47 = vld [vmem:[#allocation2 + $0x1ec] sm:$0xff]  ;;  %v11449_v51 = vld [vmem:[#allocation2 + $0x1f4] sm:$0xff]  ;;  %28141 = vst [vmem:[#allocation213_spill] sm:$0xff] %v24158_v45  ;;  %v24170_v12 = vpack.c.bf16 %v11435_v63, %v11434_v17  ;;  %v24198_v22 = vpack.c.bf16 %v11445_v18, %v11444_v4 }
 0x1b4   : > { %v11442_v34 = vld [vmem:[#allocation2 + $0x1bc] sm:$0xff]  ;;  %v11451_v6 = vld [vmem:[#allocation2 + $0x204] sm:$0xff]  ;;  %v11452_v27 = vld [vmem:[#allocation2 + $0x20c] sm:$0xff]  ;;  %28142 = vst [vmem:[#allocation214_spill] sm:$0xff] %v24160_v28  ;;  %v24185_v63 = vpack.c.bf16 %v11439_v43, %v11438_v15  ;;  %v24202_v43 = vpack.c.bf16 %v11449_v51, %v11448_v47 }
 0x1b5   : > { %v11453_v54 = vld [vmem:[#allocation2 + $0x214] sm:$0xff]  ;;  %28143 = vst [vmem:[#allocation215_spill] sm:$0xff] %v24162_v59  ;;  %v11455_v62 = vld [vmem:[#allocation2 + $0x224] sm:$0xff]  ;;  %v11456_v37 = vld [vmem:[#allocation2 + $0x22c] sm:$0xff]  ;;  %v24196_v48 = vpack.c.bf16 %v11443_v55, %v11442_v34 }
 0x1b6   : > { %v11457_v57 = vld [vmem:[#allocation2 + $0x234] sm:$0xff]  ;;  %28144 = vst [vmem:[#allocation216_spill] sm:$0xff] %v24166_v32  ;;  %28145 = vst [vmem:[#allocation217_spill] sm:$0xff] %v24168_v41  ;;  %v22608_v30 = vld [vmem:[%s27609_s3 + $0x140] sm:$0xff]   ;;  %v24206_v35 = vpack.c.bf16 %v11453_v54, %v11452_v27 }
 0x1b7   : > { %28146 = vst [vmem:[#allocation218_spill] sm:$0xff] %v24170_v12  ;;  %v22607_v23 = vld [vmem:[%s27609_s3 + $0x190] sm:$0xff]   ;;  %v11446_v33 = vld [vmem:[#allocation2 + $0x1dc] sm:$0xff]  ;;  %28148 = vst [vmem:[#allocation219_spill] sm:$0xff] %v24183_v1  ;;  %18947 = vmatprep.subr.bf16.mxu0 %v22608_v30  ;;  %v24210_v38 = vpack.c.bf16 %v11457_v57, %v11456_v37  ;;  %18880 = vmatmul.mubr.msk.bf16.gmra.mrb[76].mxu0 %vm1294_vm3, %v23438_v44 }
 0x1b8   : > { %28149 = vst [vmem:[#allocation220_spill] sm:$0xff] %v24185_v63  ;;  %28150 = vst [vmem:[#allocation221_spill] sm:$0xff] %v24187_v16  ;;  %v22610_v56 = vld [vmem:[%s27609_s3 + $0x148] sm:$0xff]   ;;  %v11450_v46 = vld [vmem:[#allocation2 + $0x1fc] sm:$0xff]  ;;  %v24200_v13 = vpack.c.bf16 %v11447_v14, %v11446_v33  ;;  %18948 = vmatpush3.bf16.msra.mxu0 %v22608_v30  ;;  %19751 = vmatprep.subr.bf16.mxu1 %v22607_v23 }
 0x1b9   : > { %v11454_v0 = vld [vmem:[#allocation2 + $0x21c] sm:$0xff]  ;;  %28152 = vst [vmem:[#allocation222_spill] sm:$0xff] %v24196_v48  ;;  %28153 = vst [vmem:[#allocation223_spill] sm:$0xff] %v24198_v22  ;;  %v24204_v53 = vpack.c.bf16 %v11451_v6, %v11450_v46  ;;  %v22935_v55 = vld [vmem:[#allocation2 + $0x4a] sm:$0xff]  ;;  %18949 = vmatprep.subr.bf16.mxu0 %v22610_v56  ;;  %19752 = vmatpush3.bf16.msra.mxu1 %v22607_v23 }
 0x1ba   : > { %28154 = vst [vmem:[#allocation224_spill] sm:$0xff] %v24200_v13  ;;  %28155 = vst [vmem:[#allocation225_spill] sm:$0xff] %v24202_v43  ;;  %v24208_v42 = vpack.c.bf16 %v11455_v62, %v11454_v0  ;;  %v22936_v20 = vld [vmem:[#allocation2 + $0x52] sm:$0xff]  ;;  %v22937_v24 = vld [vmem:[#allocation2 + $0x5a] sm:$0xff]  ;;  %18883 = vmatprep.mubr.msk.bf16.mxu0 %vm1294_vm3, %v23506_v39 }
 0x1bb   : > { %28156 = vst [vmem:[#allocation226_spill] sm:$0xff] %v24204_v53  ;;  %28157 = vst [vmem:[#allocation227_spill] sm:$0xff] %v24206_v35  ;;  %v24213_v17 = vpack.c.bf16 %v22936_v20, %v22935_v55  ;;  %v22609_v29 = vld [vmem:[%s27609_s3 + $0x198] sm:$0xff]   ;;  %v22938_v36 = vld [vmem:[#allocation2 + $0x62] sm:$0xff] }
 0x1bc   : > { %28158 = vst [vmem:[#allocation228_spill] sm:$0xff] %v24208_v42  ;;  %28159 = vst [vmem:[#allocation229_spill] sm:$0xff] %v24210_v38  ;;  %v24218_v7 = vpack.c.bf16 %v22938_v36, %v22937_v24  ;;  %19753 = vmatprep.subr.bf16.mxu1 %v22609_v29  ;;  %v22611_v52 = vld [vmem:[%s27609_s3 + $0x150] sm:$0xff]   ;;  %18950 = vmatpush3.bf16.msra.mxu0 %v22610_v56  ;;  %v22612_v50 = vld [vmem:[%s27609_s3 + $0x158] sm:$0xff]  }
 0x1bd   : > { %19680 = vmatmul.mubr.msk.bf16.gmra.mrb[32].mxu1 %vm1294_vm3, %v24213_v17  ;;  %18951 = vmatprep.subr.bf16.mxu0 %v22611_v52  ;;  %v22939_v58 = vld [vmem:[#allocation2 + $0x6a] sm:$0xff]  ;;  %v22940_v5 = vld [vmem:[#allocation2 + $0x72] sm:$0xff]  ;;  %v22941_v18 = vld [vmem:[#allocation2 + $0x7a] sm:$0xff] }
 0x1be   : > { %19683 = vmatprep.mubr.msk.bf16.mxu1 %vm1294_vm3, %v24218_v7  ;;  %19754 = vmatpush3.bf16.msra.mxu1 %v22609_v29  ;;  %v24234_v4 = vpack.c.bf16 %v22940_v5, %v22939_v58  ;;  %v22942_v15 = vld [vmem:[#allocation2 + $0x82] sm:$0xff]  ;;  %v28161_v51 = vld [vmem:[#allocation25_spill] sm:$0xff]  ;;  %v22943_v34 = vld [vmem:[#allocation2 + $0x8a] sm:$0xff] }
 0x1bf   : > { %v24236_v14 = vpack.c.bf16 %v22942_v15, %v22941_v18  ;;  %v28160_v47 = vld [vmem:[#allocation14_spill] sm:$0xff]  ;;  %v22944_v6 = vld [vmem:[#allocation2 + $0x92] sm:$0xff]  ;;  %v28162_v57 = vld [vmem:[#allocation23_spill] sm:$0xff] }
 0x1c0   : > { %18952 = vmatpush3.bf16.msra.mxu0 %v22611_v52  ;;  %v24246_v27 = vpack.c.bf16 %v22944_v6, %v22943_v34  ;;  %v22945_v54 = vld [vmem:[#allocation2 + $0x9a] sm:$0xff]  ;;  %v22946_v62 = vld [vmem:[#allocation2 + $0xa2] sm:$0xff]  ;;  %v22947_v23 = vld [vmem:[#allocation2 + $0xaa] sm:$0xff] }
 0x1c1   : > { %18953 = vmatprep.subr.bf16.mxu0 %v22612_v50  ;;  %18884 = vmatmul.mubr.msk.bf16.gmra.mrb[80].mxu0 %vm1294_vm3, %v28160_v47  ;;  %v24248_v37 = vpack.c.bf16 %v22946_v62, %v22945_v54  ;;  %v28163_v61 = vld [vmem:[#allocation34_spill] sm:$0xff]  ;;  %v22948_v30 = vld [vmem:[#allocation2 + $0xb2] sm:$0xff]  ;;  %v28164_v0 = vld [vmem:[#allocation31_spill] sm:$0xff] }
 0x1c2   : > { %18887 = vmatprep.mubr.msk.bf16.mxu0 %vm1294_vm3, %v28161_v51  ;;  %v24258_v33 = vpack.c.bf16 %v22948_v30, %v22947_v23  ;;  %v22949_v40 = vld [vmem:[#allocation2 + $0xba] sm:$0xff]  ;;  %v22950_v56 = vld [vmem:[#allocation2 + $0xc2] sm:$0xff]  ;;  %v28165_v55 = vld [vmem:[#allocation44_spill] sm:$0xff] }
 0x1c3   : > { %v24260_v46 = vpack.c.bf16 %v22950_v56, %v22949_v40  ;;  %v24273_v20 = vld [vmem:[%s27609_s3 + $0x220] sm:$0xff]   ;;  %v22951_v29 = vld [vmem:[#allocation2 + $0xca] sm:$0xff]  ;;  %v22952_v24 = vld [vmem:[#allocation2 + $0xd2] sm:$0xff] }
 0x1c4   : > { %18954 = vmatpush3.bf16.msra.mxu0 %v22612_v50  ;;  %19827 = vmatprep.subr.bf16.mxu1 %v24273_v20  ;;  %v24276_v36 = vpack.c.bf16 %v22952_v24, %v22951_v29  ;;  %v22953_v52 = vld [vmem:[#allocation2 + $0xda] sm:$0xff]  ;;  %v22954_v50 = vld [vmem:[#allocation2 + $0xe2] sm:$0xff]  ;;  %v22955_v15 = vld [vmem:[#allocation2 + $0xea] sm:$0xff] }
 0x1c5   : > { %19684 = vmatmul.mubr.msk.bf16.gmra.mrb[36].mxu1 %vm1294_vm3, %v24234_v4  ;;  %v24278_v58 = vpack.c.bf16 %v22954_v50, %v22953_v52  ;;  %v28166_v5 = vld [vmem:[#allocation41_spill] sm:$0xff]  ;;  %v28167_v18 = vld [vmem:[#allocation54_spill] sm:$0xff]  ;;  %v28168_v30 = vld [vmem:[#allocation51_spill] sm:$0xff] }
 0x1c6   : > { %19687 = vmatprep.mubr.msk.bf16.mxu1 %vm1294_vm3, %v24236_v14  ;;  %v22956_v34 = vld [vmem:[#allocation2 + $0xf2] sm:$0xff]  ;;  %v22957_v54 = vld [vmem:[#allocation2 + $0xfa] sm:$0xff]  ;;  %v22958_v62 = vld [vmem:[#allocation2 + $0x102] sm:$0xff] }
 0x1c7   : > { %v24288_v6 = vpack.c.bf16 %v22956_v34, %v22955_v15  ;;  %v24290_v23 = vpack.c.bf16 %v22958_v62, %v22957_v54  ;;  %v28169_v40 = vld [vmem:[#allocation64_spill] sm:$0xff]  ;;  %v22961_v52 = vld [vmem:[#allocation2 + $0x11a] sm:$0xff]  ;;  %v22962_v50 = vld [vmem:[#allocation2 + $0x122] sm:$0xff] }
 0x1c8   : > { %v22959_v56 = vld [vmem:[#allocation2 + $0x10a] sm:$0xff]  ;;  %v22960_v29 = vld [vmem:[#allocation2 + $0x112] sm:$0xff]  ;;  %v24302_v15 = vpack.c.bf16 %v22962_v50, %v22961_v52  ;;  %v28171_v54 = vld [vmem:[#allocation74_spill] sm:$0xff] }
 0x1c9   : > { %18888 = vmatmul.mubr.msk.bf16.gmra.mrb[84].mxu0 %vm1294_vm3, %v28162_v57  ;;  %v24300_v24 = vpack.c.bf16 %v22960_v29, %v22959_v56  ;;  %v28170_v34 = vld [vmem:[#allocation61_spill] sm:$0xff]  ;;  %v22963_v62 = vld [vmem:[#allocation2 + $0x12a] sm:$0xff]  ;;  %v22966_v42 = vld [vmem:[#allocation2 + $0x142] sm:$0xff] }
 0x1ca   : > { %18891 = vmatprep.mubr.msk.bf16.mxu0 %vm1294_vm3, %v28163_v61  ;;  %v22964_v38 = vld [vmem:[#allocation2 + $0x132] sm:$0xff]  ;;  %v22965_v29 = vld [vmem:[#allocation2 + $0x13a] sm:$0xff]  ;;  %v28172_v50 = vld [vmem:[#allocation71_spill] sm:$0xff] }
 0x1cb   : > { %v24312_v56 = vpack.c.bf16 %v22964_v38, %v22963_v62  ;;  %v24314_v52 = vpack.c.bf16 %v22966_v42, %v22965_v29  ;;  %v28173_v35 = vld [vmem:[#allocation84_spill] sm:$0xff]  ;;  %v22969_v62 = vld [vmem:[#allocation2 + $0x15a] sm:$0xff]  ;;  %v22970_v13 = vld [vmem:[#allocation2 + $0x162] sm:$0xff] }
 0x1cc   : > { %v22967_v53 = vld [vmem:[#allocation2 + $0x14a] sm:$0xff]  ;;  %v22968_v43 = vld [vmem:[#allocation2 + $0x152] sm:$0xff]  ;;  %v24326_v42 = vpack.c.bf16 %v22970_v13, %v22969_v62  ;;  %v28175_v22 = vld [vmem:[#allocation94_spill] sm:$0xff] }
 0x1cd   : > { %19688 = vmatmul.mubr.msk.bf16.gmra.mrb[40].mxu1 %vm1294_vm3, %v24246_v27  ;;  %v24324_v38 = vpack.c.bf16 %v22968_v43, %v22967_v53  ;;  %v28174_v29 = vld [vmem:[#allocation81_spill] sm:$0xff]  ;;  %v28177_v43 = vld [vmem:[#allocation116_spill] sm:$0xff]  ;;  %v28178_v13 = vld [vmem:[#allocation91_spill] sm:$0xff] }
 0x1ce   : > { %19691 = vmatprep.mubr.msk.bf16.mxu1 %vm1294_vm3, %v24248_v37  ;;  %v28176_v48 = vld [vmem:[#allocation105_spill] sm:$0xff]  ;;  %v28179_v53 = vld [vmem:[#allocation106_spill] sm:$0xff]  ;;  %v28181_v16 = vld [vmem:[#allocation127_spill] sm:$0xff] }
 0x1cf   : > { %v28180_v62 = vld [vmem:[#allocation117_spill] sm:$0xff]  ;;  %v28183_v1 = vld [vmem:[#allocation118_spill] sm:$0xff]  ;;  %v28184_v12 = vld [vmem:[#allocation128_spill] sm:$0xff] }
 0x1d0   : > { %v28182_v63 = vld [vmem:[#allocation101_spill] sm:$0xff]  ;;  %v28185_v41 = vld [vmem:[#allocation138_spill] sm:$0xff]  ;;  %v28186_v32 = vld [vmem:[#allocation112_spill] sm:$0xff] }
 0x1d1   : > { %18892 = vmatmul.mubr.msk.bf16.gmra.mrb[88].mxu0 %vm1294_vm3, %v28164_v0  ;;  %v28187_v59 = vld [vmem:[#allocation129_spill] sm:$0xff]  ;;  %v28188_v28 = vld [vmem:[#allocation139_spill] sm:$0xff]  ;;  %v28191_v19 = vld [vmem:[#allocation140_spill] sm:$0xff] }
 0x1d2   : > { %18895 = vmatprep.mubr.msk.bf16.mxu0 %vm1294_vm3, %v28165_v55  ;;  %v28189_v45 = vld [vmem:[#allocation149_spill] sm:$0xff]  ;;  %v28190_v60 = vld [vmem:[#allocation123_spill] sm:$0xff]  ;;  %v28192_v26 = vld [vmem:[#allocation150_spill] sm:$0xff] }
 0x1d3   : > { %v28193_v2 = vld [vmem:[#allocation160_spill] sm:$0xff]  ;;  %v28194_v49 = vld [vmem:[#allocation134_spill] sm:$0xff]  ;;  %v28195_v3 = vld [vmem:[#allocation151_spill] sm:$0xff] }
 0x1d4   : > { %v28196_v10 = vld [vmem:[#allocation162_spill] sm:$0xff]  ;;  %v28198_v9 = vld [vmem:[#allocation145_spill] sm:$0xff]  ;;  %v28199_v25 = vld [vmem:[#allocation163_spill] sm:$0xff] }
 0x1d5   : > { %19692 = vmatmul.mubr.msk.bf16.gmra.mrb[44].mxu1 %vm1294_vm3, %v24258_v33  ;;  %v28197_v11 = vld [vmem:[#allocation182_spill] sm:$0xff]  ;;  %v28200_v21 = vld [vmem:[#allocation188_spill] sm:$0xff] }
 0x1d6   : > { %19695 = vmatprep.mubr.msk.bf16.mxu1 %vm1294_vm3, %v24260_v46  ;;  %v24384_v31 = vld [vmem:[#allocation2 + $0x242] sm:$0xff] }
 0x1d7   : > { %v24388_v8 = vpack.c.bf16 %v24384_v31, %v28200_v21 }
 0x1d9   : > { %18896 = vmatmul.mubr.msk.bf16.gmra.mrb[92].mxu0 %vm1294_vm3, %v28166_v5  ;;  %28201 = vst [vmem:[#allocation14_spill] sm:$0xff] %v24388_v8 }
 0x1da   : > { %18899 = vmatprep.mubr.msk.bf16.mxu0 %vm1294_vm3, %v28167_v18 }
 0x1dd   : > { %19696 = vmatmul.mubr.msk.bf16.gmra.mrb[48].mxu1 %vm1294_vm3, %v24276_v36 }
 0x1de   : > { %19699 = vmatprep.mubr.msk.bf16.mxu1 %vm1294_vm3, %v24278_v58 }
 0x1e1   : > { %18900 = vmatmul.mubr.msk.bf16.gmra.mrb[96].mxu0 %vm1294_vm3, %v28168_v30 }
 0x1e2   : > { %18903 = vmatprep.mubr.msk.bf16.mxu0 %vm1294_vm3, %v28169_v40 }
 0x1e5   : > { %19700 = vmatmul.mubr.msk.bf16.gmra.mrb[52].mxu1 %vm1294_vm3, %v24288_v6 }
 0x1e6   : > { %19703 = vmatprep.mubr.msk.bf16.mxu1 %vm1294_vm3, %v24290_v23 }
 0x1e9   : > { %18904 = vmatmul.mubr.msk.bf16.gmra.mrb[100].mxu0 %vm1294_vm3, %v28170_v34 }
 0x1ea   : > { %18907 = vmatprep.mubr.msk.bf16.mxu0 %vm1294_vm3, %v28171_v54 }
 0x1ed   : > { %19704 = vmatmul.mubr.msk.bf16.gmra.mrb[56].mxu1 %vm1294_vm3, %v24300_v24 }
 0x1ee   : > { %19707 = vmatprep.mubr.msk.bf16.mxu1 %vm1294_vm3, %v24302_v15 }
 0x1f1   : > { %18908 = vmatmul.mubr.msk.bf16.gmra.mrb[104].mxu0 %vm1294_vm3, %v28172_v50 }
 0x1f2   : > { %18911 = vmatprep.mubr.msk.bf16.mxu0 %vm1294_vm3, %v28173_v35 }
 0x1f5   : > { %19708 = vmatmul.mubr.msk.bf16.gmra.mrb[60].mxu1 %vm1294_vm3, %v24312_v56 }
 0x1f6   : > { %19711 = vmatprep.mubr.msk.bf16.mxu1 %vm1294_vm3, %v24314_v52 }
 0x1f9   : > { %18912 = vmatmul.mubr.msk.bf16.gmra.mrb[108].mxu0 %vm1294_vm3, %v28174_v29 }
 0x1fa   : > { %18915 = vmatprep.mubr.msk.bf16.mxu0 %vm1294_vm3, %v28175_v22 }
 0x1fd   : > { %19712 = vmatmul.mubr.msk.bf16.gmra.mrb[64].mxu1 %vm1294_vm3, %v24324_v38 }
 0x1fe   : > { %19715 = vmatprep.mubr.msk.bf16.mxu1 %vm1294_vm3, %v24326_v42 }
 0x201   : > { %18916 = vmatmul.mubr.msk.bf16.gmra.mrb[112].mxu0 %vm1294_vm3, %v28178_v13 }
 0x202   : > { %18919 = vmatprep.mubr.msk.bf16.mxu0 %vm1294_vm3, %v28179_v53 }
 0x205   : > { %19716 = vmatmul.mubr.msk.bf16.gmra.mrb[68].mxu1 %vm1294_vm3, %v28176_v48 }
 0x206   : > { %19719 = vmatprep.mubr.msk.bf16.mxu1 %vm1294_vm3, %v28177_v43 }
 0x209   : > { %18920 = vmatmul.mubr.msk.bf16.gmra.mrb[116].mxu0 %vm1294_vm3, %v28182_v63 }
 0x20a   : > { %18923 = vmatprep.mubr.msk.bf16.mxu0 %vm1294_vm3, %v28183_v1 }
 0x20d   : > { %19720 = vmatmul.mubr.msk.bf16.gmra.mrb[0].mxu1 %vm1294_vm3, %v28180_v62 }
 0x20e   : > { %19723 = vmatprep.mubr.msk.bf16.mxu1 %vm1294_vm3, %v28181_v16 }
 0x211   : > { %18924 = vmatmul.mubr.msk.bf16.gmra.mrb[120].mxu0 %vm1294_vm3, %v28186_v32 }
 0x212   : > { %18927 = vmatprep.mubr.msk.bf16.mxu0 %vm1294_vm3, %v28187_v59 }
 0x215   : > { %19724 = vmatmul.mubr.msk.bf16.gmra.mrb[4].mxu1 %vm1294_vm3, %v28184_v12  ;;  %v28208_v12 = vld [vmem:[#allocation21_spill] sm:$0xff] }
 0x216   : > { %19727 = vmatprep.mubr.msk.bf16.mxu1 %vm1294_vm3, %v28185_v41  ;;  %v28207_v41 = vld [vmem:[#allocation16_spill] sm:$0xff] }
 0x219   : > { %18928 = vmatmul.mubr.msk.bf16.gmra.mrb[124].mxu0 %vm1294_vm3, %v28190_v60 }
 0x21a   : > { %18931 = vmatprep.mubr.msk.bf16.mxu0 %vm1294_vm3, %v28191_v19 }
 0x21d   : > { %19728 = vmatmul.mubr.msk.bf16.gmra.mrb[8].mxu1 %vm1294_vm3, %v28188_v28  ;;  %v22614_v28 = vld [vmem:[%s27609_s3 + $0x228] sm:$0xff]  }
 0x21e   : > { %19731 = vmatprep.mubr.msk.bf16.mxu1 %vm1294_vm3, %v28189_v45  ;;  %v28204_v45 = vld [vmem:[#allocation185_spill] sm:$0xff] }
 0x221   : > { %18932 = vmatmul.mubr.msk.bf16.gmra.mrb[128].mxu0 %vm1294_vm3, %v28194_v49 }
 0x222   : > { %18935 = vmatprep.mubr.msk.bf16.mxu0 %vm1294_vm3, %v28195_v3 }
 0x225   : > { %19732 = vmatmul.mubr.msk.bf16.gmra.mrb[12].mxu1 %vm1294_vm3, %v28192_v26  ;;  %v28203_v26 = vld [vmem:[#allocation156_spill] sm:$0xff] }
 0x226   : > { %19735 = vmatprep.mubr.msk.bf16.mxu1 %vm1294_vm3, %v28193_v2  ;;  %v28202_v2 = vld [vmem:[#allocation184_spill] sm:$0xff] }
 0x229   : > { %18936 = vmatmul.mubr.msk.bf16.gmra.mrb[132].mxu0 %vm1294_vm3, %v28198_v9 }
 0x22a   : > { %18939 = vmatprep.mubr.msk.bf16.mxu0 %vm1294_vm3, %v28199_v25 }
 0x22d   : > { %19736 = vmatmul.mubr.msk.bf16.gmra.mrb[16].mxu1 %vm1294_vm3, %v28196_v10  ;;  %v24394_v10 = vld [vmem:[#allocation2 + $0x24a] sm:$0xff] }
 0x22e   : > { %19739 = vmatprep.mubr.msk.bf16.mxu1 %vm1294_vm3, %v28197_v11  ;;  %v24396_v11 = vld [vmem:[#allocation2 + $0x252] sm:$0xff] }
 0x22f   : > { %v24404_v21 = vpack.c.bf16 %v24396_v11, %v24394_v10 }
 0x231   : > { %18940 = vmatmul.mubr.msk.bf16.gmra.mrb[136].mxu0 %vm1294_vm3, %v28203_v26 }
 0x232   : > { %18943 = vmatprep.mubr.msk.bf16.mxu0 %vm1294_vm3, %v28204_v45 }
 0x235   : > { %19740 = vmatmul.mubr.msk.bf16.gmra.mrb[20].mxu1 %vm1294_vm3, %v28202_v2  ;;  %v28205_v2 = vld [vmem:[#allocation12_spill] sm:$0xff] }
 0x236   : > { %19743 = vmatprep.mubr.msk.bf16.mxu1 %vm1294_vm3, %v24388_v8  ;;  %v28206_v8 = vld [vmem:[#allocation179_spill] sm:$0xff] }
 0x239   : > { %18944 = vmatmul.mubr.msk.bf16.gmra.mrb[140].mxu0 %vm1294_vm3, %v28206_v8 }
 0x23a   : > { %18955 = vmatprep.mubr.msk.bf16.mxu0 %vm1294_vm3, %v23438_v44  ;;  %v22615_v44 = vld [vmem:[%s27609_s3 + $0x230] sm:$0xff]  }
 0x23d   : > { %19744 = vmatmul.mubr.msk.bf16.gmra.mrb[24].mxu1 %vm1294_vm3, %v24404_v21 }
 0x23e   : > { %19755 = vmatprep.mubr.msk.bf16.mxu1 %vm1294_vm3, %v28205_v2  ;;  %v22616_v2 = vld [vmem:[%s27609_s3 + $0x1e0] sm:$0xff]  }
 0x23f   : > { %19027 = vmatprep.subr.bf16.mxu0 %v22616_v2 }
 0x241   : > { %18956 = vmatmul.mubr.msk.bf16.vlgmr.msra.gmra.mrb[72].mxu0 %vm1294_vm3, %v23506_v39  ;;  %v22617_v39 = vld [vmem:[%s27609_s3 + $0x238] sm:$0xff]  }
 0x242   : > { %18959 = vmatprep.mubr.msk.bf16.mxu0 %vm1294_vm3, %v28160_v47  ;;  %19028 = vmatpush3.bf16.msra.mxu0 %v22616_v2  ;;  %v22619_v2 = vld [vmem:[%s27609_s3 + $0x1f0] sm:$0xff]   ;;  %v28211_v47 = vld [vmem:[#allocation35_spill] sm:$0xff] }
 0x245   : > { %19756 = vmatmul.mubr.msk.bf16.vlgmr.msra.gmra.mrb[28].mxu1 %vm1294_vm3, %v28207_v41  ;;  %v22618_v41 = vld [vmem:[%s27609_s3 + $0x1e8] sm:$0xff]  }
 0x246   : > { %19759 = vmatprep.mubr.msk.bf16.mxu1 %vm1294_vm3, %v28208_v12  ;;  %19828 = vmatpush3.bf16.msra.mxu1 %v24273_v20  ;;  %v28209_v20 = vld [vmem:[#allocation26_spill] sm:$0xff] }
 0x247   : > { %19829 = vmatprep.subr.bf16.mxu1 %v22614_v28  ;;  %19029 = vmatprep.subr.bf16.mxu0 %v22618_v41  ;;  %v28210_v12 = vld [vmem:[#allocation30_spill] sm:$0xff] }
 0x248   : > { %19030 = vmatpush3.bf16.msra.mxu0 %v22618_v41  ;;  %v28213_v41 = vld [vmem:[#allocation45_spill] sm:$0xff] }
 0x249   : > { %18960 = vmatmul.mubr.msk.bf16.gmra.mrb[76].mxu0 %vm1294_vm3, %v28161_v51  ;;  %19031 = vmatprep.subr.bf16.mxu0 %v22619_v2 }
 0x24a   : > { %19830 = vmatpush3.bf16.msra.mxu1 %v22614_v28  ;;  %18963 = vmatprep.mubr.msk.bf16.mxu0 %vm1294_vm3, %v28162_v57  ;;  %v22620_v28 = vld [vmem:[%s27609_s3 + $0x1f8] sm:$0xff]   ;;  %v28214_v57 = vld [vmem:[#allocation50_spill] sm:$0xff] }
 0x24b   : > { %19831 = vmatprep.subr.bf16.mxu1 %v22615_v44 }
 0x24c   : > { %19032 = vmatpush3.bf16.msra.mxu0 %v22619_v2  ;;  %v28216_v2 = vld [vmem:[#allocation60_spill] sm:$0xff] }
 0x24d   : > { %19760 = vmatmul.mubr.msk.bf16.gmra.mrb[32].mxu1 %vm1294_vm3, %v28209_v20  ;;  %19033 = vmatprep.subr.bf16.mxu0 %v22620_v28 }
 0x24e   : > { %19763 = vmatprep.mubr.msk.bf16.mxu1 %vm1294_vm3, %v28210_v12  ;;  %19832 = vmatpush3.bf16.msra.mxu1 %v22615_v44  ;;  %v28212_v44 = vld [vmem:[#allocation40_spill] sm:$0xff] }
 0x24f   : > { %19833 = vmatprep.subr.bf16.mxu1 %v22617_v39 }
 0x250   : > { %19034 = vmatpush3.bf16.msra.mxu0 %v22620_v28  ;;  %v24479_v28 = vld [vmem:[%s27609_s3 + $0x2c0] sm:$0xff]  }
 0x251   : > { %18964 = vmatmul.mubr.msk.bf16.gmra.mrb[80].mxu0 %vm1294_vm3, %v28163_v61 }
 0x252   : > { %19834 = vmatpush3.bf16.msra.mxu1 %v22617_v39  ;;  %18967 = vmatprep.mubr.msk.bf16.mxu0 %vm1294_vm3, %v28164_v0  ;;  %v28215_v39 = vld [vmem:[#allocation55_spill] sm:$0xff] }
 0x253   : > { %19907 = vmatprep.subr.bf16.mxu1 %v24479_v28 }
 0x255   : > { %19764 = vmatmul.mubr.msk.bf16.gmra.mrb[36].mxu1 %vm1294_vm3, %v28211_v47 }
 0x256   : > { %19767 = vmatprep.mubr.msk.bf16.mxu1 %vm1294_vm3, %v28212_v44 }
 0x259   : > { %18968 = vmatmul.mubr.msk.bf16.gmra.mrb[84].mxu0 %vm1294_vm3, %v28165_v55 }
 0x25a   : > { %18971 = vmatprep.mubr.msk.bf16.mxu0 %vm1294_vm3, %v28166_v5  ;;  %v28217_v5 = vld [vmem:[#allocation65_spill] sm:$0xff] }
 0x25d   : > { %19768 = vmatmul.mubr.msk.bf16.gmra.mrb[40].mxu1 %vm1294_vm3, %v28213_v41 }
 0x25e   : > { %19771 = vmatprep.mubr.msk.bf16.mxu1 %vm1294_vm3, %v28214_v57 }
 0x261   : > { %18972 = vmatmul.mubr.msk.bf16.gmra.mrb[88].mxu0 %vm1294_vm3, %v28167_v18 }
 0x262   : > { %18975 = vmatprep.mubr.msk.bf16.mxu0 %vm1294_vm3, %v28168_v30  ;;  %v28219_v30 = vld [vmem:[#allocation75_spill] sm:$0xff] }
 0x265   : > { %19772 = vmatmul.mubr.msk.bf16.gmra.mrb[44].mxu1 %vm1294_vm3, %v28215_v39  ;;  %v28218_v39 = vld [vmem:[#allocation70_spill] sm:$0xff] }
 0x266   : > { %19775 = vmatprep.mubr.msk.bf16.mxu1 %vm1294_vm3, %v28216_v2  ;;  %v28220_v2 = vld [vmem:[#allocation80_spill] sm:$0xff] }
 0x269   : > { %18976 = vmatmul.mubr.msk.bf16.gmra.mrb[92].mxu0 %vm1294_vm3, %v28169_v40 }
 0x26a   : > { %18979 = vmatprep.mubr.msk.bf16.mxu0 %vm1294_vm3, %v28170_v34  ;;  %v28223_v34 = vld [vmem:[#allocation95_spill] sm:$0xff] }
 0x26d   : > { %19776 = vmatmul.mubr.msk.bf16.gmra.mrb[48].mxu1 %vm1294_vm3, %v28217_v5  ;;  %v28221_v5 = vld [vmem:[#allocation85_spill] sm:$0xff] }
 0x26e   : > { %19779 = vmatprep.mubr.msk.bf16.mxu1 %vm1294_vm3, %v28218_v39  ;;  %v28222_v39 = vld [vmem:[#allocation90_spill] sm:$0xff] }
 0x271   : > { %18980 = vmatmul.mubr.msk.bf16.gmra.mrb[96].mxu0 %vm1294_vm3, %v28171_v54 }
 0x272   : > { %18983 = vmatprep.mubr.msk.bf16.mxu0 %vm1294_vm3, %v28172_v50  ;;  %v28225_v50 = vld [vmem:[#allocation104_spill] sm:$0xff] }
 0x275   : > { %19780 = vmatmul.mubr.msk.bf16.gmra.mrb[52].mxu1 %vm1294_vm3, %v28219_v30 }
 0x276   : > { %19783 = vmatprep.mubr.msk.bf16.mxu1 %vm1294_vm3, %v28220_v2  ;;  %v28224_v2 = vld [vmem:[#allocation100_spill] sm:$0xff] }
 0x279   : > { %18984 = vmatmul.mubr.msk.bf16.gmra.mrb[100].mxu0 %vm1294_vm3, %v28173_v35 }
 0x27a   : > { %18987 = vmatprep.mubr.msk.bf16.mxu0 %vm1294_vm3, %v28174_v29  ;;  %v28227_v29 = vld [vmem:[#allocation115_spill] sm:$0xff] }
 0x27d   : > { %19784 = vmatmul.mubr.msk.bf16.gmra.mrb[56].mxu1 %vm1294_vm3, %v28221_v5 }
 0x27e   : > { %19787 = vmatprep.mubr.msk.bf16.mxu1 %vm1294_vm3, %v28222_v39  ;;  %v28226_v39 = vld [vmem:[#allocation111_spill] sm:$0xff] }
 0x281   : > { %18988 = vmatmul.mubr.msk.bf16.gmra.mrb[104].mxu0 %vm1294_vm3, %v28175_v22 }
 0x282   : > { %18991 = vmatprep.mubr.msk.bf16.mxu0 %vm1294_vm3, %v28178_v13  ;;  %v28229_v13 = vld [vmem:[#allocation126_spill] sm:$0xff] }
 0x285   : > { %19788 = vmatmul.mubr.msk.bf16.gmra.mrb[60].mxu1 %vm1294_vm3, %v28223_v34 }
 0x286   : > { %19791 = vmatprep.mubr.msk.bf16.mxu1 %vm1294_vm3, %v28224_v2  ;;  %v28228_v2 = vld [vmem:[#allocation122_spill] sm:$0xff] }
 0x289   : > { %18992 = vmatmul.mubr.msk.bf16.gmra.mrb[108].mxu0 %vm1294_vm3, %v28179_v53 }
 0x28a   : > { %18995 = vmatprep.mubr.msk.bf16.mxu0 %vm1294_vm3, %v28182_v63  ;;  %v28231_v63 = vld [vmem:[#allocation137_spill] sm:$0xff] }
 0x28d   : > { %19792 = vmatmul.mubr.msk.bf16.gmra.mrb[64].mxu1 %vm1294_vm3, %v28225_v50 }
 0x28e   : > { %19795 = vmatprep.mubr.msk.bf16.mxu1 %vm1294_vm3, %v28226_v39  ;;  %v28230_v39 = vld [vmem:[#allocation133_spill] sm:$0xff] }
 0x291   : > { %18996 = vmatmul.mubr.msk.bf16.gmra.mrb[112].mxu0 %vm1294_vm3, %v28183_v1 }
 0x292   : > { %18999 = vmatprep.mubr.msk.bf16.mxu0 %vm1294_vm3, %v28186_v32  ;;  %v28233_v32 = vld [vmem:[#allocation148_spill] sm:$0xff] }
 0x295   : > { %19796 = vmatmul.mubr.msk.bf16.gmra.mrb[68].mxu1 %vm1294_vm3, %v28227_v29 }
 0x296   : > { %19799 = vmatprep.mubr.msk.bf16.mxu1 %vm1294_vm3, %v28228_v2  ;;  %v28232_v2 = vld [vmem:[#allocation144_spill] sm:$0xff] }
 0x299   : > { %19000 = vmatmul.mubr.msk.bf16.gmra.mrb[116].mxu0 %vm1294_vm3, %v28187_v59 }
 0x29a   : > { %19003 = vmatprep.mubr.msk.bf16.mxu0 %vm1294_vm3, %v28190_v60  ;;  %v28235_v60 = vld [vmem:[#allocation159_spill] sm:$0xff] }
 0x29d   : > { %19800 = vmatmul.mubr.msk.bf16.gmra.mrb[0].mxu1 %vm1294_vm3, %v28229_v13 }
 0x29e   : > { %19803 = vmatprep.mubr.msk.bf16.mxu1 %vm1294_vm3, %v28230_v39  ;;  %v28234_v39 = vld [vmem:[#allocation155_spill] sm:$0xff] }
 0x2a1   : > { %19004 = vmatmul.mubr.msk.bf16.gmra.mrb[120].mxu0 %vm1294_vm3, %v28191_v19 }
 0x2a2   : > { %19007 = vmatprep.mubr.msk.bf16.mxu0 %vm1294_vm3, %v28194_v49  ;;  %v28237_v49 = vld [vmem:[#allocation181_spill] sm:$0xff] }
 0x2a5   : > { %19804 = vmatmul.mubr.msk.bf16.gmra.mrb[4].mxu1 %vm1294_vm3, %v28231_v63 }
 0x2a6   : > { %19807 = vmatprep.mubr.msk.bf16.mxu1 %vm1294_vm3, %v28232_v2  ;;  %v28236_v2 = vld [vmem:[#allocation178_spill] sm:$0xff] }
 0x2a9   : > { %19008 = vmatmul.mubr.msk.bf16.gmra.mrb[124].mxu0 %vm1294_vm3, %v28195_v3 }
 0x2aa   : > { %19011 = vmatprep.mubr.msk.bf16.mxu0 %vm1294_vm3, %v28198_v9  ;;  %v24568_v9 = vld [vmem:[#allocation2 + $0x25a] sm:$0xff] }
 0x2ad   : > { %19808 = vmatmul.mubr.msk.bf16.gmra.mrb[8].mxu1 %vm1294_vm3, %v28233_v32 }
 0x2ae   : > { %19811 = vmatprep.mubr.msk.bf16.mxu1 %vm1294_vm3, %v28234_v39  ;;  %v28238_v39 = vld [vmem:[#allocation193_spill] sm:$0xff] }
 0x2b1   : > { %19012 = vmatmul.mubr.msk.bf16.gmra.mrb[128].mxu0 %vm1294_vm3, %v28199_v25  ;;  %v24576_v25 = vld [vmem:[#allocation2 + $0x258] sm:$0xff] }
 0x2b2   : > { %19015 = vmatprep.mubr.msk.bf16.mxu0 %vm1294_vm3, %v28203_v26  ;;  %v24580_v26 = vpack.c.bf16 %v24568_v9, %v24396_v11  ;;  %v24602_v11 = vld [vmem:[#allocation2 + $0x260] sm:$0xff] }
 0x2b4   : > { %28239 = vst [vmem:[#allocation25_spill] sm:$0xff] %v24580_v26 }
 0x2b5   : > { %19812 = vmatmul.mubr.msk.bf16.gmra.mrb[12].mxu1 %vm1294_vm3, %v28235_v60 }
 0x2b6   : > { %19815 = vmatprep.mubr.msk.bf16.mxu1 %vm1294_vm3, %v28236_v2  ;;  %v24574_v2 = vpack.c.bf16 %v24394_v10, %v24384_v31  ;;  %v24594_v31 = vld [vmem:[#allocation2 + $0x262] sm:$0xff]  ;;  %v24596_v10 = vld [vmem:[#allocation2 + $0x26a] sm:$0xff] }
 0x2b9   : > { %19016 = vmatmul.mubr.msk.bf16.gmra.mrb[132].mxu0 %vm1294_vm3, %v28204_v45  ;;  %v28242_v45 = vld [vmem:[#allocation190_spill] sm:$0xff] }
 0x2ba   : > { %19019 = vmatprep.mubr.msk.bf16.mxu0 %vm1294_vm3, %v28206_v8  ;;  %v24588_v3 = vpack.c.bf16 %v24576_v25, %v28242_v45  ;;  %v24608_v45 = vpack.c.bf16 %v24596_v10, %v24594_v31 }
 0x2bc   : > { %28243 = vst [vmem:[#allocation34_spill] sm:$0xff] %v24588_v3  ;;  %28244 = vst [vmem:[#allocation31_spill] sm:$0xff] %v24608_v45 }
 0x2bd   : > { %19816 = vmatmul.mubr.msk.bf16.gmra.mrb[16].mxu1 %vm1294_vm3, %v28237_v49  ;;  %v28240_v49 = vld [vmem:[#allocation176_spill] sm:$0xff] }
 0x2be   : > { %19819 = vmatprep.mubr.msk.bf16.mxu1 %vm1294_vm3, %v28238_v39  ;;  %v28241_v39 = vld [vmem:[#allocation189_spill] sm:$0xff] }
 0x2bf   : > { %v24584_v60 = vpack.c.bf16 %v28241_v39, %v28240_v49  ;;  %v24604_v49 = vld [vmem:[#allocation2 + $0x268] sm:$0xff] }
 0x2c0   : > { %v24612_v39 = vpack.c.bf16 %v24604_v49, %v24602_v11 }
 0x2c1   : > { %19020 = vmatmul.mubr.msk.bf16.gmra.mrb[136].mxu0 %vm1294_vm3, %v24584_v60 }
 0x2c2   : > { %19023 = vmatprep.mubr.msk.bf16.mxu0 %vm1294_vm3, %v24588_v3  ;;  %28245 = vst [vmem:[#allocation44_spill] sm:$0xff] %v24612_v39  ;;  %v28246_v3 = vld [vmem:[#allocation15_spill] sm:$0xff] }
 0x2c5   : > { %19820 = vmatmul.mubr.msk.bf16.gmra.mrb[20].mxu1 %vm1294_vm3, %v24574_v2 }
 0x2c6   : > { %19823 = vmatprep.mubr.msk.bf16.mxu1 %vm1294_vm3, %v24580_v26  ;;  %v22622_v26 = vld [vmem:[%s27609_s3 + $0x2c8] sm:$0xff]  }
 0x2c9   : > { %19024 = vmatmul.mubr.msk.bf16.gmra.mrb[140].mxu0 %vm1294_vm3, %v24612_v39  ;;  %v28248_v39 = vld [vmem:[#allocation24_spill] sm:$0xff] }
 0x2ca   : > { %19035 = vmatprep.mubr.msk.bf16.mxu0 %vm1294_vm3, %v28246_v3  ;;  %v22623_v3 = vld [vmem:[%s27609_s3 + $0x2d0] sm:$0xff]  }
 0x2cd   : > { %19824 = vmatmul.mubr.msk.bf16.gmra.mrb[24].mxu1 %vm1294_vm3, %v24608_v45  ;;  %v28247_v45 = vld [vmem:[#allocation20_spill] sm:$0xff] }
 0x2ce   : > { %19835 = vmatprep.mubr.msk.bf16.mxu1 %vm1294_vm3, %v24213_v17  ;;  %v22624_v17 = vld [vmem:[%s27609_s3 + $0x280] sm:$0xff]  }
 0x2cf   : > { %19107 = vmatprep.subr.bf16.mxu0 %v22624_v17 }
 0x2d1   : > { %19036 = vmatmul.mubr.msk.bf16.vlgmr.msra.gmra.mrb[72].mxu0 %vm1294_vm3, %v28247_v45  ;;  %v28250_v45 = vld [vmem:[#allocation33_spill] sm:$0xff] }
 0x2d2   : > { %19039 = vmatprep.mubr.msk.bf16.mxu0 %vm1294_vm3, %v28248_v39  ;;  %19108 = vmatpush3.bf16.msra.mxu0 %v22624_v17  ;;  %v28252_v39 = vld [vmem:[#allocation43_spill] sm:$0xff] }
 0x2d3   : > { %v28256_v17 = vld [vmem:[#allocation63_spill] sm:$0xff] }
 0x2d5   : > { %19836 = vmatmul.mubr.msk.bf16.vlgmr.msra.gmra.mrb[28].mxu1 %vm1294_vm3, %v24218_v7  ;;  %v22626_v7 = vld [vmem:[%s27609_s3 + $0x288] sm:$0xff]  }
 0x2d6   : > { %19839 = vmatprep.mubr.msk.bf16.mxu1 %vm1294_vm3, %v24234_v4  ;;  %19908 = vmatpush3.bf16.msra.mxu1 %v24479_v28  ;;  %v22625_v4 = vld [vmem:[%s27609_s3 + $0x2d8] sm:$0xff]  }
 0x2d7   : > { %19909 = vmatprep.subr.bf16.mxu1 %v22622_v26  ;;  %19109 = vmatprep.subr.bf16.mxu0 %v22626_v7  ;;  %v28249_v28 = vld [vmem:[#allocation29_spill] sm:$0xff] }
 0x2d8   : > { %19110 = vmatpush3.bf16.msra.mxu0 %v22626_v7  ;;  %v28260_v7 = vld [vmem:[#allocation83_spill] sm:$0xff] }
 0x2d9   : > { %19040 = vmatmul.mubr.msk.bf16.gmra.mrb[76].mxu0 %vm1294_vm3, %v28249_v28  ;;  %v28272_v28 = vld [vmem:[#allocation132_spill] sm:$0xff] }
 0x2da   : > { %19910 = vmatpush3.bf16.msra.mxu1 %v22622_v26  ;;  %v22627_v26 = vld [vmem:[%s27609_s3 + $0x290] sm:$0xff]   ;;  %19043 = vmatprep.mubr.msk.bf16.mxu0 %vm1294_vm3, %v28250_v45  ;;  %v28275_v45 = vld [vmem:[#allocation150_spill] sm:$0xff] }
 0x2db   : > { %19911 = vmatprep.subr.bf16.mxu1 %v22623_v3  ;;  %19111 = vmatprep.subr.bf16.mxu0 %v22627_v26 }
 0x2dc   : > { %19112 = vmatpush3.bf16.msra.mxu0 %v22627_v26  ;;  %v28273_v26 = vld [vmem:[#allocation136_spill] sm:$0xff] }
 0x2dd   : > { %19840 = vmatmul.mubr.msk.bf16.gmra.mrb[32].mxu1 %vm1294_vm3, %v24236_v14  ;;  %v22628_v14 = vld [vmem:[%s27609_s3 + $0x298] sm:$0xff]  }
 0x2de   : > { %19843 = vmatprep.mubr.msk.bf16.mxu1 %vm1294_vm3, %v24246_v27  ;;  %19912 = vmatpush3.bf16.msra.mxu1 %v22623_v3  ;;  %v28251_v27 = vld [vmem:[#allocation39_spill] sm:$0xff]  ;;  %v28253_v3 = vld [vmem:[#allocation49_spill] sm:$0xff] }
 0x2df   : > { %19913 = vmatprep.subr.bf16.mxu1 %v22625_v4  ;;  %19113 = vmatprep.subr.bf16.mxu0 %v22628_v14 }
 0x2e0   : > { %19114 = vmatpush3.bf16.msra.mxu0 %v22628_v14  ;;  %v28276_v14 = vld [vmem:[#allocation143_spill] sm:$0xff] }
 0x2e1   : > { %19044 = vmatmul.mubr.msk.bf16.gmra.mrb[80].mxu0 %vm1294_vm3, %v28251_v27  ;;  %v28277_v27 = vld [vmem:[#allocation147_spill] sm:$0xff] }
 0x2e2   : > { %19914 = vmatpush3.bf16.msra.mxu1 %v22625_v4  ;;  %19047 = vmatprep.mubr.msk.bf16.mxu0 %vm1294_vm3, %v28252_v39  ;;  %v28269_v4 = vld [vmem:[#allocation125_spill] sm:$0xff]  ;;  %v28278_v39 = vld [vmem:[#allocation160_spill] sm:$0xff] }
 0x2e5   : > { %19844 = vmatmul.mubr.msk.bf16.gmra.mrb[36].mxu1 %vm1294_vm3, %v24248_v37  ;;  %v28254_v37 = vld [vmem:[#allocation53_spill] sm:$0xff] }
 0x2e6   : > { %19847 = vmatprep.mubr.msk.bf16.mxu1 %vm1294_vm3, %v24258_v33  ;;  %v28255_v33 = vld [vmem:[#allocation59_spill] sm:$0xff] }
 0x2e9   : > { %19048 = vmatmul.mubr.msk.bf16.gmra.mrb[84].mxu0 %vm1294_vm3, %v28253_v3  ;;  %v28279_v3 = vld [vmem:[#allocation162_spill] sm:$0xff] }
 0x2ea   : > { %19051 = vmatprep.mubr.msk.bf16.mxu0 %vm1294_vm3, %v28254_v37  ;;  %v28280_v37 = vld [vmem:[#allocation154_spill] sm:$0xff] }
 0x2ed   : > { %19848 = vmatmul.mubr.msk.bf16.gmra.mrb[40].mxu1 %vm1294_vm3, %v24260_v46  ;;  %v24687_v46 = vld [vmem:[%s27609_s3 + $0x60] sm:$0xff]  }
 0x2ee   : > { %19851 = vmatprep.mubr.msk.bf16.mxu1 %vm1294_vm3, %v24276_v36  ;;  %19987 = vmatprep.subr.bf16.mxu1 %v24687_v46  ;;  %v28257_v36 = vld [vmem:[#allocation69_spill] sm:$0xff] }
 0x2f1   : > { %19052 = vmatmul.mubr.msk.bf16.gmra.mrb[88].mxu0 %vm1294_vm3, %v28255_v33  ;;  %v28281_v33 = vld [vmem:[#allocation158_spill] sm:$0xff] }
 0x2f2   : > { %19055 = vmatprep.mubr.msk.bf16.mxu0 %vm1294_vm3, %v28256_v17  ;;  %v28282_v17 = vld [vmem:[#allocation182_spill] sm:$0xff] }
 0x2f5   : > { %19852 = vmatmul.mubr.msk.bf16.gmra.mrb[44].mxu1 %vm1294_vm3, %v24278_v58  ;;  %v28258_v58 = vld [vmem:[#allocation73_spill] sm:$0xff] }
 0x2f6   : > { %19855 = vmatprep.mubr.msk.bf16.mxu1 %vm1294_vm3, %v24288_v6  ;;  %v28259_v6 = vld [vmem:[#allocation79_spill] sm:$0xff] }
 0x2f9   : > { %19056 = vmatmul.mubr.msk.bf16.gmra.mrb[92].mxu0 %vm1294_vm3, %v28257_v36  ;;  %v28283_v36 = vld [vmem:[#allocation184_spill] sm:$0xff] }
 0x2fa   : > { %19059 = vmatprep.mubr.msk.bf16.mxu0 %vm1294_vm3, %v28258_v58  ;;  %v28284_v58 = vld [vmem:[#allocation177_spill] sm:$0xff] }
 0x2fd   : > { %19856 = vmatmul.mubr.msk.bf16.gmra.mrb[48].mxu1 %vm1294_vm3, %v24290_v23  ;;  %v28261_v23 = vld [vmem:[#allocation89_spill] sm:$0xff] }
 0x2fe   : > { %19859 = vmatprep.mubr.msk.bf16.mxu1 %vm1294_vm3, %v24300_v24  ;;  %v28262_v24 = vld [vmem:[#allocation93_spill] sm:$0xff] }
 0x301   : > { %19060 = vmatmul.mubr.msk.bf16.gmra.mrb[96].mxu0 %vm1294_vm3, %v28259_v6  ;;  %v28285_v6 = vld [vmem:[#allocation180_spill] sm:$0xff] }
 0x302   : > { %19063 = vmatprep.mubr.msk.bf16.mxu0 %vm1294_vm3, %v28260_v7  ;;  %v28286_v7 = vld [vmem:[#allocation14_spill] sm:$0xff] }
 0x305   : > { %19860 = vmatmul.mubr.msk.bf16.gmra.mrb[52].mxu1 %vm1294_vm3, %v24302_v15  ;;  %v28263_v15 = vld [vmem:[#allocation99_spill] sm:$0xff] }
 0x306   : > { %19863 = vmatprep.mubr.msk.bf16.mxu1 %vm1294_vm3, %v24312_v56  ;;  %v28264_v56 = vld [vmem:[#allocation103_spill] sm:$0xff] }
 0x309   : > { %19064 = vmatmul.mubr.msk.bf16.gmra.mrb[100].mxu0 %vm1294_vm3, %v28261_v23  ;;  %v28287_v23 = vld [vmem:[#allocation183_spill] sm:$0xff] }
 0x30a   : > { %19067 = vmatprep.mubr.msk.bf16.mxu0 %vm1294_vm3, %v28262_v24  ;;  %v24776_v24 = vld [vmem:[#allocation2 + $0x272] sm:$0xff] }
 0x30d   : > { %19864 = vmatmul.mubr.msk.bf16.gmra.mrb[56].mxu1 %vm1294_vm3, %v24314_v52  ;;  %v28265_v52 = vld [vmem:[#allocation110_spill] sm:$0xff] }
 0x30e   : > { %19867 = vmatprep.mubr.msk.bf16.mxu1 %vm1294_vm3, %v24324_v38  ;;  %v28266_v38 = vld [vmem:[#allocation114_spill] sm:$0xff] }
 0x311   : > { %19068 = vmatmul.mubr.msk.bf16.gmra.mrb[104].mxu0 %vm1294_vm3, %v28263_v15  ;;  %v28288_v15 = vld [vmem:[#allocation194_spill] sm:$0xff] }
 0x312   : > { %19071 = vmatprep.mubr.msk.bf16.mxu0 %vm1294_vm3, %v28264_v56  ;;  %v7973_v56 = vpack.c.bf16 %v24594_v31, %v24568_v9  ;;  %v24798_v9 = vld [vmem:[#allocation2 + $0x278] sm:$0xff]  ;;  %v24800_v31 = vld [vmem:[#allocation2 + $0x280] sm:$0xff] }
 0x315   : > { %19868 = vmatmul.mubr.msk.bf16.gmra.mrb[60].mxu1 %vm1294_vm3, %v24326_v42  ;;  %v28268_v42 = vld [vmem:[#allocation121_spill] sm:$0xff] }
 0x316   : > { %19871 = vmatprep.mubr.msk.bf16.mxu1 %vm1294_vm3, %v28176_v48  ;;  %v28267_v48 = vld [vmem:[#allocation128_spill] sm:$0xff] }
 0x319   : > { %19072 = vmatmul.mubr.msk.bf16.gmra.mrb[108].mxu0 %vm1294_vm3, %v28265_v52  ;;  %v24782_v52 = vld [vmem:[#allocation2 + $0x270] sm:$0xff] }
 0x31a   : > { %19075 = vmatprep.mubr.msk.bf16.mxu0 %vm1294_vm3, %v28266_v38  ;;  %v7974_v38 = vpack.c.bf16 %v24776_v24, %v24596_v10  ;;  %v2899_v10 = vpack.c.bf16 %v24800_v31, %v24798_v9 }
 0x31d   : > { %19872 = vmatmul.mubr.msk.bf16.gmra.mrb[64].mxu1 %vm1294_vm3, %v28177_v43  ;;  %v28270_v43 = vld [vmem:[#allocation138_spill] sm:$0xff] }
 0x31e   : > { %19875 = vmatprep.mubr.msk.bf16.mxu1 %vm1294_vm3, %v28180_v62  ;;  %v28271_v62 = vld [vmem:[#allocation139_spill] sm:$0xff] }
 0x321   : > { %19076 = vmatmul.mubr.msk.bf16.gmra.mrb[112].mxu0 %vm1294_vm3, %v28268_v42  ;;  %v24792_v42 = vld [vmem:[#allocation2 + $0x27a] sm:$0xff] }
 0x322   : > { %19079 = vmatprep.mubr.msk.bf16.mxu0 %vm1294_vm3, %v28269_v4  ;;  %v24794_v4 = vld [vmem:[#allocation2 + $0x282] sm:$0xff] }
 0x325   : > { %19876 = vmatmul.mubr.msk.bf16.gmra.mrb[68].mxu1 %vm1294_vm3, %v28181_v16  ;;  %v28274_v16 = vld [vmem:[#allocation149_spill] sm:$0xff] }
 0x326   : > { %19879 = vmatprep.mubr.msk.bf16.mxu1 %vm1294_vm3, %v28267_v48  ;;  %v2897_v48 = vpack.c.bf16 %v24602_v11, %v24576_v25  ;;  %v7975_v25 = vpack.c.bf16 %v24794_v4, %v24792_v42  ;;  %v22630_v11 = vld [vmem:[%s27609_s3 + $0x68] sm:$0xff]  }
 0x329   : > { %19080 = vmatmul.mubr.msk.bf16.gmra.mrb[116].mxu0 %vm1294_vm3, %v28272_v28  ;;  %v22636_v28 = vld [vmem:[%s27609_s3 + $0x38] sm:$0xff]  }
 0x32a   : > { %19083 = vmatprep.mubr.msk.bf16.mxu0 %vm1294_vm3, %v28273_v26  ;;  %v28291_v26 = vld [vmem:[#allocation41_spill] sm:$0xff] }
 0x32d   : > { %19880 = vmatmul.mubr.msk.bf16.gmra.mrb[0].mxu1 %vm1294_vm3, %v28270_v43  ;;  %v22632_v43 = vld [vmem:[%s27609_s3 + $0x20] sm:$0xff]  }
 0x32e   : > { %19883 = vmatprep.mubr.msk.bf16.mxu1 %vm1294_vm3, %v28271_v62  ;;  %v22634_v62 = vld [vmem:[%s27609_s3 + $0x28] sm:$0xff]   ;;  %19187 = vmatprep.subr.bf16.mxu0 %v22632_v43 }
 0x331   : > { %19084 = vmatmul.mubr.msk.bf16.gmra.mrb[120].mxu0 %vm1294_vm3, %v28276_v14  ;;  %v28295_v14 = vld [vmem:[#allocation70_spill] sm:$0xff] }
 0x332   : > { %19087 = vmatprep.mubr.msk.bf16.mxu0 %vm1294_vm3, %v28277_v27  ;;  %v24877_v27 = vld [vmem:[%s27609_s3 + $0x100] sm:$0xff]  }
 0x335   : > { %19884 = vmatmul.mubr.msk.bf16.gmra.mrb[4].mxu1 %vm1294_vm3, %v28274_v16  ;;  %v28293_v16 = vld [vmem:[#allocation65_spill] sm:$0xff] }
 0x336   : > { %19887 = vmatprep.mubr.msk.bf16.mxu1 %vm1294_vm3, %v28275_v45  ;;  %v28294_v45 = vld [vmem:[#allocation51_spill] sm:$0xff] }
 0x339   : > { %19088 = vmatmul.mubr.msk.bf16.gmra.mrb[124].mxu0 %vm1294_vm3, %v28280_v37  ;;  %v28301_v37 = vld [vmem:[#allocation100_spill] sm:$0xff] }
 0x33a   : > { %19091 = vmatprep.mubr.msk.bf16.mxu0 %vm1294_vm3, %v28281_v33  ;;  %v28302_v33 = vld [vmem:[#allocation91_spill] sm:$0xff] }
 0x33d   : > { %19888 = vmatmul.mubr.msk.bf16.gmra.mrb[8].mxu1 %vm1294_vm3, %v28278_v39  ;;  %v28298_v39 = vld [vmem:[#allocation71_spill] sm:$0xff] }
 0x33e   : > { %19891 = vmatprep.mubr.msk.bf16.mxu1 %vm1294_vm3, %v28279_v3  ;;  %v28300_v3 = vld [vmem:[#allocation81_spill] sm:$0xff] }
 0x341   : > { %19092 = vmatmul.mubr.msk.bf16.gmra.mrb[128].mxu0 %vm1294_vm3, %v28284_v58  ;;  %v28314_v58 = vld [vmem:[#allocation145_spill] sm:$0xff] }
 0x342   : > { %19095 = vmatprep.mubr.msk.bf16.mxu0 %vm1294_vm3, %v28285_v6  ;;  %v28316_v6 = vld [vmem:[#allocation178_spill] sm:$0xff] }
 0x345   : > { %19892 = vmatmul.mubr.msk.bf16.gmra.mrb[12].mxu1 %vm1294_vm3, %v28282_v17  ;;  %v28304_v17 = vld [vmem:[#allocation101_spill] sm:$0xff] }
 0x346   : > { %19895 = vmatprep.mubr.msk.bf16.mxu1 %vm1294_vm3, %v28283_v36  ;;  %v28312_v36 = vld [vmem:[#allocation155_spill] sm:$0xff] }
 0x349   : > { %19096 = vmatmul.mubr.msk.bf16.gmra.mrb[132].mxu0 %vm1294_vm3, %v28287_v23  ;;  %v28319_v23 = vld [vmem:[#allocation185_spill] sm:$0xff] }
 0x34a   : > { %19099 = vmatprep.mubr.msk.bf16.mxu0 %vm1294_vm3, %v28288_v15  ;;  %v28320_v15 = vld [vmem:[#allocation193_spill] sm:$0xff] }
 0x34d   : > { %19896 = vmatmul.mubr.msk.bf16.gmra.mrb[16].mxu1 %vm1294_vm3, %v28286_v7  ;;  %v28318_v7 = vld [vmem:[#allocation156_spill] sm:$0xff] }
 0x34e   : > { %19899 = vmatprep.mubr.msk.bf16.mxu1 %vm1294_vm3, %v24404_v21  ;;  %v2898_v21 = vpack.c.bf16 %v24782_v52, %v24604_v49  ;;  %v28289_v49 = vld [vmem:[#allocation23_spill] sm:$0xff] }
 0x351   : > { %19100 = vmatmul.mubr.msk.bf16.gmra.mrb[136].mxu0 %vm1294_vm3, %v2897_v48  ;;  %v28323_v48 = vld [vmem:[#allocation34_spill] sm:$0xff] }
 0x352   : > { %19103 = vmatprep.mubr.msk.bf16.mxu0 %vm1294_vm3, %v2898_v21  ;;  %v6392_v21 = vld [vmem:[#allocation2 + $0x28a] sm:$0xff] }
 0x355   : > { %19900 = vmatmul.mubr.msk.bf16.gmra.mrb[20].mxu1 %vm1294_vm3, %v7973_v56  ;;  %v28321_v56 = vld [vmem:[#allocation25_spill] sm:$0xff] }
 0x356   : > { %19903 = vmatprep.mubr.msk.bf16.mxu1 %vm1294_vm3, %v7974_v38  ;;  %v28322_v38 = vld [vmem:[#allocation31_spill] sm:$0xff] }
 0x359   : > { %19104 = vmatmul.mubr.msk.bf16.gmra.mrb[140].mxu0 %vm1294_vm3, %v2899_v10  ;;  %v8412_v10 = vpack.c.bf16 %v6392_v21, %v24794_v4  ;;  %v8850_v4 = vld [vmem:[#allocation2 + $0xb] sm:$0xff] }
 0x35a   : > { %19115 = vmatprep.mubr.msk.bf16.mxu0 %vm1294_vm3, %v28161_v51  ;;  %v22631_v51 = vld [vmem:[%s27609_s3 + $0x70] sm:$0xff]  }
 0x35b   : > { %v22643_v21 = vld [vmem:[%s27609_s3 + $0xd0] sm:$0xff]  }
 0x35d   : > { %19904 = vmatmul.mubr.msk.bf16.gmra.mrb[24].mxu1 %vm1294_vm3, %v7975_v25  ;;  %v28324_v25 = vld [vmem:[#allocation44_spill] sm:$0xff] }
 0x35e   : > { %19915 = vmatprep.mubr.msk.bf16.mxu1 %vm1294_vm3, %v28209_v20  ;;  %v23088_v20 = vld [vmem:[#allocation2 + $0x1e9] sm:$0xff] }
 0x361   : > { %19116 = vmatmul.mubr.msk.bf16.vlgmr.msra.gmra.mrb[72].mxu0 %vm1294_vm3, %v28289_v49  ;;  %v6393_v49 = vld [vmem:[#allocation2 + $0x292] sm:$0xff] }
 0x362   : > { %19119 = vmatprep.mubr.msk.bf16.mxu0 %vm1294_vm3, %v28163_v61  ;;  %19188 = vmatpush3.bf16.msra.mxu0 %v22632_v43  ;;  %v22635_v61 = vld [vmem:[%s27609_s3 + $0x30] sm:$0xff]  }
 0x363   : > { %19189 = vmatprep.subr.bf16.mxu0 %v22634_v62  ;;  %v1462_v43 = vld [vmem:[#allocation2 + $0x290] sm:$0xff] }
 0x365   : > { %19916 = vmatmul.mubr.msk.bf16.vlgmr.msra.gmra.mrb[28].mxu1 %vm1294_vm3, %v28210_v12  ;;  %v23087_v12 = vld [vmem:[#allocation2 + $0x1e1] sm:$0xff] }
 0x366   : > { %19919 = vmatprep.mubr.msk.bf16.mxu1 %vm1294_vm3, %v28211_v47  ;;  %19988 = vmatpush3.bf16.msra.mxu1 %v24687_v46  ;;  %v22633_v46 = vld [vmem:[%s27609_s3 + $0x78] sm:$0xff]  }
 0x367   : > { %19989 = vmatprep.subr.bf16.mxu1 %v22630_v11  ;;  %19190 = vmatpush3.bf16.msra.mxu0 %v22634_v62  ;;  %v8849_v62 = vld [vmem:[#allocation2 + $0x3] sm:$0xff]  ;;  %v23085_v47 = vld [vmem:[#allocation2 + $0x1d1] sm:$0xff] }
 0x368   : > { %19191 = vmatprep.subr.bf16.mxu0 %v22635_v61 }
 0x369   : > { %19120 = vmatmul.mubr.msk.bf16.gmra.mrb[76].mxu0 %vm1294_vm3, %v28164_v0  ;;  %v28290_v0 = vld [vmem:[#allocation55_spill] sm:$0xff] }
 0x36a   : > { %19990 = vmatpush3.bf16.msra.mxu1 %v22630_v11  ;;  %19123 = vmatprep.mubr.msk.bf16.mxu0 %vm1294_vm3, %v28165_v55  ;;  %v28292_v55 = vld [vmem:[#allocation60_spill] sm:$0xff] }
 0x36b   : > { %19991 = vmatprep.subr.bf16.mxu1 %v22631_v51  ;;  %19192 = vmatpush3.bf16.msra.mxu0 %v22635_v61  ;;  %v3773_v61 = vld [vmem:[#allocation2 + $0x1] sm:$0xff] }
 0x36c   : > { %19193 = vmatprep.subr.bf16.mxu0 %v22636_v28 }
 0x36d   : > { %19920 = vmatmul.mubr.msk.bf16.gmra.mrb[32].mxu1 %vm1294_vm3, %v28212_v44 }
 0x36e   : > { %19923 = vmatprep.mubr.msk.bf16.mxu1 %vm1294_vm3, %v28213_v41  ;;  %19992 = vmatpush3.bf16.msra.mxu1 %v22631_v51  ;;  %v6394_v51 = vld [vmem:[#allocation2 + $0x29a] sm:$0xff]  ;;  %v23080_v41 = vld [vmem:[#allocation2 + $0x1c9] sm:$0xff] }
 0x36f   : > { %19993 = vmatprep.subr.bf16.mxu1 %v22633_v46  ;;  %19194 = vmatpush3.bf16.msra.mxu0 %v22636_v28  ;;  %v8851_v28 = vld [vmem:[#allocation2 + $0x13] sm:$0xff] }
 0x371   : > { %19124 = vmatmul.mubr.msk.bf16.gmra.mrb[80].mxu0 %vm1294_vm3, %v28291_v26  ;;  %v22971_v26 = vld [vmem:[#allocation2 + $0x1b] sm:$0xff] }
 0x372   : > { %19994 = vmatpush3.bf16.msra.mxu1 %v22633_v46  ;;  %19127 = vmatprep.mubr.msk.bf16.mxu0 %vm1294_vm3, %v28167_v18  ;;  %v28296_v18 = vld [vmem:[#allocation61_spill] sm:$0xff] }
 0x373   : > { %20067 = vmatprep.subr.bf16.mxu1 %v24877_v27 }
 0x375   : > { %19924 = vmatmul.mubr.msk.bf16.gmra.mrb[36].mxu1 %vm1294_vm3, %v28214_v57  ;;  %v23079_v57 = vld [vmem:[#allocation2 + $0x1c1] sm:$0xff] }
 0x376   : > { %19927 = vmatprep.mubr.msk.bf16.mxu1 %vm1294_vm3, %v28290_v0  ;;  %v23077_v0 = vld [vmem:[#allocation2 + $0x1b1] sm:$0xff]  ;;  %v25216_v44 = vpack.c.bf16 %v23080_v41, %v23079_v57  ;;  %v23086_v57 = vld [vmem:[#allocation2 + $0x1d9] sm:$0xff] }
 0x377   : > { %v25228_v41 = vpack.c.bf16 %v23086_v57, %v23085_v47  ;;  %v23092_v47 = vld [vmem:[#allocation2 + $0x20b] sm:$0xff] }
 0x378   : > { %28327 = vst [vmem:[#allocation74_spill] sm:$0xff] %v25216_v44 }
 0x379   : > { %19128 = vmatmul.mubr.msk.bf16.gmra.mrb[84].mxu0 %vm1294_vm3, %v28294_v45  ;;  %v8934_v45 = vpack.c.bf16 %v22971_v26, %v8851_v28  ;;  %v22997_v26 = vld [vmem:[#allocation2 + $0x71] sm:$0xff]  ;;  %28330 = vst [vmem:[#allocation105_spill] sm:$0xff] %v25228_v41 }
 0x37a   : > { %19131 = vmatprep.mubr.msk.bf16.mxu0 %vm1294_vm3, %v28169_v40  ;;  %v28297_v40 = vld [vmem:[#allocation80_spill] sm:$0xff] }
 0x37d   : > { %19928 = vmatmul.mubr.msk.bf16.gmra.mrb[40].mxu1 %vm1294_vm3, %v28292_v55 }
 0x37e   : > { %19931 = vmatprep.mubr.msk.bf16.mxu1 %vm1294_vm3, %v28293_v16  ;;  %v23072_v16 = vld [vmem:[#allocation2 + $0x1a9] sm:$0xff] }
 0x381   : > { %19132 = vmatmul.mubr.msk.bf16.gmra.mrb[88].mxu0 %vm1294_vm3, %v28296_v18  ;;  %v22638_v18 = vld [vmem:[%s27609_s3 + $0x108] sm:$0xff]  }
 0x382   : > { %19135 = vmatprep.mubr.msk.bf16.mxu0 %vm1294_vm3, %v28171_v54  ;;  %v28299_v54 = vld [vmem:[#allocation90_spill] sm:$0xff] }
 0x385   : > { %19932 = vmatmul.mubr.msk.bf16.gmra.mrb[44].mxu1 %vm1294_vm3, %v28295_v14  ;;  %v23071_v14 = vld [vmem:[#allocation2 + $0x1a1] sm:$0xff] }
 0x386   : > { %19935 = vmatprep.mubr.msk.bf16.mxu1 %vm1294_vm3, %v28219_v30  ;;  %v23069_v30 = vld [vmem:[#allocation2 + $0x191] sm:$0xff]  ;;  %v25200_v55 = vpack.c.bf16 %v23072_v16, %v23071_v14  ;;  %v23078_v16 = vld [vmem:[#allocation2 + $0x1b9] sm:$0xff] }
 0x387   : > { %v25212_v14 = vpack.c.bf16 %v23078_v16, %v23077_v0  ;;  %v23084_v0 = vld [vmem:[#allocation2 + $0x1eb] sm:$0xff] }
 0x389   : > { %19136 = vmatmul.mubr.msk.bf16.gmra.mrb[92].mxu0 %vm1294_vm3, %v28298_v39  ;;  %v22972_v39 = vld [vmem:[#allocation2 + $0x23] sm:$0xff]  ;;  %28326 = vst [vmem:[#allocation64_spill] sm:$0xff] %v25212_v14 }
 0x38a   : > { %19139 = vmatprep.mubr.msk.bf16.mxu0 %vm1294_vm3, %v28173_v35  ;;  %v28303_v35 = vld [vmem:[#allocation111_spill] sm:$0xff] }
 0x38d   : > { %19936 = vmatmul.mubr.msk.bf16.gmra.mrb[48].mxu1 %vm1294_vm3, %v28297_v40 }
 0x38e   : > { %19939 = vmatprep.mubr.msk.bf16.mxu1 %vm1294_vm3, %v28221_v5  ;;  %v23064_v5 = vld [vmem:[#allocation2 + $0x189] sm:$0xff] }
 0x391   : > { %19140 = vmatmul.mubr.msk.bf16.gmra.mrb[96].mxu0 %vm1294_vm3, %v28300_v3  ;;  %v22973_v3 = vld [vmem:[#allocation2 + $0x2b] sm:$0xff] }
 0x392   : > { %19143 = vmatprep.mubr.msk.bf16.mxu0 %vm1294_vm3, %v28175_v22  ;;  %v28305_v22 = vld [vmem:[#allocation122_spill] sm:$0xff] }
 0x395   : > { %19940 = vmatmul.mubr.msk.bf16.gmra.mrb[52].mxu1 %vm1294_vm3, %v28299_v54  ;;  %v23063_v54 = vld [vmem:[#allocation2 + $0x181] sm:$0xff] }
 0x396   : > { %19943 = vmatprep.mubr.msk.bf16.mxu1 %vm1294_vm3, %v28223_v34  ;;  %v23061_v34 = vld [vmem:[#allocation2 + $0x171] sm:$0xff]  ;;  %v25184_v40 = vpack.c.bf16 %v23064_v5, %v23063_v54  ;;  %v23070_v5 = vld [vmem:[#allocation2 + $0x199] sm:$0xff] }
 0x397   : > { %v25196_v54 = vpack.c.bf16 %v23070_v5, %v23069_v30  ;;  %v23076_v30 = vld [vmem:[#allocation2 + $0x1cb] sm:$0xff] }
 0x399   : > { %19144 = vmatmul.mubr.msk.bf16.gmra.mrb[100].mxu0 %vm1294_vm3, %v28302_v33  ;;  %v8935_v33 = vpack.c.bf16 %v22973_v3, %v22972_v39  ;;  %v22999_v39 = vld [vmem:[#allocation2 + $0x81] sm:$0xff]  ;;  %v23000_v3 = vld [vmem:[#allocation2 + $0x89] sm:$0xff] }
 0x39a   : > { %19147 = vmatprep.mubr.msk.bf16.mxu0 %vm1294_vm3, %v28179_v53  ;;  %v28307_v53 = vld [vmem:[#allocation133_spill] sm:$0xff] }
 0x39d   : > { %19944 = vmatmul.mubr.msk.bf16.gmra.mrb[56].mxu1 %vm1294_vm3, %v28301_v37 }
 0x39e   : > { %19947 = vmatprep.mubr.msk.bf16.mxu1 %vm1294_vm3, %v28225_v50  ;;  %v28306_v50 = vld [vmem:[#allocation112_spill] sm:$0xff] }
 0x3a1   : > { %19148 = vmatmul.mubr.msk.bf16.gmra.mrb[104].mxu0 %vm1294_vm3, %v28304_v17  ;;  %v22974_v17 = vld [vmem:[#allocation2 + $0x19] sm:$0xff] }
 0x3a2   : > { %19151 = vmatprep.mubr.msk.bf16.mxu0 %vm1294_vm3, %v28183_v1  ;;  %v28309_v1 = vld [vmem:[#allocation144_spill] sm:$0xff] }
 0x3a5   : > { %19948 = vmatmul.mubr.msk.bf16.gmra.mrb[60].mxu1 %vm1294_vm3, %v28303_v35  ;;  %v3775_v35 = vld [vmem:[#allocation2 + $0x11] sm:$0xff] }
 0x3a6   : > { %19951 = vmatprep.mubr.msk.bf16.mxu1 %vm1294_vm3, %v28227_v29  ;;  %v28308_v29 = vld [vmem:[#allocation123_spill] sm:$0xff] }
 0x3a9   : > { %19152 = vmatmul.mubr.msk.bf16.gmra.mrb[108].mxu0 %vm1294_vm3, %v28306_v50  ;;  %v22975_v50 = vld [vmem:[#allocation2 + $0x29] sm:$0xff] }
 0x3aa   : > { %19155 = vmatprep.mubr.msk.bf16.mxu0 %vm1294_vm3, %v28187_v59  ;;  %v28311_v59 = vld [vmem:[#allocation151_spill] sm:$0xff] }
 0x3ad   : > { %19952 = vmatmul.mubr.msk.bf16.gmra.mrb[64].mxu1 %vm1294_vm3, %v28305_v22  ;;  %v3858_v22 = vpack.c.bf16 %v22974_v17, %v3775_v35  ;;  %v23001_v35 = vld [vmem:[#allocation2 + $0x93] sm:$0xff]  ;;  %v23002_v17 = vld [vmem:[#allocation2 + $0x9b] sm:$0xff] }
 0x3ae   : > { %19955 = vmatprep.mubr.msk.bf16.mxu1 %vm1294_vm3, %v28229_v13  ;;  %v28310_v13 = vld [vmem:[#allocation134_spill] sm:$0xff] }
 0x3b1   : > { %19156 = vmatmul.mubr.msk.bf16.gmra.mrb[112].mxu0 %vm1294_vm3, %v28308_v29 }
 0x3b2   : > { %19159 = vmatprep.mubr.msk.bf16.mxu0 %vm1294_vm3, %v28191_v19  ;;  %v28315_v19 = vld [vmem:[#allocation163_spill] sm:$0xff] }
 0x3b5   : > { %19956 = vmatmul.mubr.msk.bf16.gmra.mrb[68].mxu1 %vm1294_vm3, %v28307_v53  ;;  %v22976_v53 = vld [vmem:[#allocation2 + $0x21] sm:$0xff] }
 0x3b6   : > { %19959 = vmatprep.mubr.msk.bf16.mxu1 %vm1294_vm3, %v28231_v63  ;;  %v28313_v63 = vld [vmem:[#allocation159_spill] sm:$0xff]  ;;  %v3859_v29 = vpack.c.bf16 %v22975_v50, %v22976_v53 }
 0x3b7   : > { %v23003_v50 = vld [vmem:[#allocation2 + $0xa3] sm:$0xff]  ;;  %v23004_v53 = vld [vmem:[#allocation2 + $0xab] sm:$0xff] }
 0x3b9   : > { %19160 = vmatmul.mubr.msk.bf16.gmra.mrb[116].mxu0 %vm1294_vm3, %v28310_v13  ;;  %v22640_v13 = vld [vmem:[%s27609_s3 + $0xc0] sm:$0xff]  }
 0x3ba   : > { %19163 = vmatprep.mubr.msk.bf16.mxu0 %vm1294_vm3, %v28311_v59  ;;  %v22642_v59 = vld [vmem:[%s27609_s3 + $0xc8] sm:$0xff]   ;;  %19267 = vmatprep.subr.bf16.mxu0 %v22640_v13 }
 0x3bd   : > { %19960 = vmatmul.mubr.msk.bf16.gmra.mrb[0].mxu1 %vm1294_vm3, %v28309_v1  ;;  %v22639_v1 = vld [vmem:[%s27609_s3 + $0x110] sm:$0xff]  }
 0x3be   : > { %19963 = vmatprep.mubr.msk.bf16.mxu1 %vm1294_vm3, %v28233_v32  ;;  %v28317_v32 = vld [vmem:[#allocation181_spill] sm:$0xff] }
 0x3c1   : > { %19164 = vmatmul.mubr.msk.bf16.gmra.mrb[120].mxu0 %vm1294_vm3, %v28314_v58  ;;  %v22641_v58 = vld [vmem:[%s27609_s3 + $0x118] sm:$0xff]  }
 0x3c2   : > { %19167 = vmatprep.mubr.msk.bf16.mxu0 %vm1294_vm3, %v28315_v19  ;;  %v22979_v19 = vld [vmem:[#allocation2 + $0x43] sm:$0xff] }
 0x3c5   : > { %19964 = vmatmul.mubr.msk.bf16.gmra.mrb[4].mxu1 %vm1294_vm3, %v28312_v36  ;;  %v22978_v36 = vld [vmem:[#allocation2 + $0x3b] sm:$0xff] }
 0x3c6   : > { %19967 = vmatprep.mubr.msk.bf16.mxu1 %vm1294_vm3, %v28313_v63 }
 0x3c9   : > { %19168 = vmatmul.mubr.msk.bf16.gmra.mrb[124].mxu0 %vm1294_vm3, %v28318_v7  ;;  %v22981_v7 = vld [vmem:[#allocation2 + $0x31] sm:$0xff] }
 0x3ca   : > { %19171 = vmatprep.mubr.msk.bf16.mxu0 %vm1294_vm3, %v28319_v23  ;;  %v22982_v23 = vld [vmem:[#allocation2 + $0x39] sm:$0xff] }
 0x3cd   : > { %19968 = vmatmul.mubr.msk.bf16.gmra.mrb[8].mxu1 %vm1294_vm3, %v28316_v6  ;;  %v22980_v6 = vld [vmem:[#allocation2 + $0x4b] sm:$0xff] }
 0x3ce   : > { %19971 = vmatprep.mubr.msk.bf16.mxu1 %vm1294_vm3, %v28317_v32  ;;  %v25004_v32 = vpack.c.bf16 %v22980_v6, %v22979_v19  ;;  %v25075_v19 = vld [vmem:[%s27609_s3 + $0x1a0] sm:$0xff]   ;;  %v23009_v6 = vld [vmem:[#allocation2 + $0xb3] sm:$0xff] }
 0x3d1   : > { %19172 = vmatmul.mubr.msk.bf16.gmra.mrb[128].mxu0 %vm1294_vm3, %v28206_v8  ;;  %v1461_v8 = vld [vmem:[#allocation2 + $0x288] sm:$0xff] }
 0x3d2   : > { %19175 = vmatprep.mubr.msk.bf16.mxu0 %vm1294_vm3, %v24584_v60  ;;  %v3335_v60 = vpack.c.bf16 %v24798_v9, %v24782_v52  ;;  %v3336_v11 = vpack.c.bf16 %v1461_v8, %v24800_v31  ;;  %v3774_v52 = vld [vmem:[#allocation2 + $0x9] sm:$0xff]  ;;  %v8933_v9 = vpack.c.bf16 %v8850_v4, %v8849_v62  ;;  %v22986_v8 = vld [vmem:[#allocation2 + $0x5b] sm:$0xff] }
 0x3d3   : > { %v3857_v31 = vpack.c.bf16 %v3774_v52, %v3773_v61  ;;  %v22992_v62 = vld [vmem:[#allocation2 + $0x69] sm:$0xff]  ;;  %v22994_v61 = vld [vmem:[#allocation2 + $0x7b] sm:$0xff] }
 0x3d5   : > { %19972 = vmatmul.mubr.msk.bf16.gmra.mrb[12].mxu1 %vm1294_vm3, %v28320_v15  ;;  %v25008_v15 = vpack.c.bf16 %v22982_v23, %v22981_v7  ;;  %v23010_v7 = vld [vmem:[#allocation2 + $0xbb] sm:$0xff] }
 0x3d6   : > { %19975 = vmatprep.mubr.msk.bf16.mxu1 %vm1294_vm3, %v24574_v2  ;;  %v8411_v2 = vpack.c.bf16 %v24792_v42, %v24776_v24  ;;  %v1463_v24 = vld [vmem:[#allocation2 + $0x298] sm:$0xff]  ;;  %v8413_v42 = vpack.c.bf16 %v6394_v51, %v6393_v49  ;;  %v25078_v23 = vpack.c.bf16 %v23010_v7, %v23009_v6 }
 0x3d7   : > { %v3337_v46 = vpack.c.bf16 %v1463_v24, %v1462_v43  ;;  %v22989_v51 = vld [vmem:[#allocation2 + $0x51] sm:$0xff]  ;;  %v22990_v43 = vld [vmem:[#allocation2 + $0x59] sm:$0xff] }
 0x3d8   : > { %v25030_v24 = vpack.c.bf16 %v22990_v43, %v22989_v51  ;;  %v23017_v43 = vld [vmem:[#allocation2 + $0xd3] sm:$0xff] }
 0x3d9   : > { %19176 = vmatmul.mubr.msk.bf16.gmra.mrb[132].mxu0 %vm1294_vm3, %v28323_v48  ;;  %v23030_v6 = vld [vmem:[#allocation2 + $0xf9] sm:$0xff] }
 0x3da   : > { %19179 = vmatprep.mubr.msk.bf16.mxu0 %vm1294_vm3, %v28324_v25  ;;  %v22644_v25 = vld [vmem:[%s27609_s3 + $0xd8] sm:$0xff]  }
 0x3dd   : > { %19976 = vmatmul.mubr.msk.bf16.gmra.mrb[16].mxu1 %vm1294_vm3, %v28321_v56  ;;  %v22983_v56 = vld [vmem:[#allocation2 + $0x41] sm:$0xff] }
 0x3de   : > { %19979 = vmatprep.mubr.msk.bf16.mxu1 %vm1294_vm3, %v28322_v38  ;;  %v22984_v38 = vld [vmem:[#allocation2 + $0x49] sm:$0xff] }
 0x3df   : > { %v25012_v48 = vpack.c.bf16 %v22984_v38, %v22983_v56  ;;  %v23011_v56 = vld [vmem:[#allocation2 + $0xc3] sm:$0xff]  ;;  %v23012_v38 = vld [vmem:[#allocation2 + $0xcb] sm:$0xff] }
 0x3e1   : > { %19180 = vmatmul.mubr.msk.bf16.gmra.mrb[136].mxu0 %vm1294_vm3, %v3335_v60  ;;  %v22987_v60 = vld [vmem:[#allocation2 + $0x63] sm:$0xff] }
 0x3e2   : > { %19183 = vmatprep.mubr.msk.bf16.mxu0 %vm1294_vm3, %v3336_v11  ;;  %v22988_v11 = vld [vmem:[#allocation2 + $0x6b] sm:$0xff] }
 0x3e3   : > { %v25026_v49 = vpack.c.bf16 %v22988_v11, %v22987_v60  ;;  %v23015_v60 = vld [vmem:[#allocation2 + $0xc1] sm:$0xff]  ;;  %v23016_v11 = vld [vmem:[#allocation2 + $0xc9] sm:$0xff] }
 0x3e4   : > { %v25088_v51 = vpack.c.bf16 %v23016_v11, %v23015_v60  ;;  %v23034_v60 = vld [vmem:[#allocation2 + $0x11b] sm:$0xff] }
 0x3e5   : > { %19980 = vmatmul.mubr.msk.bf16.gmra.mrb[20].mxu1 %vm1294_vm3, %v8411_v2  ;;  %v22985_v2 = vld [vmem:[#allocation2 + $0x53] sm:$0xff] }
 0x3e6   : > { %19983 = vmatprep.mubr.msk.bf16.mxu1 %vm1294_vm3, %v8412_v10  ;;  %v25024_v10 = vpack.c.bf16 %v22986_v8, %v22985_v2  ;;  %v23014_v2 = vld [vmem:[#allocation2 + $0xb9] sm:$0xff] }
 0x3e9   : > { %19184 = vmatmul.mubr.msk.bf16.gmra.mrb[140].mxu0 %vm1294_vm3, %v3337_v46  ;;  %v22993_v46 = vld [vmem:[#allocation2 + $0x73] sm:$0xff] }
 0x3ea   : > { %19195 = vmatprep.mubr.msk.bf16.mxu0 %vm1294_vm3, %v3857_v31  ;;  %v25040_v52 = vpack.c.bf16 %v22994_v61, %v22993_v46  ;;  %v22996_v31 = vld [vmem:[#allocation2 + $0x8b] sm:$0xff]  ;;  %v23019_v46 = vld [vmem:[#allocation2 + $0xe3] sm:$0xff] }
 0x3eb   : > { %v23020_v61 = vld [vmem:[#allocation2 + $0xeb] sm:$0xff] }
 0x3ed   : > { %19984 = vmatmul.mubr.msk.bf16.gmra.mrb[24].mxu1 %vm1294_vm3, %v8413_v42  ;;  %v22991_v42 = vld [vmem:[#allocation2 + $0x61] sm:$0xff] }
 0x3ee   : > { %19995 = vmatprep.mubr.msk.bf16.mxu1 %vm1294_vm3, %v8933_v9  ;;  %v25034_v4 = vpack.c.bf16 %v22992_v62, %v22991_v42  ;;  %v22995_v9 = vld [vmem:[#allocation2 + $0x83] sm:$0xff]  ;;  %v23018_v42 = vld [vmem:[#allocation2 + $0xdb] sm:$0xff] }
 0x3ef   : > { %v25042_v28 = vpack.c.bf16 %v22996_v31, %v22995_v9  ;;  %v25094_v62 = vpack.c.bf16 %v23018_v42, %v23017_v43  ;;  %v25096_v9 = vpack.c.bf16 %v23020_v61, %v23019_v46  ;;  %v23021_v31 = vld [vmem:[#allocation2 + $0xd1] sm:$0xff]  ;;  %v23035_v43 = vld [vmem:[#allocation2 + $0x123] sm:$0xff] }
 0x3f0   : > { %v23036_v42 = vld [vmem:[#allocation2 + $0x12b] sm:$0xff] }
 0x3f1   : > { %19196 = vmatmul.mubr.msk.bf16.vlgmr.msra.gmra.mrb[72].mxu0 %vm1294_vm3, %v3858_v22  ;;  %v25056_v22 = vpack.c.bf16 %v23002_v17, %v23001_v35  ;;  %v23025_v17 = vld [vmem:[#allocation2 + $0xf3] sm:$0xff]  ;;  %v25128_v46 = vpack.c.bf16 %v23036_v42, %v23035_v43  ;;  %v23047_v43 = vld [vmem:[#allocation2 + $0x141] sm:$0xff]  ;;  %v23048_v42 = vld [vmem:[#allocation2 + $0x149] sm:$0xff] }
 0x3f2   : > { %19199 = vmatprep.mubr.msk.bf16.mxu0 %vm1294_vm3, %v3859_v29  ;;  %19268 = vmatpush3.bf16.msra.mxu0 %v22640_v13  ;;  %v25058_v29 = vpack.c.bf16 %v23004_v53, %v23003_v50  ;;  %v23006_v13 = vld [vmem:[#allocation2 + $0x99] sm:$0xff]  ;;  %v23037_v61 = vld [vmem:[#allocation2 + $0x111] sm:$0xff] }
 0x3f3   : > { %19269 = vmatprep.subr.bf16.mxu0 %v22642_v59  ;;  %v23026_v50 = vld [vmem:[#allocation2 + $0xfb] sm:$0xff] }
 0x3f4   : > { %v25110_v53 = vpack.c.bf16 %v23026_v50, %v23025_v17  ;;  %v23041_v50 = vld [vmem:[#allocation2 + $0x133] sm:$0xff] }
 0x3f5   : > { %19996 = vmatmul.mubr.msk.bf16.vlgmr.msra.gmra.mrb[28].mxu1 %vm1294_vm3, %v8934_v45  ;;  %v22998_v45 = vld [vmem:[#allocation2 + $0x79] sm:$0xff] }
 0x3f6   : > { %19999 = vmatprep.mubr.msk.bf16.mxu1 %vm1294_vm3, %v8935_v33  ;;  %20068 = vmatpush3.bf16.msra.mxu1 %v24877_v27  ;;  %v22977_v27 = vld [vmem:[#allocation2 + $0x33] sm:$0xff]  ;;  %v25050_v33 = vpack.c.bf16 %v23000_v3, %v22999_v39  ;;  %v23023_v39 = vld [vmem:[#allocation2 + $0xe1] sm:$0xff]  ;;  %v23024_v3 = vld [vmem:[#allocation2 + $0xe9] sm:$0xff] }
 0x3f7   : > { %20069 = vmatprep.subr.bf16.mxu1 %v22638_v18  ;;  %v24999_v63 = vpack.c.bf16 %v22978_v36, %v22977_v27  ;;  %19270 = vmatpush3.bf16.msra.mxu0 %v22642_v59  ;;  %v23007_v27 = vld [vmem:[#allocation2 + $0xa1] sm:$0xff]  ;;  %v23008_v36 = vld [vmem:[#allocation2 + $0xa9] sm:$0xff]  ;;  %v25104_v35 = vpack.c.bf16 %v23024_v3, %v23023_v39 }
 0x3f8   : > { %19271 = vmatprep.subr.bf16.mxu0 %v22643_v21  ;;  %v23039_v39 = vld [vmem:[#allocation2 + $0x121] sm:$0xff]  ;;  %v23040_v3 = vld [vmem:[#allocation2 + $0x129] sm:$0xff] }
 0x3f9   : > { %19200 = vmatmul.mubr.msk.bf16.gmra.mrb[76].mxu0 %vm1294_vm3, %v25008_v15  ;;  %v25136_v17 = vpack.c.bf16 %v23040_v3, %v23039_v39  ;;  %v23050_v39 = vld [vmem:[#allocation2 + $0x15b] sm:$0xff] }
 0x3fa   : > { %20070 = vmatpush3.bf16.msra.mxu1 %v22638_v18  ;;  %19203 = vmatprep.mubr.msk.bf16.mxu0 %vm1294_vm3, %v25012_v48  ;;  %v25046_v18 = vpack.c.bf16 %v22998_v45, %v22997_v26  ;;  %v23022_v26 = vld [vmem:[#allocation2 + $0xd9] sm:$0xff] }
 0x3fb   : > { %20071 = vmatprep.subr.bf16.mxu1 %v22639_v1  ;;  %19272 = vmatpush3.bf16.msra.mxu0 %v22643_v21  ;;  %v25080_v21 = vpack.c.bf16 %v23012_v38, %v23011_v56  ;;  %v25100_v45 = vpack.c.bf16 %v23022_v26, %v23021_v31  ;;  %v23031_v56 = vld [vmem:[#allocation2 + $0x101] sm:$0xff]  ;;  %v23032_v38 = vld [vmem:[#allocation2 + $0x109] sm:$0xff]  ;;  %v23038_v31 = vld [vmem:[#allocation2 + $0x119] sm:$0xff] }
 0x3fc   : > { %19273 = vmatprep.subr.bf16.mxu0 %v22644_v25  ;;  %v25132_v26 = vpack.c.bf16 %v23038_v31, %v23037_v61  ;;  %v25152_v61 = vpack.c.bf16 %v23048_v42, %v23047_v43  ;;  %v23049_v31 = vld [vmem:[#allocation2 + $0x153] sm:$0xff]  ;;  %v23055_v43 = vld [vmem:[#allocation2 + $0x161] sm:$0xff]  ;;  %v23056_v42 = vld [vmem:[#allocation2 + $0x169] sm:$0xff] }
 0x3fd   : > { %20000 = vmatmul.mubr.msk.bf16.gmra.mrb[32].mxu1 %vm1294_vm3, %v24999_v63  ;;  %v25158_v3 = vpack.c.bf16 %v23050_v39, %v23049_v31  ;;  %v25168_v37 = vpack.c.bf16 %v23056_v42, %v23055_v43  ;;  %v23057_v31 = vld [vmem:[#allocation2 + $0x173] sm:$0xff]  ;;  %v23058_v39 = vld [vmem:[#allocation2 + $0x17b] sm:$0xff] }
 0x3fe   : > { %20003 = vmatprep.mubr.msk.bf16.mxu1 %vm1294_vm3, %v25004_v32  ;;  %20072 = vmatpush3.bf16.msra.mxu1 %v22639_v1  ;;  %v23005_v1 = vld [vmem:[#allocation2 + $0x91] sm:$0xff]  ;;  %v23062_v43 = vld [vmem:[#allocation2 + $0x179] sm:$0xff] }
 0x3ff   : > { %20073 = vmatprep.subr.bf16.mxu1 %v22641_v58  ;;  %19274 = vmatpush3.bf16.msra.mxu0 %v22644_v25  ;;  %v25062_v59 = vpack.c.bf16 %v23006_v13, %v23005_v1  ;;  %v23013_v25 = vld [vmem:[#allocation2 + $0xb1] sm:$0xff]  ;;  %v23027_v1 = vld [vmem:[#allocation2 + $0x103] sm:$0xff]  ;;  %v25180_v42 = vpack.c.bf16 %v23062_v43, %v23061_v34 }
 0x400   : > { %v25084_v8 = vpack.c.bf16 %v23014_v2, %v23013_v25  ;;  %v23028_v13 = vld [vmem:[#allocation2 + $0x10b] sm:$0xff]  ;;  %v25120_v25 = vpack.c.bf16 %v23032_v38, %v23031_v56  ;;  %v23033_v2 = vld [vmem:[#allocation2 + $0x113] sm:$0xff] }
 0x401   : > { %19204 = vmatmul.mubr.msk.bf16.gmra.mrb[80].mxu0 %vm1294_vm3, %v25030_v24  ;;  %v25126_v11 = vpack.c.bf16 %v23034_v60, %v23033_v2  ;;  %v23045_v38 = vld [vmem:[#allocation2 + $0x131] sm:$0xff]  ;;  %v23046_v2 = vld [vmem:[#allocation2 + $0x139] sm:$0xff] }
 0x402   : > { %20074 = vmatpush3.bf16.msra.mxu1 %v22641_v58  ;;  %19207 = vmatprep.mubr.msk.bf16.mxu0 %vm1294_vm3, %v25034_v4  ;;  %v25066_v58 = vpack.c.bf16 %v23008_v36, %v23007_v27  ;;  %v25112_v27 = vpack.c.bf16 %v23028_v13, %v23027_v1  ;;  %v23029_v36 = vld [vmem:[#allocation2 + $0xf1] sm:$0xff]  ;;  %v23042_v1 = vld [vmem:[#allocation2 + $0x13b] sm:$0xff]  ;;  %v25148_v60 = vpack.c.bf16 %v23046_v2, %v23045_v38 }
 0x403   : > { %20147 = vmatprep.subr.bf16.mxu1 %v25075_v19  ;;  %v25116_v7 = vpack.c.bf16 %v23030_v6, %v23029_v36  ;;  %v25142_v13 = vpack.c.bf16 %v23042_v1, %v23041_v50  ;;  %v23043_v36 = vld [vmem:[#allocation2 + $0x143] sm:$0xff]  ;;  %v23044_v6 = vld [vmem:[#allocation2 + $0x14b] sm:$0xff]  ;;  %v23054_v38 = vld [vmem:[#allocation2 + $0x159] sm:$0xff] }
 0x404   : > { %v25144_v56 = vpack.c.bf16 %v23044_v6, %v23043_v36  ;;  %v23051_v50 = vld [vmem:[#allocation2 + $0x163] sm:$0xff]  ;;  %v23052_v1 = vld [vmem:[#allocation2 + $0x16b] sm:$0xff] }
 0x405   : > { %20004 = vmatmul.mubr.msk.bf16.gmra.mrb[36].mxu1 %vm1294_vm3, %v25024_v10  ;;  %v25160_v36 = vpack.c.bf16 %v23052_v1, %v23051_v50  ;;  %v23053_v6 = vld [vmem:[#allocation2 + $0x151] sm:$0xff]  ;;  %v25174_v50 = vpack.c.bf16 %v23058_v39, %v23057_v31  ;;  %v23059_v1 = vld [vmem:[#allocation2 + $0x183] sm:$0xff]  ;;  %v23066_v39 = vld [vmem:[#allocation2 + $0x19b] sm:$0xff] }
 0x406   : > { %20007 = vmatprep.mubr.msk.bf16.mxu1 %vm1294_vm3, %v25026_v49  ;;  %v25164_v2 = vpack.c.bf16 %v23054_v38, %v23053_v6  ;;  %v23060_v6 = vld [vmem:[#allocation2 + $0x18b] sm:$0xff]  ;;  %v23065_v31 = vld [vmem:[#allocation2 + $0x193] sm:$0xff] }
 0x407   : > { %v25176_v38 = vpack.c.bf16 %v23060_v6, %v23059_v1  ;;  %v25190_v1 = vpack.c.bf16 %v23066_v39, %v23065_v31  ;;  %v23067_v6 = vld [vmem:[#allocation2 + $0x1a3] sm:$0xff]  ;;  %v23068_v34 = vld [vmem:[#allocation2 + $0x1ab] sm:$0xff]  ;;  %v23073_v31 = vld [vmem:[#allocation2 + $0x1b3] sm:$0xff] }
 0x408   : > { %v25192_v43 = vpack.c.bf16 %v23068_v34, %v23067_v6  ;;  %v23074_v39 = vld [vmem:[#allocation2 + $0x1bb] sm:$0xff]  ;;  %v23075_v34 = vld [vmem:[#allocation2 + $0x1c3] sm:$0xff] }
 0x409   : > { %19208 = vmatmul.mubr.msk.bf16.gmra.mrb[84].mxu0 %vm1294_vm3, %v25046_v18  ;;  %v25206_v6 = vpack.c.bf16 %v23074_v39, %v23073_v31  ;;  %v25208_v5 = vpack.c.bf16 %v23076_v30, %v23075_v34  ;;  %v23081_v31 = vld [vmem:[#allocation2 + $0x1d3] sm:$0xff]  ;;  %v23082_v39 = vld [vmem:[#allocation2 + $0x1db] sm:$0xff]  ;;  %v23083_v30 = vld [vmem:[#allocation2 + $0x1e3] sm:$0xff] }
 0x40a   : > { %19211 = vmatprep.mubr.msk.bf16.mxu0 %vm1294_vm3, %v25050_v33  ;;  %v25222_v34 = vpack.c.bf16 %v23082_v39, %v23081_v31  ;;  %v25224_v16 = vpack.c.bf16 %v23084_v0, %v23083_v30  ;;  %v23089_v31 = vld [vmem:[#allocation2 + $0x1f3] sm:$0xff]  ;;  %v23090_v39 = vld [vmem:[#allocation2 + $0x1fb] sm:$0xff]  ;;  %v23091_v0 = vld [vmem:[#allocation2 + $0x203] sm:$0xff] }
 0x40b   : > { %28325 = vst [vmem:[#allocation54_spill] sm:$0xff] %v25208_v5  ;;  %v25238_v30 = vpack.c.bf16 %v23090_v39, %v23089_v31  ;;  %v25240_v57 = vpack.c.bf16 %v23092_v47, %v23091_v0  ;;  %v23097_v31 = vld [vmem:[#allocation2 + $0x213] sm:$0xff]  ;;  %v23098_v39 = vld [vmem:[#allocation2 + $0x21b] sm:$0xff]  ;;  %v23099_v47 = vld [vmem:[#allocation2 + $0x223] sm:$0xff] }
 0x40c   : > { %28328 = vst [vmem:[#allocation84_spill] sm:$0xff] %v25222_v34  ;;  %28329 = vst [vmem:[#allocation94_spill] sm:$0xff] %v25224_v16  ;;  %v25254_v0 = vpack.c.bf16 %v23098_v39, %v23097_v31  ;;  %v25270_v31 = vld [vmem:[#allocation2 + $0x23b] sm:$0xff] }
 0x40d   : > { %20008 = vmatmul.mubr.msk.bf16.gmra.mrb[40].mxu1 %vm1294_vm3, %v25040_v52  ;;  %28332 = vst [vmem:[#allocation106_spill] sm:$0xff] %v25238_v30  ;;  %28333 = vst [vmem:[#allocation117_spill] sm:$0xff] %v25240_v57  ;;  %v25272_v39 = vld [vmem:[#allocation2 + $0x239] sm:$0xff] }
 0x40e   : > { %20011 = vmatprep.mubr.msk.bf16.mxu1 %vm1294_vm3, %v25042_v28  ;;  %28336 = vst [vmem:[#allocation129_spill] sm:$0xff] %v25254_v0 }
 0x411   : > { %19212 = vmatmul.mubr.msk.bf16.gmra.mrb[88].mxu0 %vm1294_vm3, %v25062_v59 }
 0x412   : > { %19215 = vmatprep.mubr.msk.bf16.mxu0 %vm1294_vm3, %v25066_v58 }
 0x415   : > { %20012 = vmatmul.mubr.msk.bf16.gmra.mrb[44].mxu1 %vm1294_vm3, %v25056_v22 }
 0x416   : > { %20015 = vmatprep.mubr.msk.bf16.mxu1 %vm1294_vm3, %v25058_v29 }
 0x419   : > { %19216 = vmatmul.mubr.msk.bf16.gmra.mrb[92].mxu0 %vm1294_vm3, %v25084_v8 }
 0x41a   : > { %19219 = vmatprep.mubr.msk.bf16.mxu0 %vm1294_vm3, %v25088_v51 }
 0x41d   : > { %20016 = vmatmul.mubr.msk.bf16.gmra.mrb[48].mxu1 %vm1294_vm3, %v25078_v23 }
 0x41e   : > { %20019 = vmatprep.mubr.msk.bf16.mxu1 %vm1294_vm3, %v25080_v21 }
 0x421   : > { %19220 = vmatmul.mubr.msk.bf16.gmra.mrb[96].mxu0 %vm1294_vm3, %v25100_v45 }
 0x422   : > { %19223 = vmatprep.mubr.msk.bf16.mxu0 %vm1294_vm3, %v25104_v35 }
 0x425   : > { %20020 = vmatmul.mubr.msk.bf16.gmra.mrb[52].mxu1 %vm1294_vm3, %v25094_v62 }
 0x426   : > { %20023 = vmatprep.mubr.msk.bf16.mxu1 %vm1294_vm3, %v25096_v9 }
 0x429   : > { %19224 = vmatmul.mubr.msk.bf16.gmra.mrb[100].mxu0 %vm1294_vm3, %v25116_v7 }
 0x42a   : > { %19227 = vmatprep.mubr.msk.bf16.mxu0 %vm1294_vm3, %v25120_v25 }
 0x42d   : > { %20024 = vmatmul.mubr.msk.bf16.gmra.mrb[56].mxu1 %vm1294_vm3, %v25110_v53 }
 0x42e   : > { %20027 = vmatprep.mubr.msk.bf16.mxu1 %vm1294_vm3, %v25112_v27 }
 0x431   : > { %19228 = vmatmul.mubr.msk.bf16.gmra.mrb[104].mxu0 %vm1294_vm3, %v25132_v26 }
 0x432   : > { %19231 = vmatprep.mubr.msk.bf16.mxu0 %vm1294_vm3, %v25136_v17 }
 0x435   : > { %20028 = vmatmul.mubr.msk.bf16.gmra.mrb[60].mxu1 %vm1294_vm3, %v25126_v11 }
 0x436   : > { %20031 = vmatprep.mubr.msk.bf16.mxu1 %vm1294_vm3, %v25128_v46 }
 0x439   : > { %19232 = vmatmul.mubr.msk.bf16.gmra.mrb[108].mxu0 %vm1294_vm3, %v25148_v60 }
 0x43a   : > { %19235 = vmatprep.mubr.msk.bf16.mxu0 %vm1294_vm3, %v25152_v61 }
 0x43d   : > { %20032 = vmatmul.mubr.msk.bf16.gmra.mrb[64].mxu1 %vm1294_vm3, %v25142_v13 }
 0x43e   : > { %20035 = vmatprep.mubr.msk.bf16.mxu1 %vm1294_vm3, %v25144_v56 }
 0x441   : > { %19236 = vmatmul.mubr.msk.bf16.gmra.mrb[112].mxu0 %vm1294_vm3, %v25164_v2 }
 0x442   : > { %19239 = vmatprep.mubr.msk.bf16.mxu0 %vm1294_vm3, %v25168_v37 }
 0x445   : > { %20036 = vmatmul.mubr.msk.bf16.gmra.mrb[68].mxu1 %vm1294_vm3, %v25158_v3 }
 0x446   : > { %20039 = vmatprep.mubr.msk.bf16.mxu1 %vm1294_vm3, %v25160_v36 }
 0x449   : > { %19240 = vmatmul.mubr.msk.bf16.gmra.mrb[116].mxu0 %vm1294_vm3, %v25180_v42 }
 0x44a   : > { %19243 = vmatprep.mubr.msk.bf16.mxu0 %vm1294_vm3, %v25184_v40 }
 0x44d   : > { %20040 = vmatmul.mubr.msk.bf16.gmra.mrb[0].mxu1 %vm1294_vm3, %v25174_v50 }
 0x44e   : > { %20043 = vmatprep.mubr.msk.bf16.mxu1 %vm1294_vm3, %v25176_v38 }
 0x451   : > { %19244 = vmatmul.mubr.msk.bf16.gmra.mrb[120].mxu0 %vm1294_vm3, %v25196_v54 }
 0x452   : > { %19247 = vmatprep.mubr.msk.bf16.mxu0 %vm1294_vm3, %v25200_v55 }
 0x455   : > { %20044 = vmatmul.mubr.msk.bf16.gmra.mrb[4].mxu1 %vm1294_vm3, %v25190_v1 }
 0x456   : > { %20047 = vmatprep.mubr.msk.bf16.mxu1 %vm1294_vm3, %v25192_v43 }
 0x459   : > { %19248 = vmatmul.mubr.msk.bf16.gmra.mrb[124].mxu0 %vm1294_vm3, %v25212_v14 }
 0x45a   : > { %19251 = vmatprep.mubr.msk.bf16.mxu0 %vm1294_vm3, %v25216_v44  ;;  %v25232_v44 = vpack.c.bf16 %v23088_v20, %v23087_v12  ;;  %v23094_v12 = vld [vmem:[#allocation2 + $0x1f9] sm:$0xff] }
 0x45c   : > { %28331 = vst [vmem:[#allocation116_spill] sm:$0xff] %v25232_v44 }
 0x45d   : > { %20048 = vmatmul.mubr.msk.bf16.gmra.mrb[8].mxu1 %vm1294_vm3, %v25206_v6 }
 0x45e   : > { %20051 = vmatprep.mubr.msk.bf16.mxu1 %vm1294_vm3, %v25208_v5 }
 0x461   : > { %19252 = vmatmul.mubr.msk.bf16.gmra.mrb[128].mxu0 %vm1294_vm3, %v25228_v41  ;;  %v23095_v41 = vld [vmem:[#allocation2 + $0x201] sm:$0xff] }
 0x462   : > { %19255 = vmatprep.mubr.msk.bf16.mxu0 %vm1294_vm3, %v25232_v44  ;;  %v23096_v44 = vld [vmem:[#allocation2 + $0x209] sm:$0xff] }
 0x465   : > { %20052 = vmatmul.mubr.msk.bf16.gmra.mrb[12].mxu1 %vm1294_vm3, %v25222_v34  ;;  %v25248_v34 = vpack.c.bf16 %v23096_v44, %v23095_v41  ;;  %v23102_v44 = vld [vmem:[#allocation2 + $0x219] sm:$0xff] }
 0x466   : > { %20055 = vmatprep.mubr.msk.bf16.mxu1 %vm1294_vm3, %v25224_v16  ;;  %v23093_v16 = vld [vmem:[#allocation2 + $0x1f1] sm:$0xff] }
 0x467   : > { %v25244_v20 = vpack.c.bf16 %v23094_v12, %v23093_v16  ;;  %28335 = vst [vmem:[#allocation118_spill] sm:$0xff] %v25248_v34  ;;  %v23100_v16 = vld [vmem:[#allocation2 + $0x22b] sm:$0xff] }
 0x468   : > { %v25256_v12 = vpack.c.bf16 %v23100_v16, %v23099_v47  ;;  %v23105_v47 = vld [vmem:[#allocation2 + $0x233] sm:$0xff] }
 0x469   : > { %28334 = vst [vmem:[#allocation127_spill] sm:$0xff] %v25244_v20  ;;  %19256 = vmatmul.mubr.msk.bf16.gmra.mrb[132].mxu0 %vm1294_vm3, %v25244_v20  ;;  %v23103_v20 = vld [vmem:[#allocation2 + $0x221] sm:$0xff]  ;;  %v23106_v16 = vld [vmem:[#allocation2 + $0x231] sm:$0xff] }
 0x46a   : > { %19259 = vmatprep.mubr.msk.bf16.mxu0 %vm1294_vm3, %v25248_v34  ;;  %28337 = vst [vmem:[#allocation140_spill] sm:$0xff] %v25256_v12  ;;  %v23104_v34 = vld [vmem:[#allocation2 + $0x229] sm:$0xff] }
 0x46d   : > { %20056 = vmatmul.mubr.msk.bf16.gmra.mrb[16].mxu1 %vm1294_vm3, %v25238_v30  ;;  %v25264_v30 = vpack.c.bf16 %v23104_v34, %v23103_v20  ;;  %v25280_v34 = vpack.c.bf16 %v25272_v39, %v23106_v16  ;;  %v28342_v20 = vld [vmem:[#allocation6_spill] sm:$0xff]  ;;  %v28349_v16 = vld [vmem:[#allocation7_spill] sm:$0xff] }
 0x46e   : > { %20059 = vmatprep.mubr.msk.bf16.mxu1 %vm1294_vm3, %v25240_v57  ;;  %v23101_v57 = vld [vmem:[#allocation2 + $0x211] sm:$0xff] }
 0x46f   : > { %v25260_v41 = vpack.c.bf16 %v23102_v44, %v23101_v57  ;;  %28339 = vst [vmem:[#allocation179_spill] sm:$0xff] %v25264_v30  ;;  %v25275_v57 = vpack.c.bf16 %v25270_v31, %v23105_v47  ;;  %28341 = vst [vmem:[#allocation115_spill] sm:$0xff] %v25280_v34  ;;  %v28343_v44 = vld [vmem:[#allocation5_spill] sm:$0xff]  ;;  %v22646_v47 = vld [vmem:[%s27609_s3 + $0x1a8] sm:$0xff]  }
 0x471   : > { %28338 = vst [vmem:[#allocation188_spill] sm:$0xff] %v25260_v41  ;;  %19260 = vmatmul.mubr.msk.bf16.gmra.mrb[136].mxu0 %vm1294_vm3, %v25260_v41  ;;  %28340 = vst [vmem:[#allocation104_spill] sm:$0xff] %v25275_v57  ;;  %v28346_v41 = vld [vmem:[#allocation13_spill] sm:$0xff] }
 0x472   : > { %19263 = vmatprep.mubr.msk.bf16.mxu0 %vm1294_vm3, %v25264_v30  ;;  %v28345_v30 = vld [vmem:[#allocation11_spill] sm:$0xff] }
 0x475   : > { %20060 = vmatmul.mubr.msk.bf16.gmra.mrb[20].mxu1 %vm1294_vm3, %v25254_v0  ;;  %v28347_v0 = vpack.c.bf16 %v28345_v30, %v28346_v41  ;;  %v28355_v30 = vld [vmem:[#allocation8_spill] sm:$0xff] }
 0x476   : > { %20063 = vmatprep.mubr.msk.bf16.mxu1 %vm1294_vm3, %v25256_v12  ;;  %v28344_v12 = vpack.c.bf16 %v28342_v20, %v28343_v44  ;;  %v28351_v20 = vld [vmem:[#allocation17_spill] sm:$0xff]  ;;  %v28352_v44 = vld [vmem:[#allocation18_spill] sm:$0xff] }
 0x479   : > { %19264 = vmatmul.mubr.msk.bf16.gmra.mrb[140].mxu0 %vm1294_vm3, %v25280_v34  ;;  %v28354_v34 = vld [vmem:[#allocation10_spill] sm:$0xff] }
 0x47a   : > { %19275 = vmatprep.mubr.msk.bf16.mxu0 %vm1294_vm3, %v28347_v0  ;;  %v28356_v41 = vpack.c.bf16 %v28354_v34, %v28355_v30  ;;  %v22647_v0 = vld [vmem:[%s27609_s3 + $0x1b0] sm:$0xff]   ;;  %v22649_v34 = vld [vmem:[%s27609_s3 + $0x1b8] sm:$0xff]  }
 0x47b   : > { %v28362_v30 = vld [vmem:[#allocation32_spill] sm:$0xff] }
 0x47d   : > { %20064 = vmatmul.mubr.msk.bf16.gmra.mrb[24].mxu1 %vm1294_vm3, %v25275_v57  ;;  %v28348_v57 = vld [vmem:[#allocation9_spill] sm:$0xff] }
 0x47e   : > { %20075 = vmatprep.mubr.msk.bf16.mxu1 %vm1294_vm3, %v28344_v12  ;;  %v28350_v5 = vpack.c.bf16 %v28348_v57, %v28349_v16  ;;  %v28353_v12 = vpack.c.bf16 %v28351_v20, %v28352_v44  ;;  %v28357_v57 = vld [vmem:[#allocation19_spill] sm:$0xff]  ;;  %v28358_v16 = vld [vmem:[#allocation22_spill] sm:$0xff] }
 0x47f   : > { %v28359_v20 = vpack.c.bf16 %v28357_v57, %v28358_v16  ;;  %v28360_v44 = vld [vmem:[#allocation27_spill] sm:$0xff]  ;;  %v28365_v57 = vld [vmem:[#allocation38_spill] sm:$0xff] }
 0x480   : > { %v28366_v16 = vld [vmem:[#allocation42_spill] sm:$0xff] }
 0x481   : > { %19276 = vmatmul.mubr.msk.bf16.vlgmr.msra.gmra.mrb[72].mxu0 %vm1294_vm3, %v28356_v41  ;;  %v28363_v41 = vld [vmem:[#allocation36_spill] sm:$0xff] }
 0x482   : > { %19279 = vmatprep.mubr.msk.bf16.mxu0 %vm1294_vm3, %v28359_v20  ;;  %v28367_v20 = vld [vmem:[#allocation46_spill] sm:$0xff] }
 0x485   : > { %20076 = vmatmul.mubr.msk.bf16.vlgmr.msra.gmra.mrb[28].mxu1 %vm1294_vm3, %v28350_v5  ;;  %v22648_v5 = vld [vmem:[%s27609_s3 + $0x160] sm:$0xff]  }
 0x486   : > { %20079 = vmatprep.mubr.msk.bf16.mxu1 %vm1294_vm3, %v28353_v12  ;;  %20148 = vmatpush3.bf16.msra.mxu1 %v25075_v19  ;;  %v22650_v19 = vld [vmem:[%s27609_s3 + $0x168] sm:$0xff]   ;;  %v28361_v12 = vld [vmem:[#allocation28_spill] sm:$0xff] }
 0x487   : > { %20149 = vmatprep.subr.bf16.mxu1 %v22646_v47  ;;  %19347 = vmatprep.subr.bf16.mxu0 %v22648_v5 }
 0x488   : > { %19348 = vmatpush3.bf16.msra.mxu0 %v22648_v5  ;;  %v22652_v5 = vld [vmem:[%s27609_s3 + $0x178] sm:$0xff]  }
 0x489   : > { %19349 = vmatprep.subr.bf16.mxu0 %v22650_v19  ;;  %19280 = vmatmul.mubr.msk.bf16.gmra.mrb[76].mxu0 %vm1294_vm3, %v28362_v30 }
 0x48a   : > { %20150 = vmatpush3.bf16.msra.mxu1 %v22646_v47  ;;  %v22651_v47 = vld [vmem:[%s27609_s3 + $0x170] sm:$0xff]   ;;  %19283 = vmatprep.mubr.msk.bf16.mxu0 %vm1294_vm3, %v28363_v41 }
 0x48b   : > { %20151 = vmatprep.subr.bf16.mxu1 %v22647_v0  ;;  %v28369_v41 = vld [vmem:[#allocation48_spill] sm:$0xff] }
 0x48c   : > { %19350 = vmatpush3.bf16.msra.mxu0 %v22650_v19  ;;  %v28368_v19 = vld [vmem:[#allocation47_spill] sm:$0xff] }
 0x48d   : > { %20080 = vmatmul.mubr.msk.bf16.gmra.mrb[32].mxu1 %vm1294_vm3, %v28360_v44  ;;  %19351 = vmatprep.subr.bf16.mxu0 %v22651_v47 }
 0x48e   : > { %20083 = vmatprep.mubr.msk.bf16.mxu1 %vm1294_vm3, %v28361_v12  ;;  %20152 = vmatpush3.bf16.msra.mxu1 %v22647_v0  ;;  %v28364_v0 = vld [vmem:[#allocation37_spill] sm:$0xff] }
 0x48f   : > { %20153 = vmatprep.subr.bf16.mxu1 %v22649_v34 }
 0x490   : > { %19352 = vmatpush3.bf16.msra.mxu0 %v22651_v47  ;;  %v28371_v47 = vld [vmem:[#allocation56_spill] sm:$0xff] }
 0x491   : > { %19353 = vmatprep.subr.bf16.mxu0 %v22652_v5  ;;  %19284 = vmatmul.mubr.msk.bf16.gmra.mrb[80].mxu0 %vm1294_vm3, %v28366_v16  ;;  %v28373_v16 = vld [vmem:[#allocation58_spill] sm:$0xff] }
 0x492   : > { %20154 = vmatpush3.bf16.msra.mxu1 %v22649_v34  ;;  %19287 = vmatprep.mubr.msk.bf16.mxu0 %vm1294_vm3, %v28367_v20  ;;  %v28370_v34 = vld [vmem:[#allocation52_spill] sm:$0xff]  ;;  %v28374_v20 = vld [vmem:[#allocation62_spill] sm:$0xff] }
 0x494   : > { %19354 = vmatpush3.bf16.msra.mxu0 %v22652_v5  ;;  %v28375_v5 = vld [vmem:[#allocation66_spill] sm:$0xff] }
 0x495   : > { %20084 = vmatmul.mubr.msk.bf16.gmra.mrb[36].mxu1 %vm1294_vm3, %v28364_v0  ;;  %v28383_v0 = vld [vmem:[#allocation86_spill] sm:$0xff] }
 0x496   : > { %20087 = vmatprep.mubr.msk.bf16.mxu1 %vm1294_vm3, %v28365_v57  ;;  %v28372_v57 = vld [vmem:[#allocation57_spill] sm:$0xff] }
 0x499   : > { %19288 = vmatmul.mubr.msk.bf16.gmra.mrb[84].mxu0 %vm1294_vm3, %v28370_v34  ;;  %v28381_v34 = vld [vmem:[#allocation78_spill] sm:$0xff] }
 0x49a   : > { %19291 = vmatprep.mubr.msk.bf16.mxu0 %vm1294_vm3, %v28371_v47  ;;  %v28376_v47 = vld [vmem:[#allocation67_spill] sm:$0xff] }
 0x49d   : > { %20088 = vmatmul.mubr.msk.bf16.gmra.mrb[40].mxu1 %vm1294_vm3, %v28368_v19  ;;  %v28382_v19 = vld [vmem:[#allocation82_spill] sm:$0xff] }
 0x49e   : > { %20091 = vmatprep.mubr.msk.bf16.mxu1 %vm1294_vm3, %v28369_v41  ;;  %v25365_v41 = vld [vmem:[%s27609_s3 + $0x240] sm:$0xff]  }
 0x49f   : > { %20227 = vmatprep.subr.bf16.mxu1 %v25365_v41 }
 0x4a1   : > { %19292 = vmatmul.mubr.msk.bf16.gmra.mrb[88].mxu0 %vm1294_vm3, %v28374_v20  ;;  %v28379_v20 = vld [vmem:[#allocation76_spill] sm:$0xff] }
 0x4a2   : > { %19295 = vmatprep.mubr.msk.bf16.mxu0 %vm1294_vm3, %v28375_v5  ;;  %v28380_v5 = vld [vmem:[#allocation77_spill] sm:$0xff] }
 0x4a5   : > { %20092 = vmatmul.mubr.msk.bf16.gmra.mrb[44].mxu1 %vm1294_vm3, %v28372_v57  ;;  %v28377_v57 = vld [vmem:[#allocation68_spill] sm:$0xff] }
 0x4a6   : > { %20095 = vmatprep.mubr.msk.bf16.mxu1 %vm1294_vm3, %v28373_v16  ;;  %v28378_v16 = vld [vmem:[#allocation72_spill] sm:$0xff] }
 0x4a9   : > { %19296 = vmatmul.mubr.msk.bf16.gmra.mrb[92].mxu0 %vm1294_vm3, %v28378_v16  ;;  %v28386_v16 = vld [vmem:[#allocation92_spill] sm:$0xff] }
 0x4aa   : > { %19299 = vmatprep.mubr.msk.bf16.mxu0 %vm1294_vm3, %v28379_v20  ;;  %v28387_v20 = vld [vmem:[#allocation96_spill] sm:$0xff] }
 0x4ad   : > { %20096 = vmatmul.mubr.msk.bf16.gmra.mrb[48].mxu1 %vm1294_vm3, %v28376_v47  ;;  %v28384_v47 = vld [vmem:[#allocation87_spill] sm:$0xff] }
 0x4ae   : > { %20099 = vmatprep.mubr.msk.bf16.mxu1 %vm1294_vm3, %v28377_v57  ;;  %v28385_v57 = vld [vmem:[#allocation88_spill] sm:$0xff] }
 0x4b1   : > { %19300 = vmatmul.mubr.msk.bf16.gmra.mrb[96].mxu0 %vm1294_vm3, %v28382_v19  ;;  %v28390_v19 = vld [vmem:[#allocation102_spill] sm:$0xff] }
 0x4b2   : > { %19303 = vmatprep.mubr.msk.bf16.mxu0 %vm1294_vm3, %v28383_v0  ;;  %v28391_v0 = vld [vmem:[#allocation107_spill] sm:$0xff] }
 0x4b5   : > { %20100 = vmatmul.mubr.msk.bf16.gmra.mrb[52].mxu1 %vm1294_vm3, %v28380_v5  ;;  %v28388_v5 = vld [vmem:[#allocation97_spill] sm:$0xff] }
 0x4b6   : > { %20103 = vmatprep.mubr.msk.bf16.mxu1 %vm1294_vm3, %v28381_v34  ;;  %v28389_v34 = vld [vmem:[#allocation98_spill] sm:$0xff] }
 0x4b9   : > { %19304 = vmatmul.mubr.msk.bf16.gmra.mrb[100].mxu0 %vm1294_vm3, %v28386_v16  ;;  %v28394_v16 = vld [vmem:[#allocation113_spill] sm:$0xff] }
 0x4ba   : > { %19307 = vmatprep.mubr.msk.bf16.mxu0 %vm1294_vm3, %v28387_v20  ;;  %v28395_v20 = vld [vmem:[#allocation119_spill] sm:$0xff] }
 0x4bd   : > { %20104 = vmatmul.mubr.msk.bf16.gmra.mrb[56].mxu1 %vm1294_vm3, %v28384_v47  ;;  %v28392_v47 = vld [vmem:[#allocation108_spill] sm:$0xff] }
 0x4be   : > { %20107 = vmatprep.mubr.msk.bf16.mxu1 %vm1294_vm3, %v28385_v57  ;;  %v28393_v57 = vld [vmem:[#allocation109_spill] sm:$0xff] }
 0x4c1   : > { %19308 = vmatmul.mubr.msk.bf16.gmra.mrb[104].mxu0 %vm1294_vm3, %v28390_v19  ;;  %v28398_v19 = vld [vmem:[#allocation130_spill] sm:$0xff] }
 0x4c2   : > { %19311 = vmatprep.mubr.msk.bf16.mxu0 %vm1294_vm3, %v28391_v0  ;;  %v28399_v0 = vld [vmem:[#allocation131_spill] sm:$0xff] }
 0x4c5   : > { %20108 = vmatmul.mubr.msk.bf16.gmra.mrb[60].mxu1 %vm1294_vm3, %v28388_v5  ;;  %v28396_v5 = vld [vmem:[#allocation120_spill] sm:$0xff] }
 0x4c6   : > { %20111 = vmatprep.mubr.msk.bf16.mxu1 %vm1294_vm3, %v28389_v34  ;;  %v28397_v34 = vld [vmem:[#allocation124_spill] sm:$0xff] }
 0x4c9   : > { %19312 = vmatmul.mubr.msk.bf16.gmra.mrb[108].mxu0 %vm1294_vm3, %v28394_v16  ;;  %v28402_v16 = vld [vmem:[#allocation142_spill] sm:$0xff] }
 0x4ca   : > { %19315 = vmatprep.mubr.msk.bf16.mxu0 %vm1294_vm3, %v28395_v20  ;;  %v28403_v20 = vld [vmem:[#allocation146_spill] sm:$0xff] }
 0x4cd   : > { %20112 = vmatmul.mubr.msk.bf16.gmra.mrb[64].mxu1 %vm1294_vm3, %v28392_v47  ;;  %v28400_v47 = vld [vmem:[#allocation135_spill] sm:$0xff] }
 0x4ce   : > { %20115 = vmatprep.mubr.msk.bf16.mxu1 %vm1294_vm3, %v28393_v57  ;;  %v28401_v57 = vld [vmem:[#allocation141_spill] sm:$0xff] }
 0x4d1   : > { %19316 = vmatmul.mubr.msk.bf16.gmra.mrb[112].mxu0 %vm1294_vm3, %v28398_v19  ;;  %v28406_v19 = vld [vmem:[#allocation157_spill] sm:$0xff] }
 0x4d2   : > { %19319 = vmatprep.mubr.msk.bf16.mxu0 %vm1294_vm3, %v28399_v0  ;;  %v28407_v0 = vld [vmem:[#allocation164_spill] sm:$0xff] }
 0x4d5   : > { %20116 = vmatmul.mubr.msk.bf16.gmra.mrb[68].mxu1 %vm1294_vm3, %v28396_v5  ;;  %v28404_v5 = vld [vmem:[#allocation152_spill] sm:$0xff] }
 0x4d6   : > { %20119 = vmatprep.mubr.msk.bf16.mxu1 %vm1294_vm3, %v28397_v34  ;;  %v28405_v34 = vld [vmem:[#allocation153_spill] sm:$0xff] }
 0x4d9   : > { %19320 = vmatmul.mubr.msk.bf16.gmra.mrb[116].mxu0 %vm1294_vm3, %v28402_v16  ;;  %v28410_v16 = vld [vmem:[#allocation168_spill] sm:$0xff] }
 0x4da   : > { %19323 = vmatprep.mubr.msk.bf16.mxu0 %vm1294_vm3, %v28403_v20  ;;  %v28411_v20 = vld [vmem:[#allocation169_spill] sm:$0xff] }
 0x4dd   : > { %20120 = vmatmul.mubr.msk.bf16.gmra.mrb[0].mxu1 %vm1294_vm3, %v28400_v47  ;;  %v28408_v47 = vld [vmem:[#allocation165_spill] sm:$0xff] }
 0x4de   : > { %20123 = vmatprep.mubr.msk.bf16.mxu1 %vm1294_vm3, %v28401_v57  ;;  %v28409_v57 = vld [vmem:[#allocation166_spill] sm:$0xff] }
 0x4e1   : > { %19324 = vmatmul.mubr.msk.bf16.gmra.mrb[120].mxu0 %vm1294_vm3, %v28406_v19  ;;  %v28414_v19 = vld [vmem:[#allocation172_spill] sm:$0xff] }
 0x4e2   : > { %19327 = vmatprep.mubr.msk.bf16.mxu0 %vm1294_vm3, %v28407_v0  ;;  %v28415_v0 = vld [vmem:[#allocation173_spill] sm:$0xff] }
 0x4e5   : > { %20124 = vmatmul.mubr.msk.bf16.gmra.mrb[4].mxu1 %vm1294_vm3, %v28404_v5  ;;  %v28412_v5 = vld [vmem:[#allocation170_spill] sm:$0xff] }
 0x4e6   : > { %20127 = vmatprep.mubr.msk.bf16.mxu1 %vm1294_vm3, %v28405_v34  ;;  %v28413_v34 = vld [vmem:[#allocation171_spill] sm:$0xff] }
 0x4e9   : > { %19328 = vmatmul.mubr.msk.bf16.gmra.mrb[124].mxu0 %vm1294_vm3, %v28410_v16  ;;  %v28418_v16 = vld [vmem:[#allocation175_spill] sm:$0xff] }
 0x4ea   : > { %19331 = vmatprep.mubr.msk.bf16.mxu0 %vm1294_vm3, %v28411_v20  ;;  %v28419_v20 = vld [vmem:[#allocation187_spill] sm:$0xff] }
 0x4ed   : > { %20128 = vmatmul.mubr.msk.bf16.gmra.mrb[8].mxu1 %vm1294_vm3, %v28408_v47  ;;  %v28416_v47 = vld [vmem:[#allocation174_spill] sm:$0xff] }
 0x4ee   : > { %20131 = vmatprep.mubr.msk.bf16.mxu1 %vm1294_vm3, %v28409_v57  ;;  %v28417_v57 = vld [vmem:[#allocation186_spill] sm:$0xff] }
 0x4f1   : > { %19332 = vmatmul.mubr.msk.bf16.gmra.mrb[128].mxu0 %vm1294_vm3, %v28414_v19 }
 0x4f2   : > { %19335 = vmatprep.mubr.msk.bf16.mxu0 %vm1294_vm3, %v28415_v0  ;;  %v28421_v0 = vld [vmem:[#allocation191_spill] sm:$0xff] }
 0x4f5   : > { %20132 = vmatmul.mubr.msk.bf16.gmra.mrb[12].mxu1 %vm1294_vm3, %v28412_v5  ;;  %v25456_v5 = vld [vmem:[#allocation2 + $0x243] sm:$0xff] }
 0x4f6   : > { %20135 = vmatprep.mubr.msk.bf16.mxu1 %vm1294_vm3, %v28413_v34  ;;  %v25458_v34 = vld [vmem:[#allocation2 + $0x241] sm:$0xff]  ;;  %v25462_v19 = vpack.c.bf16 %v25456_v5, %v25270_v31  ;;  %v25480_v31 = vld [vmem:[#allocation2 + $0x249] sm:$0xff] }
 0x4f8   : > { %28420 = vst [vmem:[#allocation126_spill] sm:$0xff] %v25462_v19 }
 0x4f9   : > { %19336 = vmatmul.mubr.msk.bf16.gmra.mrb[132].mxu0 %vm1294_vm3, %v28418_v16  ;;  %v25472_v16 = vld [vmem:[#allocation2 + $0x24b] sm:$0xff] }
 0x4fa   : > { %19339 = vmatprep.mubr.msk.bf16.mxu0 %vm1294_vm3, %v28419_v20  ;;  %v25474_v20 = vld [vmem:[#allocation2 + $0x253] sm:$0xff] }
 0x4fd   : > { %20136 = vmatmul.mubr.msk.bf16.gmra.mrb[16].mxu1 %vm1294_vm3, %v28416_v47  ;;  %v28423_v47 = vld [vmem:[#allocation192_spill] sm:$0xff] }
 0x4fe   : > { %20139 = vmatprep.mubr.msk.bf16.mxu1 %vm1294_vm3, %v28417_v57  ;;  %v25470_v57 = vpack.c.bf16 %v25458_v34, %v25272_v39 }
 0x500   : > { %28422 = vst [vmem:[#allocation137_spill] sm:$0xff] %v25470_v57 }
 0x501   : > { %19340 = vmatmul.mubr.msk.bf16.gmra.mrb[136].mxu0 %vm1294_vm3, %v28423_v47 }
 0x502   : > { %19343 = vmatprep.mubr.msk.bf16.mxu0 %vm1294_vm3, %v25470_v57  ;;  %v22654_v57 = vld [vmem:[%s27609_s3 + $0x248] sm:$0xff]  }
 0x505   : > { %20140 = vmatmul.mubr.msk.bf16.gmra.mrb[20].mxu1 %vm1294_vm3, %v28421_v0  ;;  %v25482_v0 = vld [vmem:[#allocation2 + $0x251] sm:$0xff] }
 0x506   : > { %20143 = vmatprep.mubr.msk.bf16.mxu1 %vm1294_vm3, %v25462_v19  ;;  %v25486_v19 = vpack.c.bf16 %v25474_v20, %v25472_v16  ;;  %v25490_v39 = vpack.c.bf16 %v25482_v0, %v25480_v31 }
 0x509   : > { %19344 = vmatmul.mubr.msk.bf16.gmra.mrb[140].mxu0 %vm1294_vm3, %v25490_v39 }
 0x50a   : > { %19355 = vmatprep.mubr.msk.bf16.mxu0 %vm1294_vm3, %v25008_v15  ;;  %v22656_v15 = vld [vmem:[%s27609_s3 + $0x200] sm:$0xff]  }
 0x50b   : > { %19427 = vmatprep.subr.bf16.mxu0 %v22656_v15 }
 0x50d   : > { %20144 = vmatmul.mubr.msk.bf16.gmra.mrb[24].mxu1 %vm1294_vm3, %v25486_v19 }
 0x50e   : > { %20155 = vmatprep.mubr.msk.bf16.mxu1 %vm1294_vm3, %v24999_v63  ;;  %v22655_v63 = vld [vmem:[%s27609_s3 + $0x250] sm:$0xff]  }
 0x511   : > { %19356 = vmatmul.mubr.msk.bf16.vlgmr.msra.gmra.mrb[72].mxu0 %vm1294_vm3, %v25012_v48  ;;  %v22657_v48 = vld [vmem:[%s27609_s3 + $0x258] sm:$0xff]  }
 0x512   : > { %19359 = vmatprep.mubr.msk.bf16.mxu0 %vm1294_vm3, %v25030_v24  ;;  %19428 = vmatpush3.bf16.msra.mxu0 %v22656_v15  ;;  %v22660_v24 = vld [vmem:[%s27609_s3 + $0x218] sm:$0xff]   ;;  %v28426_v15 = vld [vmem:[#allocation74_spill] sm:$0xff] }
 0x515   : > { %20156 = vmatmul.mubr.msk.bf16.vlgmr.msra.gmra.mrb[28].mxu1 %vm1294_vm3, %v25004_v32  ;;  %v22658_v32 = vld [vmem:[%s27609_s3 + $0x208] sm:$0xff]  }
 0x516   : > { %20159 = vmatprep.mubr.msk.bf16.mxu1 %vm1294_vm3, %v25024_v10  ;;  %20228 = vmatpush3.bf16.msra.mxu1 %v25365_v41  ;;  %v22659_v10 = vld [vmem:[%s27609_s3 + $0x210] sm:$0xff]   ;;  %v25565_v41 = vld [vmem:[%s27609_s3 + $0x2e0] sm:$0xff]  }
 0x517   : > { %20229 = vmatprep.subr.bf16.mxu1 %v22654_v57  ;;  %19429 = vmatprep.subr.bf16.mxu0 %v22658_v32 }
 0x518   : > { %19430 = vmatpush3.bf16.msra.mxu0 %v22658_v32  ;;  %v28427_v32 = vld [vmem:[#allocation105_spill] sm:$0xff] }
 0x519   : > { %19360 = vmatmul.mubr.msk.bf16.gmra.mrb[76].mxu0 %vm1294_vm3, %v25034_v4  ;;  %19431 = vmatprep.subr.bf16.mxu0 %v22659_v10 }
 0x51a   : > { %20230 = vmatpush3.bf16.msra.mxu1 %v22654_v57  ;;  %19363 = vmatprep.mubr.msk.bf16.mxu0 %vm1294_vm3, %v25046_v18  ;;  %v28424_v57 = vld [vmem:[#allocation54_spill] sm:$0xff] }
 0x51b   : > { %20231 = vmatprep.subr.bf16.mxu1 %v22655_v63 }
 0x51c   : > { %19432 = vmatpush3.bf16.msra.mxu0 %v22659_v10  ;;  %v28429_v10 = vld [vmem:[#allocation106_spill] sm:$0xff] }
 0x51d   : > { %20160 = vmatmul.mubr.msk.bf16.gmra.mrb[32].mxu1 %vm1294_vm3, %v25026_v49  ;;  %19433 = vmatprep.subr.bf16.mxu0 %v22660_v24 }
 0x51e   : > { %20163 = vmatprep.mubr.msk.bf16.mxu1 %vm1294_vm3, %v25040_v52  ;;  %20232 = vmatpush3.bf16.msra.mxu1 %v22655_v63  ;;  %v28425_v63 = vld [vmem:[#allocation84_spill] sm:$0xff] }
 0x51f   : > { %20233 = vmatprep.subr.bf16.mxu1 %v22657_v48 }
 0x520   : > { %19434 = vmatpush3.bf16.msra.mxu0 %v22660_v24  ;;  %v28430_v24 = vld [vmem:[#allocation116_spill] sm:$0xff] }
 0x521   : > { %19364 = vmatmul.mubr.msk.bf16.gmra.mrb[80].mxu0 %vm1294_vm3, %v25050_v33 }
 0x522   : > { %20234 = vmatpush3.bf16.msra.mxu1 %v22657_v48  ;;  %19367 = vmatprep.mubr.msk.bf16.mxu0 %vm1294_vm3, %v25062_v59  ;;  %v28428_v48 = vld [vmem:[#allocation94_spill] sm:$0xff] }
 0x523   : > { %20307 = vmatprep.subr.bf16.mxu1 %v25565_v41 }
 0x525   : > { %20164 = vmatmul.mubr.msk.bf16.gmra.mrb[36].mxu1 %vm1294_vm3, %v25042_v28 }
 0x526   : > { %20167 = vmatprep.mubr.msk.bf16.mxu1 %vm1294_vm3, %v25056_v22 }
 0x529   : > { %19368 = vmatmul.mubr.msk.bf16.gmra.mrb[84].mxu0 %vm1294_vm3, %v25066_v58 }
 0x52a   : > { %19371 = vmatprep.mubr.msk.bf16.mxu0 %vm1294_vm3, %v25084_v8 }
 0x52d   : > { %20168 = vmatmul.mubr.msk.bf16.gmra.mrb[40].mxu1 %vm1294_vm3, %v25058_v29 }
 0x52e   : > { %20171 = vmatprep.mubr.msk.bf16.mxu1 %vm1294_vm3, %v25078_v23 }
 0x531   : > { %19372 = vmatmul.mubr.msk.bf16.gmra.mrb[88].mxu0 %vm1294_vm3, %v25088_v51 }
 0x532   : > { %19375 = vmatprep.mubr.msk.bf16.mxu0 %vm1294_vm3, %v25100_v45 }
 0x535   : > { %20172 = vmatmul.mubr.msk.bf16.gmra.mrb[44].mxu1 %vm1294_vm3, %v25080_v21 }
 0x536   : > { %20175 = vmatprep.mubr.msk.bf16.mxu1 %vm1294_vm3, %v25094_v62 }
 0x539   : > { %19376 = vmatmul.mubr.msk.bf16.gmra.mrb[92].mxu0 %vm1294_vm3, %v25104_v35 }
 0x53a   : > { %19379 = vmatprep.mubr.msk.bf16.mxu0 %vm1294_vm3, %v25116_v7 }
 0x53d   : > { %20176 = vmatmul.mubr.msk.bf16.gmra.mrb[48].mxu1 %vm1294_vm3, %v25096_v9 }
 0x53e   : > { %20179 = vmatprep.mubr.msk.bf16.mxu1 %vm1294_vm3, %v25110_v53 }
 0x541   : > { %19380 = vmatmul.mubr.msk.bf16.gmra.mrb[96].mxu0 %vm1294_vm3, %v25120_v25 }
 0x542   : > { %19383 = vmatprep.mubr.msk.bf16.mxu0 %vm1294_vm3, %v25132_v26 }
 0x545   : > { %20180 = vmatmul.mubr.msk.bf16.gmra.mrb[52].mxu1 %vm1294_vm3, %v25112_v27 }
 0x546   : > { %20183 = vmatprep.mubr.msk.bf16.mxu1 %vm1294_vm3, %v25126_v11 }
 0x549   : > { %19384 = vmatmul.mubr.msk.bf16.gmra.mrb[100].mxu0 %vm1294_vm3, %v25136_v17 }
 0x54a   : > { %19387 = vmatprep.mubr.msk.bf16.mxu0 %vm1294_vm3, %v25148_v60 }
 0x54d   : > { %20184 = vmatmul.mubr.msk.bf16.gmra.mrb[56].mxu1 %vm1294_vm3, %v25128_v46 }
 0x54e   : > { %20187 = vmatprep.mubr.msk.bf16.mxu1 %vm1294_vm3, %v25142_v13 }
 0x551   : > { %19388 = vmatmul.mubr.msk.bf16.gmra.mrb[104].mxu0 %vm1294_vm3, %v25152_v61 }
 0x552   : > { %19391 = vmatprep.mubr.msk.bf16.mxu0 %vm1294_vm3, %v25164_v2 }
 0x555   : > { %20188 = vmatmul.mubr.msk.bf16.gmra.mrb[60].mxu1 %vm1294_vm3, %v25144_v56 }
 0x556   : > { %20191 = vmatprep.mubr.msk.bf16.mxu1 %vm1294_vm3, %v25158_v3 }
 0x559   : > { %19392 = vmatmul.mubr.msk.bf16.gmra.mrb[108].mxu0 %vm1294_vm3, %v25168_v37 }
 0x55a   : > { %19395 = vmatprep.mubr.msk.bf16.mxu0 %vm1294_vm3, %v25180_v42 }
 0x55d   : > { %20192 = vmatmul.mubr.msk.bf16.gmra.mrb[64].mxu1 %vm1294_vm3, %v25160_v36 }
 0x55e   : > { %20195 = vmatprep.mubr.msk.bf16.mxu1 %vm1294_vm3, %v25174_v50 }
 0x561   : > { %19396 = vmatmul.mubr.msk.bf16.gmra.mrb[112].mxu0 %vm1294_vm3, %v25184_v40 }
 0x562   : > { %19399 = vmatprep.mubr.msk.bf16.mxu0 %vm1294_vm3, %v25196_v54 }
 0x565   : > { %20196 = vmatmul.mubr.msk.bf16.gmra.mrb[68].mxu1 %vm1294_vm3, %v25176_v38 }
 0x566   : > { %20199 = vmatprep.mubr.msk.bf16.mxu1 %vm1294_vm3, %v25190_v1 }
 0x569   : > { %19400 = vmatmul.mubr.msk.bf16.gmra.mrb[116].mxu0 %vm1294_vm3, %v25200_v55 }
 0x56a   : > { %19403 = vmatprep.mubr.msk.bf16.mxu0 %vm1294_vm3, %v25212_v14  ;;  %v28431_v14 = vld [vmem:[#allocation127_spill] sm:$0xff] }
 0x56d   : > { %20200 = vmatmul.mubr.msk.bf16.gmra.mrb[0].mxu1 %vm1294_vm3, %v25192_v43 }
 0x56e   : > { %20203 = vmatprep.mubr.msk.bf16.mxu1 %vm1294_vm3, %v25206_v6 }
 0x571   : > { %19404 = vmatmul.mubr.msk.bf16.gmra.mrb[120].mxu0 %vm1294_vm3, %v28426_v15  ;;  %v28434_v15 = vld [vmem:[#allocation118_spill] sm:$0xff] }
 0x572   : > { %19407 = vmatprep.mubr.msk.bf16.mxu0 %vm1294_vm3, %v28427_v32  ;;  %v28435_v32 = vld [vmem:[#allocation188_spill] sm:$0xff] }
 0x575   : > { %20204 = vmatmul.mubr.msk.bf16.gmra.mrb[4].mxu1 %vm1294_vm3, %v28424_v57  ;;  %v28432_v57 = vld [vmem:[#allocation117_spill] sm:$0xff] }
 0x576   : > { %20207 = vmatprep.mubr.msk.bf16.mxu1 %vm1294_vm3, %v28425_v63  ;;  %v28433_v63 = vld [vmem:[#allocation129_spill] sm:$0xff] }
 0x579   : > { %19408 = vmatmul.mubr.msk.bf16.gmra.mrb[124].mxu0 %vm1294_vm3, %v28430_v24  ;;  %v28438_v24 = vld [vmem:[#allocation179_spill] sm:$0xff] }
 0x57a   : > { %19411 = vmatprep.mubr.msk.bf16.mxu0 %vm1294_vm3, %v28431_v14  ;;  %v25654_v14 = vld [vmem:[#allocation2 + $0x25b] sm:$0xff] }
 0x57d   : > { %20208 = vmatmul.mubr.msk.bf16.gmra.mrb[8].mxu1 %vm1294_vm3, %v28428_v48  ;;  %v28436_v48 = vld [vmem:[#allocation140_spill] sm:$0xff] }
 0x57e   : > { %20211 = vmatprep.mubr.msk.bf16.mxu1 %vm1294_vm3, %v28429_v10  ;;  %v28437_v10 = vld [vmem:[#allocation104_spill] sm:$0xff] }
 0x581   : > { %19412 = vmatmul.mubr.msk.bf16.gmra.mrb[128].mxu0 %vm1294_vm3, %v28434_v15  ;;  %v25662_v15 = vld [vmem:[#allocation2 + $0x259] sm:$0xff] }
 0x582   : > { %19415 = vmatprep.mubr.msk.bf16.mxu0 %vm1294_vm3, %v28435_v32  ;;  %v25666_v32 = vpack.c.bf16 %v25654_v14, %v25474_v20  ;;  %v25688_v20 = vld [vmem:[#allocation2 + $0x261] sm:$0xff] }
 0x584   : > { %28440 = vst [vmem:[#allocation148_spill] sm:$0xff] %v25666_v32 }
 0x585   : > { %20212 = vmatmul.mubr.msk.bf16.gmra.mrb[12].mxu1 %vm1294_vm3, %v28432_v57  ;;  %v28439_v57 = vld [vmem:[#allocation115_spill] sm:$0xff] }
 0x586   : > { %20215 = vmatprep.mubr.msk.bf16.mxu1 %vm1294_vm3, %v28433_v63  ;;  %v25660_v63 = vpack.c.bf16 %v25472_v16, %v25456_v5  ;;  %v25680_v16 = vld [vmem:[#allocation2 + $0x263] sm:$0xff]  ;;  %v25682_v5 = vld [vmem:[#allocation2 + $0x26b] sm:$0xff] }
 0x589   : > { %19416 = vmatmul.mubr.msk.bf16.gmra.mrb[132].mxu0 %vm1294_vm3, %v28438_v24  ;;  %v25674_v24 = vpack.c.bf16 %v25662_v15, %v25482_v0  ;;  %v25690_v0 = vld [vmem:[#allocation2 + $0x269] sm:$0xff] }
 0x58a   : > { %19419 = vmatprep.mubr.msk.bf16.mxu0 %vm1294_vm3, %v28439_v57  ;;  %v28471_v57 = vld [vmem:[#allocation102_spill] sm:$0xff] }
 0x58b   : > { %28442 = vst [vmem:[#allocation189_spill] sm:$0xff] %v25674_v24 }
 0x58d   : > { %20216 = vmatmul.mubr.msk.bf16.gmra.mrb[16].mxu1 %vm1294_vm3, %v28436_v48 }
 0x58e   : > { %20219 = vmatprep.mubr.msk.bf16.mxu1 %vm1294_vm3, %v28437_v10  ;;  %v25670_v10 = vpack.c.bf16 %v25480_v31, %v25458_v34  ;;  %v25694_v34 = vpack.c.bf16 %v25682_v5, %v25680_v16  ;;  %v25698_v31 = vpack.c.bf16 %v25690_v0, %v25688_v20 }
 0x590   : > { %28441 = vst [vmem:[#allocation176_spill] sm:$0xff] %v25670_v10  ;;  %28443 = vst [vmem:[#allocation190_spill] sm:$0xff] %v25694_v34 }
 0x591   : > { %19420 = vmatmul.mubr.msk.bf16.gmra.mrb[136].mxu0 %vm1294_vm3, %v25670_v10  ;;  %28444 = vst [vmem:[#allocation15_spill] sm:$0xff] %v25698_v31  ;;  %v28450_v10 = vld [vmem:[#allocation46_spill] sm:$0xff] }
 0x592   : > { %19423 = vmatprep.mubr.msk.bf16.mxu0 %vm1294_vm3, %v25674_v24  ;;  %v22662_v24 = vld [vmem:[%s27609_s3 + $0x2e8] sm:$0xff]  }
 0x595   : > { %20220 = vmatmul.mubr.msk.bf16.gmra.mrb[20].mxu1 %vm1294_vm3, %v25660_v63 }
 0x596   : > { %20223 = vmatprep.mubr.msk.bf16.mxu1 %vm1294_vm3, %v25666_v32  ;;  %v28445_v32 = vld [vmem:[#allocation37_spill] sm:$0xff] }
 0x599   : > { %19424 = vmatmul.mubr.msk.bf16.gmra.mrb[140].mxu0 %vm1294_vm3, %v25698_v31  ;;  %v28447_v31 = vld [vmem:[#allocation42_spill] sm:$0xff] }
 0x59a   : > { %19435 = vmatprep.mubr.msk.bf16.mxu0 %vm1294_vm3, %v28362_v30  ;;  %v22664_v30 = vld [vmem:[%s27609_s3 + $0x2a0] sm:$0xff]  }
 0x59b   : > { %19507 = vmatprep.subr.bf16.mxu0 %v22664_v30 }
 0x59d   : > { %20224 = vmatmul.mubr.msk.bf16.gmra.mrb[24].mxu1 %vm1294_vm3, %v25694_v34  ;;  %v28446_v34 = vld [vmem:[#allocation36_spill] sm:$0xff] }
 0x59e   : > { %20235 = vmatprep.mubr.msk.bf16.mxu1 %vm1294_vm3, %v28360_v44  ;;  %v22663_v44 = vld [vmem:[%s27609_s3 + $0x2f0] sm:$0xff]  }
 0x5a1   : > { %19436 = vmatmul.mubr.msk.bf16.vlgmr.msra.gmra.mrb[72].mxu0 %vm1294_vm3, %v28446_v34  ;;  %v28449_v34 = vld [vmem:[#allocation47_spill] sm:$0xff] }
 0x5a2   : > { %19439 = vmatprep.mubr.msk.bf16.mxu0 %vm1294_vm3, %v28447_v31  ;;  %19508 = vmatpush3.bf16.msra.mxu0 %v22664_v30  ;;  %v28451_v31 = vld [vmem:[#allocation52_spill] sm:$0xff]  ;;  %v22668_v30 = vld [vmem:[%s27609_s3 + $0x2b8] sm:$0xff]  }
 0x5a5   : > { %20236 = vmatmul.mubr.msk.bf16.vlgmr.msra.gmra.mrb[28].mxu1 %vm1294_vm3, %v28361_v12  ;;  %v22666_v12 = vld [vmem:[%s27609_s3 + $0x2a8] sm:$0xff]  }
 0x5a6   : > { %20239 = vmatprep.mubr.msk.bf16.mxu1 %vm1294_vm3, %v28445_v32  ;;  %20308 = vmatpush3.bf16.msra.mxu1 %v25565_v41  ;;  %v22665_v41 = vld [vmem:[%s27609_s3 + $0x2f8] sm:$0xff]   ;;  %v28448_v32 = vld [vmem:[#allocation38_spill] sm:$0xff] }
 0x5a7   : > { %20309 = vmatprep.subr.bf16.mxu1 %v22662_v24  ;;  %19509 = vmatprep.subr.bf16.mxu0 %v22666_v12 }
 0x5a8   : > { %19510 = vmatpush3.bf16.msra.mxu0 %v22666_v12  ;;  %v25757_v12 = vld [vmem:[%s27609_s3 + $0x40] sm:$0xff]  }
 0x5a9   : > { %19440 = vmatmul.mubr.msk.bf16.gmra.mrb[76].mxu0 %vm1294_vm3, %v28450_v10  ;;  %v28453_v10 = vld [vmem:[#allocation57_spill] sm:$0xff] }
 0x5aa   : > { %20310 = vmatpush3.bf16.msra.mxu1 %v22662_v24  ;;  %v22667_v24 = vld [vmem:[%s27609_s3 + $0x2b0] sm:$0xff]   ;;  %19443 = vmatprep.mubr.msk.bf16.mxu0 %vm1294_vm3, %v28451_v31  ;;  %v28458_v31 = vld [vmem:[#allocation66_spill] sm:$0xff] }
 0x5ab   : > { %20311 = vmatprep.subr.bf16.mxu1 %v22663_v44  ;;  %19511 = vmatprep.subr.bf16.mxu0 %v22667_v24 }
 0x5ac   : > { %19512 = vmatpush3.bf16.msra.mxu0 %v22667_v24  ;;  %v28457_v24 = vld [vmem:[#allocation67_spill] sm:$0xff] }
 0x5ad   : > { %20240 = vmatmul.mubr.msk.bf16.gmra.mrb[32].mxu1 %vm1294_vm3, %v28448_v32  ;;  %19513 = vmatprep.subr.bf16.mxu0 %v22668_v30  ;;  %v28454_v32 = vld [vmem:[#allocation56_spill] sm:$0xff] }
 0x5ae   : > { %20243 = vmatprep.mubr.msk.bf16.mxu1 %vm1294_vm3, %v28449_v34  ;;  %20312 = vmatpush3.bf16.msra.mxu1 %v22663_v44  ;;  %v28452_v44 = vld [vmem:[#allocation48_spill] sm:$0xff]  ;;  %v28455_v34 = vld [vmem:[#allocation62_spill] sm:$0xff] }
 0x5af   : > { %20313 = vmatprep.subr.bf16.mxu1 %v22665_v41 }
 0x5b0   : > { %19514 = vmatpush3.bf16.msra.mxu0 %v22668_v30  ;;  %v28460_v30 = vld [vmem:[#allocation68_spill] sm:$0xff] }
 0x5b1   : > { %19444 = vmatmul.mubr.msk.bf16.gmra.mrb[80].mxu0 %vm1294_vm3, %v28454_v32  ;;  %19587 = vmatprep.subr.bf16.mxu0 %v25757_v12  ;;  %v28462_v32 = vld [vmem:[#allocation76_spill] sm:$0xff] }
 0x5b2   : > { %20314 = vmatpush3.bf16.msra.mxu1 %v22665_v41  ;;  %19447 = vmatprep.mubr.msk.bf16.mxu0 %vm1294_vm3, %v28455_v34  ;;  %v28456_v41 = vld [vmem:[#allocation58_spill] sm:$0xff] }
 0x5b3   : > { %v28463_v34 = vld [vmem:[#allocation82_spill] sm:$0xff] }
 0x5b5   : > { %20244 = vmatmul.mubr.msk.bf16.gmra.mrb[36].mxu1 %vm1294_vm3, %v28452_v44  ;;  %v28459_v44 = vld [vmem:[#allocation72_spill] sm:$0xff] }
 0x5b6   : > { %20247 = vmatprep.mubr.msk.bf16.mxu1 %vm1294_vm3, %v28453_v10  ;;  %v28461_v10 = vld [vmem:[#allocation77_spill] sm:$0xff] }
 0x5b9   : > { %19448 = vmatmul.mubr.msk.bf16.gmra.mrb[84].mxu0 %vm1294_vm3, %v28458_v31  ;;  %v28465_v31 = vld [vmem:[#allocation87_spill] sm:$0xff] }
 0x5ba   : > { %19451 = vmatprep.mubr.msk.bf16.mxu0 %vm1294_vm3, %v28459_v44  ;;  %v28466_v44 = vld [vmem:[#allocation86_spill] sm:$0xff] }
 0x5bd   : > { %20248 = vmatmul.mubr.msk.bf16.gmra.mrb[40].mxu1 %vm1294_vm3, %v28456_v41  ;;  %v25779_v41 = vld [vmem:[%s27609_s3 + $0x80] sm:$0xff]  }
 0x5be   : > { %20251 = vmatprep.mubr.msk.bf16.mxu1 %vm1294_vm3, %v28457_v24  ;;  %20387 = vmatprep.subr.bf16.mxu1 %v25779_v41  ;;  %v28464_v24 = vld [vmem:[#allocation78_spill] sm:$0xff] }
 0x5c1   : > { %19452 = vmatmul.mubr.msk.bf16.gmra.mrb[88].mxu0 %vm1294_vm3, %v28462_v32  ;;  %v28469_v32 = vld [vmem:[#allocation97_spill] sm:$0xff] }
 0x5c2   : > { %19455 = vmatprep.mubr.msk.bf16.mxu0 %vm1294_vm3, %v28463_v34  ;;  %v28470_v34 = vld [vmem:[#allocation96_spill] sm:$0xff] }
 0x5c5   : > { %20252 = vmatmul.mubr.msk.bf16.gmra.mrb[44].mxu1 %vm1294_vm3, %v28460_v30  ;;  %v28467_v30 = vld [vmem:[#allocation92_spill] sm:$0xff] }
 0x5c6   : > { %20255 = vmatprep.mubr.msk.bf16.mxu1 %vm1294_vm3, %v28461_v10  ;;  %v28468_v10 = vld [vmem:[#allocation88_spill] sm:$0xff] }
 0x5c9   : > { %19456 = vmatmul.mubr.msk.bf16.gmra.mrb[92].mxu0 %vm1294_vm3, %v28466_v44  ;;  %v28474_v44 = vld [vmem:[#allocation107_spill] sm:$0xff] }
 0x5ca   : > { %19459 = vmatprep.mubr.msk.bf16.mxu0 %vm1294_vm3, %v28467_v30  ;;  %v28475_v30 = vld [vmem:[#allocation113_spill] sm:$0xff] }
 0x5cd   : > { %20256 = vmatmul.mubr.msk.bf16.gmra.mrb[48].mxu1 %vm1294_vm3, %v28464_v24  ;;  %v28472_v24 = vld [vmem:[#allocation98_spill] sm:$0xff] }
 0x5ce   : > { %20259 = vmatprep.mubr.msk.bf16.mxu1 %vm1294_vm3, %v28465_v31  ;;  %v28473_v31 = vld [vmem:[#allocation108_spill] sm:$0xff] }
 0x5d1   : > { %19460 = vmatmul.mubr.msk.bf16.gmra.mrb[96].mxu0 %vm1294_vm3, %v28470_v34  ;;  %v28478_v34 = vld [vmem:[#allocation119_spill] sm:$0xff] }
 0x5d2   : > { %19463 = vmatprep.mubr.msk.bf16.mxu0 %vm1294_vm3, %v28471_v57  ;;  %v28479_v57 = vld [vmem:[#allocation130_spill] sm:$0xff] }
 0x5d5   : > { %20260 = vmatmul.mubr.msk.bf16.gmra.mrb[52].mxu1 %vm1294_vm3, %v28468_v10  ;;  %v28476_v10 = vld [vmem:[#allocation109_spill] sm:$0xff] }
 0x5d6   : > { %20263 = vmatprep.mubr.msk.bf16.mxu1 %vm1294_vm3, %v28469_v32  ;;  %v28477_v32 = vld [vmem:[#allocation120_spill] sm:$0xff] }
 0x5d9   : > { %19464 = vmatmul.mubr.msk.bf16.gmra.mrb[100].mxu0 %vm1294_vm3, %v28474_v44  ;;  %v28482_v44 = vld [vmem:[#allocation131_spill] sm:$0xff] }
 0x5da   : > { %19467 = vmatprep.mubr.msk.bf16.mxu0 %vm1294_vm3, %v28475_v30  ;;  %v28483_v30 = vld [vmem:[#allocation142_spill] sm:$0xff] }
 0x5dd   : > { %20264 = vmatmul.mubr.msk.bf16.gmra.mrb[56].mxu1 %vm1294_vm3, %v28472_v24  ;;  %v28480_v24 = vld [vmem:[#allocation124_spill] sm:$0xff] }
 0x5de   : > { %20267 = vmatprep.mubr.msk.bf16.mxu1 %vm1294_vm3, %v28473_v31  ;;  %v28481_v31 = vld [vmem:[#allocation135_spill] sm:$0xff] }
 0x5e1   : > { %19468 = vmatmul.mubr.msk.bf16.gmra.mrb[104].mxu0 %vm1294_vm3, %v28478_v34  ;;  %v28486_v34 = vld [vmem:[#allocation146_spill] sm:$0xff] }
 0x5e2   : > { %19471 = vmatprep.mubr.msk.bf16.mxu0 %vm1294_vm3, %v28479_v57  ;;  %v28487_v57 = vld [vmem:[#allocation157_spill] sm:$0xff] }
 0x5e5   : > { %20268 = vmatmul.mubr.msk.bf16.gmra.mrb[60].mxu1 %vm1294_vm3, %v28476_v10  ;;  %v28484_v10 = vld [vmem:[#allocation141_spill] sm:$0xff] }
 0x5e6   : > { %20271 = vmatprep.mubr.msk.bf16.mxu1 %vm1294_vm3, %v28477_v32  ;;  %v28485_v32 = vld [vmem:[#allocation152_spill] sm:$0xff] }
 0x5e9   : > { %19472 = vmatmul.mubr.msk.bf16.gmra.mrb[108].mxu0 %vm1294_vm3, %v28482_v44  ;;  %v28490_v44 = vld [vmem:[#allocation164_spill] sm:$0xff] }
 0x5ea   : > { %19475 = vmatprep.mubr.msk.bf16.mxu0 %vm1294_vm3, %v28483_v30  ;;  %v28491_v30 = vld [vmem:[#allocation168_spill] sm:$0xff] }
 0x5ed   : > { %20272 = vmatmul.mubr.msk.bf16.gmra.mrb[64].mxu1 %vm1294_vm3, %v28480_v24  ;;  %v28488_v24 = vld [vmem:[#allocation153_spill] sm:$0xff] }
 0x5ee   : > { %20275 = vmatprep.mubr.msk.bf16.mxu1 %vm1294_vm3, %v28481_v31  ;;  %v28489_v31 = vld [vmem:[#allocation165_spill] sm:$0xff] }
 0x5f1   : > { %19476 = vmatmul.mubr.msk.bf16.gmra.mrb[112].mxu0 %vm1294_vm3, %v28486_v34  ;;  %v28494_v34 = vld [vmem:[#allocation169_spill] sm:$0xff] }
 0x5f2   : > { %19479 = vmatprep.mubr.msk.bf16.mxu0 %vm1294_vm3, %v28487_v57  ;;  %v28495_v57 = vld [vmem:[#allocation172_spill] sm:$0xff] }
 0x5f5   : > { %20276 = vmatmul.mubr.msk.bf16.gmra.mrb[68].mxu1 %vm1294_vm3, %v28484_v10  ;;  %v28492_v10 = vld [vmem:[#allocation166_spill] sm:$0xff] }
 0x5f6   : > { %20279 = vmatprep.mubr.msk.bf16.mxu1 %vm1294_vm3, %v28485_v32  ;;  %v28493_v32 = vld [vmem:[#allocation170_spill] sm:$0xff] }
 0x5f9   : > { %19480 = vmatmul.mubr.msk.bf16.gmra.mrb[116].mxu0 %vm1294_vm3, %v28490_v44  ;;  %v28498_v44 = vld [vmem:[#allocation173_spill] sm:$0xff] }
 0x5fa   : > { %19483 = vmatprep.mubr.msk.bf16.mxu0 %vm1294_vm3, %v28491_v30  ;;  %v28499_v30 = vld [vmem:[#allocation175_spill] sm:$0xff] }
 0x5fd   : > { %20280 = vmatmul.mubr.msk.bf16.gmra.mrb[0].mxu1 %vm1294_vm3, %v28488_v24  ;;  %v28496_v24 = vld [vmem:[#allocation171_spill] sm:$0xff] }
 0x5fe   : > { %20283 = vmatprep.mubr.msk.bf16.mxu1 %vm1294_vm3, %v28489_v31  ;;  %v28497_v31 = vld [vmem:[#allocation174_spill] sm:$0xff] }
 0x601   : > { %19484 = vmatmul.mubr.msk.bf16.gmra.mrb[120].mxu0 %vm1294_vm3, %v28494_v34  ;;  %v28502_v34 = vld [vmem:[#allocation187_spill] sm:$0xff] }
 0x602   : > { %19487 = vmatprep.mubr.msk.bf16.mxu0 %vm1294_vm3, %v28495_v57  ;;  %v28503_v57 = vld [vmem:[#allocation126_spill] sm:$0xff] }
 0x605   : > { %20284 = vmatmul.mubr.msk.bf16.gmra.mrb[4].mxu1 %vm1294_vm3, %v28492_v10  ;;  %v28500_v10 = vld [vmem:[#allocation186_spill] sm:$0xff] }
 0x606   : > { %20287 = vmatprep.mubr.msk.bf16.mxu1 %vm1294_vm3, %v28493_v32  ;;  %v28501_v32 = vld [vmem:[#allocation191_spill] sm:$0xff] }
 0x609   : > { %19488 = vmatmul.mubr.msk.bf16.gmra.mrb[124].mxu0 %vm1294_vm3, %v28498_v44  ;;  %v10511_v44 = vpack.c.bf16 %v25680_v16, %v25654_v14  ;;  %v25890_v14 = vld [vmem:[#allocation2 + $0x279] sm:$0xff]  ;;  %v25892_v16 = vld [vmem:[#allocation2 + $0x281] sm:$0xff] }
 0x60a   : > { %19491 = vmatprep.mubr.msk.bf16.mxu0 %vm1294_vm3, %v28499_v30  ;;  %v25874_v30 = vld [vmem:[#allocation2 + $0x271] sm:$0xff] }
 0x60d   : > { %20288 = vmatmul.mubr.msk.bf16.gmra.mrb[8].mxu1 %vm1294_vm3, %v28496_v24  ;;  %v28504_v24 = vld [vmem:[#allocation137_spill] sm:$0xff] }
 0x60e   : > { %20291 = vmatprep.mubr.msk.bf16.mxu1 %vm1294_vm3, %v28497_v31  ;;  %v25868_v31 = vld [vmem:[#allocation2 + $0x273] sm:$0xff] }
 0x611   : > { %19492 = vmatmul.mubr.msk.bf16.gmra.mrb[128].mxu0 %vm1294_vm3, %v28502_v34  ;;  %v22674_v34 = vld [vmem:[%s27609_s3 + $0x128] sm:$0xff]  }
 0x612   : > { %19495 = vmatprep.mubr.msk.bf16.mxu0 %vm1294_vm3, %v28423_v47  ;;  %v10512_v47 = vpack.c.bf16 %v25868_v31, %v25682_v5  ;;  %v5437_v5 = vpack.c.bf16 %v25892_v16, %v25890_v14 }
 0x615   : > { %20292 = vmatmul.mubr.msk.bf16.gmra.mrb[12].mxu1 %vm1294_vm3, %v28500_v10  ;;  %v5435_v10 = vpack.c.bf16 %v25688_v20, %v25662_v15  ;;  %v22670_v20 = vld [vmem:[%s27609_s3 + $0x88] sm:$0xff]  }
 0x616   : > { %20295 = vmatprep.mubr.msk.bf16.mxu1 %vm1294_vm3, %v28501_v32  ;;  %v25884_v32 = vld [vmem:[#allocation2 + $0x27b] sm:$0xff] }
 0x619   : > { %19496 = vmatmul.mubr.msk.bf16.gmra.mrb[132].mxu0 %vm1294_vm3, %v28504_v24  ;;  %v23112_v24 = vld [vmem:[#allocation2 + $0x2c] sm:$0xff] }
 0x61a   : > { %19499 = vmatprep.mubr.msk.bf16.mxu0 %vm1294_vm3, %v25490_v39  ;;  %v25886_v39 = vld [vmem:[#allocation2 + $0x283] sm:$0xff] }
 0x61b   : > { %v10513_v15 = vpack.c.bf16 %v25886_v39, %v25884_v32 }
 0x61d   : > { %20296 = vmatmul.mubr.msk.bf16.gmra.mrb[16].mxu1 %vm1294_vm3, %v28503_v57  ;;  %v6313_v57 = vld [vmem:[#allocation2 + $0x12] sm:$0xff] }
 0x61e   : > { %20299 = vmatprep.mubr.msk.bf16.mxu1 %vm1294_vm3, %v25486_v19  ;;  %v5436_v19 = vpack.c.bf16 %v25874_v30, %v25690_v0  ;;  %v11389_v0 = vld [vmem:[#allocation2 + $0x14] sm:$0xff] }
 0x621   : > { %19500 = vmatmul.mubr.msk.bf16.gmra.mrb[136].mxu0 %vm1294_vm3, %v5435_v10  ;;  %v22675_v10 = vld [vmem:[%s27609_s3 + $0x130] sm:$0xff]  }
 0x622   : > { %19503 = vmatprep.mubr.msk.bf16.mxu0 %vm1294_vm3, %v5436_v19  ;;  %v28526_v19 = vld [vmem:[#allocation4_spill] sm:$0xff] }
 0x625   : > { %20300 = vmatmul.mubr.msk.bf16.gmra.mrb[20].mxu1 %vm1294_vm3, %v10511_v44 }
 0x626   : > { %20303 = vmatprep.mubr.msk.bf16.mxu1 %vm1294_vm3, %v10512_v47 }
 0x629   : > { %19504 = vmatmul.mubr.msk.bf16.gmra.mrb[140].mxu0 %vm1294_vm3, %v5437_v5  ;;  %v22676_v5 = vld [vmem:[%s27609_s3 + $0x138] sm:$0xff]  }
 0x62a   : > { %19515 = vmatprep.mubr.msk.bf16.mxu0 %vm1294_vm3, %v25034_v4  ;;  %v23108_v4 = vld [vmem:[%s27609_s3 + $0x48] sm:$0xff]  }
 0x62d   : > { %20304 = vmatmul.mubr.msk.bf16.gmra.mrb[24].mxu1 %vm1294_vm3, %v10513_v15 }
 0x62e   : > { %20315 = vmatprep.mubr.msk.bf16.mxu1 %vm1294_vm3, %v25026_v49  ;;  %v22671_v49 = vld [vmem:[%s27609_s3 + $0x90] sm:$0xff]  }
 0x631   : > { %19516 = vmatmul.mubr.msk.bf16.vlgmr.msra.gmra.mrb[72].mxu0 %vm1294_vm3, %v25046_v18  ;;  %v23110_v18 = vld [vmem:[%s27609_s3 + $0x58] sm:$0xff]  }
 0x632   : > { %19519 = vmatprep.mubr.msk.bf16.mxu0 %vm1294_vm3, %v25050_v33  ;;  %19588 = vmatpush3.bf16.msra.mxu0 %v25757_v12  ;;  %v25967_v33 = vld [vmem:[%s27609_s3 + $0x120] sm:$0xff]  }
 0x633   : > { %19589 = vmatprep.subr.bf16.mxu0 %v23108_v4  ;;  %v23111_v12 = vld [vmem:[#allocation2 + $0x1c] sm:$0xff] }
 0x635   : > { %20316 = vmatmul.mubr.msk.bf16.vlgmr.msra.gmra.mrb[28].mxu1 %vm1294_vm3, %v25040_v52  ;;  %v22672_v52 = vld [vmem:[%s27609_s3 + $0x98] sm:$0xff]  }
 0x636   : > { %20319 = vmatprep.mubr.msk.bf16.mxu1 %vm1294_vm3, %v25042_v28  ;;  %20388 = vmatpush3.bf16.msra.mxu1 %v25779_v41  ;;  %v23109_v28 = vld [vmem:[%s27609_s3 + $0x50] sm:$0xff]   ;;  %v11472_v41 = vpack.c.bf16 %v23111_v12, %v11389_v0  ;;  %v23140_v12 = vld [vmem:[#allocation2 + $0xfc] sm:$0xff] }
 0x637   : > { %20389 = vmatprep.subr.bf16.mxu1 %v22670_v20  ;;  %19590 = vmatpush3.bf16.msra.mxu0 %v23108_v4  ;;  %v23139_v0 = vld [vmem:[#allocation2 + $0xf4] sm:$0xff] }
 0x638   : > { %19591 = vmatprep.subr.bf16.mxu0 %v23109_v28 }
 0x639   : > { %19520 = vmatmul.mubr.msk.bf16.gmra.mrb[76].mxu0 %vm1294_vm3, %v25062_v59  ;;  %v28509_v59 = vld [vmem:[#allocation94_spill] sm:$0xff] }
 0x63a   : > { %20390 = vmatpush3.bf16.msra.mxu1 %v22670_v20  ;;  %19523 = vmatprep.mubr.msk.bf16.mxu0 %vm1294_vm3, %v25066_v58  ;;  %v28510_v58 = vld [vmem:[#allocation105_spill] sm:$0xff]  ;;  %v23117_v20 = vld [vmem:[#allocation2 + $0x44] sm:$0xff] }
 0x63b   : > { %20391 = vmatprep.subr.bf16.mxu1 %v22671_v49  ;;  %19592 = vmatpush3.bf16.msra.mxu0 %v23109_v28  ;;  %v28530_v28 = vld [vmem:[#allocation16_spill] sm:$0xff] }
 0x63c   : > { %19593 = vmatprep.subr.bf16.mxu0 %v23110_v18 }
 0x63d   : > { %20320 = vmatmul.mubr.msk.bf16.gmra.mrb[32].mxu1 %vm1294_vm3, %v25056_v22  ;;  %v28506_v22 = vld [vmem:[#allocation64_spill] sm:$0xff] }
 0x63e   : > { %20323 = vmatprep.mubr.msk.bf16.mxu1 %vm1294_vm3, %v25058_v29  ;;  %20392 = vmatpush3.bf16.msra.mxu1 %v22671_v49  ;;  %v28508_v29 = vld [vmem:[#allocation84_spill] sm:$0xff] }
 0x63f   : > { %20393 = vmatprep.subr.bf16.mxu1 %v22672_v52  ;;  %19594 = vmatpush3.bf16.msra.mxu0 %v23110_v18  ;;  %v23118_v49 = vld [vmem:[#allocation2 + $0x4c] sm:$0xff]  ;;  %v23119_v18 = vld [vmem:[#allocation2 + $0x54] sm:$0xff] }
 0x640   : > { %v26091_v4 = vpack.c.bf16 %v23118_v49, %v23117_v20  ;;  %v23148_v20 = vld [vmem:[#allocation2 + $0x13c] sm:$0xff] }
 0x641   : > { %19524 = vmatmul.mubr.msk.bf16.gmra.mrb[80].mxu0 %vm1294_vm3, %v25084_v8  ;;  %v28514_v8 = vld [vmem:[#allocation127_spill] sm:$0xff] }
 0x642   : > { %20394 = vmatpush3.bf16.msra.mxu1 %v22672_v52  ;;  %19527 = vmatprep.mubr.msk.bf16.mxu0 %vm1294_vm3, %v25088_v51  ;;  %v28515_v51 = vld [vmem:[#allocation118_spill] sm:$0xff]  ;;  %v28529_v52 = vld [vmem:[#allocation12_spill] sm:$0xff] }
 0x643   : > { %20467 = vmatprep.subr.bf16.mxu1 %v25967_v33 }
 0x645   : > { %20324 = vmatmul.mubr.msk.bf16.gmra.mrb[36].mxu1 %vm1294_vm3, %v25078_v23  ;;  %v28512_v23 = vld [vmem:[#allocation106_spill] sm:$0xff] }
 0x646   : > { %20327 = vmatprep.mubr.msk.bf16.mxu1 %vm1294_vm3, %v25080_v21  ;;  %v28513_v21 = vld [vmem:[#allocation117_spill] sm:$0xff] }
 0x649   : > { %19528 = vmatmul.mubr.msk.bf16.gmra.mrb[84].mxu0 %vm1294_vm3, %v25100_v45  ;;  %v28518_v45 = vld [vmem:[#allocation179_spill] sm:$0xff] }
 0x64a   : > { %19531 = vmatprep.mubr.msk.bf16.mxu0 %vm1294_vm3, %v25104_v35  ;;  %v28519_v35 = vld [vmem:[#allocation104_spill] sm:$0xff] }
 0x64d   : > { %20328 = vmatmul.mubr.msk.bf16.gmra.mrb[40].mxu1 %vm1294_vm3, %v25094_v62  ;;  %v28516_v62 = vld [vmem:[#allocation129_spill] sm:$0xff] }
 0x64e   : > { %20331 = vmatprep.mubr.msk.bf16.mxu1 %vm1294_vm3, %v25096_v9  ;;  %v28517_v9 = vld [vmem:[#allocation188_spill] sm:$0xff] }
 0x651   : > { %19532 = vmatmul.mubr.msk.bf16.gmra.mrb[88].mxu0 %vm1294_vm3, %v25116_v7  ;;  %v28522_v7 = vld [vmem:[#allocation148_spill] sm:$0xff] }
 0x652   : > { %19535 = vmatprep.mubr.msk.bf16.mxu0 %vm1294_vm3, %v25120_v25  ;;  %v28523_v25 = vld [vmem:[#allocation190_spill] sm:$0xff] }
 0x655   : > { %20332 = vmatmul.mubr.msk.bf16.gmra.mrb[44].mxu1 %vm1294_vm3, %v25110_v53  ;;  %v28520_v53 = vld [vmem:[#allocation115_spill] sm:$0xff] }
 0x656   : > { %20335 = vmatprep.mubr.msk.bf16.mxu1 %vm1294_vm3, %v25112_v27  ;;  %v28521_v27 = vld [vmem:[#allocation176_spill] sm:$0xff] }
 0x659   : > { %19536 = vmatmul.mubr.msk.bf16.gmra.mrb[92].mxu0 %vm1294_vm3, %v25132_v26  ;;  %v28525_v26 = vld [vmem:[#allocation15_spill] sm:$0xff] }
 0x65a   : > { %19539 = vmatprep.mubr.msk.bf16.mxu0 %vm1294_vm3, %v25136_v17  ;;  %v10949_v17 = vpack.c.bf16 %v25884_v32, %v25868_v31  ;;  %v23113_v31 = vld [vmem:[#allocation2 + $0x24] sm:$0xff] }
 0x65b   : > { %v11473_v44 = vpack.c.bf16 %v23112_v24, %v23113_v31  ;;  %v28527_v32 = vld [vmem:[#allocation3_spill] sm:$0xff]  ;;  %v28541_v31 = vld [vmem:[#allocation70_spill] sm:$0xff] }
 0x65d   : > { %20336 = vmatmul.mubr.msk.bf16.gmra.mrb[48].mxu1 %vm1294_vm3, %v25126_v11  ;;  %v28524_v11 = vld [vmem:[#allocation189_spill] sm:$0xff] }
 0x65e   : > { %20339 = vmatprep.mubr.msk.bf16.mxu1 %vm1294_vm3, %v25128_v46  ;;  %v8930_v46 = vld [vmem:[#allocation2 + $0x28b] sm:$0xff] }
 0x661   : > { %19540 = vmatmul.mubr.msk.bf16.gmra.mrb[96].mxu0 %vm1294_vm3, %v25148_v60  ;;  %v5873_v60 = vpack.c.bf16 %v25890_v14, %v25874_v30  ;;  %v23114_v30 = vld [vmem:[#allocation2 + $0x1a] sm:$0xff] }
 0x662   : > { %19543 = vmatprep.mubr.msk.bf16.mxu0 %vm1294_vm3, %v25152_v61  ;;  %v6396_v47 = vpack.c.bf16 %v23114_v30, %v6313_v57  ;;  %v23115_v14 = vld [vmem:[#allocation2 + $0x34] sm:$0xff]  ;;  %v23142_v57 = vld [vmem:[#allocation2 + $0x10c] sm:$0xff] }
 0x663   : > { %v23143_v30 = vld [vmem:[#allocation2 + $0x114] sm:$0xff] }
 0x665   : > { %20340 = vmatmul.mubr.msk.bf16.gmra.mrb[52].mxu1 %vm1294_vm3, %v25142_v13  ;;  %v3854_v13 = vld [vmem:[#allocation2 + $0x289] sm:$0xff] }
 0x666   : > { %20343 = vmatprep.mubr.msk.bf16.mxu1 %vm1294_vm3, %v25144_v56  ;;  %v10950_v56 = vpack.c.bf16 %v8930_v46, %v25886_v39  ;;  %v5874_v61 = vpack.c.bf16 %v3854_v13, %v25892_v16  ;;  %v28528_v39 = vpack.c.bf16 %v28526_v19, %v28527_v32  ;;  %v23116_v16 = vld [vmem:[#allocation2 + $0x3c] sm:$0xff]  ;;  %v28535_v46 = vld [vmem:[#allocation40_spill] sm:$0xff]  ;;  %v23145_v19 = vld [vmem:[#allocation2 + $0x124] sm:$0xff] }
 0x667   : > { %v26086_v15 = vpack.c.bf16 %v23116_v16, %v23115_v14  ;;  %v23132_v13 = vld [vmem:[#allocation2 + $0xbc] sm:$0xff]  ;;  %v23146_v32 = vld [vmem:[#allocation2 + $0x12c] sm:$0xff] }
 0x668   : > { %v28543_v14 = vld [vmem:[#allocation80_spill] sm:$0xff]  ;;  %v28544_v16 = vld [vmem:[#allocation85_spill] sm:$0xff] }
 0x669   : > { %19544 = vmatmul.mubr.msk.bf16.gmra.mrb[100].mxu0 %vm1294_vm3, %v25164_v2  ;;  %v3855_v2 = vld [vmem:[#allocation2 + $0x291] sm:$0xff] }
 0x66a   : > { %19547 = vmatprep.mubr.msk.bf16.mxu0 %vm1294_vm3, %v25168_v37  ;;  %v28505_v37 = vld [vmem:[#allocation54_spill] sm:$0xff] }
 0x66d   : > { %20344 = vmatmul.mubr.msk.bf16.gmra.mrb[56].mxu1 %vm1294_vm3, %v25158_v3  ;;  %v8931_v3 = vld [vmem:[#allocation2 + $0x293] sm:$0xff] }
 0x66e   : > { %20347 = vmatprep.mubr.msk.bf16.mxu1 %vm1294_vm3, %v25160_v36  ;;  %v8932_v36 = vld [vmem:[#allocation2 + $0x29b] sm:$0xff] }
 0x671   : > { %19548 = vmatmul.mubr.msk.bf16.gmra.mrb[104].mxu0 %vm1294_vm3, %v25180_v42  ;;  %v11387_v42 = vld [vmem:[#allocation2 + $0x4] sm:$0xff] }
 0x672   : > { %19551 = vmatprep.mubr.msk.bf16.mxu0 %vm1294_vm3, %v25184_v40  ;;  %v28507_v40 = vld [vmem:[#allocation74_spill] sm:$0xff] }
 0x675   : > { %20348 = vmatmul.mubr.msk.bf16.gmra.mrb[60].mxu1 %vm1294_vm3, %v25174_v50  ;;  %v3856_v50 = vld [vmem:[#allocation2 + $0x299] sm:$0xff] }
 0x676   : > { %20351 = vmatprep.mubr.msk.bf16.mxu1 %vm1294_vm3, %v25176_v38  ;;  %v10951_v38 = vpack.c.bf16 %v8932_v36, %v8931_v3  ;;  %v26144_v36 = vld [vmem:[%s27609_s3 + $0x1c0] sm:$0xff]  }
 0x679   : > { %19552 = vmatmul.mubr.msk.bf16.gmra.mrb[108].mxu0 %vm1294_vm3, %v25196_v54  ;;  %v6311_v54 = vld [vmem:[#allocation2 + $0x2] sm:$0xff] }
 0x67a   : > { %19555 = vmatprep.mubr.msk.bf16.mxu0 %vm1294_vm3, %v25200_v55  ;;  %v28511_v55 = vld [vmem:[#allocation116_spill] sm:$0xff] }
 0x67d   : > { %20352 = vmatmul.mubr.msk.bf16.gmra.mrb[64].mxu1 %vm1294_vm3, %v25190_v1  ;;  %v11388_v1 = vld [vmem:[#allocation2 + $0xc] sm:$0xff] }
 0x67e   : > { %20355 = vmatprep.mubr.msk.bf16.mxu1 %vm1294_vm3, %v25192_v43  ;;  %v5875_v43 = vpack.c.bf16 %v3856_v50, %v3855_v2  ;;  %v28537_v2 = vld [vmem:[#allocation50_spill] sm:$0xff]  ;;  %v28538_v50 = vld [vmem:[#allocation55_spill] sm:$0xff] }
 0x681   : > { %19556 = vmatmul.mubr.msk.bf16.gmra.mrb[112].mxu0 %vm1294_vm3, %v28506_v22  ;;  %v23121_v22 = vld [vmem:[#allocation2 + $0x64] sm:$0xff] }
 0x682   : > { %19559 = vmatprep.mubr.msk.bf16.mxu0 %vm1294_vm3, %v28507_v40  ;;  %v23122_v40 = vld [vmem:[#allocation2 + $0x6c] sm:$0xff] }
 0x685   : > { %20356 = vmatmul.mubr.msk.bf16.gmra.mrb[68].mxu1 %vm1294_vm3, %v25206_v6  ;;  %v6312_v6 = vld [vmem:[#allocation2 + $0xa] sm:$0xff] }
 0x686   : > { %20359 = vmatprep.mubr.msk.bf16.mxu1 %vm1294_vm3, %v28505_v37 }
 0x689   : > { %19560 = vmatmul.mubr.msk.bf16.gmra.mrb[116].mxu0 %vm1294_vm3, %v28510_v58  ;;  %v28532_v58 = vld [vmem:[#allocation26_spill] sm:$0xff] }
 0x68a   : > { %19563 = vmatprep.mubr.msk.bf16.mxu0 %vm1294_vm3, %v28511_v55  ;;  %v23123_v55 = vld [vmem:[#allocation2 + $0x74] sm:$0xff] }
 0x68d   : > { %20360 = vmatmul.mubr.msk.bf16.gmra.mrb[0].mxu1 %vm1294_vm3, %v28508_v29  ;;  %v26103_v29 = vpack.c.bf16 %v23122_v40, %v23121_v22  ;;  %v28546_v22 = vld [vmem:[#allocation95_spill] sm:$0xff]  ;;  %v23151_v40 = vld [vmem:[#allocation2 + $0x154] sm:$0xff] }
 0x68e   : > { %20363 = vmatprep.mubr.msk.bf16.mxu1 %vm1294_vm3, %v28509_v59  ;;  %v28531_v59 = vld [vmem:[#allocation21_spill] sm:$0xff] }
 0x691   : > { %19564 = vmatmul.mubr.msk.bf16.gmra.mrb[120].mxu0 %vm1294_vm3, %v28514_v8  ;;  %v23125_v8 = vld [vmem:[#allocation2 + $0x84] sm:$0xff] }
 0x692   : > { %19567 = vmatprep.mubr.msk.bf16.mxu0 %vm1294_vm3, %v28515_v51  ;;  %v23126_v51 = vld [vmem:[#allocation2 + $0x8c] sm:$0xff] }
 0x695   : > { %20364 = vmatmul.mubr.msk.bf16.gmra.mrb[4].mxu1 %vm1294_vm3, %v28512_v23  ;;  %v23124_v23 = vld [vmem:[#allocation2 + $0x7c] sm:$0xff] }
 0x696   : > { %20367 = vmatprep.mubr.msk.bf16.mxu1 %vm1294_vm3, %v28513_v21  ;;  %v26113_v21 = vpack.c.bf16 %v23124_v23, %v23123_v55  ;;  %v23153_v55 = vld [vmem:[#allocation2 + $0x164] sm:$0xff]  ;;  %v23154_v23 = vld [vmem:[#allocation2 + $0x16c] sm:$0xff] }
 0x699   : > { %19568 = vmatmul.mubr.msk.bf16.gmra.mrb[124].mxu0 %vm1294_vm3, %v28517_v9  ;;  %v28533_v9 = vld [vmem:[#allocation30_spill] sm:$0xff] }
 0x69a   : > { %19571 = vmatprep.mubr.msk.bf16.mxu0 %vm1294_vm3, %v28518_v45  ;;  %v28534_v45 = vld [vmem:[#allocation35_spill] sm:$0xff] }
 0x69d   : > { %20368 = vmatmul.mubr.msk.bf16.gmra.mrb[8].mxu1 %vm1294_vm3, %v28516_v62  ;;  %v26115_v62 = vpack.c.bf16 %v23126_v51, %v23125_v8  ;;  %v26205_v8 = vpack.c.bf16 %v23154_v23, %v23153_v55  ;;  %v28547_v51 = vld [vmem:[#allocation100_spill] sm:$0xff]  ;;  %v28549_v55 = vld [vmem:[#allocation197_spill] sm:$0xff] }
 0x69e   : > { %20371 = vmatprep.mubr.msk.bf16.mxu1 %vm1294_vm3, %v28436_v48  ;;  %v6395_v48 = vpack.c.bf16 %v6312_v6, %v6311_v54  ;;  %v23138_v54 = vld [vmem:[#allocation2 + $0xec] sm:$0xff] }
 0x6a1   : > { %19572 = vmatmul.mubr.msk.bf16.gmra.mrb[128].mxu0 %vm1294_vm3, %v28520_v53  ;;  %v23128_v53 = vld [vmem:[#allocation2 + $0x9c] sm:$0xff] }
 0x6a2   : > { %19575 = vmatprep.mubr.msk.bf16.mxu0 %vm1294_vm3, %v28521_v27 }
 0x6a5   : > { %20372 = vmatmul.mubr.msk.bf16.gmra.mrb[12].mxu1 %vm1294_vm3, %v28519_v35  ;;  %v23127_v35 = vld [vmem:[#allocation2 + $0x94] sm:$0xff] }
 0x6a6   : > { %20375 = vmatprep.mubr.msk.bf16.mxu1 %vm1294_vm3, %v25660_v63  ;;  %v11471_v63 = vpack.c.bf16 %v11388_v1, %v11387_v42  ;;  %v26125_v27 = vpack.c.bf16 %v23128_v53, %v23127_v35  ;;  %v23136_v42 = vld [vmem:[#allocation2 + $0xdc] sm:$0xff]  ;;  %v23157_v53 = vld [vmem:[#allocation2 + $0x184] sm:$0xff] }
 0x6a9   : > { %19576 = vmatmul.mubr.msk.bf16.gmra.mrb[132].mxu0 %vm1294_vm3, %v28524_v11 }
 0x6aa   : > { %19579 = vmatprep.mubr.msk.bf16.mxu0 %vm1294_vm3, %v28525_v26  ;;  %v28536_v26 = vld [vmem:[#allocation45_spill] sm:$0xff] }
 0x6ad   : > { %20376 = vmatmul.mubr.msk.bf16.gmra.mrb[16].mxu1 %vm1294_vm3, %v28522_v7  ;;  %v23129_v7 = vld [vmem:[#allocation2 + $0xa4] sm:$0xff] }
 0x6ae   : > { %20379 = vmatprep.mubr.msk.bf16.mxu1 %vm1294_vm3, %v28523_v25  ;;  %v23130_v25 = vld [vmem:[#allocation2 + $0xac] sm:$0xff] }
 0x6af   : > { %v26127_v11 = vpack.c.bf16 %v23130_v25, %v23129_v7  ;;  %v23158_v7 = vld [vmem:[#allocation2 + $0x18c] sm:$0xff] }
 0x6b0   : > { %v26215_v25 = vpack.c.bf16 %v23158_v7, %v23157_v53  ;;  %v28554_v7 = vld [vmem:[#allocation196_spill] sm:$0xff] }
 0x6b1   : > { %19580 = vmatmul.mubr.msk.bf16.gmra.mrb[136].mxu0 %vm1294_vm3, %v5873_v60  ;;  %v23133_v60 = vld [vmem:[#allocation2 + $0xc4] sm:$0xff] }
 0x6b2   : > { %19583 = vmatprep.mubr.msk.bf16.mxu0 %vm1294_vm3, %v5874_v61  ;;  %v23134_v61 = vld [vmem:[#allocation2 + $0xcc] sm:$0xff] }
 0x6b3   : > { %v26139_v3 = vpack.c.bf16 %v23134_v61, %v23133_v60  ;;  %v23162_v60 = vld [vmem:[#allocation2 + $0x1ac] sm:$0xff] }
 0x6b5   : > { %20380 = vmatmul.mubr.msk.bf16.gmra.mrb[20].mxu1 %vm1294_vm3, %v10949_v17  ;;  %v23131_v17 = vld [vmem:[#allocation2 + $0xb4] sm:$0xff] }
 0x6b6   : > { %20383 = vmatprep.mubr.msk.bf16.mxu1 %vm1294_vm3, %v10950_v56  ;;  %v26137_v56 = vpack.c.bf16 %v23132_v13, %v23131_v17  ;;  %v23161_v13 = vld [vmem:[#allocation2 + $0x1a4] sm:$0xff] }
 0x6b7   : > { %v26223_v61 = vpack.c.bf16 %v23162_v60, %v23161_v13  ;;  %v22679_v13 = vld [vmem:[%s27609_s3 + $0x1d0] sm:$0xff]   ;;  %v22680_v60 = vld [vmem:[%s27609_s3 + $0x1d8] sm:$0xff]  }
 0x6b9   : > { %19584 = vmatmul.mubr.msk.bf16.gmra.mrb[140].mxu0 %vm1294_vm3, %v5875_v43  ;;  %v23137_v43 = vld [vmem:[#allocation2 + $0xe4] sm:$0xff] }
 0x6ba   : > { %19595 = vmatprep.mubr.msk.bf16.mxu0 %vm1294_vm3, %v6395_v48  ;;  %v26157_v6 = vpack.c.bf16 %v23138_v54, %v23137_v43  ;;  %v28540_v48 = vld [vmem:[#allocation65_spill] sm:$0xff]  ;;  %v23166_v43 = vld [vmem:[#allocation2 + $0x1cc] sm:$0xff] }
 0x6bd   : > { %20384 = vmatmul.mubr.msk.bf16.gmra.mrb[24].mxu1 %vm1294_vm3, %v10951_v38  ;;  %v23135_v38 = vld [vmem:[#allocation2 + $0xd4] sm:$0xff] }
 0x6be   : > { %20395 = vmatprep.mubr.msk.bf16.mxu1 %vm1294_vm3, %v11471_v63  ;;  %v26155_v1 = vpack.c.bf16 %v23136_v42, %v23135_v38  ;;  %v28539_v63 = vld [vmem:[#allocation60_spill] sm:$0xff]  ;;  %v23165_v42 = vld [vmem:[#allocation2 + $0x1c4] sm:$0xff] }
 0x6bf   : > { %v26231_v54 = vpack.c.bf16 %v23166_v43, %v23165_v42 }
 0x6c1   : > { %19596 = vmatmul.mubr.msk.bf16.vlgmr.msra.gmra.mrb[72].mxu0 %vm1294_vm3, %v6396_v47  ;;  %v23144_v47 = vld [vmem:[#allocation2 + $0x11c] sm:$0xff] }
 0x6c2   : > { %19599 = vmatprep.mubr.msk.bf16.mxu0 %vm1294_vm3, %v28528_v39  ;;  %v26181_v39 = vpack.c.bf16 %v23146_v32, %v23145_v19  ;;  %v23174_v19 = vld [vmem:[#allocation2 + $0x20c] sm:$0xff] }
 0x6c5   : > { %20396 = vmatmul.mubr.msk.bf16.vlgmr.msra.gmra.mrb[28].mxu1 %vm1294_vm3, %v11472_v41  ;;  %v26167_v41 = vpack.c.bf16 %v23140_v12, %v23139_v0  ;;  %v23169_v12 = vld [vmem:[#allocation2 + $0x1e4] sm:$0xff] }
 0x6c6   : > { %20399 = vmatprep.mubr.msk.bf16.mxu1 %vm1294_vm3, %v11473_v44  ;;  %20468 = vmatpush3.bf16.msra.mxu1 %v25967_v33  ;;  %v23120_v33 = vld [vmem:[#allocation2 + $0x5c] sm:$0xff]  ;;  %v28542_v44 = vld [vmem:[#allocation75_spill] sm:$0xff] }
 0x6c7   : > { %20469 = vmatprep.subr.bf16.mxu1 %v22674_v34  ;;  %v26101_v37 = vpack.c.bf16 %v23120_v33, %v23119_v18  ;;  %v28545_v33 = vld [vmem:[#allocation90_spill] sm:$0xff] }
 0x6c9   : > { %19600 = vmatmul.mubr.msk.bf16.gmra.mrb[76].mxu0 %vm1294_vm3, %v28529_v52  ;;  %v23149_v52 = vld [vmem:[#allocation2 + $0x144] sm:$0xff] }
 0x6ca   : > { %20470 = vmatpush3.bf16.msra.mxu1 %v22674_v34  ;;  %19603 = vmatprep.mubr.msk.bf16.mxu0 %vm1294_vm3, %v28530_v28  ;;  %v23141_v34 = vld [vmem:[#allocation2 + $0x104] sm:$0xff]  ;;  %v23150_v28 = vld [vmem:[#allocation2 + $0x14c] sm:$0xff] }
 0x6cb   : > { %20471 = vmatprep.subr.bf16.mxu1 %v22675_v10  ;;  %v26169_v24 = vpack.c.bf16 %v23142_v57, %v23141_v34  ;;  %v26193_v18 = vpack.c.bf16 %v23150_v28, %v23149_v52  ;;  %v23170_v34 = vld [vmem:[#allocation2 + $0x1ec] sm:$0xff] }
 0x6cc   : > { %v26239_v57 = vpack.c.bf16 %v23170_v34, %v23169_v12  ;;  %v23178_v52 = vld [vmem:[#allocation2 + $0x22c] sm:$0xff]  ;;  %v28564_v12 = vld [vmem:[#allocation202_spill] sm:$0xff] }
 0x6cd   : > { %20400 = vmatmul.mubr.msk.bf16.gmra.mrb[32].mxu1 %vm1294_vm3, %v26086_v15 }
 0x6ce   : > { %20403 = vmatprep.mubr.msk.bf16.mxu1 %vm1294_vm3, %v26091_v4  ;;  %20472 = vmatpush3.bf16.msra.mxu1 %v22675_v10  ;;  %v26179_v10 = vpack.c.bf16 %v23144_v47, %v23143_v30  ;;  %v23173_v47 = vld [vmem:[#allocation2 + $0x204] sm:$0xff] }
 0x6cf   : > { %20473 = vmatprep.subr.bf16.mxu1 %v22676_v5  ;;  %v26247_v32 = vpack.c.bf16 %v23174_v19, %v23173_v47  ;;  %v28569_v19 = vld [vmem:[#allocation203_spill] sm:$0xff] }
 0x6d1   : > { %19604 = vmatmul.mubr.msk.bf16.gmra.mrb[80].mxu0 %vm1294_vm3, %v28531_v59  ;;  %v23152_v59 = vld [vmem:[#allocation2 + $0x15c] sm:$0xff] }
 0x6d2   : > { %20474 = vmatpush3.bf16.msra.mxu1 %v22676_v5  ;;  %19607 = vmatprep.mubr.msk.bf16.mxu0 %vm1294_vm3, %v28532_v58  ;;  %v23147_v5 = vld [vmem:[#allocation2 + $0x134] sm:$0xff]  ;;  %v26203_v58 = vpack.c.bf16 %v23152_v59, %v23151_v40  ;;  %v28548_v59 = vld [vmem:[#allocation195_spill] sm:$0xff] }
 0x6d3   : > { %20547 = vmatprep.subr.bf16.mxu1 %v26144_v36  ;;  %v26191_v49 = vpack.c.bf16 %v23148_v20, %v23147_v5  ;;  %v23177_v20 = vld [vmem:[#allocation2 + $0x224] sm:$0xff]  ;;  %v28550_v23 = vpack.c.bf16 %v28548_v59, %v28549_v55  ;;  %v28575_v59 = vld [vmem:[#allocation205_spill] sm:$0xff] }
 0x6d4   : > { %v26255_v28 = vpack.c.bf16 %v23178_v52, %v23177_v20  ;;  %v28576_v55 = vld [vmem:[#allocation206_spill] sm:$0xff] }
 0x6d5   : > { %20404 = vmatmul.mubr.msk.bf16.gmra.mrb[36].mxu1 %vm1294_vm3, %v26101_v37 }
 0x6d6   : > { %20407 = vmatprep.mubr.msk.bf16.mxu1 %vm1294_vm3, %v26103_v29 }
 0x6d9   : > { %19608 = vmatmul.mubr.msk.bf16.gmra.mrb[84].mxu0 %vm1294_vm3, %v28533_v9  ;;  %v23155_v9 = vld [vmem:[#allocation2 + $0x174] sm:$0xff] }
 0x6da   : > { %19611 = vmatprep.mubr.msk.bf16.mxu0 %vm1294_vm3, %v28534_v45  ;;  %v23156_v45 = vld [vmem:[#allocation2 + $0x17c] sm:$0xff] }
 0x6db   : > { %v26213_v35 = vpack.c.bf16 %v23156_v45, %v23155_v9  ;;  %v28551_v9 = vld [vmem:[#allocation167_spill] sm:$0xff]  ;;  %v28552_v45 = vld [vmem:[#allocation161_spill] sm:$0xff] }
 0x6dc   : > { %v28553_v53 = vpack.c.bf16 %v28551_v9, %v28552_v45 }
 0x6dd   : > { %20408 = vmatmul.mubr.msk.bf16.gmra.mrb[40].mxu1 %vm1294_vm3, %v26113_v21 }
 0x6de   : > { %20411 = vmatprep.mubr.msk.bf16.mxu1 %vm1294_vm3, %v26115_v62 }
 0x6e1   : > { %19612 = vmatmul.mubr.msk.bf16.gmra.mrb[88].mxu0 %vm1294_vm3, %v28535_v46  ;;  %v23159_v46 = vld [vmem:[#allocation2 + $0x194] sm:$0xff] }
 0x6e2   : > { %19615 = vmatprep.mubr.msk.bf16.mxu0 %vm1294_vm3, %v28536_v26  ;;  %v23160_v26 = vld [vmem:[#allocation2 + $0x19c] sm:$0xff] }
 0x6e3   : > { %v26221_v17 = vpack.c.bf16 %v23160_v26, %v23159_v46  ;;  %v28555_v46 = vld [vmem:[#allocation198_spill] sm:$0xff] }
 0x6e4   : > { %v28556_v26 = vpack.c.bf16 %v28554_v7, %v28555_v46  ;;  %v28581_v7 = vld [vmem:[#allocation207_spill] sm:$0xff]  ;;  %v28582_v46 = vld [vmem:[#allocation208_spill] sm:$0xff] }
 0x6e5   : > { %20412 = vmatmul.mubr.msk.bf16.gmra.mrb[44].mxu1 %vm1294_vm3, %v26125_v27 }
 0x6e6   : > { %20415 = vmatprep.mubr.msk.bf16.mxu1 %vm1294_vm3, %v26127_v11 }
 0x6e9   : > { %19616 = vmatmul.mubr.msk.bf16.gmra.mrb[92].mxu0 %vm1294_vm3, %v28537_v2  ;;  %v23163_v2 = vld [vmem:[#allocation2 + $0x1b4] sm:$0xff] }
 0x6ea   : > { %19619 = vmatprep.mubr.msk.bf16.mxu0 %vm1294_vm3, %v28538_v50  ;;  %v23164_v50 = vld [vmem:[#allocation2 + $0x1bc] sm:$0xff] }
 0x6eb   : > { %v26229_v38 = vpack.c.bf16 %v23164_v50, %v23163_v2  ;;  %v28557_v2 = vld [vmem:[#allocation199_spill] sm:$0xff]  ;;  %v28558_v50 = vld [vmem:[#allocation200_spill] sm:$0xff] }
 0x6ed   : > { %20416 = vmatmul.mubr.msk.bf16.gmra.mrb[48].mxu1 %vm1294_vm3, %v26137_v56 }
 0x6ee   : > { %20419 = vmatprep.mubr.msk.bf16.mxu1 %vm1294_vm3, %v26139_v3 }
 0x6f1   : > { %19620 = vmatmul.mubr.msk.bf16.gmra.mrb[96].mxu0 %vm1294_vm3, %v28539_v63  ;;  %v23167_v63 = vld [vmem:[#allocation2 + $0x1d4] sm:$0xff] }
 0x6f2   : > { %19623 = vmatprep.mubr.msk.bf16.mxu0 %vm1294_vm3, %v28540_v48  ;;  %v23168_v48 = vld [vmem:[#allocation2 + $0x1dc] sm:$0xff] }
 0x6f3   : > { %v26237_v0 = vpack.c.bf16 %v23168_v48, %v23167_v63  ;;  %v28563_v48 = vld [vmem:[#allocation201_spill] sm:$0xff] }
 0x6f5   : > { %20420 = vmatmul.mubr.msk.bf16.gmra.mrb[52].mxu1 %vm1294_vm3, %v26155_v1 }
 0x6f6   : > { %20423 = vmatprep.mubr.msk.bf16.mxu1 %vm1294_vm3, %v26157_v6 }
 0x6f9   : > { %19624 = vmatmul.mubr.msk.bf16.gmra.mrb[100].mxu0 %vm1294_vm3, %v28541_v31  ;;  %v23171_v31 = vld [vmem:[#allocation2 + $0x1f4] sm:$0xff] }
 0x6fa   : > { %19627 = vmatprep.mubr.msk.bf16.mxu0 %vm1294_vm3, %v28542_v44  ;;  %v23172_v44 = vld [vmem:[#allocation2 + $0x1fc] sm:$0xff] }
 0x6fb   : > { %v26245_v30 = vpack.c.bf16 %v23172_v44, %v23171_v31 }
 0x6fd   : > { %20424 = vmatmul.mubr.msk.bf16.gmra.mrb[56].mxu1 %vm1294_vm3, %v26167_v41 }
 0x6fe   : > { %20427 = vmatprep.mubr.msk.bf16.mxu1 %vm1294_vm3, %v26169_v24 }
 0x701   : > { %19628 = vmatmul.mubr.msk.bf16.gmra.mrb[104].mxu0 %vm1294_vm3, %v28543_v14  ;;  %v23175_v14 = vld [vmem:[#allocation2 + $0x214] sm:$0xff] }
 0x702   : > { %19631 = vmatprep.mubr.msk.bf16.mxu0 %vm1294_vm3, %v28544_v16  ;;  %v23176_v16 = vld [vmem:[#allocation2 + $0x21c] sm:$0xff] }
 0x703   : > { %v26253_v5 = vpack.c.bf16 %v23176_v16, %v23175_v14  ;;  %v28570_v14 = vld [vmem:[#allocation204_spill] sm:$0xff] }
 0x705   : > { %20428 = vmatmul.mubr.msk.bf16.gmra.mrb[60].mxu1 %vm1294_vm3, %v26179_v10 }
 0x706   : > { %20431 = vmatprep.mubr.msk.bf16.mxu1 %vm1294_vm3, %v26181_v39 }
 0x709   : > { %19632 = vmatmul.mubr.msk.bf16.gmra.mrb[108].mxu0 %vm1294_vm3, %v28545_v33  ;;  %v26261_v33 = vld [vmem:[#allocation2 + $0x23c] sm:$0xff] }
 0x70a   : > { %19635 = vmatprep.mubr.msk.bf16.mxu0 %vm1294_vm3, %v28546_v22  ;;  %v23179_v22 = vld [vmem:[#allocation2 + $0x234] sm:$0xff] }
 0x70b   : > { %v26264_v40 = vpack.c.bf16 %v26261_v33, %v23179_v22 }
 0x70d   : > { %20432 = vmatmul.mubr.msk.bf16.gmra.mrb[64].mxu1 %vm1294_vm3, %v26191_v49 }
 0x70e   : > { %20435 = vmatprep.mubr.msk.bf16.mxu1 %vm1294_vm3, %v26193_v18 }
 0x711   : > { %19636 = vmatmul.mubr.msk.bf16.gmra.mrb[112].mxu0 %vm1294_vm3, %v28547_v51  ;;  %v22678_v51 = vld [vmem:[%s27609_s3 + $0x1c8] sm:$0xff]  }
 0x715   : > { %20436 = vmatmul.mubr.msk.bf16.gmra.mrb[68].mxu1 %vm1294_vm3, %v26203_v58 }
 0x716   : > { %20439 = vmatprep.mubr.msk.bf16.mxu1 %vm1294_vm3, %v26205_v8 }
 0x71d   : > { %20440 = vmatmul.mubr.msk.bf16.gmra.mrb[0].mxu1 %vm1294_vm3, %v26213_v35 }
 0x71e   : > { %20443 = vmatprep.mubr.msk.bf16.mxu1 %vm1294_vm3, %v26215_v25 }
 0x725   : > { %20444 = vmatmul.mubr.msk.bf16.gmra.mrb[4].mxu1 %vm1294_vm3, %v26221_v17 }
 0x726   : > { %20447 = vmatprep.mubr.msk.bf16.mxu1 %vm1294_vm3, %v26223_v61 }
 0x72d   : > { %20448 = vmatmul.mubr.msk.bf16.gmra.mrb[8].mxu1 %vm1294_vm3, %v26229_v38 }
 0x72e   : > { %20451 = vmatprep.mubr.msk.bf16.mxu1 %vm1294_vm3, %v26231_v54 }
 0x735   : > { %20452 = vmatmul.mubr.msk.bf16.gmra.mrb[12].mxu1 %vm1294_vm3, %v26237_v0 }
 0x736   : > { %20455 = vmatprep.mubr.msk.bf16.mxu1 %vm1294_vm3, %v26239_v57 }
 0x73d   : > { %20456 = vmatmul.mubr.msk.bf16.gmra.mrb[16].mxu1 %vm1294_vm3, %v26245_v30 }
 0x73e   : > { %20459 = vmatprep.mubr.msk.bf16.mxu1 %vm1294_vm3, %v26247_v32 }
 0x745   : > { %20460 = vmatmul.mubr.msk.bf16.gmra.mrb[20].mxu1 %vm1294_vm3, %v26253_v5 }
 0x746   : > { %20463 = vmatprep.mubr.msk.bf16.mxu1 %vm1294_vm3, %v26255_v28 }
 0x74d   : > { %20464 = vmatmul.mubr.msk.bf16.gmra.mrb[24].mxu1 %vm1294_vm3, %v26264_v40 }
 0x74e   : > { %20475 = vmatprep.mubr.msk.bf16.mxu1 %vm1294_vm3, %v28550_v23  ;;  %v26333_v23 = vld [vmem:[%s27609_s3 + $0x260] sm:$0xff]  }
 0x755   : > { %20476 = vmatmul.mubr.msk.bf16.vlgmr.msra.gmra.mrb[28].mxu1 %vm1294_vm3, %v28553_v53 }
 0x756   : > { %20479 = vmatprep.mubr.msk.bf16.mxu1 %vm1294_vm3, %v28556_v26  ;;  %20548 = vmatpush3.bf16.msra.mxu1 %v26144_v36 }
 0x757   : > { %20549 = vmatprep.subr.bf16.mxu1 %v22678_v51 }
 0x75a   : > { %20550 = vmatpush3.bf16.msra.mxu1 %v22678_v51 }
 0x75b   : > { %20551 = vmatprep.subr.bf16.mxu1 %v22679_v13 }
 0x75c   : > { %v26294_v36 = vpop.f32.mrb[116].mxu0 }
 0x75d   : > { %20480 = vmatmul.mubr.msk.bf16.gmra.mrb[32].mxu1 %vm1294_vm3, %v28557_v2  ;;  %28559 = vst [vmem:[#allocation20_spill] sm:$0xff] %v26294_v36  ;;  %v26296_v42 = vpop.f32.mrb[117].mxu0 }
 0x75e   : > { %20483 = vmatprep.mubr.msk.bf16.mxu1 %vm1294_vm3, %v28558_v50  ;;  %20552 = vmatpush3.bf16.msra.mxu1 %v22679_v13  ;;  %28560 = vst [vmem:[#allocation24_spill] sm:$0xff] %v26296_v42  ;;  %v26298_v43 = vpop.f32.mrb[118].mxu0  ;;  %v28612_v42 = vld [vmem:[#allocation218_spill] sm:$0xff] }
 0x75f   : > { %20553 = vmatprep.subr.bf16.mxu1 %v22680_v60  ;;  %28561 = vst [vmem:[#allocation29_spill] sm:$0xff] %v26298_v43  ;;  %v26300_v63 = vpop.f32.mrb[119].mxu0  ;;  %v28611_v43 = vld [vmem:[#allocation217_spill] sm:$0xff] }
 0x760   : > { %28562 = vst [vmem:[#allocation33_spill] sm:$0xff] %v26300_v63 }
 0x762   : > { %20554 = vmatpush3.bf16.msra.mxu1 %v22680_v60 }
 0x763   : > { %20627 = vmatprep.subr.bf16.mxu1 %v26333_v23 }
 0x764   : > { %v26306_v34 = vpop.f32.mrb[120].mxu0 }
 0x765   : > { %20484 = vmatmul.mubr.msk.bf16.gmra.mrb[36].mxu1 %vm1294_vm3, %v28563_v48  ;;  %28565 = vst [vmem:[#allocation39_spill] sm:$0xff] %v26306_v34  ;;  %v26308_v31 = vpop.f32.mrb[121].mxu0 }
 0x766   : > { %20487 = vmatprep.mubr.msk.bf16.mxu1 %vm1294_vm3, %v28564_v12  ;;  %28566 = vst [vmem:[#allocation43_spill] sm:$0xff] %v26308_v31  ;;  %v26310_v44 = vpop.f32.mrb[122].mxu0 }
 0x767   : > { %28567 = vst [vmem:[#allocation49_spill] sm:$0xff] %v26310_v44  ;;  %v26312_v47 = vpop.f32.mrb[123].mxu0 }
 0x768   : > { %28568 = vst [vmem:[#allocation53_spill] sm:$0xff] %v26312_v47 }
 0x76c   : > { %v26318_v16 = vpop.f32.mrb[124].mxu0 }
 0x76d   : > { %20488 = vmatmul.mubr.msk.bf16.gmra.mrb[40].mxu1 %vm1294_vm3, %v28569_v19  ;;  %28571 = vst [vmem:[#allocation59_spill] sm:$0xff] %v26318_v16  ;;  %v26320_v20 = vpop.f32.mrb[125].mxu0 }
 0x76e   : > { %20491 = vmatprep.mubr.msk.bf16.mxu1 %vm1294_vm3, %v28570_v14  ;;  %28572 = vst [vmem:[#allocation63_spill] sm:$0xff] %v26320_v20  ;;  %v26322_v52 = vpop.f32.mrb[126].mxu0 }
 0x76f   : > { %28573 = vst [vmem:[#allocation69_spill] sm:$0xff] %v26322_v52  ;;  %v26324_v22 = vpop.f32.mrb[127].mxu0 }
 0x770   : > { %28574 = vst [vmem:[#allocation73_spill] sm:$0xff] %v26324_v22 }
 0x774   : > { %v26336_v51 = vpop.f32.mrb[128].mxu0 }
 0x775   : > { %20492 = vmatmul.mubr.msk.bf16.gmra.mrb[44].mxu1 %vm1294_vm3, %v28575_v59  ;;  %28577 = vst [vmem:[#allocation79_spill] sm:$0xff] %v26336_v51  ;;  %v26338_v9 = vpop.f32.mrb[129].mxu0  ;;  %v28587_v51 = vld [vmem:[#allocation209_spill] sm:$0xff] }
 0x776   : > { %20495 = vmatprep.mubr.msk.bf16.mxu1 %vm1294_vm3, %v28576_v55  ;;  %28578 = vst [vmem:[#allocation83_spill] sm:$0xff] %v26338_v9  ;;  %v26340_v45 = vpop.f32.mrb[130].mxu0 }
 0x777   : > { %28579 = vst [vmem:[#allocation89_spill] sm:$0xff] %v26340_v45  ;;  %v26342_v53 = vpop.f32.mrb[131].mxu0  ;;  %v28588_v45 = vld [vmem:[#allocation210_spill] sm:$0xff] }
 0x778   : > { %28580 = vst [vmem:[#allocation93_spill] sm:$0xff] %v26342_v53 }
 0x77c   : > { %v26348_v26 = vpop.f32.mrb[132].mxu0 }
 0x77d   : > { %20496 = vmatmul.mubr.msk.bf16.gmra.mrb[48].mxu1 %vm1294_vm3, %v28581_v7  ;;  %28583 = vst [vmem:[#allocation99_spill] sm:$0xff] %v26348_v26  ;;  %v26350_v13 = vpop.f32.mrb[133].mxu0  ;;  %v28593_v26 = vld [vmem:[#allocation211_spill] sm:$0xff] }
 0x77e   : > { %20499 = vmatprep.mubr.msk.bf16.mxu1 %vm1294_vm3, %v28582_v46  ;;  %28584 = vst [vmem:[#allocation103_spill] sm:$0xff] %v26350_v13  ;;  %v26352_v60 = vpop.f32.mrb[134].mxu0 }
 0x77f   : > { %28585 = vst [vmem:[#allocation110_spill] sm:$0xff] %v26352_v60  ;;  %v26354_v22 = vpop.f32.mrb[135].mxu0  ;;  %v28594_v60 = vld [vmem:[#allocation212_spill] sm:$0xff] }
 0x780   : > { %28586 = vst [vmem:[#allocation114_spill] sm:$0xff] %v26354_v22 }
 0x784   : > { %v26360_v53 = vpop.f32.mrb[136].mxu0 }
 0x785   : > { %20500 = vmatmul.mubr.msk.bf16.gmra.mrb[52].mxu1 %vm1294_vm3, %v28587_v51  ;;  %28589 = vst [vmem:[#allocation128_spill] sm:$0xff] %v26360_v53  ;;  %v26362_v9 = vpop.f32.mrb[137].mxu0  ;;  %v28599_v53 = vld [vmem:[#allocation213_spill] sm:$0xff] }
 0x786   : > { %20503 = vmatprep.mubr.msk.bf16.mxu1 %vm1294_vm3, %v28588_v45  ;;  %28590 = vst [vmem:[#allocation121_spill] sm:$0xff] %v26362_v9  ;;  %v26364_v52 = vpop.f32.mrb[138].mxu0 }
 0x787   : > { %28591 = vst [vmem:[#allocation125_spill] sm:$0xff] %v26364_v52  ;;  %v26366_v20 = vpop.f32.mrb[139].mxu0  ;;  %v28600_v52 = vld [vmem:[#allocation214_spill] sm:$0xff] }
 0x788   : > { %28592 = vst [vmem:[#allocation138_spill] sm:$0xff] %v26366_v20 }
 0x78c   : > { %v26372_v22 = vpop.f32.mrb[140].mxu0 }
 0x78d   : > { %20504 = vmatmul.mubr.msk.bf16.gmra.mrb[56].mxu1 %vm1294_vm3, %v28593_v26  ;;  %28595 = vst [vmem:[#allocation139_spill] sm:$0xff] %v26372_v22  ;;  %v26374_v13 = vpop.f32.mrb[141].mxu0  ;;  %v28605_v22 = vld [vmem:[#allocation215_spill] sm:$0xff] }
 0x78e   : > { %20507 = vmatprep.mubr.msk.bf16.mxu1 %vm1294_vm3, %v28594_v60  ;;  %28596 = vst [vmem:[#allocation132_spill] sm:$0xff] %v26374_v13  ;;  %v26376_v16 = vpop.f32.mrb[142].mxu0 }
 0x78f   : > { %28597 = vst [vmem:[#allocation136_spill] sm:$0xff] %v26376_v16  ;;  %v26378_v47 = vpop.f32.mrb[143].mxu0  ;;  %v28606_v16 = vld [vmem:[#allocation216_spill] sm:$0xff] }
 0x790   : > { %28598 = vst [vmem:[#allocation149_spill] sm:$0xff] %v26378_v47 }
 0x794   : > { %v26384_v20 = vpop.f32.mrb[72].mxu0 }
 0x795   : > { %20508 = vmatmul.mubr.msk.bf16.gmra.mrb[60].mxu1 %vm1294_vm3, %v28599_v53  ;;  %28601 = vst [vmem:[#allocation150_spill] sm:$0xff] %v26384_v20  ;;  %v26386_v9 = vpop.f32.mrb[73].mxu0 }
 0x796   : > { %20511 = vmatprep.mubr.msk.bf16.mxu1 %vm1294_vm3, %v28600_v52  ;;  %28602 = vst [vmem:[#allocation143_spill] sm:$0xff] %v26386_v9  ;;  %v26388_v44 = vpop.f32.mrb[74].mxu0 }
 0x797   : > { %28603 = vst [vmem:[#allocation147_spill] sm:$0xff] %v26388_v44  ;;  %v26390_v31 = vpop.f32.mrb[75].mxu0 }
 0x798   : > { %28604 = vst [vmem:[#allocation160_spill] sm:$0xff] %v26390_v31 }
 0x79c   : > { %v26396_v47 = vpop.f32.mrb[76].mxu0 }
 0x79d   : > { %20512 = vmatmul.mubr.msk.bf16.gmra.mrb[64].mxu1 %vm1294_vm3, %v28605_v22  ;;  %28607 = vst [vmem:[#allocation162_spill] sm:$0xff] %v26396_v47  ;;  %v26398_v13 = vpop.f32.mrb[77].mxu0  ;;  %v28617_v47 = vld [vmem:[#allocation219_spill] sm:$0xff] }
 0x79e   : > { %20515 = vmatprep.mubr.msk.bf16.mxu1 %vm1294_vm3, %v28606_v16  ;;  %28608 = vst [vmem:[#allocation154_spill] sm:$0xff] %v26398_v13  ;;  %v26400_v34 = vpop.f32.mrb[78].mxu0 }
 0x79f   : > { %28609 = vst [vmem:[#allocation158_spill] sm:$0xff] %v26400_v34  ;;  %v26402_v63 = vpop.f32.mrb[79].mxu0  ;;  %v28618_v34 = vld [vmem:[#allocation220_spill] sm:$0xff] }
 0x7a0   : > { %28610 = vst [vmem:[#allocation182_spill] sm:$0xff] %v26402_v63 }
 0x7a4   : > { %v26408_v36 = vpop.f32.mrb[80].mxu0 }
 0x7a5   : > { %20516 = vmatmul.mubr.msk.bf16.gmra.mrb[68].mxu1 %vm1294_vm3, %v28611_v43  ;;  %28613 = vst [vmem:[#allocation184_spill] sm:$0xff] %v26408_v36  ;;  %v26410_v31 = vpop.f32.mrb[81].mxu0  ;;  %v28623_v36 = vld [vmem:[#allocation221_spill] sm:$0xff] }
 0x7a6   : > { %20519 = vmatprep.mubr.msk.bf16.mxu1 %vm1294_vm3, %v28612_v42  ;;  %28614 = vst [vmem:[#allocation177_spill] sm:$0xff] %v26410_v31  ;;  %v26412_v44 = vpop.f32.mrb[82].mxu0 }
 0x7a7   : > { %28615 = vst [vmem:[#allocation180_spill] sm:$0xff] %v26412_v44  ;;  %v26414_v9 = vpop.f32.mrb[83].mxu0  ;;  %v28624_v44 = vld [vmem:[#allocation222_spill] sm:$0xff] }
 0x7a8   : > { %28616 = vst [vmem:[#allocation14_spill] sm:$0xff] %v26414_v9 }
 0x7ac   : > { %v26420_v63 = vpop.f32.mrb[84].mxu0 }
 0x7ad   : > { %20520 = vmatmul.mubr.msk.bf16.gmra.mrb[0].mxu1 %vm1294_vm3, %v28617_v47  ;;  %28619 = vst [vmem:[#allocation183_spill] sm:$0xff] %v26420_v63  ;;  %v26422_v13 = vpop.f32.mrb[85].mxu0  ;;  %v28629_v63 = vld [vmem:[#allocation223_spill] sm:$0xff] }
 0x7ae   : > { %20523 = vmatprep.mubr.msk.bf16.mxu1 %vm1294_vm3, %v28618_v34  ;;  %28620 = vst [vmem:[#allocation194_spill] sm:$0xff] %v26422_v13  ;;  %v26424_v20 = vpop.f32.mrb[86].mxu0 }
 0x7af   : > { %28621 = vst [vmem:[#allocation23_spill] sm:$0xff] %v26424_v20  ;;  %v26426_v42 = vpop.f32.mrb[87].mxu0  ;;  %v28630_v20 = vld [vmem:[#allocation224_spill] sm:$0xff] }
 0x7b0   : > { %28622 = vst [vmem:[#allocation41_spill] sm:$0xff] %v26426_v42 }
 0x7b4   : > { %v26432_v9 = vpop.f32.mrb[88].mxu0 }
 0x7b5   : > { %20524 = vmatmul.mubr.msk.bf16.gmra.mrb[4].mxu1 %vm1294_vm3, %v28623_v36  ;;  %28625 = vst [vmem:[#allocation51_spill] sm:$0xff] %v26432_v9  ;;  %v26434_v31 = vpop.f32.mrb[89].mxu0  ;;  %v28635_v9 = vld [vmem:[#allocation225_spill] sm:$0xff] }
 0x7b6   : > { %20527 = vmatprep.mubr.msk.bf16.mxu1 %vm1294_vm3, %v28624_v44  ;;  %28626 = vst [vmem:[#allocation61_spill] sm:$0xff] %v26434_v31  ;;  %v26436_v47 = vpop.f32.mrb[90].mxu0 }
 0x7b7   : > { %28627 = vst [vmem:[#allocation71_spill] sm:$0xff] %v26436_v47  ;;  %v26438_v34 = vpop.f32.mrb[91].mxu0  ;;  %v28636_v47 = vld [vmem:[#allocation226_spill] sm:$0xff] }
 0x7b8   : > { %28628 = vst [vmem:[#allocation81_spill] sm:$0xff] %v26438_v34 }
 0x7bc   : > { %v26444_v42 = vpop.f32.mrb[92].mxu0 }
 0x7bd   : > { %20528 = vmatmul.mubr.msk.bf16.gmra.mrb[8].mxu1 %vm1294_vm3, %v28629_v63  ;;  %28631 = vst [vmem:[#allocation91_spill] sm:$0xff] %v26444_v42  ;;  %v26446_v13 = vpop.f32.mrb[93].mxu0  ;;  %v28641_v42 = vld [vmem:[#allocation227_spill] sm:$0xff] }
 0x7be   : > { %20531 = vmatprep.mubr.msk.bf16.mxu1 %vm1294_vm3, %v28630_v20  ;;  %28632 = vst [vmem:[#allocation111_spill] sm:$0xff] %v26446_v13  ;;  %v26448_v36 = vpop.f32.mrb[94].mxu0 }
 0x7bf   : > { %28633 = vst [vmem:[#allocation101_spill] sm:$0xff] %v26448_v36  ;;  %v26450_v44 = vpop.f32.mrb[95].mxu0  ;;  %v28642_v36 = vld [vmem:[#allocation228_spill] sm:$0xff] }
 0x7c0   : > { %28634 = vst [vmem:[#allocation122_spill] sm:$0xff] %v26450_v44  ;;  %v26468_v44 = vld [vmem:[#allocation2 + $0x244] sm:$0xff] }
 0x7c4   : > { %v26456_v34 = vpop.f32.mrb[96].mxu0 }
 0x7c5   : > { %20532 = vmatmul.mubr.msk.bf16.gmra.mrb[12].mxu1 %vm1294_vm3, %v28635_v9  ;;  %28637 = vst [vmem:[#allocation112_spill] sm:$0xff] %v26456_v34  ;;  %v26458_v31 = vpop.f32.mrb[97].mxu0  ;;  %v11460_v34 = vld [vmem:[#allocation2 + $0x24c] sm:$0xff] }
 0x7c6   : > { %20535 = vmatprep.mubr.msk.bf16.mxu1 %vm1294_vm3, %v28636_v47  ;;  %28638 = vst [vmem:[#allocation133_spill] sm:$0xff] %v26458_v31  ;;  %v26460_v63 = vpop.f32.mrb[98].mxu0  ;;  %v26478_v31 = vpack.c.bf16 %v26468_v44, %v26261_v33 }
 0x7c7   : > { %28639 = vst [vmem:[#allocation123_spill] sm:$0xff] %v26460_v63  ;;  %v26462_v20 = vpop.f32.mrb[99].mxu0 }
 0x7c8   : > { %28640 = vst [vmem:[#allocation144_spill] sm:$0xff] %v26462_v20  ;;  %28646 = vst [vmem:[#allocation159_spill] sm:$0xff] %v26478_v31  ;;  %v28648_v20 = vld [vmem:[#allocation229_spill] sm:$0xff] }
 0x7cc   : > { %v26470_v13 = vpop.f32.mrb[100].mxu0 }
 0x7cd   : > { %20536 = vmatmul.mubr.msk.bf16.gmra.mrb[16].mxu1 %vm1294_vm3, %v28641_v42  ;;  %28643 = vst [vmem:[#allocation134_spill] sm:$0xff] %v26470_v13  ;;  %v26472_v9 = vpop.f32.mrb[101].mxu0 }
 0x7ce   : > { %20539 = vmatprep.mubr.msk.bf16.mxu1 %vm1294_vm3, %v28642_v36  ;;  %28644 = vst [vmem:[#allocation151_spill] sm:$0xff] %v26472_v9  ;;  %v26474_v47 = vpop.f32.mrb[102].mxu0  ;;  %v11461_v36 = vld [vmem:[#allocation2 + $0x254] sm:$0xff] }
 0x7cf   : > { %28645 = vst [vmem:[#allocation155_spill] sm:$0xff] %v26474_v47  ;;  %v26480_v63 = vpop.f32.mrb[103].mxu0  ;;  %v26486_v42 = vpack.c.bf16 %v11461_v36, %v11460_v34 }
 0x7d0   : > { %28647 = vst [vmem:[#allocation145_spill] sm:$0xff] %v26480_v63 }
 0x7d4   : > { %v26488_v13 = vpop.f32.mrb[104].mxu0 }
 0x7d5   : > { %20540 = vmatmul.mubr.msk.bf16.gmra.mrb[20].mxu1 %vm1294_vm3, %v28648_v20  ;;  %28649 = vst [vmem:[#allocation163_spill] sm:$0xff] %v26488_v13  ;;  %v26490_v9 = vpop.f32.mrb[105].mxu0  ;;  %v22682_v13 = vld [vmem:[%s27609_s3 + $0x268] sm:$0xff]  }
 0x7d6   : > { %20543 = vmatprep.mubr.msk.bf16.mxu1 %vm1294_vm3, %v26478_v31  ;;  %28650 = vst [vmem:[#allocation178_spill] sm:$0xff] %v26490_v9  ;;  %v26492_v47 = vpop.f32.mrb[106].mxu0 }
 0x7d7   : > { %v26494_v33 = vpop.f32.mrb[107].mxu0 }
 0x7dc   : > { %v26500_v63 = vpop.f32.mrb[108].mxu0 }
 0x7dd   : > { %20544 = vmatmul.mubr.msk.bf16.gmra.mrb[24].mxu1 %vm1294_vm3, %v26486_v42  ;;  %28651 = vst [vmem:[#allocation181_spill] sm:$0xff] %v26500_v63  ;;  %v26502_v31 = vpop.f32.mrb[109].mxu0 }
 0x7de   : > { %20555 = vmatprep.mubr.msk.bf16.mxu1 %vm1294_vm3, %v26086_v15  ;;  %28652 = vst [vmem:[#allocation156_spill] sm:$0xff] %v26502_v31  ;;  %v26507_v20 = vpop.f32.mrb[110].mxu0  ;;  %v22683_v15 = vld [vmem:[%s27609_s3 + $0x270] sm:$0xff]  }
 0x7df   : > { %v26509_v9 = vpop.f32.mrb[111].mxu0 }
 0x7e0   : > { %28653 = vst [vmem:[#allocation185_spill] sm:$0xff] %v26509_v9 }
 0x7e4   : > { %v26519_v31 = vpop.f32.mrb[112].mxu0 }
 0x7e5   : > { %20556 = vmatmul.mubr.msk.bf16.vlgmr.msra.gmra.mrb[28].mxu1 %vm1294_vm3, %v26091_v4  ;;  %v26521_v63 = vpop.f32.mrb[113].mxu0  ;;  %v22684_v4 = vld [vmem:[%s27609_s3 + $0x278] sm:$0xff]  }
 0x7e6   : > { %20559 = vmatprep.mubr.msk.bf16.mxu1 %vm1294_vm3, %v26101_v37  ;;  %20628 = vmatpush3.bf16.msra.mxu1 %v26333_v23  ;;  %28654 = vst [vmem:[#allocation193_spill] sm:$0xff] %v26521_v63  ;;  %v26526_v9 = vpop.f32.mrb[114].mxu0  ;;  %v22685_v23 = vld [vmem:[%s27609_s3 + $0x300] sm:$0xff]  }
 0x7e7   : > { %20629 = vmatprep.subr.bf16.mxu1 %v22682_v13  ;;  %28655 = vst [vmem:[#allocation25_spill] sm:$0xff] %v26526_v9  ;;  %v26528_v37 = vpop.f32.mrb[115].mxu0  ;;  %v11464_v9 = vld [vmem:[#allocation2 + $0x26c] sm:$0xff] }
 0x7e8   : > { %28656 = vst [vmem:[#allocation31_spill] sm:$0xff] %v26528_v37  ;;  %v11463_v37 = vld [vmem:[#allocation2 + $0x264] sm:$0xff] }
 0x7e9   : > { %v26602_v63 = vpack.c.bf16 %v11464_v9, %v11463_v37 }
 0x7ea   : > { %20630 = vmatpush3.bf16.msra.mxu1 %v22682_v13  ;;  %v11462_v13 = vld [vmem:[#allocation2 + $0x25c] sm:$0xff] }
 0x7eb   : > { %20631 = vmatprep.subr.bf16.mxu1 %v22683_v15 }
 0x7ed   : > { %20560 = vmatmul.mubr.msk.bf16.gmra.mrb[32].mxu1 %vm1294_vm3, %v26103_v29 }
 0x7ee   : > { %20563 = vmatprep.mubr.msk.bf16.mxu1 %vm1294_vm3, %v26113_v21  ;;  %20632 = vmatpush3.bf16.msra.mxu1 %v22683_v15  ;;  %v26594_v15 = vpack.c.bf16 %v11460_v34, %v26468_v44  ;;  %v22687_v34 = vld [vmem:[%s27609_s3 + $0x310] sm:$0xff]   ;;  %v28660_v44 = vld [vmem:[#allocation221_spill] sm:$0xff] }
 0x7ef   : > { %20633 = vmatprep.subr.bf16.mxu1 %v22684_v4 }
 0x7f2   : > { %20634 = vmatpush3.bf16.msra.mxu1 %v22684_v4  ;;  %v26596_v4 = vpack.c.bf16 %v11462_v13, %v11461_v36  ;;  %v22686_v36 = vld [vmem:[%s27609_s3 + $0x308] sm:$0xff]  }
 0x7f3   : > { %20707 = vmatprep.subr.bf16.mxu1 %v22685_v23 }
 0x7f5   : > { %20564 = vmatmul.mubr.msk.bf16.gmra.mrb[36].mxu1 %vm1294_vm3, %v26115_v62 }
 0x7f6   : > { %20567 = vmatprep.mubr.msk.bf16.mxu1 %vm1294_vm3, %v26125_v27 }
 0x7fd   : > { %20568 = vmatmul.mubr.msk.bf16.gmra.mrb[40].mxu1 %vm1294_vm3, %v26127_v11 }
 0x7fe   : > { %20571 = vmatprep.mubr.msk.bf16.mxu1 %vm1294_vm3, %v26137_v56 }
 0x805   : > { %20572 = vmatmul.mubr.msk.bf16.gmra.mrb[44].mxu1 %vm1294_vm3, %v26139_v3 }
 0x806   : > { %20575 = vmatprep.mubr.msk.bf16.mxu1 %vm1294_vm3, %v26155_v1 }
 0x80d   : > { %20576 = vmatmul.mubr.msk.bf16.gmra.mrb[48].mxu1 %vm1294_vm3, %v26157_v6 }
 0x80e   : > { %20579 = vmatprep.mubr.msk.bf16.mxu1 %vm1294_vm3, %v26167_v41 }
 0x815   : > { %20580 = vmatmul.mubr.msk.bf16.gmra.mrb[52].mxu1 %vm1294_vm3, %v26169_v24 }
 0x816   : > { %20583 = vmatprep.mubr.msk.bf16.mxu1 %vm1294_vm3, %v26179_v10 }
 0x81d   : > { %20584 = vmatmul.mubr.msk.bf16.gmra.mrb[56].mxu1 %vm1294_vm3, %v26181_v39 }
 0x81e   : > { %20587 = vmatprep.mubr.msk.bf16.mxu1 %vm1294_vm3, %v26191_v49 }
 0x825   : > { %20588 = vmatmul.mubr.msk.bf16.gmra.mrb[60].mxu1 %vm1294_vm3, %v26193_v18 }
 0x826   : > { %20591 = vmatprep.mubr.msk.bf16.mxu1 %vm1294_vm3, %v26203_v58 }
 0x82d   : > { %20592 = vmatmul.mubr.msk.bf16.gmra.mrb[64].mxu1 %vm1294_vm3, %v26205_v8 }
 0x82e   : > { %20595 = vmatprep.mubr.msk.bf16.mxu1 %vm1294_vm3, %v26213_v35 }
 0x835   : > { %20596 = vmatmul.mubr.msk.bf16.gmra.mrb[68].mxu1 %vm1294_vm3, %v26215_v25 }
 0x836   : > { %20599 = vmatprep.mubr.msk.bf16.mxu1 %vm1294_vm3, %v26221_v17 }
 0x83d   : > { %20600 = vmatmul.mubr.msk.bf16.gmra.mrb[0].mxu1 %vm1294_vm3, %v26223_v61 }
 0x83e   : > { %20603 = vmatprep.mubr.msk.bf16.mxu1 %vm1294_vm3, %v26229_v38 }
 0x845   : > { %20604 = vmatmul.mubr.msk.bf16.gmra.mrb[4].mxu1 %vm1294_vm3, %v26231_v54 }
 0x846   : > { %20607 = vmatprep.mubr.msk.bf16.mxu1 %vm1294_vm3, %v26237_v0 }
 0x84d   : > { %20608 = vmatmul.mubr.msk.bf16.gmra.mrb[8].mxu1 %vm1294_vm3, %v26239_v57 }
 0x84e   : > { %20611 = vmatprep.mubr.msk.bf16.mxu1 %vm1294_vm3, %v26245_v30 }
 0x855   : > { %20612 = vmatmul.mubr.msk.bf16.gmra.mrb[12].mxu1 %vm1294_vm3, %v26247_v32 }
 0x856   : > { %20615 = vmatprep.mubr.msk.bf16.mxu1 %vm1294_vm3, %v26253_v5 }
 0x85d   : > { %20616 = vmatmul.mubr.msk.bf16.gmra.mrb[16].mxu1 %vm1294_vm3, %v26255_v28 }
 0x85e   : > { %20619 = vmatprep.mubr.msk.bf16.mxu1 %vm1294_vm3, %v26264_v40 }
 0x865   : > { %20620 = vmatmul.mubr.msk.bf16.gmra.mrb[20].mxu1 %vm1294_vm3, %v26594_v15 }
 0x866   : > { %20623 = vmatprep.mubr.msk.bf16.mxu1 %vm1294_vm3, %v26596_v4 }
 0x86d   : > { %20624 = vmatmul.mubr.msk.bf16.gmra.mrb[24].mxu1 %vm1294_vm3, %v26602_v63 }
 0x86e   : > { %20635 = vmatprep.mubr.msk.bf16.mxu1 %vm1294_vm3, %v28557_v2  ;;  %v22688_v2 = vld [vmem:[%s27609_s3 + $0x318] sm:$0xff]  }
 0x875   : > { %20636 = vmatmul.mubr.msk.bf16.vlgmr.msra.gmra.mrb[28].mxu1 %vm1294_vm3, %v28558_v50  ;;  %v28657_v50 = vld [vmem:[#allocation218_spill] sm:$0xff] }
 0x876   : > { %20639 = vmatprep.mubr.msk.bf16.mxu1 %vm1294_vm3, %v28563_v48  ;;  %20708 = vmatpush3.bf16.msra.mxu1 %v22685_v23  ;;  %v28658_v48 = vld [vmem:[#allocation219_spill] sm:$0xff] }
 0x877   : > { %20709 = vmatprep.subr.bf16.mxu1 %v22686_v36 }
 0x87a   : > { %20710 = vmatpush3.bf16.msra.mxu1 %v22686_v36 }
 0x87b   : > { %20711 = vmatprep.subr.bf16.mxu1 %v22687_v34 }
 0x87d   : > { %20640 = vmatmul.mubr.msk.bf16.gmra.mrb[32].mxu1 %vm1294_vm3, %v28564_v12  ;;  %v28659_v12 = vld [vmem:[#allocation220_spill] sm:$0xff] }
 0x87e   : > { %20643 = vmatprep.mubr.msk.bf16.mxu1 %vm1294_vm3, %v28569_v19  ;;  %20712 = vmatpush3.bf16.msra.mxu1 %v22687_v34  ;;  %v28661_v19 = vld [vmem:[#allocation222_spill] sm:$0xff] }
 0x87f   : > { %20713 = vmatprep.subr.bf16.mxu1 %v22688_v2 }
 0x882   : > { %20714 = vmatpush3.bf16.msra.mxu1 %v22688_v2 }
 0x885   : > { %20644 = vmatmul.mubr.msk.bf16.gmra.mrb[36].mxu1 %vm1294_vm3, %v28570_v14  ;;  %v28662_v14 = vld [vmem:[#allocation223_spill] sm:$0xff] }
 0x886   : > { %20647 = vmatprep.mubr.msk.bf16.mxu1 %vm1294_vm3, %v28575_v59  ;;  %v28667_v59 = vld [vmem:[#allocation228_spill] sm:$0xff] }
 0x88d   : > { %20648 = vmatmul.mubr.msk.bf16.gmra.mrb[40].mxu1 %vm1294_vm3, %v28576_v55  ;;  %v28668_v55 = vld [vmem:[#allocation229_spill] sm:$0xff] }
 0x88e   : > { %20651 = vmatprep.mubr.msk.bf16.mxu1 %vm1294_vm3, %v28581_v7 }
 0x895   : > { %20652 = vmatmul.mubr.msk.bf16.gmra.mrb[44].mxu1 %vm1294_vm3, %v28582_v46  ;;  %v11466_v46 = vld [vmem:[#allocation2 + $0x27c] sm:$0xff] }
 0x896   : > { %20655 = vmatprep.mubr.msk.bf16.mxu1 %vm1294_vm3, %v28587_v51  ;;  %v28669_v51 = vld [vmem:[#allocation159_spill] sm:$0xff] }
 0x89d   : > { %20656 = vmatmul.mubr.msk.bf16.gmra.mrb[48].mxu1 %vm1294_vm3, %v28588_v45  ;;  %v11465_v45 = vld [vmem:[#allocation2 + $0x274] sm:$0xff] }
 0x89e   : > { %20659 = vmatprep.mubr.msk.bf16.mxu1 %vm1294_vm3, %v28593_v26  ;;  %v13050_v7 = vpack.c.bf16 %v11465_v45, %v11464_v9  ;;  %v11467_v26 = vld [vmem:[#allocation2 + $0x284] sm:$0xff] }
 0x8a5   : > { %20660 = vmatmul.mubr.msk.bf16.gmra.mrb[52].mxu1 %vm1294_vm3, %v28594_v60  ;;  %v13051_v60 = vpack.c.bf16 %v11467_v26, %v11466_v46 }
 0x8a6   : > { %20663 = vmatprep.mubr.msk.bf16.mxu1 %vm1294_vm3, %v28599_v53  ;;  %v13049_v53 = vpack.c.bf16 %v11463_v37, %v11462_v13 }
 0x8ad   : > { %20664 = vmatmul.mubr.msk.bf16.gmra.mrb[56].mxu1 %vm1294_vm3, %v28600_v52  ;;  %v28665_v52 = vld [vmem:[#allocation226_spill] sm:$0xff] }
 0x8ae   : > { %20667 = vmatprep.mubr.msk.bf16.mxu1 %vm1294_vm3, %v28605_v22  ;;  %v28666_v22 = vld [vmem:[#allocation227_spill] sm:$0xff] }
 0x8b5   : > { %20668 = vmatmul.mubr.msk.bf16.gmra.mrb[60].mxu1 %vm1294_vm3, %v28606_v16  ;;  %v28663_v16 = vld [vmem:[#allocation224_spill] sm:$0xff] }
 0x8b6   : > { %20671 = vmatprep.mubr.msk.bf16.mxu1 %vm1294_vm3, %v28611_v43  ;;  %v28664_v43 = vld [vmem:[#allocation225_spill] sm:$0xff] }
 0x8bd   : > { %20672 = vmatmul.mubr.msk.bf16.gmra.mrb[64].mxu1 %vm1294_vm3, %v28657_v50  ;;  %v28676_v50 = vld [vmem:[#allocation158_spill] sm:$0xff] }
 0x8be   : > { %20675 = vmatprep.mubr.msk.bf16.mxu1 %vm1294_vm3, %v28658_v48 }
 0x8c5   : > { %20676 = vmatmul.mubr.msk.bf16.gmra.mrb[68].mxu1 %vm1294_vm3, %v28659_v12 }
 0x8c6   : > { %20679 = vmatprep.mubr.msk.bf16.mxu1 %vm1294_vm3, %v28660_v44 }
 0x8cd   : > { %20680 = vmatmul.mubr.msk.bf16.gmra.mrb[0].mxu1 %vm1294_vm3, %v28661_v19 }
 0x8ce   : > { %20683 = vmatprep.mubr.msk.bf16.mxu1 %vm1294_vm3, %v28662_v14  ;;  %v28677_v14 = vld [vmem:[#allocation182_spill] sm:$0xff] }
 0x8d5   : > { %20684 = vmatmul.mubr.msk.bf16.gmra.mrb[4].mxu1 %vm1294_vm3, %v28663_v16 }
 0x8d6   : > { %20687 = vmatprep.mubr.msk.bf16.mxu1 %vm1294_vm3, %v28664_v43 }
 0x8dd   : > { %20688 = vmatmul.mubr.msk.bf16.gmra.mrb[8].mxu1 %vm1294_vm3, %v28665_v52 }
 0x8de   : > { %20691 = vmatprep.mubr.msk.bf16.mxu1 %vm1294_vm3, %v28666_v22 }
 0x8e5   : > { %20692 = vmatmul.mubr.msk.bf16.gmra.mrb[12].mxu1 %vm1294_vm3, %v28667_v59 }
 0x8e6   : > { %20695 = vmatprep.mubr.msk.bf16.mxu1 %vm1294_vm3, %v28668_v55 }
 0x8ed   : > { %20696 = vmatmul.mubr.msk.bf16.gmra.mrb[16].mxu1 %vm1294_vm3, %v28669_v51 }
 0x8ee   : > { %20699 = vmatprep.mubr.msk.bf16.mxu1 %vm1294_vm3, %v26486_v42 }
 0x8f5   : > { %20700 = vmatmul.mubr.msk.bf16.gmra.mrb[20].mxu1 %vm1294_vm3, %v13049_v53 }
 0x8f6   : > { %20703 = vmatprep.mubr.msk.bf16.mxu1 %vm1294_vm3, %v13050_v7 }
 0x8fd   : > { %20704 = vmatmul.mubr.msk.bf16.gmra.mrb[24].mxu1 %vm1294_vm3, %v13051_v60 }
 0x8fe   : > { %20715 = vmatprep.mubr.msk.bf16.mxu1 %vm1294_vm3, %v26103_v29  ;;  %v11468_v29 = vld [vmem:[#allocation2 + $0x28c] sm:$0xff] }
 0x905   : > { %20716 = vmatmul.mubr.msk.bf16.vlgmr.msra.gmra.mrb[28].mxu1 %vm1294_vm3, %v26113_v21  ;;  %v13487_v21 = vpack.c.bf16 %v11466_v46, %v11465_v45  ;;  %v28678_v46 = vld [vmem:[#allocation184_spill] sm:$0xff] }
 0x906   : > { %20719 = vmatprep.mubr.msk.bf16.mxu1 %vm1294_vm3, %v26115_v62  ;;  %v13488_v62 = vpack.c.bf16 %v11468_v29, %v11467_v26 }
 0x90d   : > { %20720 = vmatmul.mubr.msk.bf16.gmra.mrb[32].mxu1 %vm1294_vm3, %v26125_v27  ;;  %v11469_v27 = vld [vmem:[#allocation2 + $0x294] sm:$0xff] }
 0x90e   : > { %20723 = vmatprep.mubr.msk.bf16.mxu1 %vm1294_vm3, %v26127_v11  ;;  %v11470_v11 = vld [vmem:[#allocation2 + $0x29c] sm:$0xff] }
 0x915   : > { %20724 = vmatmul.mubr.msk.bf16.gmra.mrb[36].mxu1 %vm1294_vm3, %v26137_v56  ;;  %v13489_v56 = vpack.c.bf16 %v11470_v11, %v11469_v27 }
 0x916   : > { %20727 = vmatprep.mubr.msk.bf16.mxu1 %vm1294_vm3, %v26139_v3  ;;  %v22691_v3 = vld [vmem:[%s27611_s5 + $0x4] ss:$20 sps:$4 sm:$0x1f]  }
 0x917   : > { %14322 = vmatprep.mubr.bf16.mxu0 %v22691_v3 }
 0x91d   : > { %20728 = vmatmul.mubr.msk.bf16.gmra.mrb[40].mxu1 %vm1294_vm3, %v26155_v1 }
 0x91e   : > { %20731 = vmatprep.mubr.msk.bf16.mxu1 %vm1294_vm3, %v26157_v6  ;;  %v26759_v6 = vld [vmem:[%s27610_s4] ss:$0 sm:$0xff] }
 0x925   : > { %20732 = vmatmul.mubr.msk.bf16.gmra.mrb[44].mxu1 %vm1294_vm3, %v26167_v41  ;;  %v28670_v41 = vld [vmem:[#allocation150_spill] sm:$0xff] }
 0x926   : > { %20735 = vmatprep.mubr.msk.bf16.mxu1 %vm1294_vm3, %v26169_v24 }
 0x92d   : > { %20736 = vmatmul.mubr.msk.bf16.gmra.mrb[48].mxu1 %vm1294_vm3, %v26179_v10 }
 0x92e   : > { %20739 = vmatprep.mubr.msk.bf16.mxu1 %vm1294_vm3, %v26181_v39  ;;  %v28671_v39 = vld [vmem:[#allocation143_spill] sm:$0xff] }
 0x935   : > { %20740 = vmatmul.mubr.msk.bf16.gmra.mrb[52].mxu1 %vm1294_vm3, %v26191_v49 }
 0x936   : > { %20743 = vmatprep.mubr.msk.bf16.mxu1 %vm1294_vm3, %v26193_v18 }
 0x93d   : > { %20744 = vmatmul.mubr.msk.bf16.gmra.mrb[56].mxu1 %vm1294_vm3, %v26203_v58 }
 0x93e   : > { %20747 = vmatprep.mubr.msk.bf16.mxu1 %vm1294_vm3, %v26205_v8  ;;  %v28672_v8 = vld [vmem:[#allocation147_spill] sm:$0xff] }
 0x945   : > { %20748 = vmatmul.mubr.msk.bf16.gmra.mrb[60].mxu1 %vm1294_vm3, %v26213_v35 }
 0x946   : > { %20751 = vmatprep.mubr.msk.bf16.mxu1 %vm1294_vm3, %v26215_v25 }
 0x94d   : > { %20752 = vmatmul.mubr.msk.bf16.gmra.mrb[64].mxu1 %vm1294_vm3, %v26221_v17 }
 0x94e   : > { %20755 = vmatprep.mubr.msk.bf16.mxu1 %vm1294_vm3, %v26223_v61  ;;  %v28673_v61 = vld [vmem:[#allocation160_spill] sm:$0xff] }
 0x955   : > { %20756 = vmatmul.mubr.msk.bf16.gmra.mrb[68].mxu1 %vm1294_vm3, %v26229_v38 }
 0x956   : > { %20759 = vmatprep.mubr.msk.bf16.mxu1 %vm1294_vm3, %v26231_v54 }
 0x95d   : > { %20760 = vmatmul.mubr.msk.bf16.gmra.mrb[0].mxu1 %vm1294_vm3, %v26237_v0 }
 0x95e   : > { %20763 = vmatprep.mubr.msk.bf16.mxu1 %vm1294_vm3, %v26239_v57 }
 0x965   : > { %20764 = vmatmul.mubr.msk.bf16.gmra.mrb[4].mxu1 %vm1294_vm3, %v26245_v30 }
 0x966   : > { %20767 = vmatprep.mubr.msk.bf16.mxu1 %vm1294_vm3, %v26247_v32 }
 0x96d   : > { %20768 = vmatmul.mubr.msk.bf16.gmra.mrb[8].mxu1 %vm1294_vm3, %v26253_v5 }
 0x96e   : > { %20771 = vmatprep.mubr.msk.bf16.mxu1 %vm1294_vm3, %v26255_v28 }
 0x975   : > { %20772 = vmatmul.mubr.msk.bf16.gmra.mrb[12].mxu1 %vm1294_vm3, %v26264_v40 }
 0x976   : > { %20775 = vmatprep.mubr.msk.bf16.mxu1 %vm1294_vm3, %v26594_v15  ;;  %v28675_v15 = vld [vmem:[#allocation154_spill] sm:$0xff] }
 0x97d   : > { %20776 = vmatmul.mubr.msk.bf16.gmra.mrb[16].mxu1 %vm1294_vm3, %v26596_v4 }
 0x97e   : > { %20779 = vmatprep.mubr.msk.bf16.mxu1 %vm1294_vm3, %v26602_v63  ;;  %v28674_v63 = vld [vmem:[#allocation162_spill] sm:$0xff] }
 0x985   : > { %20780 = vmatmul.mubr.msk.bf16.gmra.mrb[20].mxu1 %vm1294_vm3, %v13487_v21 }
 0x986   : > { %20783 = vmatprep.mubr.msk.bf16.mxu1 %vm1294_vm3, %v13488_v62  ;;  %v28679_v62 = vld [vmem:[#allocation177_spill] sm:$0xff] }
 0x98d   : > { %20784 = vmatmul.mubr.msk.bf16.gmra.mrb[24].mxu1 %vm1294_vm3, %v13489_v56 }
 0x9d8   : > { %v20717_v1 = vpop.f32.mrb[28].mxu1 }
 0x9d9   : > { %v20807_v24 = vadd.f32 %v20717_v1, %v28670_v41  ;;  %v13566_v10 = vpop.f32.mrb[29].mxu1  ;;  %v28680_v1 = vld [vmem:[#allocation180_spill] sm:$0xff] }
 0x9da   : > { %v20808_v49 = vadd.f32 %v13566_v10, %v28671_v39  ;;  %v20718_v18 = vpop.f32.mrb[30].mxu1 }
 0x9db   : > { %v13934_v58 = vadd.f32 %v20807_v24, %v26759_v6  ;;  %v20809_v35 = vadd.f32 %v20718_v18, %v28672_v8  ;;  %v13569_v25 = vpop.f32.mrb[31].mxu1 }
 0x9dc   : > { %v13932_v17 = vadd.f32 %v20808_v49, %v26759_v6  ;;  %v20810_v38 = vadd.f32 %v13569_v25, %v28673_v61  ;;  %v28681_v49 = vld [vmem:[#allocation14_spill] sm:$0xff] }
 0x9dd   : > { %v14078_v54 = vmul.f32 0.01, %v13934_v58  ;;  %v13935_v0 = vadd.f32 %v20809_v35, %v26759_v6  ;;  %vm14006_vm15 = vcmp.gt.f32.partialorder %v13934_v58, 0.0 }
 0x9de   : > { %v14076_v57 = vmul.f32 0.01, %v13932_v17  ;;  %v13933_v30 = vadd.f32 %v20810_v38, %v26759_v6  ;;  %vm14004_vm0 = vcmp.gt.f32.partialorder %v13932_v17, 0.0 }
 0x9df   : > { %vm14007_vm1 = vcmp.gt.f32.partialorder %v13935_v0, 0.0  ;;  %v14079_v32 = vmul.f32 0.01, %v13935_v0  ;;  %v26769_v40 = vsel %vm14006_vm15, %v13934_v58, %v14078_v54 }
 0x9e0   : > { %vm14005_vm2 = vcmp.gt.f32.partialorder %v13933_v30, 0.0  ;;  %v14077_v5 = vmul.f32 0.01, %v13933_v30  ;;  %v20721_v28 = vpop.f32.mrb[32].mxu1  ;;  %v26774_v23 = vsel %vm14004_vm0, %v13932_v17, %v14076_v57  ;;  %v28682_v57 = vld [vmem:[#allocation183_spill] sm:$0xff] }
 0x9e1   : > { %v26771_v42 = vsel %vm14007_vm1, %v13935_v0, %v14079_v32  ;;  %v20811_v9 = vadd.f32 %v20721_v28, %v28674_v63  ;;  %v13582_v37 = vpop.f32.mrb[33].mxu1  ;;  %v28683_v63 = vld [vmem:[#allocation194_spill] sm:$0xff] }
 0x9e2   : > { %v26776_v13 = vsel %vm14005_vm2, %v13933_v30, %v14077_v5  ;;  %v20812_v4 = vadd.f32 %v13582_v37, %v28675_v15  ;;  %v20722_v36 = vpop.f32.mrb[34].mxu1  ;;  %v14227_v34 = vpack.c.bf16 %v26771_v42, %v26769_v40 }
 0x9e3   : > { %v13938_v2 = vadd.f32 %v20811_v9, %v26759_v6  ;;  %v20813_v48 = vadd.f32 %v20722_v36, %v28676_v50  ;;  %v13585_v12 = vpop.f32.mrb[35].mxu1  ;;  %v14226_v44 = vpack.c.bf16 %v26776_v13, %v26774_v23  ;;  %v28684_v36 = vld [vmem:[#allocation23_spill] sm:$0xff] }
 0x9e4   : > { %v13936_v19 = vadd.f32 %v20812_v4, %v26759_v6  ;;  %v20814_v16 = vadd.f32 %v13585_v12, %v28677_v14 }
 0x9e5   : > { %v14082_v43 = vmul.f32 0.01, %v13938_v2  ;;  %v13939_v52 = vadd.f32 %v20813_v48, %v26759_v6  ;;  %vm14010_vm4 = vcmp.gt.f32.partialorder %v13938_v2, 0.0 }
 0x9e6   : > { %v14080_v22 = vmul.f32 0.01, %v13936_v19  ;;  %v13937_v59 = vadd.f32 %v20814_v16, %v26759_v6  ;;  %vm14008_vm5 = vcmp.gt.f32.partialorder %v13936_v19, 0.0 }
 0x9e7   : > { %vm14011_vm6 = vcmp.gt.f32.partialorder %v13939_v52, 0.0  ;;  %v14083_v55 = vmul.f32 0.01, %v13939_v52  ;;  %v26789_v53 = vsel %vm14010_vm4, %v13938_v2, %v14082_v43 }
 0x9e8   : > { %vm14009_vm7 = vcmp.gt.f32.partialorder %v13937_v59, 0.0  ;;  %v14081_v51 = vmul.f32 0.01, %v13937_v59  ;;  %v20725_v45 = vpop.f32.mrb[36].mxu1  ;;  %v26794_v29 = vsel %vm14008_vm5, %v13936_v19, %v14080_v22  ;;  %v28685_v19 = vld [vmem:[#allocation41_spill] sm:$0xff] }
 0x9e9   : > { %v26791_v7 = vsel %vm14011_vm6, %v13939_v52, %v14083_v55  ;;  %v20815_v26 = vadd.f32 %v20725_v45, %v28678_v46  ;;  %v13598_v60 = vpop.f32.mrb[37].mxu1 }
 0x9ea   : > { %v26796_v21 = vsel %vm14009_vm7, %v13937_v59, %v14081_v51  ;;  %v20816_v27 = vadd.f32 %v13598_v60, %v28679_v62  ;;  %v20726_v11 = vpop.f32.mrb[38].mxu1  ;;  %v14229_v56 = vpack.c.bf16 %v26791_v7, %v26789_v53 }
 0x9eb   : > { %v13942_v3 = vadd.f32 %v20815_v26, %v26759_v6  ;;  %v20817_v41 = vadd.f32 %v20726_v11, %v28680_v1  ;;  %v13601_v24 = vpop.f32.mrb[39].mxu1  ;;  %v14228_v10 = vpack.c.bf16 %v26796_v21, %v26794_v29  ;;  %v28686_v26 = vld [vmem:[#allocation51_spill] sm:$0xff] }
 0x9ec   : > { %v13940_v39 = vadd.f32 %v20816_v27, %v26759_v6  ;;  %v20818_v18 = vadd.f32 %v13601_v24, %v28681_v49  ;;  %v28688_v49 = vld [vmem:[#allocation71_spill] sm:$0xff] }
 0x9ed   : > { %v14086_v58 = vmul.f32 0.01, %v13942_v3  ;;  %v13943_v8 = vadd.f32 %v20817_v41, %v26759_v6  ;;  %vm14014_vm8 = vcmp.gt.f32.partialorder %v13942_v3, 0.0 }
 0x9ee   : > { %v14084_v35 = vmul.f32 0.01, %v13940_v39  ;;  %v13941_v25 = vadd.f32 %v20818_v18, %v26759_v6  ;;  %vm14012_vm9 = vcmp.gt.f32.partialorder %v13940_v39, 0.0 }
 0x9ef   : > { %vm14015_vm10 = vcmp.gt.f32.partialorder %v13943_v8, 0.0  ;;  %v14087_v17 = vmul.f32 0.01, %v13943_v8  ;;  %v26809_v54 = vsel %vm14014_vm8, %v13942_v3, %v14086_v58  ;;  %v28687_v3 = vld [vmem:[#allocation61_spill] sm:$0xff] }
 0x9f0   : > { %vm14013_vm11 = vcmp.gt.f32.partialorder %v13941_v25, 0.0  ;;  %v14085_v61 = vmul.f32 0.01, %v13941_v25  ;;  %v20729_v38 = vpop.f32.mrb[40].mxu1  ;;  %v26814_v5 = vsel %vm14012_vm9, %v13940_v39, %v14084_v35 }
 0x9f1   : > { %v26811_v0 = vsel %vm14015_vm10, %v13943_v8, %v14087_v17  ;;  %v20819_v30 = vadd.f32 %v20729_v38, %v28682_v57  ;;  %v13614_v32 = vpop.f32.mrb[41].mxu1 }
 0x9f2   : > { %v26816_v28 = vsel %vm14013_vm11, %v13941_v25, %v14085_v61  ;;  %v20820_v9 = vadd.f32 %v13614_v32, %v28683_v63  ;;  %v20730_v37 = vpop.f32.mrb[42].mxu1  ;;  %v14231_v15 = vpack.c.bf16 %v26811_v0, %v26809_v54  ;;  %v28689_v25 = vld [vmem:[#allocation81_spill] sm:$0xff] }
 0x9f3   : > { %v13946_v4 = vadd.f32 %v20819_v30, %v26759_v6  ;;  %v20821_v2 = vadd.f32 %v20730_v37, %v28684_v36  ;;  %v13617_v50 = vpop.f32.mrb[43].mxu1  ;;  %v14230_v48 = vpack.c.bf16 %v26816_v28, %v26814_v5  ;;  %v28690_v37 = vld [vmem:[#allocation91_spill] sm:$0xff] }
 0x9f4   : > { %v13944_v12 = vadd.f32 %v20820_v9, %v26759_v6  ;;  %v20822_v14 = vadd.f32 %v13617_v50, %v28685_v19 }
 0x9f5   : > { %v14090_v16 = vmul.f32 0.01, %v13946_v4  ;;  %v13947_v43 = vadd.f32 %v20821_v2, %v26759_v6  ;;  %vm14018_vm12 = vcmp.gt.f32.partialorder %v13946_v4, 0.0 }
 0x9f6   : > { %v14088_v52 = vmul.f32 0.01, %v13944_v12  ;;  %v13945_v22 = vadd.f32 %v20822_v14, %v26759_v6  ;;  %vm14016_vm13 = vcmp.gt.f32.partialorder %v13944_v12, 0.0 }
 0x9f7   : > { %vm14019_vm14 = vcmp.gt.f32.partialorder %v13947_v43, 0.0  ;;  %v14091_v59 = vmul.f32 0.01, %v13947_v43  ;;  %v26829_v45 = vsel %vm14018_vm12, %v13946_v4, %v14090_v16 }
 0x9f8   : > { %vm14017_vm15 = vcmp.gt.f32.partialorder %v13945_v22, 0.0  ;;  %v14089_v55 = vmul.f32 0.01, %v13945_v22  ;;  %v20733_v51 = vpop.f32.mrb[44].mxu1  ;;  %v26834_v27 = vsel %vm14016_vm13, %v13944_v12, %v14088_v52  ;;  %v28691_v12 = vld [vmem:[#allocation111_spill] sm:$0xff] }
 0x9f9   : > { %v26831_v46 = vsel %vm14019_vm14, %v13947_v43, %v14091_v59  ;;  %v20823_v60 = vadd.f32 %v20733_v51, %v28686_v26  ;;  %v13630_v62 = vpop.f32.mrb[45].mxu1  ;;  %v28692_v59 = vld [vmem:[#allocation101_spill] sm:$0xff] }
 0x9fa   : > { %v26836_v11 = vsel %vm14017_vm15, %v13945_v22, %v14089_v55  ;;  %v20824_v1 = vadd.f32 %v13630_v62, %v28687_v3  ;;  %v20734_v41 = vpop.f32.mrb[46].mxu1  ;;  %v14233_v24 = vpack.c.bf16 %v26831_v46, %v26829_v45  ;;  %v28693_v62 = vld [vmem:[#allocation122_spill] sm:$0xff] }
 0x9fb   : > { %v13950_v39 = vadd.f32 %v20823_v60, %v26759_v6  ;;  %v20825_v18 = vadd.f32 %v20734_v41, %v28688_v49  ;;  %v13633_v58 = vpop.f32.mrb[47].mxu1  ;;  %v14232_v8 = vpack.c.bf16 %v26836_v11, %v26834_v27 }
 0x9fc   : > { %v13948_v35 = vadd.f32 %v20824_v1, %v26759_v6  ;;  %v20826_v17 = vadd.f32 %v13633_v58, %v28689_v25  ;;  %v28694_v25 = vld [vmem:[#allocation112_spill] sm:$0xff] }
 0x9fd   : > { %v14094_v61 = vmul.f32 0.01, %v13950_v39  ;;  %v13951_v38 = vadd.f32 %v20825_v18, %v26759_v6  ;;  %vm14022_vm0 = vcmp.gt.f32.partialorder %v13950_v39, 0.0 }
 0x9fe   : > { %v14092_v57 = vmul.f32 0.01, %v13948_v35  ;;  %v13949_v30 = vadd.f32 %v20826_v17, %v26759_v6  ;;  %vm14020_vm1 = vcmp.gt.f32.partialorder %v13948_v35, 0.0 }
 0x9ff   : > { %vm14023_vm2 = vcmp.gt.f32.partialorder %v13951_v38, 0.0  ;;  %v14095_v32 = vmul.f32 0.01, %v13951_v38  ;;  %v14166_v2 = vsel %vm14022_vm0, %v13950_v39, %v14094_v61 }
 0xa00   : > { %vm14021_vm4 = vcmp.gt.f32.partialorder %v13949_v30, 0.0  ;;  %v14093_v63 = vmul.f32 0.01, %v13949_v30  ;;  %v20737_v9 = vpop.f32.mrb[48].mxu1  ;;  %v14164_v16 = vsel %vm14020_vm1, %v13948_v35, %v14092_v57 }
 0xa01   : > { %v20827_v4 = vadd.f32 %v20737_v9, %v28690_v37  ;;  %v13646_v36 = vpop.f32.mrb[49].mxu1  ;;  %v14167_v50 = vsel %vm14023_vm2, %v13951_v38, %v14095_v32  ;;  %v28696_v37 = vld [vmem:[#allocation123_spill] sm:$0xff] }
 0xa02   : > { %v20828_v19 = vadd.f32 %v13646_v36, %v28691_v12  ;;  %v20738_v14 = vpop.f32.mrb[50].mxu1  ;;  %v14165_v43 = vsel %vm14021_vm4, %v13949_v30, %v14093_v63  ;;  %v14235_v52 = vpack.c.bf16 %v14167_v50, %v14166_v2  ;;  %v28695_v30 = vld [vmem:[#allocation133_spill] sm:$0xff]  ;;  %v28697_v12 = vld [vmem:[#allocation144_spill] sm:$0xff] }
 0xa03   : > { %v13954_v22 = vadd.f32 %v20827_v4, %v26759_v6  ;;  %v20829_v55 = vadd.f32 %v20738_v14, %v28692_v59  ;;  %v13649_v51 = vpop.f32.mrb[51].mxu1  ;;  %v14234_v26 = vpack.c.bf16 %v14165_v43, %v14164_v16 }
 0xa04   : > { %v13952_v60 = vadd.f32 %v20828_v19, %v26759_v6  ;;  %v20830_v3 = vadd.f32 %v13649_v51, %v28693_v62 }
 0xa05   : > { %v14098_v1 = vmul.f32 0.01, %v13954_v22  ;;  %v13955_v41 = vadd.f32 %v20829_v55, %v26759_v6  ;;  %18658 = vmatprep.subr.bf16.mxu0 %v14234_v26  ;;  %vm14026_vm5 = vcmp.gt.f32.partialorder %v13954_v22, 0.0 }
 0xa06   : > { %v14096_v39 = vmul.f32 0.01, %v13952_v60  ;;  %v13953_v49 = vadd.f32 %v20830_v3, %v26759_v6  ;;  %18659 = vmatpush3.bf16.msra.mxu0 %v14226_v44  ;;  %vm14024_vm6 = vcmp.gt.f32.partialorder %v13952_v60, 0.0 }
 0xa07   : > { %vm14027_vm7 = vcmp.gt.f32.partialorder %v13955_v41, 0.0  ;;  %v14099_v18 = vmul.f32 0.01, %v13955_v41  ;;  %18660 = vmatprep.subr.bf16.mxu0 %v14235_v52  ;;  %v14170_v38 = vsel %vm14026_vm5, %v13954_v22, %v14098_v1  ;;  %v28698_v22 = vld [vmem:[#allocation134_spill] sm:$0xff] }
 0xa08   : > { %vm14025_vm8 = vcmp.gt.f32.partialorder %v13953_v49, 0.0  ;;  %v14097_v58 = vmul.f32 0.01, %v13953_v49  ;;  %v20741_v35 = vpop.f32.mrb[52].mxu1  ;;  %v14168_v23 = vsel %vm14024_vm6, %v13952_v60, %v14096_v39  ;;  %v28699_v60 = vld [vmem:[#allocation151_spill] sm:$0xff] }
 0xa09   : > { %v20831_v17 = vadd.f32 %v20741_v35, %v28694_v25  ;;  %v13662_v61 = vpop.f32.mrb[53].mxu1  ;;  %v14171_v57 = vsel %vm14027_vm7, %v13955_v41, %v14099_v18  ;;  %v28700_v41 = vld [vmem:[#allocation155_spill] sm:$0xff]  ;;  %v28701_v35 = vld [vmem:[#allocation145_spill] sm:$0xff] }
 0xa0a   : > { %v20832_v32 = vadd.f32 %v13662_v61, %v28695_v30  ;;  %v20742_v63 = vpop.f32.mrb[54].mxu1  ;;  %18661 = vmatpush3.bf16.msra.mxu0 %v14227_v34  ;;  %v14169_v13 = vsel %vm14025_vm8, %v13953_v49, %v14097_v58  ;;  %v14237_v44 = vpack.c.bf16 %v14171_v57, %v14170_v38  ;;  %v28702_v30 = vld [vmem:[#allocation163_spill] sm:$0xff] }
 0xa0b   : > { %v13958_v9 = vadd.f32 %v20831_v17, %v26759_v6  ;;  %v20833_v4 = vadd.f32 %v20742_v63, %v28696_v37  ;;  %v13665_v36 = vpop.f32.mrb[55].mxu1  ;;  %v14236_v2 = vpack.c.bf16 %v14169_v13, %v14168_v23 }
 0xa0c   : > { %v13956_v50 = vadd.f32 %v20832_v32, %v26759_v6  ;;  %v20834_v19 = vadd.f32 %v13665_v36, %v28697_v12 }
 0xa0d   : > { %v14102_v14 = vmul.f32 0.01, %v13958_v9  ;;  %v13959_v16 = vadd.f32 %v20833_v4, %v26759_v6  ;;  %18662 = vmatprep.subr.bf16.mxu0 %v14236_v2  ;;  %vm14030_vm9 = vcmp.gt.f32.partialorder %v13958_v9, 0.0 }
 0xa0e   : > { %v14100_v40 = vmul.f32 0.01, %v13956_v50  ;;  %v13957_v42 = vadd.f32 %v20834_v19, %v26759_v6  ;;  %18663 = vmatpush3.bf16.msra.mxu0 %v14228_v10  ;;  %vm14028_vm10 = vcmp.gt.f32.partialorder %v13956_v50, 0.0 }
 0xa0f   : > { %vm14031_vm11 = vcmp.gt.f32.partialorder %v13959_v16, 0.0  ;;  %v14103_v34 = vmul.f32 0.01, %v13959_v16  ;;  %18664 = vmatprep.subr.bf16.mxu0 %v14237_v44  ;;  %v14174_v51 = vsel %vm14030_vm9, %v13958_v9, %v14102_v14  ;;  %v28703_v44 = vld [vmem:[#allocation178_spill] sm:$0xff] }
 0xa10   : > { %vm14029_vm12 = vcmp.gt.f32.partialorder %v13957_v42, 0.0  ;;  %v14101_v43 = vmul.f32 0.01, %v13957_v42  ;;  %v20745_v52 = vpop.f32.mrb[56].mxu1  ;;  %v14172_v29 = vsel %vm14028_vm10, %v13956_v50, %v14100_v40 }
 0xa11   : > { %v20835_v59 = vadd.f32 %v20745_v52, %v28698_v22  ;;  %v13678_v55 = vpop.f32.mrb[57].mxu1  ;;  %v14175_v26 = vsel %vm14031_vm11, %v13959_v16, %v14103_v34  ;;  %v28704_v34 = vld [vmem:[#allocation181_spill] sm:$0xff]  ;;  %v22689_v22 = vld [vmem:[%s27611_s5] ss:$20 sps:$4 sm:$0x1f]  }
 0xa12   : > { %v20836_v62 = vadd.f32 %v13678_v55, %v28699_v60  ;;  %v20746_v3 = vpop.f32.mrb[58].mxu1  ;;  %18665 = vmatpush3.bf16.msra.mxu0 %v14229_v56  ;;  %v14173_v21 = vsel %vm14029_vm12, %v13957_v42, %v14101_v43  ;;  %v14239_v10 = vpack.c.bf16 %v14175_v26, %v14174_v51  ;;  %v22694_v26 = vld [vmem:[%s27611_s5 + $0xc] ss:$20 sps:$4 sm:$0x1f]  }
 0xa13   : > { %v13962_v1 = vadd.f32 %v20835_v59, %v26759_v6  ;;  %v20837_v39 = vadd.f32 %v20746_v3, %v28700_v41  ;;  %v13681_v49 = vpop.f32.mrb[59].mxu1  ;;  %v14238_v18 = vpack.c.bf16 %v14173_v21, %v14172_v29 }
 0xa14   : > { %v13960_v58 = vadd.f32 %v20836_v62, %v26759_v6  ;;  %v20838_v25 = vadd.f32 %v13681_v49, %v28701_v35 }
 0xa15   : > { %v14106_v17 = vmul.f32 0.01, %v13962_v1  ;;  %v13963_v61 = vadd.f32 %v20837_v39, %v26759_v6  ;;  %18666 = vmatprep.subr.bf16.mxu0 %v14238_v18  ;;  %vm14034_vm13 = vcmp.gt.f32.partialorder %v13962_v1, 0.0 }
 0xa16   : > { %v14104_v53 = vmul.f32 0.01, %v13960_v58  ;;  %v13961_v7 = vadd.f32 %v20838_v25, %v26759_v6  ;;  %18667 = vmatpush3.bf16.msra.mxu0 %v14230_v48  ;;  %vm14032_vm14 = vcmp.gt.f32.partialorder %v13960_v58, 0.0 }
 0xa17   : > { %vm14035_vm15 = vcmp.gt.f32.partialorder %v13963_v61, 0.0  ;;  %v14107_v56 = vmul.f32 0.01, %v13963_v61  ;;  %18668 = vmatprep.subr.bf16.mxu0 %v14239_v10  ;;  %v14178_v23 = vsel %vm14034_vm13, %v13962_v1, %v14106_v17  ;;  %v28706_v10 = vld [vmem:[#allocation185_spill] sm:$0xff] }
 0xa18   : > { %vm14033_vm0 = vcmp.gt.f32.partialorder %v13961_v7, 0.0  ;;  %v14105_v38 = vmul.f32 0.01, %v13961_v7  ;;  %v20749_v57 = vpop.f32.mrb[60].mxu1  ;;  %v14176_v5 = vsel %vm14032_vm14, %v13960_v58, %v14104_v53  ;;  %v28707_v53 = vld [vmem:[#allocation193_spill] sm:$0xff] }
 0xa19   : > { %v20839_v32 = vadd.f32 %v20749_v57, %v28702_v30  ;;  %v13694_v63 = vpop.f32.mrb[61].mxu1  ;;  %v14179_v13 = vsel %vm14035_vm15, %v13963_v61, %v14107_v56  ;;  %v28708_v30 = vld [vmem:[#allocation25_spill] sm:$0xff] }
 0xa1a   : > { %v20840_v9 = vadd.f32 %v13694_v63, %v28703_v44  ;;  %v20750_v37 = vpop.f32.mrb[62].mxu1  ;;  %18669 = vmatpush3.bf16.msra.mxu0 %v14231_v15  ;;  %v14177_v28 = vsel %vm14033_vm0, %v13961_v7, %v14105_v38  ;;  %v14241_v48 = vpack.c.bf16 %v14179_v13, %v14178_v23  ;;  %v28709_v13 = vld [vmem:[#allocation31_spill] sm:$0xff] }
 0xa1b   : > { %v13966_v4 = vadd.f32 %v20839_v32, %v26759_v6  ;;  %v20841_v36 = vadd.f32 %v20750_v37, %v26492_v47  ;;  %v13697_v2 = vpop.f32.mrb[63].mxu1  ;;  %v14240_v50 = vpack.c.bf16 %v14177_v28, %v14176_v5 }
 0xa1c   : > { %v13964_v12 = vadd.f32 %v20840_v9, %v26759_v6  ;;  %v20842_v19 = vadd.f32 %v13697_v2, %v26494_v33 }
 0xa1d   : > { %v14110_v14 = vmul.f32 0.01, %v13966_v4  ;;  %v13967_v16 = vadd.f32 %v20841_v36, %v26759_v6  ;;  %18670 = vmatprep.subr.bf16.mxu0 %v14240_v50  ;;  %vm14038_vm1 = vcmp.gt.f32.partialorder %v13966_v4, 0.0 }
 0xa1e   : > { %v14108_v54 = vmul.f32 0.01, %v13964_v12  ;;  %v13965_v0 = vadd.f32 %v20842_v19, %v26759_v6  ;;  %18671 = vmatpush3.bf16.msra.mxu0 %v14232_v8  ;;  %vm14036_vm2 = vcmp.gt.f32.partialorder %v13964_v12, 0.0  ;;  %v28705_v8 = vld [vmem:[#allocation156_spill] sm:$0xff] }
 0xa1f   : > { %vm14039_vm4 = vcmp.gt.f32.partialorder %v13967_v16, 0.0  ;;  %v14111_v47 = vmul.f32 0.01, %v13967_v16  ;;  %18672 = vmatprep.subr.bf16.mxu0 %v14241_v48  ;;  %v26902_v33 = vsel %vm14038_vm1, %v13966_v4, %v14110_v14 }
 0xa20   : > { %vm14037_vm5 = vcmp.gt.f32.partialorder %v13965_v0, 0.0  ;;  %v14109_v15 = vmul.f32 0.01, %v13965_v0  ;;  %v20753_v40 = vpop.f32.mrb[64].mxu1  ;;  %v26910_v27 = vsel %vm14036_vm2, %v13964_v12, %v14108_v54  ;;  %v28710_v12 = vld [vmem:[#allocation20_spill] sm:$0xff] }
 0xa21   : > { %v26904_v42 = vsel %vm14039_vm4, %v13967_v16, %v14111_v47  ;;  %v20843_v43 = vadd.f32 %v20753_v40, %v28704_v34  ;;  %v13710_v52 = vpop.f32.mrb[65].mxu1 }
 0xa22   : > { %v26912_v11 = vsel %vm14037_vm5, %v13965_v0, %v14109_v15  ;;  %v20844_v59 = vadd.f32 %v13710_v52, %v28705_v8  ;;  %v20754_v55 = vpop.f32.mrb[66].mxu1  ;;  %18673 = vmatpush3.bf16.msra.mxu0 %v14233_v24  ;;  %v14243_v51 = vpack.c.bf16 %v26904_v42, %v26902_v33  ;;  %v28711_v0 = vld [vmem:[#allocation24_spill] sm:$0xff] }
 0xa23   : > { %v13970_v60 = vadd.f32 %v20843_v43, %v26759_v6  ;;  %v20845_v62 = vadd.f32 %v20754_v55, %v26507_v20  ;;  %v13713_v3 = vpop.f32.mrb[67].mxu1  ;;  %v14242_v29 = vpack.c.bf16 %v26912_v11, %v26910_v27  ;;  %v28712_v43 = vld [vmem:[#allocation29_spill] sm:$0xff] }
 0xa24   : > { %v13968_v21 = vadd.f32 %v20844_v59, %v26759_v6  ;;  %v20846_v45 = vadd.f32 %v13713_v3, %v28706_v10  ;;  %v28713_v55 = vld [vmem:[#allocation33_spill] sm:$0xff] }
 0xa25   : > { %v14114_v46 = vmul.f32 0.01, %v13970_v60  ;;  %v13971_v24 = vadd.f32 %v20845_v62, %v26759_v6  ;;  %14323 = vmatmul.mubr.bf16.vlgmr.msra.gmra.mrb[144].mxu0 %v22689_v22  ;;  %vm14042_vm6 = vcmp.gt.f32.partialorder %v13970_v60, 0.0 }
 0xa26   : > { %v14112_v1 = vmul.f32 0.01, %v13968_v21  ;;  %v13969_v41 = vadd.f32 %v20846_v45, %v26759_v6  ;;  %14363 = vmatprep.mubr.bf16.mxu0 %v22694_v26  ;;  %vm14040_vm7 = vcmp.gt.f32.partialorder %v13968_v21, 0.0 }
 0xa27   : > { %vm14043_vm8 = vcmp.gt.f32.partialorder %v13971_v24, 0.0  ;;  %v14115_v20 = vmul.f32 0.01, %v13971_v24  ;;  %v26931_v18 = vsel %vm14042_vm6, %v13970_v60, %v14114_v46 }
 0xa28   : > { %vm14041_vm9 = vcmp.gt.f32.partialorder %v13969_v41, 0.0  ;;  %v14113_v39 = vmul.f32 0.01, %v13969_v41  ;;  %v20757_v49 = vpop.f32.mrb[68].mxu1  ;;  %v26936_v17 = vsel %vm14040_vm7, %v13968_v21, %v14112_v1 }
 0xa29   : > { %v26933_v58 = vsel %vm14043_vm8, %v13971_v24, %v14115_v20  ;;  %v20847_v35 = vadd.f32 %v20757_v49, %v26519_v31  ;;  %v13726_v25 = vpop.f32.mrb[69].mxu1 }
 0xa2a   : > { %v26938_v61 = vsel %vm14041_vm9, %v13969_v41, %v14113_v39  ;;  %v20848_v7 = vadd.f32 %v13726_v25, %v28707_v53  ;;  %v20758_v56 = vpop.f32.mrb[70].mxu1  ;;  %v14245_v38 = vpack.c.bf16 %v26933_v58, %v26931_v18  ;;  %v28714_v41 = vld [vmem:[#allocation39_spill] sm:$0xff] }
 0xa2b   : > { %v13974_v57 = vadd.f32 %v20847_v35, %v26759_v6  ;;  %v20849_v32 = vadd.f32 %v20758_v56, %v28708_v30  ;;  %v13729_v63 = vpop.f32.mrb[71].mxu1  ;;  %v14244_v23 = vpack.c.bf16 %v26938_v61, %v26936_v17  ;;  %v28715_v25 = vld [vmem:[#allocation43_spill] sm:$0xff]  ;;  %v28716_v30 = vld [vmem:[#allocation49_spill] sm:$0xff] }
 0xa2c   : > { %v13972_v31 = vadd.f32 %v20848_v7, %v26759_v6  ;;  %v20850_v44 = vadd.f32 %v13729_v63, %v28709_v13 }
 0xa2d   : > { %v14118_v9 = vmul.f32 0.01, %v13974_v57  ;;  %v13975_v37 = vadd.f32 %v20849_v32, %v26759_v6  ;;  %vm14046_vm10 = vcmp.gt.f32.partialorder %v13974_v57, 0.0 }
 0xa2e   : > { %v14116_v5 = vmul.f32 0.01, %v13972_v31  ;;  %v13973_v28 = vadd.f32 %v20850_v44, %v26759_v6  ;;  %vm14044_vm11 = vcmp.gt.f32.partialorder %v13972_v31, 0.0  ;;  %v28717_v44 = vld [vmem:[#allocation53_spill] sm:$0xff] }
 0xa2f   : > { %vm14047_vm12 = vcmp.gt.f32.partialorder %v13975_v37, 0.0  ;;  %v14119_v48 = vmul.f32 0.01, %v13975_v37  ;;  %v26951_v2 = vsel %vm14046_vm10, %v13974_v57, %v14118_v9 }
 0xa30   : > { %vm14045_vm13 = vcmp.gt.f32.partialorder %v13973_v28, 0.0  ;;  %v14117_v4 = vmul.f32 0.01, %v13973_v28  ;;  %v20761_v36 = vpop.f32.mrb[0].mxu1  ;;  %v26956_v16 = vsel %vm14044_vm11, %v13972_v31, %v14116_v5 }
 0xa31   : > { %v26953_v50 = vsel %vm14047_vm12, %v13975_v37, %v14119_v48  ;;  %v20851_v19 = vadd.f32 %v20761_v36, %v28710_v12  ;;  %v13742_v14 = vpop.f32.mrb[1].mxu1 }
 0xa32   : > { %v26958_v54 = vsel %vm14045_vm13, %v13973_v28, %v14117_v4  ;;  %v20852_v47 = vadd.f32 %v13742_v14, %v28711_v0  ;;  %v20762_v15 = vpop.f32.mrb[2].mxu1  ;;  %v14247_v40 = vpack.c.bf16 %v26953_v50, %v26951_v2 }
 0xa33   : > { %v13978_v34 = vadd.f32 %v20851_v19, %v26759_v6  ;;  %v20853_v52 = vadd.f32 %v20762_v15, %v28712_v43  ;;  %v13745_v22 = vpop.f32.mrb[3].mxu1  ;;  %v14246_v8 = vpack.c.bf16 %v26958_v54, %v26956_v16  ;;  %v28718_v19 = vld [vmem:[#allocation59_spill] sm:$0xff] }
 0xa34   : > { %v13976_v59 = vadd.f32 %v20852_v47, %v26759_v6  ;;  %v20854_v26 = vadd.f32 %v13745_v22, %v28713_v55 }
 0xa35   : > { %v14122_v60 = vmul.f32 0.01, %v13978_v34  ;;  %v13979_v62 = vadd.f32 %v20853_v52, %v26759_v6  ;;  %vm14050_vm14 = vcmp.gt.f32.partialorder %v13978_v34, 0.0 }
 0xa36   : > { %v14120_v3 = vmul.f32 0.01, %v13976_v59  ;;  %v13977_v21 = vadd.f32 %v20854_v26, %v26759_v6  ;;  %vm14048_vm15 = vcmp.gt.f32.partialorder %v13976_v59, 0.0 }
 0xa37   : > { %vm14051_vm0 = vcmp.gt.f32.partialorder %v13979_v62, 0.0  ;;  %v14123_v10 = vmul.f32 0.01, %v13979_v62  ;;  %v26971_v24 = vsel %vm14050_vm14, %v13978_v34, %v14122_v60  ;;  %v28719_v34 = vld [vmem:[#allocation63_spill] sm:$0xff]  ;;  %v28720_v60 = vld [vmem:[#allocation69_spill] sm:$0xff] }
 0xa38   : > { %vm14049_vm1 = vcmp.gt.f32.partialorder %v13977_v21, 0.0  ;;  %v14121_v45 = vmul.f32 0.01, %v13977_v21  ;;  %v20765_v46 = vpop.f32.mrb[4].mxu1  ;;  %v26976_v49 = vsel %vm14048_vm15, %v13976_v59, %v14120_v3 }
 0xa39   : > { %v26973_v1 = vsel %vm14051_vm0, %v13979_v62, %v14123_v10  ;;  %v20855_v20 = vadd.f32 %v20765_v46, %v28714_v41  ;;  %v13758_v39 = vpop.f32.mrb[5].mxu1 }
 0xa3a   : > { %v26978_v35 = vsel %vm14049_vm1, %v13977_v21, %v14121_v45  ;;  %v20856_v53 = vadd.f32 %v13758_v39, %v28715_v25  ;;  %v20766_v7 = vpop.f32.mrb[6].mxu1  ;;  %v14249_v56 = vpack.c.bf16 %v26973_v1, %v26971_v24  ;;  %v28721_v45 = vld [vmem:[#allocation73_spill] sm:$0xff] }
 0xa3b   : > { %v13982_v57 = vadd.f32 %v20855_v20, %v26759_v6  ;;  %v20857_v32 = vadd.f32 %v20766_v7, %v28716_v30  ;;  %v13761_v63 = vpop.f32.mrb[7].mxu1  ;;  %v14248_v31 = vpack.c.bf16 %v26978_v35, %v26976_v49  ;;  %v28722_v30 = vld [vmem:[#allocation79_spill] sm:$0xff]  ;;  %v28735_v49 = vld [vmem:[#allocation132_spill] sm:$0xff] }
 0xa3c   : > { %v13980_v13 = vadd.f32 %v20856_v53, %v26759_v6  ;;  %v20858_v9 = vadd.f32 %v13761_v63, %v28717_v44 }
 0xa3d   : > { %v14126_v37 = vmul.f32 0.01, %v13982_v57  ;;  %v13983_v5 = vadd.f32 %v20857_v32, %v26759_v6  ;;  %vm14054_vm2 = vcmp.gt.f32.partialorder %v13982_v57, 0.0 }
 0xa3e   : > { %v14124_v28 = vmul.f32 0.01, %v13980_v13  ;;  %v13981_v48 = vadd.f32 %v20858_v9, %v26759_v6  ;;  %vm14052_vm4 = vcmp.gt.f32.partialorder %v13980_v13, 0.0  ;;  %v28723_v9 = vld [vmem:[#allocation83_spill] sm:$0xff] }
 0xa3f   : > { %vm14055_vm5 = vcmp.gt.f32.partialorder %v13983_v5, 0.0  ;;  %v14127_v4 = vmul.f32 0.01, %v13983_v5  ;;  %v14198_v47 = vsel %vm14054_vm2, %v13982_v57, %v14126_v37 }
 0xa40   : > { %vm14053_vm6 = vcmp.gt.f32.partialorder %v13981_v48, 0.0  ;;  %v14125_v36 = vmul.f32 0.01, %v13981_v48  ;;  %v20769_v12 = vpop.f32.mrb[8].mxu1  ;;  %v14196_v22 = vsel %vm14052_vm4, %v13980_v13, %v14124_v28 }
 0xa41   : > { %v20859_v14 = vadd.f32 %v20769_v12, %v28718_v19  ;;  %v13774_v0 = vpop.f32.mrb[9].mxu1  ;;  %v14199_v15 = vsel %vm14055_vm5, %v13983_v5, %v14127_v4 }
 0xa42   : > { %v20860_v43 = vadd.f32 %v13774_v0, %v28719_v34  ;;  %v20770_v52 = vpop.f32.mrb[10].mxu1  ;;  %v14197_v59 = vsel %vm14053_vm6, %v13981_v48, %v14125_v36  ;;  %v14251_v55 = vpack.c.bf16 %v14199_v15, %v14198_v47  ;;  %v28724_v48 = vld [vmem:[#allocation89_spill] sm:$0xff] }
 0xa43   : > { %v13986_v26 = vadd.f32 %v20859_v14, %v26759_v6  ;;  %v20861_v62 = vadd.f32 %v20770_v52, %v28720_v60  ;;  %v13777_v3 = vpop.f32.mrb[11].mxu1  ;;  %v14250_v21 = vpack.c.bf16 %v14197_v59, %v14196_v22  ;;  %v28725_v14 = vld [vmem:[#allocation93_spill] sm:$0xff]  ;;  %v28726_v52 = vld [vmem:[#allocation99_spill] sm:$0xff] }
 0xa44   : > { %v13984_v10 = vadd.f32 %v20860_v43, %v26759_v6  ;;  %v20862_v46 = vadd.f32 %v13777_v3, %v28721_v45  ;;  %v28727_v60 = vld [vmem:[#allocation103_spill] sm:$0xff] }
 0xa45   : > { %v14130_v41 = vmul.f32 0.01, %v13986_v26  ;;  %v13987_v20 = vadd.f32 %v20861_v62, %v26759_v6  ;;  %18680 = vmatprep.subr.bf16.mxu0 %v14250_v21  ;;  %vm14058_vm7 = vcmp.gt.f32.partialorder %v13986_v26, 0.0 }
 0xa46   : > { %v14128_v39 = vmul.f32 0.01, %v13984_v10  ;;  %v13985_v25 = vadd.f32 %v20862_v46, %v26759_v6  ;;  %18681 = vmatpush3.bf16.msra.mxu0 %v14242_v29  ;;  %vm14056_vm8 = vcmp.gt.f32.partialorder %v13984_v10, 0.0 }
 0xa47   : > { %vm14059_vm9 = vcmp.gt.f32.partialorder %v13987_v20, 0.0  ;;  %v14131_v53 = vmul.f32 0.01, %v13987_v20  ;;  %18682 = vmatprep.subr.bf16.mxu0 %v14251_v55  ;;  %v14202_v13 = vsel %vm14058_vm7, %v13986_v26, %v14130_v41 }
 0xa48   : > { %vm14057_vm10 = vcmp.gt.f32.partialorder %v13985_v25, 0.0  ;;  %v14129_v7 = vmul.f32 0.01, %v13985_v25  ;;  %v20773_v57 = vpop.f32.mrb[12].mxu1  ;;  %v14200_v27 = vsel %vm14056_vm8, %v13984_v10, %v14128_v39  ;;  %v28728_v10 = vld [vmem:[#allocation110_spill] sm:$0xff] }
 0xa49   : > { %v20863_v32 = vadd.f32 %v20773_v57, %v28722_v30  ;;  %v13790_v63 = vpop.f32.mrb[13].mxu1  ;;  %v14203_v44 = vsel %vm14059_vm9, %v13987_v20, %v14131_v53  ;;  %v28729_v39 = vld [vmem:[#allocation114_spill] sm:$0xff]  ;;  %vm23189_vm9 = vmmov 0  }
 0xa4a   : > { %v20864_v37 = vadd.f32 %v13790_v63, %v28723_v9  ;;  %v20774_v5 = vpop.f32.mrb[14].mxu1  ;;  %18683 = vmatpush3.bf16.msra.mxu0 %v14243_v51  ;;  %v14201_v11 = vsel %vm14057_vm10, %v13985_v25, %v14129_v7  ;;  %v14253_v29 = vpack.c.bf16 %v14203_v44, %v14202_v13 }
 0xa4b   : > { %v13990_v28 = vadd.f32 %v20863_v32, %v26759_v6  ;;  %v20865_v4 = vadd.f32 %v20774_v5, %v28724_v48  ;;  %v13793_v36 = vpop.f32.mrb[15].mxu1  ;;  %v14252_v12 = vpack.c.bf16 %v14201_v11, %v14200_v27  ;;  %v28730_v32 = vld [vmem:[#allocation128_spill] sm:$0xff] }
 0xa4c   : > { %v13988_v19 = vadd.f32 %v20864_v37, %v26759_v6  ;;  %v20866_v0 = vadd.f32 %v13793_v36, %v28725_v14  ;;  %v28731_v37 = vld [vmem:[#allocation121_spill] sm:$0xff] }
 0xa4d   : > { %v14134_v47 = vmul.f32 0.01, %v13990_v28  ;;  %v13991_v15 = vadd.f32 %v20865_v4, %v26759_v6  ;;  %18684 = vmatprep.subr.bf16.mxu0 %v14252_v12  ;;  %vm14062_vm11 = vcmp.gt.f32.partialorder %v13990_v28, 0.0  ;;  %v28733_v12 = vld [vmem:[#allocation138_spill] sm:$0xff] }
 0xa4e   : > { %v14132_v33 = vmul.f32 0.01, %v13988_v19  ;;  %v13989_v42 = vadd.f32 %v20866_v0, %v26759_v6  ;;  %18685 = vmatpush3.bf16.msra.mxu0 %v14244_v23  ;;  %vm14060_vm12 = vcmp.gt.f32.partialorder %v13988_v19, 0.0 }
 0xa4f   : > { %vm14063_vm13 = vcmp.gt.f32.partialorder %v13991_v15, 0.0  ;;  %v14135_v51 = vmul.f32 0.01, %v13991_v15  ;;  %18686 = vmatprep.subr.bf16.mxu0 %v14253_v29  ;;  %v14206_v55 = vsel %vm14062_vm11, %v13990_v28, %v14134_v47  ;;  %v28732_v29 = vld [vmem:[#allocation125_spill] sm:$0xff] }
 0xa50   : > { %vm14061_vm14 = vcmp.gt.f32.partialorder %v13989_v42, 0.0  ;;  %v14133_v34 = vmul.f32 0.01, %v13989_v42  ;;  %v20777_v43 = vpop.f32.mrb[16].mxu1  ;;  %v14204_v17 = vsel %vm14060_vm12, %v13988_v19, %v14132_v33 }
 0xa51   : > { %v20867_v22 = vadd.f32 %v20777_v43, %v28726_v52  ;;  %v13806_v59 = vpop.f32.mrb[17].mxu1  ;;  %v14207_v26 = vsel %vm14063_vm13, %v13991_v15, %v14135_v51  ;;  %v28734_v51 = vld [vmem:[#allocation139_spill] sm:$0xff] }
 0xa52   : > { %v20868_v62 = vadd.f32 %v13806_v59, %v28727_v60  ;;  %v20778_v3 = vpop.f32.mrb[18].mxu1  ;;  %18687 = vmatpush3.bf16.msra.mxu0 %v14245_v38  ;;  %v14205_v61 = vsel %vm14061_vm14, %v13989_v42, %v14133_v34  ;;  %v14255_v23 = vpack.c.bf16 %v14207_v26, %v14206_v55  ;;  %v22692_v52 = vld [vmem:[%s27611_s5 + $0x8] ss:$20 sps:$4 sm:$0x1f]   ;;  %v28736_v60 = vld [vmem:[#allocation136_spill] sm:$0xff]  ;;  %vm15948_vm14 = vcmask 293888  }
 0xa53   : > { %v13994_v21 = vadd.f32 %v20867_v22, %v26759_v6  ;;  %v20869_v45 = vadd.f32 %v20778_v3, %v28728_v10  ;;  %v13809_v46 = vpop.f32.mrb[19].mxu1  ;;  %v14254_v41 = vpack.c.bf16 %v14205_v61, %v14204_v17  ;;  %v28737_v17 = vmov 0.0  }
 0xa54   : > { %v13992_v20 = vadd.f32 %v20868_v62, %v26759_v6  ;;  %v20870_v25 = vadd.f32 %v13809_v46, %v28729_v39 }
 0xa55   : > { %v14138_v53 = vmul.f32 0.01, %v13994_v21  ;;  %v13995_v7 = vadd.f32 %v20869_v45, %v26759_v6  ;;  %18688 = vmatprep.subr.bf16.mxu0 %v14254_v41  ;;  %vm14066_vm15 = vcmp.gt.f32.partialorder %v13994_v21, 0.0 }
 0xa56   : > { %v14136_v18 = vmul.f32 0.01, %v13992_v20  ;;  %v13993_v58 = vadd.f32 %v20870_v25, %v26759_v6  ;;  %18689 = vmatpush3.bf16.msra.mxu0 %v14246_v8  ;;  %vm14064_vm0 = vcmp.gt.f32.partialorder %v13992_v20, 0.0 }
 0xa57   : > { %vm14067_vm1 = vcmp.gt.f32.partialorder %v13995_v7, 0.0  ;;  %v14139_v38 = vmul.f32 0.01, %v13995_v7  ;;  %18690 = vmatprep.subr.bf16.mxu0 %v14255_v23  ;;  %v14210_v44 = vsel %vm14066_vm15, %v13994_v21, %v14138_v53  ;;  %v28738_v21 = vld [vmem:[#allocation149_spill] sm:$0xff] }
 0xa58   : > { %vm14065_vm2 = vcmp.gt.f32.partialorder %v13993_v58, 0.0  ;;  %v14137_v57 = vmul.f32 0.01, %v13993_v58  ;;  %v20781_v30 = vpop.f32.mrb[20].mxu1  ;;  %v14208_v16 = vsel %vm14064_vm0, %v13992_v20, %v14136_v18 }
 0xa59   : > { %v20871_v63 = vadd.f32 %v20781_v30, %v28730_v32  ;;  %v13822_v13 = vpop.f32.mrb[21].mxu1  ;;  %v14211_v9 = vsel %vm14067_vm1, %v13995_v7, %v14139_v38  ;;  %v22695_v18 = vld [vmem:[%s27611_s5 + $0x10] ss:$20 sps:$4 sm:$0x1f]   ;;  %v22701_v30 = vld [vmem:[%s27612_s6 + $0x14] ss:$8 sps:$4 sm:$0xff]  }
 0xa5a   : > { %v20872_v5 = vadd.f32 %v13822_v13, %v28731_v37  ;;  %v20782_v27 = vpop.f32.mrb[22].mxu1  ;;  %18691 = vmatpush3.bf16.msra.mxu0 %v14247_v40  ;;  %v14209_v54 = vsel %vm14065_vm2, %v13993_v58, %v14137_v57  ;;  %v14257_v8 = vpack.c.bf16 %v14211_v9, %v14210_v44  ;;  %v22696_v58 = vld [vmem:[%s27612_s6] ss:$8 sps:$4 sm:$0xff]   ;;  %v22698_v38 = vld [vmem:[%s27612_s6 + $0x4] ss:$8 sps:$4 sm:$0xff]  }
 0xa5b   : > { %v13998_v11 = vadd.f32 %v20871_v63, %v26759_v6  ;;  %v20873_v28 = vadd.f32 %v20782_v27, %v28732_v29  ;;  %v13825_v48 = vpop.f32.mrb[23].mxu1  ;;  %v14256_v4 = vpack.c.bf16 %v14209_v54, %v14208_v16  ;;  %v22699_v57 = vld [vmem:[%s27612_s6 + $0x10] ss:$8 sps:$4 sm:$0xff]   ;;  %v22704_v32 = vld [vmem:[%s27612_s6 + $0x24] ss:$8 sps:$4 sm:$0xff]   ;;  %v23190_v29 = vmov 0  }
 0xa5c   : > { %v13996_v36 = vadd.f32 %v20872_v5, %v26759_v6  ;;  %v20874_v19 = vadd.f32 %v13825_v48, %v28733_v12  ;;  %v22702_v63 = vld [vmem:[%s27612_s6 + $0x20] ss:$8 sps:$4 sm:$0xff]   ;;  %v22705_v13 = vld [vmem:[%s27612_s6 + $0x30] ss:$8 sps:$4 sm:$0xff]   ;;  %v22707_v44 = vld [vmem:[%s27612_s6 + $0x34] ss:$8 sps:$4 sm:$0xff]  }
 0xa5d   : > { %v14142_v14 = vmul.f32 0.01, %v13998_v11  ;;  %v13999_v0 = vadd.f32 %v20873_v28, %v26759_v6  ;;  %18692 = vmatprep.subr.bf16.mxu0 %v14256_v4  ;;  %vm14070_vm4 = vcmp.gt.f32.partialorder %v13998_v11, 0.0  ;;  %v22710_v9 = vld [vmem:[%s27612_s6 + $0x44] ss:$8 sps:$4 sm:$0xff]  }
 0xa5e   : > { %v14140_v2 = vmul.f32 0.01, %v13996_v36  ;;  %v13997_v50 = vadd.f32 %v20874_v19, %v26759_v6  ;;  %18693 = vmatpush3.bf16.msra.mxu0 %v14248_v31  ;;  %vm14068_vm5 = vcmp.gt.f32.partialorder %v13996_v36, 0.0  ;;  %v22708_v37 = vld [vmem:[%s27612_s6 + $0x40] ss:$8 sps:$4 sm:$0xff]  }
 0xa5f   : > { %vm14071_vm6 = vcmp.gt.f32.partialorder %v13999_v0, 0.0  ;;  %v14143_v40 = vmul.f32 0.01, %v13999_v0  ;;  %18694 = vmatprep.subr.bf16.mxu0 %v14257_v8  ;;  %v14214_v33 = vsel %vm14070_vm4, %v13998_v11, %v14142_v14  ;;  %v22713_v5 = vld [vmem:[%s27612_s6 + $0x54] ss:$8 sps:$4 sm:$0xff]  }
 0xa60   : > { %vm14069_vm7 = vcmp.gt.f32.partialorder %v13997_v50, 0.0  ;;  %v14141_v47 = vmul.f32 0.01, %v13997_v50  ;;  %v20785_v15 = vpop.f32.mrb[24].mxu1  ;;  %v14212_v22 = vsel %vm14068_vm5, %v13996_v36, %v14140_v2  ;;  %v22711_v27 = vld [vmem:[%s27612_s6 + $0x50] ss:$8 sps:$4 sm:$0xff]  }
 0xa61   : > { %v14215_v42 = vsel %vm14071_vm6, %v13999_v0, %v14143_v40  ;;  %v20875_v34 = vadd.f32 %v20785_v15, %v28734_v51  ;;  %v13838_v43 = vpop.f32.mrb[25].mxu1  ;;  %v22716_v16 = vld [vmem:[%s27612_s6 + $0x64] ss:$8 sps:$4 sm:$0xff]   ;;  %v22714_v54 = vld [vmem:[%s27612_s6 + $0x60] ss:$8 sps:$4 sm:$0xff]  }
 0xa62   : > { %v14213_v59 = vsel %vm14069_vm7, %v13997_v50, %v14141_v47  ;;  %v20876_v35 = vadd.f32 %v13838_v43, %v28735_v49  ;;  %v20786_v31 = vpop.f32.mrb[26].mxu1  ;;  %18695 = vmatpush3.bf16.msra.mxu0 %v14249_v56  ;;  %v14259_v55 = vpack.c.bf16 %v14215_v42, %v14214_v33  ;;  %v22717_v8 = vld [vmem:[%s27612_s6 + $0x70] ss:$8 sps:$4 sm:$0xff]   ;;  %v22719_v11 = vld [vmem:[%s27612_s6 + $0x74] ss:$8 sps:$4 sm:$0xff]  }
 0xa63   : > { %v14002_v26 = vadd.f32 %v20875_v34, %v26759_v6  ;;  %v20877_v62 = vadd.f32 %v20786_v31, %v28736_v60  ;;  %v13841_v3 = vpop.f32.mrb[27].mxu1  ;;  %20787 = vmatprep.subr.bf16.mxu0 %v28737_v17  ;;  %v14258_v61 = vpack.c.bf16 %v14213_v59, %v14212_v22  ;;  %v22722_v28 = vld [vmem:[%s27612_s6 + $0x84] ss:$8 sps:$4 sm:$0xff]  }
 0xa64   : > { %v14000_v23 = vadd.f32 %v20876_v35, %v26759_v6  ;;  %v20878_v10 = vadd.f32 %v13841_v3, %v28738_v21  ;;  %v22720_v35 = vld [vmem:[%s27612_s6 + $0x80] ss:$8 sps:$4 sm:$0xff]   ;;  %v22728_v60 = vld [vmem:[%s27612_s6 + $0xa4] ss:$8 sps:$4 sm:$0xff]   ;;  %v22731_v3 = vld [vmem:[%s27612_s6 + $0xb4] ss:$8 sps:$4 sm:$0xff]  }
 0xa65   : > { %v14146_v45 = vmul.f32 0.01, %v14002_v26  ;;  %v14003_v46 = vadd.f32 %v20877_v62, %v26759_v6  ;;  %14364 = vmatmul.mubr.bf16.vlgmr.msra.gmra.mrb[148].mxu0 %v22692_v52  ;;  %vm14074_vm8 = vcmp.gt.f32.partialorder %v14002_v26, 0.0  ;;  %v22726_v62 = vld [vmem:[%s27612_s6 + $0xa0] ss:$8 sps:$4 sm:$0xff]  }
 0xa66   : > { %v14144_v24 = vmul.f32 0.01, %v14000_v23  ;;  %v14001_v1 = vadd.f32 %v20878_v10, %v26759_v6  ;;  %20788 = vmatpush3.bf16.msra.mxu0 %v14258_v61  ;;  %20795 = vmatprep.mubr.msk.bf16.mxu0 %vm23189_vm9, %v28737_v17  ;;  %vm14072_vm10 = vcmp.gt.f32.partialorder %v14000_v23, 0.0  ;;  %v22734_v61 = vld [vmem:[%s27612_s6 + $0xc4] ss:$8 sps:$4 sm:$0xff]  }
 0xa67   : > { %vm14075_vm11 = vcmp.gt.f32.partialorder %v14003_v46, 0.0  ;;  %v14147_v56 = vmul.f32 0.01, %v14003_v46  ;;  %20789 = vmatprep.subr.bf16.mxu0 %v28737_v17  ;;  %v14218_v20 = vsel %vm14074_vm8, %v14002_v26, %v14146_v45  ;;  %v22723_v26 = vld [vmem:[%s27612_s6 + $0x90] ss:$8 sps:$4 sm:$0xff]  }
 0xa68   : > { %vm14073_vm12 = vcmp.gt.f32.partialorder %v14001_v1, 0.0  ;;  %v14145_v41 = vmul.f32 0.01, %v14001_v1  ;;  %v14216_v25 = vsel %vm14072_vm10, %v14000_v23, %v14144_v24  ;;  %v22732_v23 = vld [vmem:[%s27612_s6 + $0xc0] ss:$8 sps:$4 sm:$0xff]  }
 0xa69   : > { %v14219_v39 = vsel %vm14075_vm11, %v14003_v46, %v14147_v56  ;;  %v22737_v21 = vld [vmem:[%s27612_s6 + $0xd4] ss:$8 sps:$4 sm:$0xff]   ;;  %v22735_v10 = vld [vmem:[%s27612_s6 + $0xd0] ss:$8 sps:$4 sm:$0xff]   ;;  %v22740_v45 = vld [vmem:[%s27612_s6 + $0xe4] ss:$8 sps:$4 sm:$0xff]  }
 0xa6a   : > { %v14217_v53 = vsel %vm14073_vm12, %v14001_v1, %v14145_v41  ;;  %20790 = vmatpush3.bf16.msra.mxu0 %v14259_v55  ;;  %v14261_v7 = vpack.c.bf16 %v14219_v39, %v14218_v20  ;;  %v22725_v55 = vld [vmem:[%s27612_s6 + $0x94] ss:$8 sps:$4 sm:$0xff]   ;;  %v22738_v46 = vld [vmem:[%s27612_s6 + $0xe0] ss:$8 sps:$4 sm:$0xff]   ;;  %v22741_v1 = vld [vmem:[%s27612_s6 + $0xf0] ss:$8 sps:$4 sm:$0xff]  }
 0xa6b   : > { %20791 = vmatprep.subr.bf16.mxu0 %v28737_v17  ;;  %v14260_v6 = vpack.c.bf16 %v14217_v53, %v14216_v25  ;;  %v22743_v24 = vld [vmem:[%s27612_s6 + $0xf4] ss:$8 sps:$4 sm:$0xff]   ;;  %v22746_v56 = vld [vmem:[%s27612_s6 + $0x104] ss:$8 sps:$4 sm:$0xff]   ;;  %v22744_v41 = vld [vmem:[%s27612_s6 + $0x100] ss:$8 sps:$4 sm:$0xff]  }
 0xa6c   : > { %v22749_v39 = vld [vmem:[%s27612_s6 + $0x114] ss:$8 sps:$4 sm:$0xff]   ;;  %v22747_v25 = vld [vmem:[%s27612_s6 + $0x110] ss:$8 sps:$4 sm:$0xff]   ;;  %v22752_v53 = vld [vmem:[%s27612_s6 + $0x124] ss:$8 sps:$4 sm:$0xff]  }
 0xa6e   : > { %20792 = vmatpush3.bf16.msra.mxu0 %v14260_v6  ;;  %v22755_v6 = vld [vmem:[%s27612_s6 + $0x134] ss:$8 sps:$4 sm:$0xff]  }
 0xa6f   : > { %20793 = vmatprep.subr.bf16.mxu0 %v28737_v17  ;;  %v22729_v17 = vld [vmem:[%s27612_s6 + $0xb0] ss:$8 sps:$4 sm:$0xff]  }
 0xa72   : > { %20794 = vmatpush3.bf16.msra.mxu0 %v14261_v7  ;;  %v22750_v7 = vld [vmem:[%s27612_s6 + $0x120] ss:$8 sps:$4 sm:$0xff]  }
 0xa73   : > { %14513 = vmatprep.subr.bf16.mxu0 %v22698_v38  ;;  %v22756_v38 = vld [vmem:[%s27612_s6 + $0x140] ss:$8 sps:$4 sm:$0xff]  }
 0xa75   : > { %20796 = vmatmul.mubr.msk.bf16.vlgmr.msra.gmra.mrb[152].mxu0 %vm1294_vm3, %v22695_v18  ;;  %v22753_v18 = vld [vmem:[%s27612_s6 + $0x130] ss:$8 sps:$4 sm:$0xff]   ;;  %vm15952_vm3 = vcmask 1041408  }
 0xa76   : > { %14514 = vmatpush1.bf16.msra.mxu0 %v22696_v58  ;;  %14545 = vmatprep.mubr.bf16.mxu0 %v23190_v29  ;;  %v22758_v58 = vld [vmem:[%s27612_s6 + $0x144] ss:$8 sps:$4 sm:$0xff]  }
 0xa77   : > { %14515 = vmatprep.subr.bf16.mxu0 %v22701_v30  ;;  %v22759_v30 = vld [vmem:[%s27612_s6 + $0x150] ss:$8 sps:$4 sm:$0xff]  }
 0xa7a   : > { %14516 = vmatpush1.bf16.msra.mxu0 %v22699_v57  ;;  %v22761_v57 = vld [vmem:[%s27612_s6 + $0x154] ss:$8 sps:$4 sm:$0xff]  }
 0xa7b   : > { %14517 = vmatprep.subr.bf16.mxu0 %v22704_v32  ;;  %v22764_v32 = vld [vmem:[%s27612_s6 + $0x164] ss:$8 sps:$4 sm:$0xff]  }
 0xa7e   : > { %14518 = vmatpush1.bf16.msra.mxu0 %v22702_v63  ;;  %v22762_v63 = vld [vmem:[%s27612_s6 + $0x160] ss:$8 sps:$4 sm:$0xff]  }
 0xa7f   : > { %14519 = vmatprep.subr.bf16.mxu0 %v22707_v44  ;;  %v22765_v44 = vld [vmem:[%s27612_s6 + $0x170] ss:$8 sps:$4 sm:$0xff]  }
 0xa82   : > { %14520 = vmatpush1.bf16.msra.mxu0 %v22705_v13  ;;  %v22767_v13 = vld [vmem:[%s27612_s6 + $0x174] ss:$8 sps:$4 sm:$0xff]  }
 0xa83   : > { %14521 = vmatprep.subr.bf16.mxu0 %v22710_v9  ;;  %v22770_v9 = vld [vmem:[%s27612_s6 + $0x184] ss:$8 sps:$4 sm:$0xff]  }
 0xa86   : > { %14522 = vmatpush1.bf16.msra.mxu0 %v22708_v37  ;;  %v22768_v37 = vld [vmem:[%s27612_s6 + $0x180] ss:$8 sps:$4 sm:$0xff]  }
 0xa87   : > { %14523 = vmatprep.subr.bf16.mxu0 %v22713_v5 }
 0xa8a   : > { %14524 = vmatpush1.bf16.msra.mxu0 %v22711_v27  ;;  %v22773_v27 = vld [vmem:[%s27612_s6 + $0x194] ss:$8 sps:$4 sm:$0xff]  }
 0xa8b   : > { %14525 = vmatprep.subr.bf16.mxu0 %v22716_v16  ;;  %v22771_v16 = vld [vmem:[%s27612_s6 + $0x190] ss:$8 sps:$4 sm:$0xff]  }
 0xa8e   : > { %14526 = vmatpush1.bf16.msra.mxu0 %v22714_v54  ;;  %v22776_v54 = vld [vmem:[%s27612_s6 + $0x1a4] ss:$8 sps:$4 sm:$0xff]  }
 0xa8f   : > { %14527 = vmatprep.subr.bf16.mxu0 %v22719_v11  ;;  %v22779_v11 = vld [vmem:[%s27612_s6 + $0x1b4] ss:$8 sps:$4 sm:$0xff]  }
 0xa92   : > { %14528 = vmatpush1.bf16.msra.mxu0 %v22717_v8  ;;  %v22774_v8 = vld [vmem:[%s27612_s6 + $0x1a0] ss:$8 sps:$4 sm:$0xff]  }
 0xa93   : > { %14674 = vmatprep.subr.bf16.mxu0 %v22722_v28  ;;  %v22777_v28 = vld [vmem:[%s27612_s6 + $0x1b0] ss:$8 sps:$4 sm:$0xff]  }
 0xaf8   : > { %v18674_v48 = vpop.f32.mrb[144].mxu0 }
 0xaf9   : > { %v18675_v4 = vpop.f32.mrb[145].mxu0 }
 0xafa   : > { %v18676_v36 = vadd.f32 %v18675_v4, %v18674_v48  ;;  %v18677_v12 = vpop.f32.mrb[146].mxu0  ;;  %v22782_v48 = vld [vmem:[%s27612_s6 + $0x1c4] ss:$8 sps:$4 sm:$0xff]   ;;  %v22780_v4 = vld [vmem:[%s27612_s6 + $0x1c0] ss:$8 sps:$4 sm:$0xff]  }
 0xafb   : > { %v18678_v19 = vpop.f32.mrb[147].mxu0 }
 0xafc   : > { %v18679_v14 = vadd.f32 %v18678_v19, %v18677_v12  ;;  %v22783_v12 = vld [vmem:[%s27612_s6 + $0x1d0] ss:$8 sps:$4 sm:$0xff]   ;;  %v22788_v19 = vld [vmem:[%s27612_s6 + $0x1e4] ss:$8 sps:$4 sm:$0xff]  }
 0xb38   : > { %v18696_v0 = vpop.f32.mrb[148].mxu0 }
 0xb39   : > { %v18697_v2 = vpop.f32.mrb[149].mxu0 }
 0xb3a   : > { %v18698_v50 = vadd.f32 %v18697_v2, %v18696_v0  ;;  %v18699_v40 = vpop.f32.mrb[150].mxu0  ;;  %v22791_v0 = vld [vmem:[%s27612_s6 + $0x1f4] ss:$8 sps:$4 sm:$0xff]   ;;  %v22789_v2 = vld [vmem:[%s27612_s6 + $0x1f0] ss:$8 sps:$4 sm:$0xff]  }
 0xb3b   : > { %v18700_v47 = vpop.f32.mrb[151].mxu0 }
 0xb3c   : > { %v18701_v15 = vadd.f32 %v18700_v47, %v18699_v40  ;;  %v14366_v33 = vadd.f32 %v18698_v50, %v18676_v36  ;;  %v22785_v36 = vld [vmem:[%s27612_s6 + $0x1d4] ss:$8 sps:$4 sm:$0xff]   ;;  %v22794_v50 = vld [vmem:[%s27612_s6 + $0x204] ss:$8 sps:$4 sm:$0xff]   ;;  %v22792_v40 = vld [vmem:[%s27612_s6 + $0x200] ss:$8 sps:$4 sm:$0xff]  }
 0xb3e   : > { %v14369_v42 = vadd.f32 %v18701_v15, %v18679_v14  ;;  %v22786_v14 = vld [vmem:[%s27612_s6 + $0x1e0] ss:$8 sps:$4 sm:$0xff]   ;;  %v22797_v15 = vld [vmem:[%s27612_s6 + $0x214] ss:$8 sps:$4 sm:$0xff]  }
 0xb48   : > { %v14406_v51 = vpop.f32.mrb[152].mxu0 }
 0xb49   : > { %v14407_v34 = vadd.f32 %v14406_v51, %v14366_v33  ;;  %v20797_v43 = vpop.f32.mrb[153].mxu0  ;;  %v22795_v33 = vld [vmem:[%s27612_s6 + $0x210] ss:$8 sps:$4 sm:$0xff]   ;;  %v22798_v51 = vld [vmem:[%s27612_s6 + $0x220] ss:$8 sps:$4 sm:$0xff]  }
 0xb4a   : > { %v14409_v52 = vpop.f32.mrb[154].mxu0  ;;  %v22801_v43 = vld [vmem:[%s27612_s6 + $0x230] ss:$8 sps:$4 sm:$0xff]  }
 0xb4b   : > { %v14413_v22 = vmul.f32 0.027777778, %v14407_v34  ;;  %v27119_v59 = vadd.f32 %v14409_v52, %v14369_v42  ;;  %v20798_v49 = vpop.f32.mrb[155].mxu0  ;;  %v22800_v42 = vld [vmem:[%s27612_s6 + $0x224] ss:$8 sps:$4 sm:$0xff]  }
 0xb4c   : > { %v22803_v34 = vld [vmem:[%s27612_s6 + $0x234] ss:$8 sps:$4 sm:$0xff]   ;;  %v22806_v52 = vld [vmem:[%s27612_s6 + $0x244] ss:$8 sps:$4 sm:$0xff]  }
 0xb4d   : > { %v27124_v31 = vpack.c.bf16 %v14413_v22, %v14413_v22  ;;  %v22804_v22 = vld [vmem:[%s27612_s6 + $0x240] ss:$8 sps:$4 sm:$0xff]   ;;  %v22809_v49 = vld [vmem:[%s27612_s6 + $0x254] ss:$8 sps:$4 sm:$0xff]  }
 0xb4f   : > { %14546 = vmatmul.mubr.bf16.vlgmr.msra.gmra.mrb[156].mxu0 %v27124_v31  ;;  %v27177_v20 = vshrl.u32 %v27124_v31, 16  ;;  %v14752_v5 = vrot.slane %v27124_v31, 1 }
 0xb50   : > { %14675 = vmatpush1.bf16.msra.mxu0 %v22720_v35  ;;  %14706 = vmatprep.mubr.bf16.mxu0 %v23190_v29  ;;  %v22807_v35 = vld [vmem:[%s27612_s6 + $0x250] ss:$8 sps:$4 sm:$0xff]  }
 0xb51   : > { %14676 = vmatprep.subr.bf16.mxu0 %v22725_v55  ;;  %v14911_v47 = vrot.slane %v27177_v20, 1  ;;  %v22812_v55 = vld [vmem:[%s27612_s6 + $0x264] ss:$8 sps:$4 sm:$0xff]  }
 0xb54   : > { %14677 = vmatpush1.bf16.msra.mxu0 %v22723_v26  ;;  %v22810_v26 = vld [vmem:[%s27612_s6 + $0x260] ss:$8 sps:$4 sm:$0xff]  }
 0xb55   : > { %14678 = vmatprep.subr.bf16.mxu0 %v22728_v60  ;;  %v22815_v60 = vld [vmem:[%s27612_s6 + $0x274] ss:$8 sps:$4 sm:$0xff]  }
 0xb58   : > { %14679 = vmatpush1.bf16.msra.mxu0 %v22726_v62  ;;  %v22813_v62 = vld [vmem:[%s27612_s6 + $0x270] ss:$8 sps:$4 sm:$0xff]  }
 0xb59   : > { %14680 = vmatprep.subr.bf16.mxu0 %v22731_v3  ;;  %v22818_v3 = vld [vmem:[%s27612_s6 + $0x284] ss:$8 sps:$4 sm:$0xff]  }
 0xb5c   : > { %14681 = vmatpush1.bf16.msra.mxu0 %v22729_v17  ;;  %v22816_v17 = vld [vmem:[%s27612_s6 + $0x280] ss:$8 sps:$4 sm:$0xff]  }
 0xb5d   : > { %14682 = vmatprep.subr.bf16.mxu0 %v22734_v61  ;;  %v15070_v61 = vrot.slane %v27124_v31, 2 }
 0xb60   : > { %14683 = vmatpush1.bf16.msra.mxu0 %v22732_v23  ;;  %v22821_v23 = vld [vmem:[%s27612_s6 + $0x294] ss:$8 sps:$4 sm:$0xff]  }
 0xb61   : > { %14684 = vmatprep.subr.bf16.mxu0 %v22737_v21  ;;  %v22819_v21 = vld [vmem:[%s27612_s6 + $0x290] ss:$8 sps:$4 sm:$0xff]  }
 0xb64   : > { %14685 = vmatpush1.bf16.msra.mxu0 %v22735_v10  ;;  %v22824_v10 = vld [vmem:[%s27612_s6 + $0x2a4] ss:$8 sps:$4 sm:$0xff]  }
 0xb65   : > { %14686 = vmatprep.subr.bf16.mxu0 %v22740_v45  ;;  %v22822_v45 = vld [vmem:[%s27612_s6 + $0x2a0] ss:$8 sps:$4 sm:$0xff]  }
 0xb68   : > { %14687 = vmatpush1.bf16.msra.mxu0 %v22738_v46  ;;  %v22827_v46 = vld [vmem:[%s27612_s6 + $0x2b4] ss:$8 sps:$4 sm:$0xff]  }
 0xb69   : > { %14688 = vmatprep.subr.bf16.mxu0 %v22743_v24  ;;  %v22825_v24 = vld [vmem:[%s27612_s6 + $0x2b0] ss:$8 sps:$4 sm:$0xff]  }
 0xb6c   : > { %14689 = vmatpush1.bf16.msra.mxu0 %v22741_v1  ;;  %v22830_v1 = vld [vmem:[%s27612_s6 + $0x2c4] ss:$8 sps:$4 sm:$0xff]  }
 0xb6d   : > { %14834 = vmatprep.subr.bf16.mxu0 %v22746_v56  ;;  %v22828_v56 = vld [vmem:[%s27612_s6 + $0x2c0] ss:$8 sps:$4 sm:$0xff]  }
 0xb6f   : > { %14707 = vmatmul.mubr.bf16.vlgmr.msra.gmra.mrb[160].mxu0 %v27177_v20 }
 0xb70   : > { %14835 = vmatpush1.bf16.msra.mxu0 %v22744_v41  ;;  %14866 = vmatprep.mubr.bf16.mxu0 %v23190_v29  ;;  %v22833_v41 = vld [vmem:[%s27612_s6 + $0x2d4] ss:$8 sps:$4 sm:$0xff]  }
 0xb71   : > { %14836 = vmatprep.subr.bf16.mxu0 %v22749_v39  ;;  %v22831_v39 = vld [vmem:[%s27612_s6 + $0x2d0] ss:$8 sps:$4 sm:$0xff]  }
 0xb74   : > { %14837 = vmatpush1.bf16.msra.mxu0 %v22747_v25  ;;  %v22836_v25 = vld [vmem:[%s27612_s6 + $0x2e4] ss:$8 sps:$4 sm:$0xff]  }
 0xb75   : > { %14838 = vmatprep.subr.bf16.mxu0 %v22752_v53  ;;  %v22834_v53 = vld [vmem:[%s27612_s6 + $0x2e0] ss:$8 sps:$4 sm:$0xff]  }
 0xb78   : > { %14839 = vmatpush1.bf16.msra.mxu0 %v22750_v7  ;;  %v22839_v7 = vld [vmem:[%s27612_s6 + $0x2f4] ss:$8 sps:$4 sm:$0xff]  }
 0xb79   : > { %14840 = vmatprep.subr.bf16.mxu0 %v22755_v6  ;;  %v22837_v6 = vld [vmem:[%s27612_s6 + $0x2f0] ss:$8 sps:$4 sm:$0xff]  }
 0xb7c   : > { %14841 = vmatpush1.bf16.msra.mxu0 %v22753_v18  ;;  %v22842_v18 = vld [vmem:[%s27612_s6 + $0x304] ss:$8 sps:$4 sm:$0xff]  }
 0xb7d   : > { %14842 = vmatprep.subr.bf16.mxu0 %v22758_v58  ;;  %v22840_v58 = vld [vmem:[%s27612_s6 + $0x300] ss:$8 sps:$4 sm:$0xff]  }
 0xb80   : > { %14843 = vmatpush1.bf16.msra.mxu0 %v22756_v38  ;;  %v15229_v38 = vrot.slane %v27177_v20, 2 }
 0xb81   : > { %14844 = vmatprep.subr.bf16.mxu0 %v22761_v57  ;;  %v22845_v57 = vld [vmem:[%s27612_s6 + $0x314] ss:$8 sps:$4 sm:$0xff]  }
 0xb84   : > { %14845 = vmatpush1.bf16.msra.mxu0 %v22759_v30  ;;  %v22843_v30 = vld [vmem:[%s27612_s6 + $0x310] ss:$8 sps:$4 sm:$0xff]  }
 0xb85   : > { %14846 = vmatprep.subr.bf16.mxu0 %v22764_v32  ;;  %v22848_v32 = vld [vmem:[%s27612_s6 + $0x324] ss:$8 sps:$4 sm:$0xff]  }
 0xb88   : > { %14847 = vmatpush1.bf16.msra.mxu0 %v22762_v63  ;;  %v22846_v63 = vld [vmem:[%s27612_s6 + $0x320] ss:$8 sps:$4 sm:$0xff]  }
 0xb89   : > { %14848 = vmatprep.subr.bf16.mxu0 %v22767_v13  ;;  %v22851_v13 = vld [vmem:[%s27612_s6 + $0x334] ss:$8 sps:$4 sm:$0xff]  }
 0xb8c   : > { %14849 = vmatpush1.bf16.msra.mxu0 %v22765_v44  ;;  %v22849_v44 = vld [vmem:[%s27612_s6 + $0x330] ss:$8 sps:$4 sm:$0xff]  }
 0xb8d   : > { %14993 = vmatprep.subr.bf16.mxu0 %v22770_v9  ;;  %v22854_v9 = vld [vmem:[%s27612_s6 + $0x344] ss:$8 sps:$4 sm:$0xff]  }
 0xb8f   : > { %14867 = vmatmul.mubr.bf16.vlgmr.msra.gmra.mrb[164].mxu0 %v14752_v5  ;;  %v22857_v5 = vld [vmem:[%s27612_s6 + $0x354] ss:$8 sps:$4 sm:$0xff]  }
 0xb90   : > { %14994 = vmatpush1.bf16.msra.mxu0 %v22768_v37  ;;  %15025 = vmatprep.mubr.bf16.mxu0 %v23190_v29  ;;  %v22852_v37 = vld [vmem:[%s27612_s6 + $0x340] ss:$8 sps:$4 sm:$0xff]  }
 0xb91   : > { %14995 = vmatprep.subr.bf16.mxu0 %v22773_v27  ;;  %v22855_v27 = vld [vmem:[%s27612_s6 + $0x350] ss:$8 sps:$4 sm:$0xff]  }
 0xb94   : > { %14996 = vmatpush1.bf16.msra.mxu0 %v22771_v16  ;;  %v22860_v16 = vld [vmem:[%s27612_s6 + $0x364] ss:$8 sps:$4 sm:$0xff]  }
 0xb95   : > { %14997 = vmatprep.subr.bf16.mxu0 %v22776_v54  ;;  %v22858_v54 = vld [vmem:[%s27612_s6 + $0x360] ss:$8 sps:$4 sm:$0xff]  }
 0xb98   : > { %14998 = vmatpush1.bf16.msra.mxu0 %v22774_v8  ;;  %v22863_v8 = vld [vmem:[%s27612_s6 + $0x374] ss:$8 sps:$4 sm:$0xff]  }
 0xb99   : > { %14999 = vmatprep.subr.bf16.mxu0 %v22779_v11  ;;  %v22861_v11 = vld [vmem:[%s27612_s6 + $0x370] ss:$8 sps:$4 sm:$0xff]  }
 0xb9c   : > { %15000 = vmatpush1.bf16.msra.mxu0 %v22777_v28  ;;  %v22866_v28 = vld [vmem:[%s27612_s6 + $0x384] ss:$8 sps:$4 sm:$0xff]  }
 0xb9d   : > { %15001 = vmatprep.subr.bf16.mxu0 %v22782_v48  ;;  %v22864_v48 = vld [vmem:[%s27612_s6 + $0x380] ss:$8 sps:$4 sm:$0xff]  }
 0xba0   : > { %15002 = vmatpush1.bf16.msra.mxu0 %v22780_v4  ;;  %v15388_v4 = vrot.slane %v27124_v31, 3  ;;  %v22870_v31 = vld [vmem:[%s27612_s6 + $0x3a0] ss:$8 sps:$4 sm:$0xff]  }
 0xba1   : > { %15003 = vmatprep.subr.bf16.mxu0 %v22785_v36  ;;  %v22869_v36 = vld [vmem:[%s27612_s6 + $0x394] ss:$8 sps:$4 sm:$0xff]  }
 0xba4   : > { %15004 = vmatpush1.bf16.msra.mxu0 %v22783_v12  ;;  %v22867_v12 = vld [vmem:[%s27612_s6 + $0x390] ss:$8 sps:$4 sm:$0xff]  }
 0xba5   : > { %15005 = vmatprep.subr.bf16.mxu0 %v22788_v19  ;;  %v22872_v19 = vld [vmem:[%s27612_s6 + $0x3a4] ss:$8 sps:$4 sm:$0xff]  }
 0xba8   : > { %15006 = vmatpush1.bf16.msra.mxu0 %v22786_v14  ;;  %v22875_v14 = vld [vmem:[%s27612_s6 + $0x3b4] ss:$8 sps:$4 sm:$0xff]  }
 0xba9   : > { %15007 = vmatprep.subr.bf16.mxu0 %v22791_v0  ;;  %v22873_v0 = vld [vmem:[%s27612_s6 + $0x3b0] ss:$8 sps:$4 sm:$0xff]  }
 0xbac   : > { %15008 = vmatpush1.bf16.msra.mxu0 %v22789_v2  ;;  %v22878_v2 = vld [vmem:[%s27612_s6 + $0x3c4] ss:$8 sps:$4 sm:$0xff]  }
 0xbad   : > { %15152 = vmatprep.subr.bf16.mxu0 %v22794_v50  ;;  %v22876_v50 = vld [vmem:[%s27612_s6 + $0x3c0] ss:$8 sps:$4 sm:$0xff]  }
 0xbaf   : > { %15026 = vmatmul.mubr.bf16.vlgmr.msra.gmra.mrb[168].mxu0 %v14911_v47  ;;  %v22879_v47 = vld [vmem:[%s27612_s6 + $0x3d0] ss:$8 sps:$4 sm:$0xff]  }
 0xbb0   : > { %15153 = vmatpush1.bf16.msra.mxu0 %v22792_v40  ;;  %15184 = vmatprep.mubr.bf16.mxu0 %v23190_v29  ;;  %v22881_v40 = vld [vmem:[%s27612_s6 + $0x3d4] ss:$8 sps:$4 sm:$0xff]  }
 0xbb1   : > { %15154 = vmatprep.subr.bf16.mxu0 %v22797_v15  ;;  %v22884_v15 = vld [vmem:[%s27612_s6 + $0x3e4] ss:$8 sps:$4 sm:$0xff]  }
 0xbb4   : > { %15155 = vmatpush1.bf16.msra.mxu0 %v22795_v33 }
 0xbb5   : > { %15156 = vmatprep.subr.bf16.mxu0 %v22800_v42 }
 0xbb8   : > { %15157 = vmatpush1.bf16.msra.mxu0 %v22798_v51 }
 0xbb9   : > { %15158 = vmatprep.subr.bf16.mxu0 %v22803_v34 }
 0xbbc   : > { %15159 = vmatpush1.bf16.msra.mxu0 %v22801_v43  ;;  %v22882_v43 = vld [vmem:[%s27612_s6 + $0x3e0] ss:$8 sps:$4 sm:$0xff]  }
 0xbbd   : > { %15160 = vmatprep.subr.bf16.mxu0 %v22806_v52 }
 0xbc0   : > { %15161 = vmatpush1.bf16.msra.mxu0 %v22804_v22  ;;  %v22887_v22 = vld [vmem:[%s27612_s6 + $0x3f4] ss:$8 sps:$4 sm:$0xff]  }
 0xbc1   : > { %15162 = vmatprep.subr.bf16.mxu0 %v22809_v49  ;;  %v22885_v49 = vld [vmem:[%s27612_s6 + $0x3f0] ss:$8 sps:$4 sm:$0xff]  }
 0xbc4   : > { %15163 = vmatpush1.bf16.msra.mxu0 %v22807_v35  ;;  %v22890_v35 = vld [vmem:[%s27612_s6 + $0x404] ss:$8 sps:$4 sm:$0xff]  }
 0xbc5   : > { %15164 = vmatprep.subr.bf16.mxu0 %v22812_v55  ;;  %v22888_v55 = vld [vmem:[%s27612_s6 + $0x400] ss:$8 sps:$4 sm:$0xff]  }
 0xbc8   : > { %15165 = vmatpush1.bf16.msra.mxu0 %v22810_v26  ;;  %v15547_v26 = vrot.slane %v27177_v20, 3 }
 0xbc9   : > { %15166 = vmatprep.subr.bf16.mxu0 %v22815_v60  ;;  %v22893_v60 = vld [vmem:[%s27612_s6 + $0x414] ss:$8 sps:$4 sm:$0xff]  }
 0xbcc   : > { %15167 = vmatpush1.bf16.msra.mxu0 %v22813_v62  ;;  %v22891_v62 = vld [vmem:[%s27612_s6 + $0x410] ss:$8 sps:$4 sm:$0xff]  }
 0xbcd   : > { %15311 = vmatprep.subr.bf16.mxu0 %v22818_v3  ;;  %v22896_v3 = vld [vmem:[%s27612_s6 + $0x424] ss:$8 sps:$4 sm:$0xff]  }
 0xbcf   : > { %15185 = vmatmul.mubr.bf16.vlgmr.msra.gmra.mrb[172].mxu0 %v15070_v61  ;;  %v14560_v61 = vlaneseq }
 0xbd0   : > { %15312 = vmatpush1.bf16.msra.mxu0 %v22816_v17  ;;  %15343 = vmatprep.mubr.bf16.mxu0 %v23190_v29  ;;  %v23191_v17 = vmov 1966171168  }
 0xbd1   : > { %15313 = vmatprep.subr.bf16.mxu0 %v22821_v23  ;;  %v14558_v20 = vunpack.c.l.s4 %v23191_v17  ;;  %v22894_v23 = vld [vmem:[%s27612_s6 + $0x420] ss:$8 sps:$4 sm:$0xff]  }
 0xbd2   : > { %v22920_v17 = vld [vmem:[%s27614_s8 + $0x40] sm:$0xff]  }
 0xbd4   : > { %15314 = vmatpush1.bf16.msra.mxu0 %v22819_v21  ;;  %v22899_v21 = vld [vmem:[%s27612_s6 + $0x434] ss:$8 sps:$4 sm:$0xff]  }
 0xbd5   : > { %15315 = vmatprep.subr.bf16.mxu0 %v22824_v10  ;;  %v14559_v10 = vunpack.c.0.s8 %v14558_v20  ;;  %v22921_v20 = vld [vmem:[%s27614_s8 + $0x48] sm:$0xff]  }
 0xbd8   : > { %15316 = vmatpush1.bf16.msra.mxu0 %v22822_v45  ;;  %v27496_v45 = vshrl.u32 %v14560_v61, 7  ;;  %v22922_v61 = vld [vmem:[%s27614_s8 + $0x50] ss:$0 sps:$4 sm:$0x33]  }
 0xbd9   : > { %15317 = vmatprep.subr.bf16.mxu0 %v22827_v46  ;;  %v22897_v46 = vld [vmem:[%s27612_s6 + $0x430] ss:$8 sps:$4 sm:$0xff]  }
 0xbdc   : > { %15318 = vmatpush1.bf16.msra.mxu0 %v22825_v24  ;;  %v22902_v24 = vld [vmem:[%s27612_s6 + $0x444] ss:$8 sps:$4 sm:$0xff]  }
 0xbdd   : > { %15319 = vmatprep.subr.bf16.mxu0 %v22830_v1  ;;  %v27505_v1 = vsub.s32 %v14559_v10, %v27496_v45 }
 0xbe0   : > { %15320 = vmatpush1.bf16.msra.mxu0 %v22828_v56  ;;  %v22900_v56 = vld [vmem:[%s27612_s6 + $0x440] ss:$8 sps:$4 sm:$0xff]  }
 0xbe1   : > { %15321 = vmatprep.subr.bf16.mxu0 %v22833_v41  ;;  %v22905_v41 = vld [vmem:[%s27612_s6 + $0x454] ss:$8 sps:$4 sm:$0xff]  }
 0xbe4   : > { %15322 = vmatpush1.bf16.msra.mxu0 %v22831_v39 }
 0xbe5   : > { %15323 = vmatprep.subr.bf16.mxu0 %v22836_v25  ;;  %v22903_v25 = vld [vmem:[%s27612_s6 + $0x450] ss:$8 sps:$4 sm:$0xff]  }
 0xbe8   : > { %15324 = vmatpush1.bf16.msra.mxu0 %v22834_v53  ;;  %v22908_v53 = vld [vmem:[%s27612_s6 + $0x464] ss:$8 sps:$4 sm:$0xff]  }
 0xbe9   : > { %15325 = vmatprep.subr.bf16.mxu0 %v22839_v7 }
 0xbec   : > { %15326 = vmatpush1.bf16.msra.mxu0 %v22837_v6 }
 0xbed   : > { %15470 = vmatprep.subr.bf16.mxu0 %v22842_v18 }
 0xbef   : > { %15344 = vmatmul.mubr.bf16.vlgmr.msra.gmra.mrb[176].mxu0 %v15229_v38 }
 0xbf0   : > { %15471 = vmatpush1.bf16.msra.mxu0 %v22840_v58  ;;  %15502 = vmatprep.mubr.bf16.mxu0 %v23190_v29 }
 0xbf1   : > { %15472 = vmatprep.subr.bf16.mxu0 %v22845_v57  ;;  %v22906_v57 = vld [vmem:[%s27612_s6 + $0x460] ss:$8 sps:$4 sm:$0xff]  }
 0xbf4   : > { %15473 = vmatpush1.bf16.msra.mxu0 %v22843_v30  ;;  %v14415_v30 = vld [vmem:[%s27613_s7] sm:$0x3] }
 0xbf5   : > { %15474 = vmatprep.subr.bf16.mxu0 %v22848_v32 }
 0xbf8   : > { %15475 = vmatpush1.bf16.msra.mxu0 %v22846_v63  ;;  %v22911_v63 = vld [vmem:[%s27612_s6 + $0x474] ss:$8 sps:$4 sm:$0xff]  }
 0xbf9   : > { %15476 = vmatprep.subr.bf16.mxu0 %v22851_v13 }
 0xbfc   : > { %15477 = vmatpush1.bf16.msra.mxu0 %v22849_v44 }
 0xbfd   : > { %15478 = vmatprep.subr.bf16.mxu0 %v22854_v9 }
 0xc00   : > { %15479 = vmatpush1.bf16.msra.mxu0 %v22852_v37  ;;  %v22909_v37 = vld [vmem:[%s27612_s6 + $0x470] ss:$8 sps:$4 sm:$0xff]  }
 0xc01   : > { %15480 = vmatprep.subr.bf16.mxu0 %v22857_v5  ;;  %v14414_v5 = vmul.f32 0.027777778, %v27119_v59 }
 0xc04   : > { %15481 = vmatpush1.bf16.msra.mxu0 %v22855_v27 }
 0xc05   : > { %15482 = vmatprep.subr.bf16.mxu0 %v22860_v16  ;;  %v15689_v16 = vpack.c.bf16 %v14414_v5, %v14414_v5 }
 0xc08   : > { %15483 = vmatpush1.bf16.msra.mxu0 %v22858_v54 }
 0xc09   : > { %15484 = vmatprep.subr.bf16.mxu0 %v22863_v8 }
 0xc0c   : > { %15485 = vmatpush1.bf16.msra.mxu0 %v22861_v11 }
 0xc0d   : > { %15629 = vmatprep.subr.bf16.mxu0 %v22866_v28 }
 0xc0f   : > { %15503 = vmatmul.mubr.bf16.vlgmr.msra.gmra.mrb[180].mxu0 %v15388_v4 }
 0xc10   : > { %15630 = vmatpush1.bf16.msra.mxu0 %v22864_v48  ;;  %15661 = vmatprep.mubr.bf16.mxu0 %v23190_v29 }
 0xc11   : > { %15631 = vmatprep.subr.bf16.mxu0 %v22869_v36 }
 0xc14   : > { %15632 = vmatpush1.bf16.msra.mxu0 %v22867_v12 }
 0xc15   : > { %15633 = vmatprep.subr.bf16.mxu0 %v22872_v19 }
 0xc18   : > { %15634 = vmatpush1.bf16.msra.mxu0 %v22870_v31 }
 0xc19   : > { %15635 = vmatprep.subr.bf16.mxu0 %v22875_v14 }
 0xc1c   : > { %15636 = vmatpush1.bf16.msra.mxu0 %v22873_v0 }
 0xc1d   : > { %15637 = vmatprep.subr.bf16.mxu0 %v22878_v2 }
 0xc20   : > { %15638 = vmatpush1.bf16.msra.mxu0 %v22876_v50 }
 0xc21   : > { %15639 = vmatprep.subr.bf16.mxu0 %v22881_v40 }
 0xc22   : > { %v14547_v33 = vpop.f32.mrb[156].mxu0 }
 0xc23   : > { %v14549_v42 = vpop.f32.mrb[157].mxu0 }
 0xc24   : > { %v14556_v51 = vcombine.low %v14547_v33, %v14549_v42  ;;  %15640 = vmatpush1.bf16.msra.mxu0 %v22879_v47  ;;  %v14551_v34 = vpop.f32.mrb[158].mxu0  ;;  %v22912_v47 = vld [vmem:[%s27614_s8] sm:$0xff]   ;;  %v22914_v33 = vld [vmem:[%s27614_s8 + $0x10] sm:$0xff]   ;;  %v22915_v42 = vld [vmem:[%s27614_s8 + $0x18] sm:$0xff]  }
 0xc25   : > { %v14552_v52 = vpop.f32.mrb[159].mxu0  ;;  %15641 = vmatprep.subr.bf16.mxu0 %v22884_v15  ;;  %v22913_v15 = vld [vmem:[%s27614_s8 + $0x8] sm:$0xff]  }
 0xc26   : > { %v14563_v39 = vrot.slane %v14556_v51, %v27505_v1  ;;  %v22916_v51 = vld [vmem:[%s27614_s8 + $0x20] sm:$0xff]   ;;  %v22917_v34 = vld [vmem:[%s27614_s8 + $0x28] sm:$0xff]  }
 0xc28   : > { %15642 = vmatpush1.bf16.msra.mxu0 %v22882_v43  ;;  %v14570_v18 = vrot.slane %v14563_v39, %v27505_v1  ;;  %v22918_v43 = vld [vmem:[%s27614_s8 + $0x30] sm:$0xff]  }
 0xc29   : > { %15643 = vmatprep.subr.bf16.mxu0 %v22887_v22 }
 0xc2a   : > { %v14572_v44 = vadd.f32 %v14570_v18, %v14415_v30 }
 0xc2c   : > { %15644 = vmatpush1.bf16.msra.mxu0 %v22885_v49 }
 0xc2d   : > { %15787 = vmatprep.subr.bf16.mxu0 %v22890_v35 }
 0xc2f   : > { %15662 = vmatmul.mubr.bf16.vlgmr.msra.gmra.mrb[184].mxu0 %v15547_v26 }
 0xc30   : > { %15788 = vmatpush1.bf16.msra.mxu0 %v22888_v55  ;;  %15819 = vmatprep.mubr.bf16.mxu0 %v23190_v29 }
 0xc31   : > { %15789 = vmatprep.subr.bf16.mxu0 %v22893_v60 }
 0xc34   : > { %15790 = vmatpush1.bf16.msra.mxu0 %v22891_v62 }
 0xc35   : > { %15791 = vmatprep.subr.bf16.mxu0 %v22896_v3  ;;  %v22919_v3 = vld [vmem:[%s27614_s8 + $0x38] sm:$0xff]  }
 0xc38   : > { %15792 = vmatpush1.bf16.msra.mxu0 %v22894_v23  ;;  %v15954_v23 = vsel %vm15952_vm3, %v22922_v61, 0 }
 0xc39   : > { %15793 = vmatprep.subr.bf16.mxu0 %v22899_v21 }
 0xc3c   : > { %15794 = vmatpush1.bf16.msra.mxu0 %v22897_v46 }
 0xc3d   : > { %15795 = vmatprep.subr.bf16.mxu0 %v22902_v24 }
 0xc40   : > { %15796 = vmatpush1.bf16.msra.mxu0 %v22900_v56 }
 0xc41   : > { %15797 = vmatprep.subr.bf16.mxu0 %v22905_v41 }
 0xc42   : > { %v14708_v7 = vpop.f32.mrb[160].mxu0 }
 0xc43   : > { %v14710_v6 = vpop.f32.mrb[161].mxu0 }
 0xc44   : > { %v14717_v58 = vcombine.low %v14708_v7, %v14710_v6  ;;  %v14712_v38 = vpop.f32.mrb[162].mxu0  ;;  %15798 = vmatpush1.bf16.msra.mxu0 %v22903_v25 }
 0xc45   : > { %v14713_v32 = vpop.f32.mrb[163].mxu0  ;;  %15799 = vmatprep.subr.bf16.mxu0 %v22908_v53 }
 0xc46   : > { %v14724_v13 = vrot.slane %v14717_v58, %v27505_v1 }
 0xc48   : > { %v14731_v9 = vrot.slane %v14724_v13, %v27505_v1  ;;  %15800 = vmatpush1.bf16.msra.mxu0 %v22906_v57 }
 0xc49   : > { %15801 = vmatprep.subr.bf16.mxu0 %v22911_v63 }
 0xc4a   : > { %v14733_v27 = vadd.f32 %v14731_v9, %v14572_v44 }
 0xc4c   : > { %15802 = vmatpush1.bf16.msra.mxu0 %v22909_v37 }
 0xc4d   : > { %15956 = vmatprep.subr.bf16.mxu0 %v23190_v29 }
 0xc4f   : > { %15820 = vmatmul.mubr.bf16.vlgmr.msra.gmra.mrb[188].mxu0 %v15689_v16 }
 0xc50   : > { %15957 = vmatpush1.bf16.msra.mxu0 %v22912_v47 }
 0xc51   : > { %15958 = vmatprep.subr.bf16.mxu0 %v23190_v29 }
 0xc54   : > { %15959 = vmatpush1.bf16.msra.mxu0 %v22913_v15 }
 0xc55   : > { %15960 = vmatprep.subr.bf16.mxu0 %v23190_v29 }
 0xc58   : > { %15961 = vmatpush1.bf16.msra.mxu0 %v22914_v33 }
 0xc59   : > { %15962 = vmatprep.subr.bf16.mxu0 %v23190_v29 }
 0xc5c   : > { %15963 = vmatpush1.bf16.msra.mxu0 %v22915_v42 }
 0xc5d   : > { %15964 = vmatprep.subr.bf16.mxu0 %v23190_v29 }
 0xc60   : > { %15965 = vmatpush1.bf16.msra.mxu0 %v22916_v51 }
 0xc61   : > { %15966 = vmatprep.subr.bf16.mxu0 %v23190_v29 }
 0xc62   : > { %v14868_v54 = vpop.f32.mrb[164].mxu0 }
 0xc63   : > { %v14870_v8 = vpop.f32.mrb[165].mxu0 }
 0xc64   : > { %v14877_v11 = vcombine.low %v14868_v54, %v14870_v8  ;;  %v14872_v28 = vpop.f32.mrb[166].mxu0  ;;  %15967 = vmatpush1.bf16.msra.mxu0 %v22917_v34 }
 0xc65   : > { %v14873_v48 = vpop.f32.mrb[167].mxu0  ;;  %15968 = vmatprep.subr.bf16.mxu0 %v23190_v29 }
 0xc66   : > { %v14884_v4 = vrot.slane %v14877_v11, %v27505_v1 }
 0xc68   : > { %v14891_v36 = vrot.slane %v14884_v4, %v27505_v1  ;;  %15969 = vmatpush1.bf16.msra.mxu0 %v22918_v43 }
 0xc69   : > { %15970 = vmatprep.subr.bf16.mxu0 %v23190_v29 }
 0xc6a   : > { %v14893_v12 = vadd.f32 %v14891_v36, %v14733_v27  ;;  %v15857_v36 = vsub.s32 1, %v27496_v45 }
 0xc6c   : > { %15971 = vmatpush1.bf16.msra.mxu0 %v22919_v3 }
 0xc6d   : > { %15972 = vmatprep.subr.bf16.mxu0 %v23190_v29 }
 0xc70   : > { %15973 = vmatpush1.bf16.msra.mxu0 %v22920_v17 }
 0xc71   : > { %15974 = vmatprep.subr.bf16.mxu0 %v23190_v29 }
 0xc74   : > { %15975 = vmatpush1.bf16.msra.mxu0 %v22921_v20 }
 0xc75   : > { %15976 = vmatprep.subr.bf16.mxu0 %v23190_v29 }
 0xc78   : > { %15977 = vmatpush1.bf16.msra.mxu0 %v15954_v23 }
 0xc82   : > { %v15027_v19 = vpop.f32.mrb[168].mxu0 }
 0xc83   : > { %v15029_v31 = vpop.f32.mrb[169].mxu0 }
 0xc84   : > { %v15036_v59 = vcombine.low %v15027_v19, %v15029_v31  ;;  %v15031_v14 = vpop.f32.mrb[170].mxu0 }
 0xc85   : > { %v15032_v0 = vpop.f32.mrb[171].mxu0 }
 0xc86   : > { %v15043_v2 = vrot.slane %v15036_v59, %v27505_v1 }
 0xc88   : > { %v15050_v50 = vrot.slane %v15043_v2, %v27505_v1 }
 0xc8a   : > { %v15052_v40 = vadd.f32 %v15050_v50, %v14893_v12  ;;  %v15853_v12 = vsub.s32 0, %v27496_v45 }
 0xca2   : > { %v15186_v52 = vpop.f32.mrb[172].mxu0 }
 0xca3   : > { %v15188_v22 = vpop.f32.mrb[173].mxu0 }
 0xca4   : > { %v15195_v49 = vcombine.low %v15186_v52, %v15188_v22  ;;  %v15190_v35 = vpop.f32.mrb[174].mxu0 }
 0xca5   : > { %v15191_v55 = vpop.f32.mrb[175].mxu0 }
 0xca6   : > { %v15202_v26 = vrot.slane %v15195_v49, %v27505_v1 }
 0xca8   : > { %v15209_v60 = vrot.slane %v15202_v26, %v27505_v1 }
 0xcaa   : > { %v15211_v62 = vadd.f32 %v15209_v60, %v15052_v40 }
 0xcc2   : > { %v15345_v21 = vpop.f32.mrb[176].mxu0 }
 0xcc3   : > { %v15347_v10 = vpop.f32.mrb[177].mxu0 }
 0xcc4   : > { %v15354_v46 = vcombine.low %v15345_v21, %v15347_v10  ;;  %v15349_v24 = vpop.f32.mrb[178].mxu0 }
 0xcc5   : > { %v15350_v56 = vpop.f32.mrb[179].mxu0 }
 0xcc6   : > { %v15361_v41 = vrot.slane %v15354_v46, %v27505_v1 }
 0xcc8   : > { %v15368_v39 = vrot.slane %v15361_v41, %v27505_v1 }
 0xcca   : > { %v15370_v25 = vadd.f32 %v15368_v39, %v15211_v62 }
 0xce2   : > { %v15504_v53 = vpop.f32.mrb[180].mxu0 }
 0xce3   : > { %v15506_v7 = vpop.f32.mrb[181].mxu0 }
 0xce4   : > { %v15513_v6 = vcombine.low %v15504_v53, %v15506_v7  ;;  %v15508_v18 = vpop.f32.mrb[182].mxu0 }
 0xce5   : > { %v15509_v58 = vpop.f32.mrb[183].mxu0 }
 0xce6   : > { %v15520_v38 = vrot.slane %v15513_v6, %v27505_v1 }
 0xce8   : > { %v15527_v29 = vrot.slane %v15520_v38, %v27505_v1 }
 0xcea   : > { %v15529_v57 = vadd.f32 %v15527_v29, %v15370_v25 }
 0xd02   : > { %v15663_v30 = vpop.f32.mrb[184].mxu0 }
 0xd03   : > { %v15665_v32 = vpop.f32.mrb[185].mxu0 }
 0xd04   : > { %v15672_v63 = vcombine.low %v15663_v30, %v15665_v32  ;;  %v15667_v13 = vpop.f32.mrb[186].mxu0 }
 0xd05   : > { %v15668_v44 = vpop.f32.mrb[187].mxu0 }
 0xd06   : > { %v15679_v9 = vrot.slane %v15672_v63, %v27505_v1 }
 0xd08   : > { %v15686_v37 = vrot.slane %v15679_v9, %v27505_v1 }
 0xd0a   : > { %v15688_v5 = vadd.f32 %v15686_v37, %v15529_v57 }
 0xd22   : > { %v15821_v27 = vpop.f32.mrb[188].mxu0 }
 0xd23   : > { %v15823_v16 = vpop.f32.mrb[189].mxu0 }
 0xd24   : > { %v15830_v54 = vcombine.low %v15821_v27, %v15823_v16  ;;  %v15825_v8 = vpop.f32.mrb[190].mxu0 }
 0xd25   : > { %v15826_v11 = vpop.f32.mrb[191].mxu0 }
 0xd26   : > { %v15837_v28 = vrot.slane %v15830_v54, %v27505_v1 }
 0xd28   : > { %v15844_v48 = vrot.slane %v15837_v28, %v27505_v1  ;;  %v15884_v1 = vld [vmem:[%s27615_s9] sm:$0x1] }
 0xd2a   : > { %v15846_v4 = vadd.f32 %v15844_v48, %v15688_v5 }
 0xd2c   : > { %vm15847_vm13 = vcmp.gt.f32.partialorder %v15846_v4, 0.0  ;;  %v15848_v19 = vmul.f32 0.01, %v15846_v4 }
 0xd2e   : > { %v15849_v31 = vsel %vm15847_vm13, %v15846_v4, %v15848_v19 }
 0xd2f   : > { %v15858_v59 = vrot.slane %v15849_v31, %v15857_v36  ;;  %v15854_v14 = vrot.slane %v15849_v31, %v15853_v12 }
 0xd31   : > { %v15862_v0 = vpack.c.bf16 %v15858_v59, %v15858_v59  ;;  %v15861_v2 = vpack.c.bf16 %v15854_v14, %v15854_v14 }
 0xd33   : > { %17615 = vmatprep.mubr.msk.bf16.mxu0 %vm15948_vm14, %v15862_v0 }
 0xd34   : > { %15989 = vmatmul.mubr.bf16.vlgmr.msra.gmra.mrb[192].mxu0 %v15861_v2 }
 0xe07   : > { %v15990_v50 = vpop.f32.mrb[192].mxu0 }
 0xe08   : > { %v15991_v40 = vadd.f32 %v15990_v50, %v15884_v1  ;;  %v15992_v47 = vpop.f32.mrb[193].mxu0 }
 0xe09   : > { %v15993_v15 = vpop.f32.mrb[194].mxu0 }
 0xe0a   : > { %v15996_v45 = vsub.f32 0.0, %v15991_v40  ;;  %v15994_v33 = vpop.f32.mrb[195].mxu0 }
 0xe0c   : > { %v15997_v42 = vmul.f32 1.442695, %v15996_v45 }
 0xe0e   : > { %22923 = vpow2.f32 %v15997_v42 }
 0xe18   : > { %v22924_v51 = vpop.eup %22923 }
 0xe19   : > { %v15999_v34 = vadd.f32 1.0, %v22924_v51 }
 0xe1b   : > { %22925 = vrcp.f32 %v15999_v34 }
 0xe25   : > { %v22926_v43 = vpop.eup %22925 }
 0xe26   : > { %16002 = vst [vmem:[%s355_s29] sm:$0x1] %v22926_v43 }
 0xe27 PF: > { %s20_s13 = sadd.s32 1, %s23186_s13  }
 0xe28   : > { %p17_p4 = scmp.ge.s32.totalorder %s20_s13, 4  }
 0xe2a   :  { %19 = sbr.rel (!%p17_p4) target bundleno = 1 (0x1), region = 122 }

</bundles_post_ra>
